<compile_context>
chip_gen: v5e
topology: v5e:2x2
jax: 0.10.0
libtpu: 0.0.40
codegen_flags: <defaults>
</compile_context>

<pallas_src>
import functools

import jax
import jax.numpy as jnp
from jax import lax
from jax.experimental import pallas as pl
from jax.experimental.pallas import tpu as pltpu

IMAGE_CHANNEL = 1
Z_DIM = 16
H_DIM = 8 * 7 * 7  # 392


# ---------------------------------------------------------------------------
# The single fused Pallas kernel (entire VAE forward)
# ---------------------------------------------------------------------------
def _vae_fused_kernel(
        x_ref, eps_ref,
        t1_ref, b1_ref, a1r_ref, a1b_ref, g1_ref, be1_ref,
        t2_ref, b2_ref, a2r_ref, a2b_ref, g2_ref, be2_ref,
        w12_ref, b12_ref, w3_ref, b3_ref,
        t3_ref, b3f_ref, a3r_ref, a3b_ref, g3_ref, be3_ref,
        t4_ref, b4_ref,
        o_ref, *, batch):
    f32 = jnp.float32

    def dense(h, t_ref, b_ref):
        # Lane-dense conv-as-matmul: (B, Cin*H*W) @ (Cin*H*W, Cout*OH*OW).
        # bf16 operands, f32 accumulation on the MXU.
        y = jnp.dot(h.astype(jnp.bfloat16), t_ref[...],
                    preferred_element_type=f32)
        return y + b_ref[...]

    def bn_relu(y, a_red_ref, a_bc_ref, g_ref, be_ref, hw):
        # nn.BatchNorm2d in training mode: per-channel batch stats over
        # (N, H, W).  Columns of y are the (C, H, W)-flattened feature map,
        # so per-channel gather / broadcast is done with 0/1 indicator
        # matmuls -- no reshapes or transposes inside the kernel.
        inv_count = 1.0 / float(batch * hw)
        s1 = jnp.sum(y, axis=0, keepdims=True)              # (1, C*HW)
        s2 = jnp.sum(y * y, axis=0, keepdims=True)          # (1, C*HW)
        mean_c = jnp.dot(s1, a_red_ref[...],
                         preferred_element_type=f32) * inv_count   # (1, C)
        ex2_c = jnp.dot(s2, a_red_ref[...],
                        preferred_element_type=f32) * inv_count    # (1, C)
        var_c = jnp.maximum(ex2_c - mean_c * mean_c, 0.0)   # biased variance
        scale_c = g_ref[...] * lax.rsqrt(var_c + 1e-5)
        shift_c = be_ref[...] - mean_c * scale_c
        y = (y * jnp.dot(scale_c, a_bc_ref[...], preferred_element_type=f32)
             + jnp.dot(shift_c, a_bc_ref[...], preferred_element_type=f32))
        return jnp.maximum(y, 0.0)                          # ReLU

    # ---------------- encoder ----------------
    x = x_ref[...]                                          # (B, 1*28*28)
    h = dense(x, t1_ref, b1_ref)                            # (B, 4*14*14)
    h = bn_relu(h, a1r_ref, a1b_ref, g1_ref, be1_ref, 14 * 14)
    h = dense(h, t2_ref, b2_ref)                            # (B, 8*7*7) == Flatten
    h = bn_relu(h, a2r_ref, a2b_ref, g2_ref, be2_ref, 7 * 7)

    # -------- bottleneck: [fc1 | fc2] fused, clamp, reparameterize, fc3 ----
    ml = jnp.dot(h, w12_ref[...], preferred_element_type=f32) + b12_ref[...]
    mu = ml[:, :Z_DIM]
    logvar = jnp.clip(ml[:, Z_DIM:], -4.0, 4.0)
    z = mu + eps_ref[...] * jnp.exp(0.5 * logvar)           # reparameterize
    h = jnp.dot(z, w3_ref[...], preferred_element_type=f32) + b3_ref[...]
    h = jnp.maximum(h, 0.0)                                 # (B, 392) == UnFlatten

    # ---------------- decoder ----------------
    h = dense(h, t3_ref, b3f_ref)                           # (B, 4*14*14)
    h = bn_relu(h, a3r_ref, a3b_ref, g3_ref, be3_ref, 14 * 14)
    h = dense(h, t4_ref, b4_ref)                            # (B, 1*28*28)
    o_ref[...] = 1.0 / (1.0 + jnp.exp(-h))                  # Sigmoid (exp on EUP)


def vae_forward(fp, x, eps):
    B = x.shape[0]
    x_flat = x.reshape(B, -1)                               # NCHW flatten
    args = (
        x_flat, eps,
        fp["t1"], fp["b1"], fp["a1r"], fp["a1b"], fp["g1"], fp["be1"],
        fp["t2"], fp["b2"], fp["a2r"], fp["a2b"], fp["g2"], fp["be2"],
        fp["w12"], fp["b12"], fp["w3"], fp["b3"],
        fp["t3"], fp["b3f"], fp["a3r"], fp["a3b"], fp["g3"], fp["be3"],
        fp["t4"], fp["b4"],
    )
    vmem = pl.BlockSpec(memory_space=pltpu.MemorySpace.VMEM)
    out_flat = pl.pallas_call(
        functools.partial(_vae_fused_kernel, batch=B),
        out_shape=jax.ShapeDtypeStruct((B, IMAGE_CHANNEL * 28 * 28), jnp.float32),
        in_specs=[vmem] * len(args),
        out_specs=vmem,
    )(*args)
    return out_flat.reshape(B, IMAGE_CHANNEL, 28, 28)


# ---------------------------------------------------------------------------
# One-time weight preparation (host side): fold each conv / conv-transpose
# into its dense flattened-feature-map matrix, build BN channel indicators.
# ---------------------------------------------------------------------------
def _conv_as_matrix(w, stride, pad, in_shape):
    """Dense T s.t. flatten(conv2d(x, w)) == flatten(x) @ T (no bias)."""
    c, h, wd = in_shape
    n = c * h * wd
    eye = jnp.eye(n, dtype=jnp.float32).reshape(n, c, h, wd)
    out = lax.conv_general_dilated(
        eye, w, window_strides=(stride, stride),
        padding=[(pad, pad), (pad, pad)],
        dimension_numbers=("NCHW", "OIHW", "NCHW"))
    return out.reshape(n, -1)


def _deconv_as_matrix(w_t, stride, pad, in_shape):
    """Dense T for PyTorch ConvTranspose2d semantics (no bias).

    ConvTranspose2d(stride=s, padding=p) == zero-dilate input by s, pad by
    k-1-p, correlate with the spatially-flipped, channel-swapped kernel.
    """
    c, h, wd = in_shape
    n = c * h * wd
    kh, kw = w_t.shape[2], w_t.shape[3]
    eye = jnp.eye(n, dtype=jnp.float32).reshape(n, c, h, wd)
    w_conv = jnp.flip(w_t, axis=(2, 3)).transpose(1, 0, 2, 3)   # (OC, IC, KH, KW)
    out = lax.conv_general_dilated(
        eye, w_conv, window_strides=(1, 1),
        padding=[(kh - 1 - pad, kh - 1 - pad), (kw - 1 - pad, kw - 1 - pad)],
        lhs_dilation=(stride, stride),
        dimension_numbers=("NCHW", "OIHW", "NCHW"))
    return out.reshape(n, -1)


def _bn_indicator(c, hw):
    """0/1 indicator matrices: reduce (C*HW, C) and broadcast (C, C*HW)."""
    ch = jnp.arange(c * hw) // hw
    a_red = (ch[:, None] == jnp.arange(c)[None, :]).astype(jnp.float32)
    return a_red, a_red.T


def prepare_fused_params(p):
    f = {}
    # encoder conv1: (1,28,28) -> (4,14,14)
    f["t1"] = _conv_as_matrix(p["conv1_w"], 2, 1,
                              (IMAGE_CHANNEL, 28, 28)).astype(jnp.bfloat16)
    f["b1"] = jnp.repeat(p["conv1_b"], 14 * 14)[None, :]
    f["a1r"], f["a1b"] = _bn_indicator(4, 14 * 14)
    f["g1"] = p["bn1_g"][None, :]
    f["be1"] = p["bn1_b"][None, :]
    # encoder conv2: (4,14,14) -> (8,7,7)
    f["t2"] = _conv_as_matrix(p["conv2_w"], 2, 1, (4, 14, 14)).astype(jnp.bfloat16)
    f["b2"] = jnp.repeat(p["conv2_b"], 7 * 7)[None, :]
    f["a2r"], f["a2b"] = _bn_indicator(8, 7 * 7)
    f["g2"] = p["bn2_g"][None, :]
    f["be2"] = p["bn2_b"][None, :]
    # bottleneck: fc1 | fc2 concatenated, fc3
    f["w12"] = jnp.concatenate([p["fc1_w"], p["fc2_w"]], axis=1)   # (392, 32)
    f["b12"] = jnp.concatenate([p["fc1_b"], p["fc2_b"]])[None, :]  # (1, 32)
    f["w3"] = p["fc3_w"]                                           # (16, 392)
    f["b3"] = p["fc3_b"][None, :]
    # decoder deconv1: (8,7,7) -> (4,14,14)
    f["t3"] = _deconv_as_matrix(p["deconv1_w"], 2, 1, (8, 7, 7)).astype(jnp.bfloat16)
    f["b3f"] = jnp.repeat(p["deconv1_b"], 14 * 14)[None, :]
    f["a3r"], f["a3b"] = _bn_indicator(4, 14 * 14)
    f["g3"] = p["bn3_g"][None, :]
    f["be3"] = p["bn3_b"][None, :]
    # decoder deconv2: (4,14,14) -> (1,28,28)
    f["t4"] = _deconv_as_matrix(p["deconv2_w"], 2, 1, (4, 14, 14)).astype(jnp.bfloat16)
    f["b4"] = jnp.repeat(p["deconv2_b"], 28 * 28)[None, :]
    return f


# ---------------------------------------------------------------------------
# Parameter init (deterministic, matches the module's layer shapes)
# ---------------------------------------------------------------------------
def init_params(key):
    ks = jax.random.split(key, 14)

    def w(k, shape, scale=0.1):
        return scale * jax.random.normal(k, shape, dtype=jnp.float32)

    p = {}
    p["conv1_w"] = w(ks[0], (4, IMAGE_CHANNEL, 4, 4)); p["conv1_b"] = w(ks[1], (4,), 0.01)
    p["bn1_g"] = jnp.ones((4,), jnp.float32);          p["bn1_b"] = jnp.zeros((4,), jnp.float32)
    p["conv2_w"] = w(ks[2], (8, 4, 4, 4));             p["conv2_b"] = w(ks[3], (8,), 0.01)
    p["bn2_g"] = jnp.ones((8,), jnp.float32);          p["bn2_b"] = jnp.zeros((8,), jnp.float32)
    p["fc1_w"] = w(ks[4], (H_DIM, Z_DIM), 0.05);       p["fc1_b"] = w(ks[5], (Z_DIM,), 0.01)
    p["fc2_w"] = w(ks[6], (H_DIM, Z_DIM), 0.05);       p["fc2_b"] = w(ks[7], (Z_DIM,), 0.01)
    p["fc3_w"] = w(ks[8], (Z_DIM, H_DIM), 0.05);       p["fc3_b"] = w(ks[9], (H_DIM,), 0.01)
    p["deconv1_w"] = w(ks[10], (8, 4, 4, 4));          p["deconv1_b"] = w(ks[11], (4,), 0.01)
    p["bn3_g"] = jnp.ones((4,), jnp.float32);          p["bn3_b"] = jnp.zeros((4,), jnp.float32)
    p["deconv2_w"] = w(ks[12], (4, IMAGE_CHANNEL, 4, 4))
    p["deconv2_b"] = w(ks[13], (IMAGE_CHANNEL,), 0.01)
    return p


if __name__ == "__main__":
    key = jax.random.PRNGKey(0)
    k_x, k_eps, k_p = jax.random.split(key, 3)
    # Input size implied by the module: h_dim = 8*7*7 => 28x28 single-channel.
    x = jax.random.normal(k_x, (2, IMAGE_CHANNEL, 28, 28), dtype=jnp.float32)
    # torch.randn_like eps of the reparameterization, pre-sampled deterministically.
    eps = jax.random.normal(k_eps, (2, Z_DIM), dtype=jnp.float32)

    params = init_params(k_p)
    fused = prepare_fused_params(params)     # one-time weight prep (not per step)

    out = jax.jit(vae_forward)(fused, x, eps)
    out = jax.block_until_ready(out)

    assert out.shape == (2, IMAGE_CHANNEL, 28, 28), out.shape
    assert bool(jnp.all(jnp.isfinite(out)))
    assert bool(jnp.all((out >= 0.0) & (out <= 1.0)))   # sigmoid output range
    print("KERNEL_OK")
</pallas_src>

<mosaic_0001>
module attributes {stable_mosaic.version = 11 : i64} {
  func.func @_vae_fused_kernel(%arg0: memref<2x784xf32, #tpu.memory_space<vmem>>, %arg1: memref<2x16xf32, #tpu.memory_space<vmem>>, %arg2: memref<784x784xbf16, #tpu.memory_space<vmem>>, %arg3: memref<1x784xf32, #tpu.memory_space<vmem>>, %arg4: memref<784x4xf32, #tpu.memory_space<vmem>>, %arg5: memref<4x784xf32, #tpu.memory_space<vmem>>, %arg6: memref<1x4xf32, #tpu.memory_space<vmem>>, %arg7: memref<1x4xf32, #tpu.memory_space<vmem>>, %arg8: memref<784x392xbf16, #tpu.memory_space<vmem>>, %arg9: memref<1x392xf32, #tpu.memory_space<vmem>>, %arg10: memref<392x8xf32, #tpu.memory_space<vmem>>, %arg11: memref<8x392xf32, #tpu.memory_space<vmem>>, %arg12: memref<1x8xf32, #tpu.memory_space<vmem>>, %arg13: memref<1x8xf32, #tpu.memory_space<vmem>>, %arg14: memref<392x32xf32, #tpu.memory_space<vmem>>, %arg15: memref<1x32xf32, #tpu.memory_space<vmem>>, %arg16: memref<16x392xf32, #tpu.memory_space<vmem>>, %arg17: memref<1x392xf32, #tpu.memory_space<vmem>>, %arg18: memref<392x784xbf16, #tpu.memory_space<vmem>>, %arg19: memref<1x784xf32, #tpu.memory_space<vmem>>, %arg20: memref<784x4xf32, #tpu.memory_space<vmem>>, %arg21: memref<4x784xf32, #tpu.memory_space<vmem>>, %arg22: memref<1x4xf32, #tpu.memory_space<vmem>>, %arg23: memref<1x4xf32, #tpu.memory_space<vmem>>, %arg24: memref<784x784xbf16, #tpu.memory_space<vmem>>, %arg25: memref<1x784xf32, #tpu.memory_space<vmem>>, %arg26: memref<2x784xf32, #tpu.memory_space<vmem>>) attributes {dimension_semantics = [], scalar_prefetch = 0 : i64, scratch_operands = 0 : i64, tpu.core_type = #tpu.core_type<tc>} {
    %c0 = arith.constant 0 : index
    %c0_0 = arith.constant 0 : index
    %0 = vector.load %arg0[%c0, %c0_0] : memref<2x784xf32, #tpu.memory_space<vmem>>, vector<2x784xf32>
    %1 = arith.truncf %0 : vector<2x784xf32> to vector<2x784xbf16>
    %c0_1 = arith.constant 0 : index
    %c0_2 = arith.constant 0 : index
    %2 = vector.load %arg2[%c0_1, %c0_2] : memref<784x784xbf16, #tpu.memory_space<vmem>>, vector<784x784xbf16>
    %cst = arith.constant dense<0.000000e+00> : vector<2x784xf32>
    %3 = tpu.matmul %1, %2, %cst {dimension_numbers = #tpu.dot_dimension_numbers<[1], [0], [0], [1], [0, 0, 1, 1], [], []>} : vector<2x784xbf16>, vector<784x784xbf16>, vector<2x784xf32> -> vector<2x784xf32>
    %c0_3 = arith.constant 0 : index
    %c0_4 = arith.constant 0 : index
    %4 = vector.load %arg3[%c0_3, %c0_4] : memref<1x784xf32, #tpu.memory_space<vmem>>, vector<1x784xf32>
    %5 = vector.broadcast %4 : vector<1x784xf32> to vector<2x784xf32>
    %6 = arith.addf %3, %5 : vector<2x784xf32>
    %cst_5 = arith.constant dense<0.000000e+00> : vector<784xf32>
    %7 = vector.multi_reduction <add>, %6, %cst_5 [0] : vector<2x784xf32> to vector<784xf32>
    %8 = vector.shape_cast %7 : vector<784xf32> to vector<1x784xf32>
    %9 = arith.mulf %6, %6 : vector<2x784xf32>
    %cst_6 = arith.constant dense<0.000000e+00> : vector<784xf32>
    %10 = vector.multi_reduction <add>, %9, %cst_6 [0] : vector<2x784xf32> to vector<784xf32>
    %11 = vector.shape_cast %10 : vector<784xf32> to vector<1x784xf32>
    %c0_7 = arith.constant 0 : index
    %c0_8 = arith.constant 0 : index
    %12 = vector.load %arg4[%c0_7, %c0_8] : memref<784x4xf32, #tpu.memory_space<vmem>>, vector<784x4xf32>
    %cst_9 = arith.constant dense<0.000000e+00> : vector<1x4xf32>
    %13 = tpu.matmul %8, %12, %cst_9 {dimension_numbers = #tpu.dot_dimension_numbers<[1], [0], [0], [1], [0, 0, 1, 1], [], []>} : vector<1x784xf32>, vector<784x4xf32>, vector<1x4xf32> -> vector<1x4xf32>
    %cst_10 = arith.constant 0.00255102036 : f32
    %14 = vector.broadcast %cst_10 : f32 to vector<1x4xf32>
    %15 = arith.mulf %13, %14 : vector<1x4xf32>
    %c0_11 = arith.constant 0 : index
    %c0_12 = arith.constant 0 : index
    %16 = vector.load %arg4[%c0_11, %c0_12] : memref<784x4xf32, #tpu.memory_space<vmem>>, vector<784x4xf32>
    %cst_13 = arith.constant dense<0.000000e+00> : vector<1x4xf32>
    %17 = tpu.matmul %11, %16, %cst_13 {dimension_numbers = #tpu.dot_dimension_numbers<[1], [0], [0], [1], [0, 0, 1, 1], [], []>} : vector<1x784xf32>, vector<784x4xf32>, vector<1x4xf32> -> vector<1x4xf32>
    %cst_14 = arith.constant 0.00255102036 : f32
    %18 = vector.broadcast %cst_14 : f32 to vector<1x4xf32>
    %19 = arith.mulf %17, %18 : vector<1x4xf32>
    %20 = arith.mulf %15, %15 : vector<1x4xf32>
    %21 = arith.subf %19, %20 : vector<1x4xf32>
    %cst_15 = arith.constant 0.000000e+00 : f32
    %22 = vector.broadcast %cst_15 : f32 to vector<1x4xf32>
    %23 = arith.maximumf %21, %22 : vector<1x4xf32>
    %c0_16 = arith.constant 0 : index
    %c0_17 = arith.constant 0 : index
    %24 = vector.load %arg6[%c0_16, %c0_17] : memref<1x4xf32, #tpu.memory_space<vmem>>, vector<1x4xf32>
    %cst_18 = arith.constant 9.99999974E-6 : f32
    %25 = vector.broadcast %cst_18 : f32 to vector<1x4xf32>
    %26 = arith.addf %23, %25 : vector<1x4xf32>
    %27 = math.rsqrt %26 : vector<1x4xf32>
    %28 = arith.mulf %24, %27 : vector<1x4xf32>
    %c0_19 = arith.constant 0 : index
    %c0_20 = arith.constant 0 : index
    %29 = vector.load %arg7[%c0_19, %c0_20] : memref<1x4xf32, #tpu.memory_space<vmem>>, vector<1x4xf32>
    %30 = arith.mulf %15, %28 : vector<1x4xf32>
    %31 = arith.subf %29, %30 : vector<1x4xf32>
    %c0_21 = arith.constant 0 : index
    %c0_22 = arith.constant 0 : index
    %32 = vector.load %arg5[%c0_21, %c0_22] : memref<4x784xf32, #tpu.memory_space<vmem>>, vector<4x784xf32>
    %cst_23 = arith.constant dense<0.000000e+00> : vector<1x784xf32>
    %33 = tpu.matmul %28, %32, %cst_23 {dimension_numbers = #tpu.dot_dimension_numbers<[1], [0], [0], [1], [0, 0, 1, 1], [], []>} : vector<1x4xf32>, vector<4x784xf32>, vector<1x784xf32> -> vector<1x784xf32>
    %34 = vector.broadcast %33 : vector<1x784xf32> to vector<2x784xf32>
    %35 = arith.mulf %6, %34 : vector<2x784xf32>
    %c0_24 = arith.constant 0 : index
    %c0_25 = arith.constant 0 : index
    %36 = vector.load %arg5[%c0_24, %c0_25] : memref<4x784xf32, #tpu.memory_space<vmem>>, vector<4x784xf32>
    %cst_26 = arith.constant dense<0.000000e+00> : vector<1x784xf32>
    %37 = tpu.matmul %31, %36, %cst_26 {dimension_numbers = #tpu.dot_dimension_numbers<[1], [0], [0], [1], [0, 0, 1, 1], [], []>} : vector<1x4xf32>, vector<4x784xf32>, vector<1x784xf32> -> vector<1x784xf32>
    %38 = vector.broadcast %37 : vector<1x784xf32> to vector<2x784xf32>
    %39 = arith.addf %35, %38 : vector<2x784xf32>
    %cst_27 = arith.constant 0.000000e+00 : f32
    %40 = vector.broadcast %cst_27 : f32 to vector<2x784xf32>
    %41 = arith.maximumf %39, %40 : vector<2x784xf32>
    %42 = arith.truncf %41 : vector<2x784xf32> to vector<2x784xbf16>
    %c0_28 = arith.constant 0 : index
    %c0_29 = arith.constant 0 : index
    %43 = vector.load %arg8[%c0_28, %c0_29] : memref<784x392xbf16, #tpu.memory_space<vmem>>, vector<784x392xbf16>
    %cst_30 = arith.constant dense<0.000000e+00> : vector<2x392xf32>
    %44 = tpu.matmul %42, %43, %cst_30 {dimension_numbers = #tpu.dot_dimension_numbers<[1], [0], [0], [1], [0, 0, 1, 1], [], []>} : vector<2x784xbf16>, vector<784x392xbf16>, vector<2x392xf32> -> vector<2x392xf32>
    %c0_31 = arith.constant 0 : index
    %c0_32 = arith.constant 0 : index
    %45 = vector.load %arg9[%c0_31, %c0_32] : memref<1x392xf32, #tpu.memory_space<vmem>>, vector<1x392xf32>
    %46 = vector.broadcast %45 : vector<1x392xf32> to vector<2x392xf32>
    %47 = arith.addf %44, %46 : vector<2x392xf32>
    %cst_33 = arith.constant dense<0.000000e+00> : vector<392xf32>
    %48 = vector.multi_reduction <add>, %47, %cst_33 [0] : vector<2x392xf32> to vector<392xf32>
    %49 = vector.shape_cast %48 : vector<392xf32> to vector<1x392xf32>
    %50 = arith.mulf %47, %47 : vector<2x392xf32>
    %cst_34 = arith.constant dense<0.000000e+00> : vector<392xf32>
    %51 = vector.multi_reduction <add>, %50, %cst_34 [0] : vector<2x392xf32> to vector<392xf32>
    %52 = vector.shape_cast %51 : vector<392xf32> to vector<1x392xf32>
    %c0_35 = arith.constant 0 : index
    %c0_36 = arith.constant 0 : index
    %53 = vector.load %arg10[%c0_35, %c0_36] : memref<392x8xf32, #tpu.memory_space<vmem>>, vector<392x8xf32>
    %cst_37 = arith.constant dense<0.000000e+00> : vector<1x8xf32>
    %54 = tpu.matmul %49, %53, %cst_37 {dimension_numbers = #tpu.dot_dimension_numbers<[1], [0], [0], [1], [0, 0, 1, 1], [], []>} : vector<1x392xf32>, vector<392x8xf32>, vector<1x8xf32> -> vector<1x8xf32>
    %cst_38 = arith.constant 0.0102040814 : f32
    %55 = vector.broadcast %cst_38 : f32 to vector<1x8xf32>
    %56 = arith.mulf %54, %55 : vector<1x8xf32>
    %c0_39 = arith.constant 0 : index
    %c0_40 = arith.constant 0 : index
    %57 = vector.load %arg10[%c0_39, %c0_40] : memref<392x8xf32, #tpu.memory_space<vmem>>, vector<392x8xf32>
    %cst_41 = arith.constant dense<0.000000e+00> : vector<1x8xf32>
    %58 = tpu.matmul %52, %57, %cst_41 {dimension_numbers = #tpu.dot_dimension_numbers<[1], [0], [0], [1], [0, 0, 1, 1], [], []>} : vector<1x392xf32>, vector<392x8xf32>, vector<1x8xf32> -> vector<1x8xf32>
    %cst_42 = arith.constant 0.0102040814 : f32
    %59 = vector.broadcast %cst_42 : f32 to vector<1x8xf32>
    %60 = arith.mulf %58, %59 : vector<1x8xf32>
    %61 = arith.mulf %56, %56 : vector<1x8xf32>
    %62 = arith.subf %60, %61 : vector<1x8xf32>
    %cst_43 = arith.constant 0.000000e+00 : f32
    %63 = vector.broadcast %cst_43 : f32 to vector<1x8xf32>
    %64 = arith.maximumf %62, %63 : vector<1x8xf32>
    %c0_44 = arith.constant 0 : index
    %c0_45 = arith.constant 0 : index
    %65 = vector.load %arg12[%c0_44, %c0_45] : memref<1x8xf32, #tpu.memory_space<vmem>>, vector<1x8xf32>
    %cst_46 = arith.constant 9.99999974E-6 : f32
    %66 = vector.broadcast %cst_46 : f32 to vector<1x8xf32>
    %67 = arith.addf %64, %66 : vector<1x8xf32>
    %68 = math.rsqrt %67 : vector<1x8xf32>
    %69 = arith.mulf %65, %68 : vector<1x8xf32>
    %c0_47 = arith.constant 0 : index
    %c0_48 = arith.constant 0 : index
    %70 = vector.load %arg13[%c0_47, %c0_48] : memref<1x8xf32, #tpu.memory_space<vmem>>, vector<1x8xf32>
    %71 = arith.mulf %56, %69 : vector<1x8xf32>
    %72 = arith.subf %70, %71 : vector<1x8xf32>
    %c0_49 = arith.constant 0 : index
    %c0_50 = arith.constant 0 : index
    %73 = vector.load %arg11[%c0_49, %c0_50] : memref<8x392xf32, #tpu.memory_space<vmem>>, vector<8x392xf32>
    %cst_51 = arith.constant dense<0.000000e+00> : vector<1x392xf32>
    %74 = tpu.matmul %69, %73, %cst_51 {dimension_numbers = #tpu.dot_dimension_numbers<[1], [0], [0], [1], [0, 0, 1, 1], [], []>} : vector<1x8xf32>, vector<8x392xf32>, vector<1x392xf32> -> vector<1x392xf32>
    %75 = vector.broadcast %74 : vector<1x392xf32> to vector<2x392xf32>
    %76 = arith.mulf %47, %75 : vector<2x392xf32>
    %c0_52 = arith.constant 0 : index
    %c0_53 = arith.constant 0 : index
    %77 = vector.load %arg11[%c0_52, %c0_53] : memref<8x392xf32, #tpu.memory_space<vmem>>, vector<8x392xf32>
    %cst_54 = arith.constant dense<0.000000e+00> : vector<1x392xf32>
    %78 = tpu.matmul %72, %77, %cst_54 {dimension_numbers = #tpu.dot_dimension_numbers<[1], [0], [0], [1], [0, 0, 1, 1], [], []>} : vector<1x8xf32>, vector<8x392xf32>, vector<1x392xf32> -> vector<1x392xf32>
    %79 = vector.broadcast %78 : vector<1x392xf32> to vector<2x392xf32>
    %80 = arith.addf %76, %79 : vector<2x392xf32>
    %cst_55 = arith.constant 0.000000e+00 : f32
    %81 = vector.broadcast %cst_55 : f32 to vector<2x392xf32>
    %82 = arith.maximumf %80, %81 : vector<2x392xf32>
    %c0_56 = arith.constant 0 : index
    %c0_57 = arith.constant 0 : index
    %83 = vector.load %arg14[%c0_56, %c0_57] : memref<392x32xf32, #tpu.memory_space<vmem>>, vector<392x32xf32>
    %cst_58 = arith.constant dense<0.000000e+00> : vector<2x32xf32>
    %84 = tpu.matmul %82, %83, %cst_58 {dimension_numbers = #tpu.dot_dimension_numbers<[1], [0], [0], [1], [0, 0, 1, 1], [], []>} : vector<2x392xf32>, vector<392x32xf32>, vector<2x32xf32> -> vector<2x32xf32>
    %c0_59 = arith.constant 0 : index
    %c0_60 = arith.constant 0 : index
    %85 = vector.load %arg15[%c0_59, %c0_60] : memref<1x32xf32, #tpu.memory_space<vmem>>, vector<1x32xf32>
    %86 = vector.broadcast %85 : vector<1x32xf32> to vector<2x32xf32>
    %87 = arith.addf %84, %86 : vector<2x32xf32>
    %88 = vector.extract_strided_slice %87 {offsets = [0, 0], sizes = [2, 16], strides = [1, 1]} : vector<2x32xf32> to vector<2x16xf32>
    %89 = vector.extract_strided_slice %87 {offsets = [0, 16], sizes = [2, 16], strides = [1, 1]} : vector<2x32xf32> to vector<2x16xf32>
    %cst_61 = arith.constant -4.000000e+00 : f32
    %cst_62 = arith.constant 4.000000e+00 : f32
    %90 = vector.broadcast %cst_61 : f32 to vector<2x16xf32>
    %91 = arith.maximumf %90, %89 : vector<2x16xf32>
    %92 = vector.broadcast %cst_62 : f32 to vector<2x16xf32>
    %93 = arith.minimumf %92, %91 : vector<2x16xf32>
    %c0_63 = arith.constant 0 : index
    %c0_64 = arith.constant 0 : index
    %94 = vector.load %arg1[%c0_63, %c0_64] : memref<2x16xf32, #tpu.memory_space<vmem>>, vector<2x16xf32>
    %cst_65 = arith.constant 5.000000e-01 : f32
    %95 = vector.broadcast %cst_65 : f32 to vector<2x16xf32>
    %96 = arith.mulf %95, %93 : vector<2x16xf32>
    %97 = math.exp %96 : vector<2x16xf32>
    %98 = arith.mulf %94, %97 : vector<2x16xf32>
    %99 = arith.addf %88, %98 : vector<2x16xf32>
    %c0_66 = arith.constant 0 : index
    %c0_67 = arith.constant 0 : index
    %100 = vector.load %arg16[%c0_66, %c0_67] : memref<16x392xf32, #tpu.memory_space<vmem>>, vector<16x392xf32>
    %cst_68 = arith.constant dense<0.000000e+00> : vector<2x392xf32>
    %101 = tpu.matmul %99, %100, %cst_68 {dimension_numbers = #tpu.dot_dimension_numbers<[1], [0], [0], [1], [0, 0, 1, 1], [], []>} : vector<2x16xf32>, vector<16x392xf32>, vector<2x392xf32> -> vector<2x392xf32>
    %c0_69 = arith.constant 0 : index
    %c0_70 = arith.constant 0 : index
    %102 = vector.load %arg17[%c0_69, %c0_70] : memref<1x392xf32, #tpu.memory_space<vmem>>, vector<1x392xf32>
    %103 = vector.broadcast %102 : vector<1x392xf32> to vector<2x392xf32>
    %104 = arith.addf %101, %103 : vector<2x392xf32>
    %cst_71 = arith.constant 0.000000e+00 : f32
    %105 = vector.broadcast %cst_71 : f32 to vector<2x392xf32>
    %106 = arith.maximumf %104, %105 : vector<2x392xf32>
    %107 = arith.truncf %106 : vector<2x392xf32> to vector<2x392xbf16>
    %c0_72 = arith.constant 0 : index
    %c0_73 = arith.constant 0 : index
    %108 = vector.load %arg18[%c0_72, %c0_73] : memref<392x784xbf16, #tpu.memory_space<vmem>>, vector<392x784xbf16>
    %cst_74 = arith.constant dense<0.000000e+00> : vector<2x784xf32>
    %109 = tpu.matmul %107, %108, %cst_74 {dimension_numbers = #tpu.dot_dimension_numbers<[1], [0], [0], [1], [0, 0, 1, 1], [], []>} : vector<2x392xbf16>, vector<392x784xbf16>, vector<2x784xf32> -> vector<2x784xf32>
    %c0_75 = arith.constant 0 : index
    %c0_76 = arith.constant 0 : index
    %110 = vector.load %arg19[%c0_75, %c0_76] : memref<1x784xf32, #tpu.memory_space<vmem>>, vector<1x784xf32>
    %111 = vector.broadcast %110 : vector<1x784xf32> to vector<2x784xf32>
    %112 = arith.addf %109, %111 : vector<2x784xf32>
    %cst_77 = arith.constant dense<0.000000e+00> : vector<784xf32>
    %113 = vector.multi_reduction <add>, %112, %cst_77 [0] : vector<2x784xf32> to vector<784xf32>
    %114 = vector.shape_cast %113 : vector<784xf32> to vector<1x784xf32>
    %115 = arith.mulf %112, %112 : vector<2x784xf32>
    %cst_78 = arith.constant dense<0.000000e+00> : vector<784xf32>
    %116 = vector.multi_reduction <add>, %115, %cst_78 [0] : vector<2x784xf32> to vector<784xf32>
    %117 = vector.shape_cast %116 : vector<784xf32> to vector<1x784xf32>
    %c0_79 = arith.constant 0 : index
    %c0_80 = arith.constant 0 : index
    %118 = vector.load %arg20[%c0_79, %c0_80] : memref<784x4xf32, #tpu.memory_space<vmem>>, vector<784x4xf32>
    %cst_81 = arith.constant dense<0.000000e+00> : vector<1x4xf32>
    %119 = tpu.matmul %114, %118, %cst_81 {dimension_numbers = #tpu.dot_dimension_numbers<[1], [0], [0], [1], [0, 0, 1, 1], [], []>} : vector<1x784xf32>, vector<784x4xf32>, vector<1x4xf32> -> vector<1x4xf32>
    %cst_82 = arith.constant 0.00255102036 : f32
    %120 = vector.broadcast %cst_82 : f32 to vector<1x4xf32>
    %121 = arith.mulf %119, %120 : vector<1x4xf32>
    %c0_83 = arith.constant 0 : index
    %c0_84 = arith.constant 0 : index
    %122 = vector.load %arg20[%c0_83, %c0_84] : memref<784x4xf32, #tpu.memory_space<vmem>>, vector<784x4xf32>
    %cst_85 = arith.constant dense<0.000000e+00> : vector<1x4xf32>
    %123 = tpu.matmul %117, %122, %cst_85 {dimension_numbers = #tpu.dot_dimension_numbers<[1], [0], [0], [1], [0, 0, 1, 1], [], []>} : vector<1x784xf32>, vector<784x4xf32>, vector<1x4xf32> -> vector<1x4xf32>
    %cst_86 = arith.constant 0.00255102036 : f32
    %124 = vector.broadcast %cst_86 : f32 to vector<1x4xf32>
    %125 = arith.mulf %123, %124 : vector<1x4xf32>
    %126 = arith.mulf %121, %121 : vector<1x4xf32>
    %127 = arith.subf %125, %126 : vector<1x4xf32>
    %cst_87 = arith.constant 0.000000e+00 : f32
    %128 = vector.broadcast %cst_87 : f32 to vector<1x4xf32>
    %129 = arith.maximumf %127, %128 : vector<1x4xf32>
    %c0_88 = arith.constant 0 : index
    %c0_89 = arith.constant 0 : index
    %130 = vector.load %arg22[%c0_88, %c0_89] : memref<1x4xf32, #tpu.memory_space<vmem>>, vector<1x4xf32>
    %cst_90 = arith.constant 9.99999974E-6 : f32
    %131 = vector.broadcast %cst_90 : f32 to vector<1x4xf32>
    %132 = arith.addf %129, %131 : vector<1x4xf32>
    %133 = math.rsqrt %132 : vector<1x4xf32>
    %134 = arith.mulf %130, %133 : vector<1x4xf32>
    %c0_91 = arith.constant 0 : index
    %c0_92 = arith.constant 0 : index
    %135 = vector.load %arg23[%c0_91, %c0_92] : memref<1x4xf32, #tpu.memory_space<vmem>>, vector<1x4xf32>
    %136 = arith.mulf %121, %134 : vector<1x4xf32>
    %137 = arith.subf %135, %136 : vector<1x4xf32>
    %c0_93 = arith.constant 0 : index
    %c0_94 = arith.constant 0 : index
    %138 = vector.load %arg21[%c0_93, %c0_94] : memref<4x784xf32, #tpu.memory_space<vmem>>, vector<4x784xf32>
    %cst_95 = arith.constant dense<0.000000e+00> : vector<1x784xf32>
    %139 = tpu.matmul %134, %138, %cst_95 {dimension_numbers = #tpu.dot_dimension_numbers<[1], [0], [0], [1], [0, 0, 1, 1], [], []>} : vector<1x4xf32>, vector<4x784xf32>, vector<1x784xf32> -> vector<1x784xf32>
    %140 = vector.broadcast %139 : vector<1x784xf32> to vector<2x784xf32>
    %141 = arith.mulf %112, %140 : vector<2x784xf32>
    %c0_96 = arith.constant 0 : index
    %c0_97 = arith.constant 0 : index
    %142 = vector.load %arg21[%c0_96, %c0_97] : memref<4x784xf32, #tpu.memory_space<vmem>>, vector<4x784xf32>
    %cst_98 = arith.constant dense<0.000000e+00> : vector<1x784xf32>
    %143 = tpu.matmul %137, %142, %cst_98 {dimension_numbers = #tpu.dot_dimension_numbers<[1], [0], [0], [1], [0, 0, 1, 1], [], []>} : vector<1x4xf32>, vector<4x784xf32>, vector<1x784xf32> -> vector<1x784xf32>
    %144 = vector.broadcast %143 : vector<1x784xf32> to vector<2x784xf32>
    %145 = arith.addf %141, %144 : vector<2x784xf32>
    %cst_99 = arith.constant 0.000000e+00 : f32
    %146 = vector.broadcast %cst_99 : f32 to vector<2x784xf32>
    %147 = arith.maximumf %145, %146 : vector<2x784xf32>
    %148 = arith.truncf %147 : vector<2x784xf32> to vector<2x784xbf16>
    %c0_100 = arith.constant 0 : index
    %c0_101 = arith.constant 0 : index
    %149 = vector.load %arg24[%c0_100, %c0_101] : memref<784x784xbf16, #tpu.memory_space<vmem>>, vector<784x784xbf16>
    %cst_102 = arith.constant dense<0.000000e+00> : vector<2x784xf32>
    %150 = tpu.matmul %148, %149, %cst_102 {dimension_numbers = #tpu.dot_dimension_numbers<[1], [0], [0], [1], [0, 0, 1, 1], [], []>} : vector<2x784xbf16>, vector<784x784xbf16>, vector<2x784xf32> -> vector<2x784xf32>
    %c0_103 = arith.constant 0 : index
    %c0_104 = arith.constant 0 : index
    %151 = vector.load %arg25[%c0_103, %c0_104] : memref<1x784xf32, #tpu.memory_space<vmem>>, vector<1x784xf32>
    %152 = vector.broadcast %151 : vector<1x784xf32> to vector<2x784xf32>
    %153 = arith.addf %150, %152 : vector<2x784xf32>
    %cst_105 = arith.constant 0.000000e+00 : f32
    %154 = vector.broadcast %cst_105 : f32 to vector<2x784xf32>
    %155 = arith.subf %154, %153 : vector<2x784xf32>
    %156 = math.exp %155 : vector<2x784xf32>
    %cst_106 = arith.constant 1.000000e+00 : f32
    %157 = vector.broadcast %cst_106 : f32 to vector<2x784xf32>
    %158 = arith.addf %157, %156 : vector<2x784xf32>
    %cst_107 = arith.constant 1.000000e+00 : f32
    %159 = vector.broadcast %cst_107 : f32 to vector<2x784xf32>
    %160 = arith.divf %159, %158 : vector<2x784xf32>
    %c0_108 = arith.constant 0 : index
    %c0_109 = arith.constant 0 : index
    %161 = vector.load %arg26[%c0_108, %c0_109] : memref<2x784xf32, #tpu.memory_space<vmem>>, vector<2x784xf32>
    tpu.vector_store %arg26[%c0_108, %c0_109], %160 {strides = array<i32>} : memref<2x784xf32, #tpu.memory_space<vmem>>, vector<2x784xf32>,
    return
  }
}

</mosaic_0001>

<bundles_post_ra>
// kernel: vae_forward.1
= control target key start
LH: loop header
LB: loop body
LE: loop exit
PB: predicated region body
PF: predicated region fallthrough
CT: control target
= control target key end

     0   :  { %s23893_s0 = inlined_call_operand.vmem [shape: f32[2,784], index: 0, kind: input, shape index: {}]   ;;  %s23894_s1 = inlined_call_operand.vmem [shape: f32[2,16], index: 1, kind: input, shape index: {}]   ;;  %s23895_s2 = inlined_call_operand.vmem [shape: bf16[784,784], index: 2, kind: input, shape index: {}]   ;;  %s23896_s3 = inlined_call_operand.vmem [shape: f32[1,784], index: 3, kind: input, shape index: {}]   ;;  %s23897_s4 = inlined_call_operand.vmem [shape: f32[784,4], index: 4, kind: input, shape index: {}]   ;;  %s23898_s5 = inlined_call_operand.vmem [shape: f32[4,784], index: 5, kind: input, shape index: {}]   ;;  %s23899_s6 = inlined_call_operand.vmem [shape: f32[1,4], index: 6, kind: input, shape index: {}]   ;;  %s23900_s7 = inlined_call_operand.vmem [shape: f32[1,4], index: 7, kind: input, shape index: {}]   ;;  %s23901_s8 = inlined_call_operand.vmem [shape: bf16[784,392], index: 8, kind: input, shape index: {}]   ;;  %s23902_s9 = inlined_call_operand.vmem [shape: f32[1,392], index: 9, kind: input, shape index: {}]   ;;  %s23903_s10 = inlined_call_operand.vmem [shape: f32[392,8], index: 10, kind: input, shape index: {}]   ;;  %s23904_s11 = inlined_call_operand.vmem [shape: f32[8,392], index: 11, kind: input, shape index: {}]   ;;  %s23905_s12 = inlined_call_operand.vmem [shape: f32[1,8], index: 12, kind: input, shape index: {}]   ;;  %s23906_s13 = inlined_call_operand.vmem [shape: f32[1,8], index: 13, kind: input, shape index: {}]   ;;  %s23907_s14 = inlined_call_operand.vmem [shape: f32[392,32], index: 14, kind: input, shape index: {}]   ;;  %s23908_s15 = inlined_call_operand.vmem [shape: f32[1,32], index: 15, kind: input, shape index: {}]   ;;  %s23909_s16 = inlined_call_operand.vmem [shape: f32[16,392], index: 16, kind: input, shape index: {}]   ;;  %s23910_s17 = inlined_call_operand.vmem [shape: f32[1,392], index: 17, kind: input, shape index: {}]   ;;  %s23911_s18 = inlined_call_operand.vmem [shape: bf16[392,784], index: 18, kind: input, shape index: {}]   ;;  %s23912_s19 = inlined_call_operand.vmem [shape: f32[1,784], index: 19, kind: input, shape index: {}]   ;;  %s23913_s20 = inlined_call_operand.vmem [shape: f32[784,4], index: 20, kind: input, shape index: {}]   ;;  %s23914_s21 = inlined_call_operand.vmem [shape: f32[4,784], index: 21, kind: input, shape index: {}]   ;;  %s23915_s22 = inlined_call_operand.vmem [shape: f32[1,4], index: 22, kind: input, shape index: {}]   ;;  %s23916_s23 = inlined_call_operand.vmem [shape: f32[1,4], index: 23, kind: input, shape index: {}]   ;;  %s23917_s24 = inlined_call_operand.hbm [shape: bf16[784,784], index: 24, kind: input, shape index: {}]   ;;  %s23918_s25 = inlined_call_operand.vmem [shape: f32[1,784], index: 25, kind: input, shape index: {}]   ;;  %s23919_s26 = inlined_call_operand.vmem [shape: f32[2,784], index: 26, kind: output, shape index: {}]  }
   0x1   :  { %23993 = sst [smem:[#allocation38_spill]] %s23893_s0 }
   0x2   :  { %23994 = sst [smem:[#allocation39_spill]] %s23894_s1 }
   0x3   :  { %23995 = sst [smem:[#allocation40_spill]] %s23895_s2 }
   0x4   :  { %23996 = sst [smem:[#allocation41_spill]] %s23896_s3 }
   0x5   :  { %23997 = sst [smem:[#allocation42_spill]] %s23897_s4 }
   0x6   :  { %23998 = sst [smem:[#allocation43_spill]] %s23898_s5 }
   0x7   :  { %23999 = sst [smem:[#allocation44_spill]] %s23899_s6 }
   0x8   :  { %24000 = sst [smem:[#allocation45_spill]] %s23900_s7 }
   0x9   :  { %24001 = sst [smem:[#allocation46_spill]] %s23901_s8 }
   0xa   :  { %24002 = sst [smem:[#allocation47_spill]] %s23902_s9 }
   0xb   :  { %24003 = sst [smem:[#allocation48_spill]] %s23903_s10 }
   0xc   :  { %31 = vsyncpa [#allocation3], 0  ;;  %s84_s7 = sshll.u32 %s23917_s24, 4  ;;  %s16925_s28 = smov [#allocation2]   ;;  %s85_s7 = int_to_ptr.hbm [resolvable:$true] %s84_s7 }
   0xd   :  { %s86_s8 = sshll.u32 %s16925_s28, 4  ;;  %s16926_s4 = smov 448   ;;  %s87_s8 = int_to_ptr.vmem [resolvable:$true] %s86_s8 }
   0xe   :  { %s16927_s29 = smov 28  }
   0xf   :  { %92 = dma.hbm_to_vmem [thread:$0]  %s85_s7, 43904, %s87_s8, [#allocation3], %s16926_s4, %s16926_s4, %s16927_s29  }
  0x10   :  { %16923 = dma.done.wait [#allocation3], 43904  }
  0x11   :  { %16924 = vsyncadd [#allocation3], 4294923392  ;;  %s24004_s30 = sld [smem:[#allocation40_spill]]  ;;  %vm2300_vm0 = vcmask 130048   ;;  %vm2941_vm1 = vcmask 1041408   ;;  %vm2984_vm2 = vcmask 123904  }
  0x12   :  { %s24005_s24 = sld [smem:[#allocation38_spill]]  ;;  %vm3479_vm3 = vcmask 1043456   ;;  %vm3475_vm7 = vcmask 31744   ;;  %vm5421_vm8 = vcmask 58368   ;;  %vm5510_vm9 = vcmask 64512   ;;  %s16928_s28 = smov 112  }
  0x13   :  { %s24006_s10 = sld [smem:[#allocation43_spill]] }
  0x14   :  { %s24010_s27 = sld [smem:[#allocation41_spill]] }
  0x15   :  { %s24079_s5 = sld [smem:[#allocation44_spill]] }
  0x16   :  { %s24081_s3 = sld [smem:[#allocation46_spill]] }
  0x17   :  { %v11703_v0 = vld [vmem:[%s24004_s30 + $0x188] sm:$0xf]  ;;  %v15858_v1 = vld [vmem:[%s24004_s30 + $0x1a0] sm:$0xf0]  ;;  %v11675_v11 = vld [vmem:[%s24004_s30 + $0x150] sm:$0xf] }
  0x18   :  { %v11927_v2 = vld [vmem:[%s24004_s30 + $0x348] sm:$0xf]  ;;  %v11704_v3 = vor.u32 %v15858_v1, %v11703_v0  ;;  %v15914_v4 = vld [vmem:[%s24004_s30 + $0x360] sm:$0xf0]  ;;  %v15851_v13 = vld [vmem:[%s24004_s30 + $0x168] sm:$0xf0] }
  0x19   :  { %v12151_v5 = vld [vmem:[%s24004_s30 + $0x508] sm:$0xf]  ;;  %v15970_v6 = vld [vmem:[%s24004_s30 + $0x520] sm:$0xf0]  ;;  %v11928_v7 = vor.u32 %v15914_v4, %v11927_v2  ;;  %v11899_v14 = vld [vmem:[%s24004_s30 + $0x310] sm:$0xf]  ;;  %v11676_v16 = vor.u32 %v15851_v13, %v11675_v11 }
  0x1a   :  { %v12152_v8 = vor.u32 %v15970_v6, %v12151_v5  ;;  %v12375_v9 = vld [vmem:[%s24004_s30 + $0x6c8] sm:$0xf]  ;;  %v16026_v10 = vld [vmem:[%s24004_s30 + $0x6e0] sm:$0xf0]  ;;  %2304 = vmatpush.bf16.msra.mxu0 %v11704_v3  ;;  %v15907_v15 = vld [vmem:[%s24004_s30 + $0x328] sm:$0xf0] }
  0x1b   :  { %v12376_v12 = vor.u32 %v16026_v10, %v12375_v9  ;;  %2317 = vmatpush.bf16.msra.mxu1 %v11928_v7  ;;  %v11900_v17 = vor.u32 %v15907_v15, %v11899_v14  ;;  %v12123_v18 = vld [vmem:[%s24004_s30 + $0x4d0] sm:$0xf]  ;;  %v15963_v19 = vld [vmem:[%s24004_s30 + $0x4e8] sm:$0xf0]  ;;  %v11647_v23 = vld [vmem:[%s24004_s30 + $0x118] sm:$0xf] }
  0x1c   :  { %2330 = vmatpush.bf16.msra.mxu2 %v12152_v8  ;;  %v12347_v20 = vld [vmem:[%s24004_s30 + $0x690] sm:$0xf]  ;;  %v12124_v21 = vor.u32 %v15963_v19, %v12123_v18  ;;  %v16019_v22 = vld [vmem:[%s24004_s30 + $0x6a8] sm:$0xf0]  ;;  %v15844_v24 = vld [vmem:[%s24004_s30 + $0x130] sm:$0xf0] }
  0x1d   :  { %2343 = vmatpush.bf16.msra.mxu3 %v12376_v12  ;;  %v12348_v25 = vor.u32 %v16019_v22, %v12347_v20  ;;  %v11871_v26 = vld [vmem:[%s24004_s30 + $0x2d8] sm:$0xf]  ;;  %v15900_v27 = vld [vmem:[%s24004_s30 + $0x2f0] sm:$0xf0]  ;;  %v11648_v29 = vor.u32 %v15844_v24, %v11647_v23  ;;  %v11619_v35 = vld [vmem:[%s24004_s30 + $0xe0] sm:$0xf] }
  0x1e   :  { %v12095_v28 = vld [vmem:[%s24004_s30 + $0x498] sm:$0xf]  ;;  %2305 = vmatpush.bf16.msra.mxu0 %v11676_v16  ;;  %v15956_v30 = vld [vmem:[%s24004_s30 + $0x4b0] sm:$0xf0]  ;;  %v11872_v33 = vor.u32 %v15900_v27, %v11871_v26  ;;  %v15837_v36 = vld [vmem:[%s24004_s30 + $0xf8] sm:$0xf0] }
  0x1f   :  { %v12319_v31 = vld [vmem:[%s24004_s30 + $0x658] sm:$0xf]  ;;  %v16012_v32 = vld [vmem:[%s24004_s30 + $0x670] sm:$0xf0]  ;;  %2318 = vmatpush.bf16.msra.mxu1 %v11900_v17  ;;  %v12096_v34 = vor.u32 %v15956_v30, %v12095_v28  ;;  %v11843_v37 = vld [vmem:[%s24004_s30 + $0x2a0] sm:$0xf]  ;;  %v11620_v44 = vor.u32 %v15837_v36, %v11619_v35 }
  0x20   :  { %2331 = vmatpush.bf16.msra.mxu2 %v12124_v21  ;;  %v12320_v38 = vor.u32 %v16012_v32, %v12319_v31  ;;  %v15893_v39 = vld [vmem:[%s24004_s30 + $0x2b8] sm:$0xf0]  ;;  %v12067_v40 = vld [vmem:[%s24004_s30 + $0x460] sm:$0xf]  ;;  %v11591_v47 = vld [vmem:[%s24004_s30 + $0xa8] sm:$0xf] }
  0x21   :  { %2344 = vmatpush.bf16.msra.mxu3 %v12348_v25  ;;  %v15949_v41 = vld [vmem:[%s24004_s30 + $0x478] sm:$0xf0]  ;;  %v12291_v42 = vld [vmem:[%s24004_s30 + $0x620] sm:$0xf]  ;;  %v11844_v45 = vor.u32 %v15893_v39, %v11843_v37  ;;  %v15830_v48 = vld [vmem:[%s24004_s30 + $0xc0] sm:$0xf0] }
  0x22   :  { %v16005_v43 = vld [vmem:[%s24004_s30 + $0x638] sm:$0xf0]  ;;  %2306 = vmatpush.bf16.msra.mxu0 %v11648_v29  ;;  %v12068_v46 = vor.u32 %v15949_v41, %v12067_v40  ;;  %v11815_v49 = vld [vmem:[%s24004_s30 + $0x268] sm:$0xf]  ;;  %v15886_v51 = vld [vmem:[%s24004_s30 + $0x280] sm:$0xf0]  ;;  %v11592_v56 = vor.u32 %v15830_v48, %v11591_v47 }
  0x23   :  { %2319 = vmatpush.bf16.msra.mxu1 %v11872_v33  ;;  %v12292_v50 = vor.u32 %v16005_v43, %v12291_v42  ;;  %v12039_v52 = vld [vmem:[%s24004_s30 + $0x428] sm:$0xf]  ;;  %v15942_v53 = vld [vmem:[%s24004_s30 + $0x440] sm:$0xf0]  ;;  %v11816_v57 = vor.u32 %v15886_v51, %v11815_v49  ;;  %v11563_v59 = vld [vmem:[%s24004_s30 + $0x70] sm:$0xf] }
  0x24   :  { %2332 = vmatpush.bf16.msra.mxu2 %v12096_v34  ;;  %v12263_v54 = vld [vmem:[%s24004_s30 + $0x5e8] sm:$0xf]  ;;  %v15998_v55 = vld [vmem:[%s24004_s30 + $0x600] sm:$0xf0]  ;;  %v12040_v58 = vor.u32 %v15942_v53, %v12039_v52  ;;  %v15823_v60 = vld [vmem:[%s24004_s30 + $0x88] sm:$0xf0] }
  0x25   :  { %2345 = vmatpush.bf16.msra.mxu3 %v12320_v38  ;;  %v11787_v61 = vld [vmem:[%s24004_s30 + $0x230] sm:$0xf]  ;;  %v12264_v62 = vor.u32 %v15998_v55, %v12263_v54  ;;  %v15879_v63 = vld [vmem:[%s24004_s30 + $0x248] sm:$0xf0]  ;;  %v11564_v4 = vor.u32 %v15823_v60, %v11563_v59  ;;  %v11535_v7 = vld [vmem:[%s24004_s30 + $0x38] sm:$0xf] }
  0x26   :  { %2307 = vmatpush.bf16.msra.mxu0 %v11620_v44  ;;  %v12011_v0 = vld [vmem:[%s24004_s30 + $0x3f0] sm:$0xf]  ;;  %v15935_v1 = vld [vmem:[%s24004_s30 + $0x408] sm:$0xf0]  ;;  %v11788_v5 = vor.u32 %v15879_v63, %v11787_v61  ;;  %v15816_v8 = vld [vmem:[%s24004_s30 + $0x50] sm:$0xf0] }
  0x27   :  { %2320 = vmatpush.bf16.msra.mxu1 %v11844_v45  ;;  %v12235_v2 = vld [vmem:[%s24004_s30 + $0x5b0] sm:$0xf]  ;;  %v15991_v3 = vld [vmem:[%s24004_s30 + $0x5c8] sm:$0xf0]  ;;  %v12012_v6 = vor.u32 %v15935_v1, %v12011_v0  ;;  %v11759_v9 = vld [vmem:[%s24004_s30 + $0x1f8] sm:$0xf]  ;;  %v11536_v17 = vor.u32 %v15816_v8, %v11535_v7 }
  0x28   :  { %2333 = vmatpush.bf16.msra.mxu2 %v12068_v46  ;;  %v12236_v10 = vor.u32 %v15991_v3, %v12235_v2  ;;  %v15872_v11 = vld [vmem:[%s24004_s30 + $0x210] sm:$0xf0]  ;;  %v11983_v12 = vld [vmem:[%s24004_s30 + $0x3b8] sm:$0xf]  ;;  %v11507_v16 = vld [vmem:[%s24004_s30] sm:$0xf] }
  0x29   :  { %2346 = vmatpush.bf16.msra.mxu3 %v12292_v50  ;;  %v15928_v13 = vld [vmem:[%s24004_s30 + $0x3d0] sm:$0xf0]  ;;  %v12207_v14 = vld [vmem:[%s24004_s30 + $0x578] sm:$0xf]  ;;  %v15809_v18 = vld [vmem:[%s24004_s30 + $0x18] sm:$0xf0]  ;;  %v11760_v21 = vor.u32 %v15872_v11, %v11759_v9 }
  0x2a   :  { %2308 = vmatpush.bf16.msra.mxu0 %v11592_v56  ;;  %v15984_v15 = vld [vmem:[%s24004_s30 + $0x590] sm:$0xf0]  ;;  %v11731_v19 = vld [vmem:[%s24004_s30 + $0x1c0] sm:$0xf]  ;;  %v15865_v20 = vld [vmem:[%s24004_s30 + $0x1d8] sm:$0xf0]  ;;  %v11984_v22 = vor.u32 %v15928_v13, %v11983_v12  ;;  %v11508_v32 = vor.u32 %v15809_v18, %v11507_v16 }
  0x2b   :  { %2321 = vmatpush.bf16.msra.mxu1 %v11816_v57  ;;  %v11955_v23 = vld [vmem:[%s24004_s30 + $0x380] sm:$0xf]  ;;  %v15921_v24 = vld [vmem:[%s24004_s30 + $0x398] sm:$0xf0]  ;;  %v12208_v26 = vor.u32 %v15984_v15, %v12207_v14  ;;  %v12599_v29 = vld [vmem:[%s24004_s30 + $0x888] sm:$0xf]  ;;  %v11732_v36 = vor.u32 %v15865_v20, %v11731_v19 }
  0x2c   :  { %2334 = vmatpush.bf16.msra.mxu2 %v12040_v58  ;;  %v100_v25 = vld [vmem:[%s24005_s24] sm:$0xff]  ;;  %v15977_v28 = vld [vmem:[%s24004_s30 + $0x558] sm:$0xf0]  ;;  %v12823_v31 = vld [vmem:[%s24004_s30 + $0xa48] sm:$0xf]  ;;  %v11956_v37 = vor.u32 %v15921_v24, %v11955_v23  ;;  %s24082_s6 = sld [smem:[#allocation48_spill]] }
  0x2d   :  { %2347 = vmatpush.bf16.msra.mxu3 %v12264_v62  ;;  %v12179_v27 = vld [vmem:[%s24004_s30 + $0x540] sm:$0xf]  ;;  %104 = vst [vmem:[#allocation1] ss:$4 sm:$0xff] %v100_v25  ;;  %v16082_v30 = vld [vmem:[%s24004_s30 + $0x8a0] sm:$0xf0] }
  0x2e   :  { %2309 = vmatpush.bf16.msra.mxu0 %v11564_v4  ;;  %v16138_v33 = vld [vmem:[%s24004_s30 + $0xa60] sm:$0xf0]  ;;  %v15855_v34 = vld [vmem:[%s24004_s30 + $0x18c] sm:$0xf]  ;;  %v11705_v35 = vld [vmem:[%s24004_s30 + $0x1a4] sm:$0xf0]  ;;  %v12180_v40 = vor.u32 %v15977_v28, %v12179_v27  ;;  %v12600_v41 = vor.u32 %v16082_v30, %v12599_v29 }
  0x2f   :  { %2322 = vmatpush.bf16.msra.mxu1 %v11788_v5  ;;  %v12851_v38 = vld [vmem:[%s24004_s30 + $0xa80] sm:$0xf]  ;;  %v16145_v39 = vld [vmem:[%s24004_s30 + $0xa98] sm:$0xf0]  ;;  %v15911_v42 = vld [vmem:[%s24004_s30 + $0x34c] sm:$0xf]  ;;  %v12824_v44 = vor.u32 %v16138_v33, %v12823_v31  ;;  %v11708_v45 = vor.u32 %v15855_v34, %v11705_v35 }
  0x30   :  { %2335 = vmatpush.bf16.msra.mxu2 %v12012_v6  ;;  %v11929_v43 = vld [vmem:[%s24004_s30 + $0x364] sm:$0xf0]  ;;  %v12571_v46 = vld [vmem:[%s24004_s30 + $0x850] sm:$0xf]  ;;  %v16075_v47 = vld [vmem:[%s24004_s30 + $0x868] sm:$0xf0]  ;;  %v12852_v49 = vor.u32 %v16145_v39, %v12851_v38 }
  0x31   :  { %2348 = vmatpush.bf16.msra.mxu3 %v12236_v10  ;;  %v12795_v48 = vld [vmem:[%s24004_s30 + $0xa10] sm:$0xf]  ;;  %v16131_v50 = vld [vmem:[%s24004_s30 + $0xa28] sm:$0xf0]  ;;  %v15848_v51 = vld [vmem:[%s24004_s30 + $0x154] sm:$0xf]  ;;  %v11932_v57 = vor.u32 %v15911_v42, %v11929_v43  ;;  %v12572_v58 = vor.u32 %v16075_v47, %v12571_v46 }
  0x32   :  { %2310 = vmatpush.bf16.msra.mxu0 %v11536_v17  ;;  %v11677_v52 = vld [vmem:[%s24004_s30 + $0x16c] sm:$0xf0]  ;;  %v15904_v54 = vld [vmem:[%s24004_s30 + $0x314] sm:$0xf]  ;;  %v12543_v59 = vld [vmem:[%s24004_s30 + $0x818] sm:$0xf]  ;;  %v12796_v61 = vor.u32 %v16131_v50, %v12795_v48 }
  0x33   :  { %2323 = vmatpush.bf16.msra.mxu1 %v11760_v21  ;;  %v11901_v55 = vld [vmem:[%s24004_s30 + $0x32c] sm:$0xf0]  ;;  %v11680_v62 = vor.u32 %v15848_v51, %v11677_v52  ;;  %v16068_v63 = vld [vmem:[%s24004_s30 + $0x830] sm:$0xf0]  ;;  %v12767_v0 = vld [vmem:[%s24004_s30 + $0x9d8] sm:$0xf] }
  0x34   :  { %2336 = vmatpush.bf16.msra.mxu2 %v11984_v22  ;;  %v109_v53 = vld.sshfl [vmem:[#allocation1 + $0x10] sm:$0xff pattern:$0x73625140]  ;;  %v107_v60 = vld.sshfl [vmem:[#allocation1] sm:$0xff pattern:$0x73625140]  ;;  %v11904_v9 = vor.u32 %v15904_v54, %v11901_v55  ;;  %v12544_v10 = vor.u32 %v16068_v63, %v12543_v59 }
  0x35   :  { %2349 = vmatpush.bf16.msra.mxu3 %v12208_v26  ;;  %v17316_v56 = vpack.c.bf16 %v109_v53, %v109_v53  ;;  %v16124_v1 = vld [vmem:[%s24004_s30 + $0x9f0] sm:$0xf0]  ;;  %v17330_v2 = vpack.c.bf16 %v107_v60, %v107_v60  ;;  %v15841_v3 = vld [vmem:[%s24004_s30 + $0x11c] sm:$0xf]  ;;  %v11649_v4 = vld [vmem:[%s24004_s30 + $0x134] sm:$0xf0] }
  0x36   :  { %2311 = vmatpush.bf16.msra.mxu0 %v11508_v32  ;;  %v17341_v5 = vld [vmem:[%s24006_s10] sm:$0xff]  ;;  %v15897_v6 = vld [vmem:[%s24004_s30 + $0x2dc] sm:$0xf]  ;;  %v11873_v7 = vld [vmem:[%s24004_s30 + $0x2f4] sm:$0xf0]  ;;  %v12768_v13 = vor.u32 %v16124_v1, %v12767_v0  ;;  %v11652_v14 = vor.u32 %v15841_v3, %v11649_v4 }
  0x37   :  { %2324 = vmatpush.bf16.msra.mxu1 %v11732_v36  ;;  %24007 = vst [vmem:[#allocation5_spill] sm:$0xff] %v17341_v5  ;;  %v12515_v8 = vld [vmem:[%s24004_s30 + $0x7e0] sm:$0xf]  ;;  %v16061_v11 = vld [vmem:[%s24004_s30 + $0x7f8] sm:$0xf0]  ;;  %v17366_v17 = vld [vmem:[%s24006_s10 + $0x8] sm:$0xff]  ;;  %v11876_v22 = vor.u32 %v15897_v6, %v11873_v7 }
  0x38   :  { %2337 = vmatpush.bf16.msra.mxu2 %v11956_v37  ;;  %v108_v12 = vld.sshfl [vmem:[#allocation1 + $0x8] sm:$0xff pattern:$0x73625140]  ;;  %v12739_v15 = vld [vmem:[%s24004_s30 + $0x9a0] sm:$0xf]  ;;  %24008 = vst [vmem:[#allocation6_spill] sm:$0xff] %v17366_v17  ;;  %v12516_v23 = vor.u32 %v16061_v11, %v12515_v8 }
  0x39   :  { %2350 = vmatpush.bf16.msra.mxu3 %v12180_v40  ;;  %2312 = vmatmul.bf16.vlgmr.msra.gmra.mxu0 %v17330_v2  ;;  %v17360_v16 = vpack.c.bf16 %v108_v12, %v108_v12  ;;  %3461 = vst [vmem:[#allocation1] ss:$2 sm:$0xff] %v17341_v5  ;;  %v16117_v18 = vld [vmem:[%s24004_s30 + $0x9b8] sm:$0xf0]  ;;  %v15834_v19 = vld [vmem:[%s24004_s30 + $0xe4] sm:$0xf] }
  0x3a   :  { %2356 = vmatpush.bf16.msrb.mxu0 %v12600_v41  ;;  %v11621_v20 = vld [vmem:[%s24004_s30 + $0xfc] sm:$0xf0]  ;;  %v110_v21 = vld.sshfl [vmem:[#allocation1 + $0x18] sm:$0xff pattern:$0x73625140]  ;;  %v12740_v27 = vor.u32 %v16117_v18, %v12739_v15 }
  0x3b   :  { %2369 = vmatpush.bf16.msrb.mxu1 %v12824_v44  ;;  %2338 = vmatmul.bf16.vlgmr.msra.gmra.mxu2 %v17316_v56  ;;  %v15890_v24 = vld [vmem:[%s24004_s30 + $0x2a4] sm:$0xf]  ;;  %v11845_v25 = vld [vmem:[%s24004_s30 + $0x2bc] sm:$0xf0]  ;;  %v17384_v26 = vpack.c.bf16 %v110_v21, %v110_v21  ;;  %3463 = vst [vmem:[#allocation1 + $0x10] ss:$2 sm:$0xff] %v17366_v17  ;;  %v11624_v28 = vor.u32 %v15834_v19, %v11621_v20 }
  0x3c   :  { %2389 = vmatpush.bf16.msrb.mxu2 %v12852_v49  ;;  %2325 = vmatmul.bf16.vlgmr.msra.gmra.mxu1 %v17360_v16  ;;  %v12487_v29 = vld [vmem:[%s24004_s30 + $0x7a8] sm:$0xf]  ;;  %v16054_v30 = vld [vmem:[%s24004_s30 + $0x7c0] sm:$0xf0]  ;;  %v15827_v33 = vld [vmem:[%s24004_s30 + $0xac] sm:$0xf]  ;;  %v11848_v36 = vor.u32 %v15890_v24, %v11845_v25 }
  0x3d   :  { %2395 = vmatpush.bf16.msrb.mxu3 %v11708_v45  ;;  %v12711_v31 = vld [vmem:[%s24004_s30 + $0x968] sm:$0xf]  ;;  %v16110_v32 = vld [vmem:[%s24004_s30 + $0x980] sm:$0xf0]  ;;  %v15883_v35 = vld [vmem:[%s24004_s30 + $0x26c] sm:$0xf]  ;;  %v12488_v37 = vor.u32 %v16054_v30, %v12487_v29 }
  0x3e   :  { %2357 = vmatpush.bf16.msrb.mxu0 %v12572_v58  ;;  %v11593_v34 = vld [vmem:[%s24004_s30 + $0xc4] sm:$0xf0]  ;;  %2351 = vmatmul.bf16.vlgmr.msra.gmra.mxu3 %v17384_v26  ;;  %v12459_v39 = vld [vmem:[%s24004_s30 + $0x770] sm:$0xf]  ;;  %v16047_v40 = vld [vmem:[%s24004_s30 + $0x788] sm:$0xf0]  ;;  %v12712_v41 = vor.u32 %v16110_v32, %v12711_v31 }
  0x3f   :  { %2370 = vmatpush.bf16.msrb.mxu1 %v12796_v61  ;;  %v11817_v38 = vld [vmem:[%s24004_s30 + $0x284] sm:$0xf0]  ;;  %v11596_v42 = vor.u32 %v15827_v33, %v11593_v34  ;;  %v12683_v43 = vld [vmem:[%s24004_s30 + $0x930] sm:$0xf]  ;;  %v16103_v44 = vld [vmem:[%s24004_s30 + $0x948] sm:$0xf0]  ;;  %v12460_v49 = vor.u32 %v16047_v40, %v12459_v39 }
  0x40   :  { %2408 = vmatpush.bf16.msra.mxu2 %v11932_v57  ;;  %v101_v45 = vld [vmem:[%s24005_s24 + $0x8] sm:$0x3f]  ;;  %v15820_v46 = vld [vmem:[%s24004_s30 + $0x74] sm:$0xf]  ;;  %v11565_v47 = vld [vmem:[%s24004_s30 + $0x8c] sm:$0xf0]  ;;  %v11820_v48 = vor.u32 %v15883_v35, %v11817_v38  ;;  %v12684_v52 = vor.u32 %v16103_v44, %v12683_v43 }
  0x41   :  { %2396 = vmatpush.bf16.msrb.mxu3 %v11680_v62  ;;  %106 = vst [vmem:[#allocation1 + $0x20] ss:$4 sm:$0xff] %v101_v45  ;;  %v15876_v50 = vld [vmem:[%s24004_s30 + $0x234] sm:$0xf]  ;;  %v11789_v51 = vld [vmem:[%s24004_s30 + $0x24c] sm:$0xf0]  ;;  %v11568_v53 = vor.u32 %v15820_v46, %v11565_v47 }
  0x42   :  { %2358 = vmatpush.bf16.msrb.mxu0 %v12544_v10  ;;  %v12431_v54 = vld [vmem:[%s24004_s30 + $0x738] sm:$0xf]  ;;  %v16040_v55 = vld [vmem:[%s24004_s30 + $0x750] sm:$0xf0]  ;;  %v15813_v59 = vld [vmem:[%s24004_s30 + $0x3c] sm:$0xf]  ;;  %v11792_v3 = vor.u32 %v15876_v50, %v11789_v51 }
  0x43   :  { %2371 = vmatpush.bf16.msrb.mxu1 %v12768_v13  ;;  %v12655_v57 = vld [vmem:[%s24004_s30 + $0x8f8] sm:$0xf]  ;;  %v16096_v58 = vld [vmem:[%s24004_s30 + $0x910] sm:$0xf0]  ;;  %v15869_v62 = vld [vmem:[%s24004_s30 + $0x1fc] sm:$0xf]  ;;  %v12432_v4 = vor.u32 %v16040_v55, %v12431_v54 }
  0x44   :  { %2409 = vmatpush.bf16.msra.mxu2 %v11904_v9  ;;  %v11537_v60 = vld [vmem:[%s24004_s30 + $0x54] sm:$0xf0]  ;;  %v17460_v61 = vld [vmem:[%s24006_s10 + $0x10] sm:$0xff]  ;;  %v12403_v0 = vld [vmem:[%s24004_s30 + $0x700] sm:$0xf]  ;;  %v12656_v10 = vor.u32 %v16096_v58, %v12655_v57  ;;  %s24011_s24 = sld [smem:[#allocation42_spill]] }
  0x45   :  { %2397 = vmatpush.bf16.msrb.mxu3 %v11652_v14  ;;  %24009 = vst [vmem:[#allocation7_spill] sm:$0xff] %v17460_v61  ;;  %v11761_v63 = vld [vmem:[%s24004_s30 + $0x214] sm:$0xf0]  ;;  %v16033_v1 = vld [vmem:[%s24004_s30 + $0x718] sm:$0xf0]  ;;  %v11540_v11 = vor.u32 %v15813_v59, %v11537_v60 }
  0x46   :  { %2359 = vmatpush.bf16.msrb.mxu0 %v12516_v23  ;;  %v12627_v6 = vld [vmem:[%s24004_s30 + $0x8c0] sm:$0xf]  ;;  %v16089_v7 = vld [vmem:[%s24004_s30 + $0x8d8] sm:$0xf0]  ;;  %v15806_v8 = vld [vmem:[%s24004_s30 + $0x4] sm:$0xf]  ;;  %v12404_v23 = vor.u32 %v16033_v1, %v12403_v0 }
  0x47   :  { %2372 = vmatpush.bf16.msrb.mxu1 %v12740_v27  ;;  %v11509_v9 = vld [vmem:[%s24004_s30 + $0x1c] sm:$0xf0]  ;;  %v15967_v13 = vld [vmem:[%s24004_s30 + $0x50c] sm:$0xf]  ;;  %v12153_v14 = vld [vmem:[%s24004_s30 + $0x524] sm:$0xf0]  ;;  %v12628_v27 = vor.u32 %v16089_v7, %v12627_v6 }
  0x48   :  { %2410 = vmatpush.bf16.msra.mxu2 %v11876_v22  ;;  %v113_v12 = vld.sshfl [vmem:[#allocation1 + $0x30] sm:$0xff pattern:$0x73625140]  ;;  %v111_v18 = vld.sshfl [vmem:[#allocation1 + $0x20] sm:$0xff pattern:$0x73625140]  ;;  %v11764_v22 = vor.u32 %v15869_v62, %v11761_v63  ;;  %v12156_v31 = vor.u32 %v15967_v13, %v12153_v14 }
  0x49   :  { %2398 = vmatpush.bf16.msrb.mxu3 %v11624_v28  ;;  %v17492_v15 = vpack.c.bf16 %v113_v12, %v113_v12  ;;  %v112_v19 = vld.sshfl [vmem:[#allocation1 + $0x28] sm:$0xff pattern:$0x73625140]  ;;  %v11512_v28 = vor.u32 %v15806_v8, %v11509_v9  ;;  %v15862_v29 = vld [vmem:[%s24004_s30 + $0x1c4] sm:$0xf] }
  0x4a   :  { %2360 = vmatpush.bf16.msrb.mxu0 %v12488_v37  ;;  %v16023_v20 = vld [vmem:[%s24004_s30 + $0x6cc] sm:$0xf]  ;;  %v12377_v21 = vld [vmem:[%s24004_s30 + $0x6e4] sm:$0xf0]  ;;  %3465 = vst [vmem:[#allocation1 + $0x20] ss:$2 sm:$0xff] %v17460_v61  ;;  %v17524_v37 = vpack.c.bf16 %v111_v18, %v111_v18 }
  0x4b   :  { %2373 = vmatpush.bf16.msrb.mxu1 %v12712_v41  ;;  %v16079_v24 = vld [vmem:[%s24004_s30 + $0x88c] sm:$0xf]  ;;  %v12601_v25 = vld [vmem:[%s24004_s30 + $0x8a4] sm:$0xf0]  ;;  %v11733_v30 = vld [vmem:[%s24004_s30 + $0x1dc] sm:$0xf0]  ;;  %12877 = vmatmul.msk.bf16.vlgmr.msrb.gmra.mxu2 %vm2300_vm0, %v17492_v15  ;;  %v12380_v32 = vor.u32 %v16023_v20, %v12377_v21 }
  0x4c   :  { %2411 = vmatpush.bf16.msra.mxu2 %v11848_v36  ;;  %v16135_v33 = vld [vmem:[%s24004_s30 + $0xa4c] sm:$0xf]  ;;  %v12825_v34 = vld [vmem:[%s24004_s30 + $0xa64] sm:$0xf0]  ;;  %v15960_v35 = vld [vmem:[%s24004_s30 + $0x4d4] sm:$0xf]  ;;  %v12604_v36 = vor.u32 %v16079_v24, %v12601_v25  ;;  %v11736_v41 = vor.u32 %v15862_v29, %v11733_v30 }
  0x4d   :  { %2399 = vmatpush.bf16.msrb.mxu3 %v11596_v42  ;;  %v12125_v38 = vld [vmem:[%s24004_s30 + $0x4ec] sm:$0xf0]  ;;  %v16016_v39 = vld [vmem:[%s24004_s30 + $0x694] sm:$0xf]  ;;  %v17535_v42 = vpack.c.bf16 %v112_v19, %v112_v19  ;;  %v12828_v45 = vor.u32 %v16135_v33, %v12825_v34  ;;  %v15953_v50 = vld [vmem:[%s24004_s30 + $0x49c] sm:$0xf] }
  0x4e   :  { %2361 = vmatpush.bf16.msrb.mxu0 %v12460_v49  ;;  %v12349_v40 = vld [vmem:[%s24004_s30 + $0x6ac] sm:$0xf0]  ;;  %v16072_v43 = vld [vmem:[%s24004_s30 + $0x854] sm:$0xf]  ;;  %v12128_v46 = vor.u32 %v15960_v35, %v12125_v38  ;;  %v12321_v54 = vld [vmem:[%s24004_s30 + $0x674] sm:$0xf0] }
  0x4f   :  { %2374 = vmatpush.bf16.msrb.mxu1 %v12684_v52  ;;  %v12573_v44 = vld [vmem:[%s24004_s30 + $0x86c] sm:$0xf0]  ;;  %v12352_v47 = vor.u32 %v16016_v39, %v12349_v40  ;;  %v12097_v52 = vld [vmem:[%s24004_s30 + $0x4b4] sm:$0xf0]  ;;  %v16065_v55 = vld [vmem:[%s24004_s30 + $0x81c] sm:$0xf] }
  0x50   :  { %2412 = vmatpush.bf16.msra.mxu2 %v11820_v48  ;;  %v16128_v48 = vld [vmem:[%s24004_s30 + $0xa14] sm:$0xf]  ;;  %v12797_v49 = vld [vmem:[%s24004_s30 + $0xa2c] sm:$0xf0]  ;;  %v12576_v51 = vor.u32 %v16072_v43, %v12573_v44  ;;  %v12545_v57 = vld [vmem:[%s24004_s30 + $0x834] sm:$0xf0]  ;;  %v12100_v59 = vor.u32 %v15953_v50, %v12097_v52 }
  0x51   :  { %2400 = vmatpush.bf16.msrb.mxu3 %v11568_v53  ;;  %v16009_v53 = vld [vmem:[%s24004_s30 + $0x65c] sm:$0xf]  ;;  %v12800_v58 = vor.u32 %v16128_v48, %v12797_v49  ;;  %v12769_v63 = vld [vmem:[%s24004_s30 + $0x9f4] sm:$0xf0]  ;;  %v15946_v0 = vld [vmem:[%s24004_s30 + $0x464] sm:$0xf]  ;;  %v12548_v1 = vor.u32 %v16065_v55, %v12545_v57 }
  0x52   :  { %2362 = vmatpush.bf16.msrb.mxu0 %v12432_v4  ;;  %v12324_v60 = vor.u32 %v16009_v53, %v12321_v54  ;;  %v16121_v62 = vld [vmem:[%s24004_s30 + $0x9dc] sm:$0xf]  ;;  %v16002_v4 = vld [vmem:[%s24004_s30 + $0x624] sm:$0xf]  ;;  %v12293_v6 = vld [vmem:[%s24004_s30 + $0x63c] sm:$0xf0] }
  0x53   :  { %2375 = vmatpush.bf16.msrb.mxu1 %v12656_v10  ;;  %v16058_v7 = vld [vmem:[%s24004_s30 + $0x7e4] sm:$0xf]  ;;  %v12517_v8 = vld [vmem:[%s24004_s30 + $0x7fc] sm:$0xf0]  ;;  %v12772_v9 = vor.u32 %v16121_v62, %v12769_v63  ;;  %v15939_v14 = vld [vmem:[%s24004_s30 + $0x42c] sm:$0xf] }
  0x54   :  { %2413 = vmatpush.bf16.msra.mxu2 %v11792_v3  ;;  %v12069_v3 = vld [vmem:[%s24004_s30 + $0x47c] sm:$0xf0]  ;;  %v16114_v12 = vld [vmem:[%s24004_s30 + $0x9a4] sm:$0xf]  ;;  %v12520_v18 = vor.u32 %v16058_v7, %v12517_v8  ;;  %v12041_v19 = vld [vmem:[%s24004_s30 + $0x444] sm:$0xf0] }
  0x55   :  { %2401 = vmatpush.bf16.msrb.mxu3 %v11540_v11  ;;  %v12072_v10 = vor.u32 %v15946_v0, %v12069_v3  ;;  %v12296_v11 = vor.u32 %v16002_v4, %v12293_v6  ;;  %v12741_v13 = vld [vmem:[%s24004_s30 + $0x9bc] sm:$0xf0]  ;;  %v15995_v20 = vld [vmem:[%s24004_s30 + $0x5ec] sm:$0xf]  ;;  %v12265_v21 = vld [vmem:[%s24004_s30 + $0x604] sm:$0xf0]  ;;  %v12044_v25 = vor.u32 %v15939_v14, %v12041_v19 }
  0x56   :  { %2363 = vmatpush.bf16.msrb.mxu0 %v12404_v23  ;;  %v12489_v23 = vld [vmem:[%s24004_s30 + $0x7c4] sm:$0xf0]  ;;  %v12744_v24 = vor.u32 %v16114_v12, %v12741_v13  ;;  %v15932_v30 = vld [vmem:[%s24004_s30 + $0x3f4] sm:$0xf]  ;;  %v12237_v34 = vld [vmem:[%s24004_s30 + $0x5cc] sm:$0xf0] }
  0x57   :  { %2376 = vmatpush.bf16.msrb.mxu1 %v12628_v27  ;;  %v12268_v27 = vor.u32 %v15995_v20, %v12265_v21  ;;  %v12713_v29 = vld [vmem:[%s24004_s30 + $0x984] sm:$0xf0]  ;;  %v15988_v33 = vld [vmem:[%s24004_s30 + $0x5b4] sm:$0xf]  ;;  %v12685_v43 = vld [vmem:[%s24004_s30 + $0x94c] sm:$0xf0] }
  0x58   :  { %2414 = vmatpush.bf16.msra.mxu2 %v11764_v22  ;;  %v16051_v22 = vld [vmem:[%s24004_s30 + $0x7ac] sm:$0xf]  ;;  %v16044_v35 = vld [vmem:[%s24004_s30 + $0x774] sm:$0xf]  ;;  %v12240_v40 = vor.u32 %v15988_v33, %v12237_v34  ;;  %v15925_v44 = vld [vmem:[%s24004_s30 + $0x3bc] sm:$0xf] }
  0x59   :  { %2402 = vmatpush.bf16.msrb.mxu3 %v11512_v28  ;;  %2364 = vmatmul.bf16.vlgmr.msrb.gmra.mxu0 %v17524_v37  ;;  %v16107_v28 = vld [vmem:[%s24004_s30 + $0x96c] sm:$0xf]  ;;  %v12209_v48 = vld [vmem:[%s24004_s30 + $0x594] sm:$0xf0]  ;;  %v16037_v49 = vld [vmem:[%s24004_s30 + $0x73c] sm:$0xf] }
  0x5a   :  { %2421 = vmatpush.bf16.msra.mxu0 %v12156_v31  ;;  %2377 = vmatmul.bf16.vlgmr.msrb.gmra.mxu1 %v17535_v42  ;;  %v12492_v31 = vor.u32 %v16051_v22, %v12489_v23  ;;  %v12716_v38 = vor.u32 %v16107_v28, %v12713_v29  ;;  %v12433_v50 = vld [vmem:[%s24004_s30 + $0x754] sm:$0xf0]  ;;  %v16093_v52 = vld [vmem:[%s24004_s30 + $0x8fc] sm:$0xf]  ;;  %v15918_v57 = vld [vmem:[%s24004_s30 + $0x384] sm:$0xf] }
  0x5b   :  { %2434 = vmatpush.bf16.msra.mxu1 %v12380_v32  ;;  %v12013_v32 = vld [vmem:[%s24004_s30 + $0x40c] sm:$0xf0]  ;;  %v12657_v53 = vld [vmem:[%s24004_s30 + $0x914] sm:$0xf0]  ;;  %v12181_v62 = vld [vmem:[%s24004_s30 + $0x55c] sm:$0xf0] }
  0x5c   :  { %2415 = vmatpush.bf16.msra.mxu2 %v11736_v41  ;;  %2403 = vmatmul.bf16.vlgmr.msrb.gmra.mxu3 %v17330_v2  ;;  %v12016_v39 = vor.u32 %v15932_v30, %v12013_v32  ;;  %v16100_v41 = vld [vmem:[%s24004_s30 + $0x934] sm:$0xf]  ;;  %v16030_v63 = vld [vmem:[%s24004_s30 + $0x704] sm:$0xf]  ;;  %v12405_v0 = vld [vmem:[%s24004_s30 + $0x71c] sm:$0xf0]  ;;  %v12660_v6 = vor.u32 %v16093_v52, %v12657_v53 }
  0x5d   :  { %2447 = vmatpush.bf16.msra.mxu3 %v12604_v36  ;;  %v12461_v36 = vld [vmem:[%s24004_s30 + $0x78c] sm:$0xf0]  ;;  %v15859_v3 = vld [vmem:[%s24004_s30 + $0x1a8] sm:$0xf0]  ;;  %v16142_v8 = vld [vmem:[%s24004_s30 + $0xa84] sm:$0xf] }
  0x5e   :  { %2422 = vmatpush.bf16.msra.mxu0 %v12128_v46  ;;  %v11985_v46 = vld [vmem:[%s24004_s30 + $0x3d4] sm:$0xf0]  ;;  %v11935_v4 = vld [vmem:[%s24004_s30 + $0x350] sm:$0xf]  ;;  %v15915_v7 = vld [vmem:[%s24004_s30 + $0x368] sm:$0xf0] }
  0x5f   :  { %2435 = vmatpush.bf16.msra.mxu1 %v12352_v47  ;;  %2416 = vmatmul.bf16.vlgmr.msra.gmra.mxu2 %v17360_v16  ;;  %v15981_v47 = vld [vmem:[%s24004_s30 + $0x57c] sm:$0xf]  ;;  %v11988_v54 = vor.u32 %v15925_v44, %v11985_v46  ;;  %v16086_v12 = vld [vmem:[%s24004_s30 + $0x8c4] sm:$0xf]  ;;  %v12629_v13 = vld [vmem:[%s24004_s30 + $0x8dc] sm:$0xf0]  ;;  %v11936_v23 = vor.u32 %v15915_v7, %v11935_v4 }
  0x60   :  { %2460 = vmatpush.bf16.msrb.mxu2 %v12828_v45  ;;  %v12464_v45 = vor.u32 %v16044_v35, %v12461_v36  ;;  %v12212_v55 = vor.u32 %v15981_v47, %v12209_v48  ;;  %v12159_v14 = vld [vmem:[%s24004_s30 + $0x510] sm:$0xf]  ;;  %v15971_v20 = vld [vmem:[%s24004_s30 + $0x528] sm:$0xf0]  ;;  %v12632_v28 = vor.u32 %v16086_v12, %v12629_v13  ;;  %v11907_v29 = vld [vmem:[%s24004_s30 + $0x318] sm:$0xf] }
  0x61   :  { %2448 = vmatpush.bf16.msra.mxu3 %v12576_v51  ;;  %v12688_v51 = vor.u32 %v16100_v41, %v12685_v43  ;;  %v12383_v21 = vld [vmem:[%s24004_s30 + $0x6d0] sm:$0xf]  ;;  %v16027_v22 = vld [vmem:[%s24004_s30 + $0x6e8] sm:$0xf0]  ;;  %v15908_v30 = vld [vmem:[%s24004_s30 + $0x330] sm:$0xf0] }
  0x62   :  { %2423 = vmatpush.bf16.msra.mxu0 %v12100_v59  ;;  %v15974_v59 = vld [vmem:[%s24004_s30 + $0x544] sm:$0xf]  ;;  %v12384_v32 = vor.u32 %v16027_v22, %v12383_v21  ;;  %v12131_v33 = vld [vmem:[%s24004_s30 + $0x4d8] sm:$0xf]  ;;  %v15964_v35 = vld [vmem:[%s24004_s30 + $0x4f0] sm:$0xf0] }
  0x63   :  { %2436 = vmatpush.bf16.msra.mxu1 %v12324_v60  ;;  %v12436_v60 = vor.u32 %v16037_v49, %v12433_v50  ;;  %v12355_v36 = vld [vmem:[%s24004_s30 + $0x698] sm:$0xf]  ;;  %v15845_v41 = vld [vmem:[%s24004_s30 + $0x138] sm:$0xf0]  ;;  %v11879_v43 = vld [vmem:[%s24004_s30 + $0x2e0] sm:$0xf] }
  0x64   :  { %2461 = vmatpush.bf16.msrb.mxu2 %v12800_v58  ;;  %v11957_v58 = vld [vmem:[%s24004_s30 + $0x39c] sm:$0xf0]  ;;  %v15901_v44 = vld [vmem:[%s24004_s30 + $0x2f8] sm:$0xf0]  ;;  %v11627_v53 = vld [vmem:[%s24004_s30 + $0xe8] sm:$0xf] }
  0x65   :  { %2449 = vmatpush.bf16.msra.mxu3 %v12548_v1  ;;  %v11711_v1 = vld [vmem:[%s24004_s30 + $0x190] sm:$0xf]  ;;  %v12103_v47 = vld [vmem:[%s24004_s30 + $0x4a0] sm:$0xf]  ;;  %v15957_v49 = vld [vmem:[%s24004_s30 + $0x4b8] sm:$0xf0]  ;;  %v11880_v52 = vor.u32 %v15901_v44, %v11879_v43 }
  0x66   :  { %2424 = vmatpush.bf16.msra.mxu0 %v12072_v10  ;;  %v11960_v10 = vor.u32 %v15918_v57, %v11957_v58  ;;  %v11712_v19 = vor.u32 %v15859_v3, %v11711_v1  ;;  %v12327_v50 = vld [vmem:[%s24004_s30 + $0x660] sm:$0xf]  ;;  %v15894_v57 = vld [vmem:[%s24004_s30 + $0x2c0] sm:$0xf0]  ;;  %v12104_v58 = vor.u32 %v15957_v49, %v12103_v47  ;;  %v11599_v4 = vld [vmem:[%s24004_s30 + $0xb0] sm:$0xf] }
  0x67   :  { %2437 = vmatpush.bf16.msra.mxu1 %v12296_v11  ;;  %v12184_v11 = vor.u32 %v15974_v59, %v12181_v62  ;;  %v16006_v1 = vld [vmem:[%s24004_s30 + $0x640] sm:$0xf0]  ;;  %v11823_v7 = vld [vmem:[%s24004_s30 + $0x270] sm:$0xf]  ;;  %v15943_v13 = vld [vmem:[%s24004_s30 + $0x448] sm:$0xf0] }
  0x68   :  { %2462 = vmatpush.bf16.msrb.mxu2 %v12772_v9  ;;  %v12853_v9 = vld [vmem:[%s24004_s30 + $0xa9c] sm:$0xf0]  ;;  %v15824_v21 = vld [vmem:[%s24004_s30 + $0x90] sm:$0xf0]  ;;  %v11795_v22 = vld [vmem:[%s24004_s30 + $0x238] sm:$0xf] }
  0x69   :  { %2450 = vmatpush.bf16.msra.mxu3 %v12520_v18  ;;  %v12408_v18 = vor.u32 %v16030_v63, %v12405_v0  ;;  %v15950_v63 = vld [vmem:[%s24004_s30 + $0x480] sm:$0xf0]  ;;  %v12299_v0 = vld [vmem:[%s24004_s30 + $0x628] sm:$0xf]  ;;  %v12215_v44 = vld [vmem:[%s24004_s30 + $0x580] sm:$0xf] }
  0x6a   :  { %2425 = vmatpush.bf16.msra.mxu0 %v12044_v25  ;;  %v11683_v25 = vld [vmem:[%s24004_s30 + $0x158] sm:$0xf]  ;;  %v11739_v49 = vld [vmem:[%s24004_s30 + $0x1c8] sm:$0xf] }
  0x6b   :  { %2438 = vmatpush.bf16.msra.mxu1 %v12268_v27  ;;  %v15852_v27 = vld [vmem:[%s24004_s30 + $0x170] sm:$0xf0]  ;;  %v19620_v5 = vld [vmem:[%s24011_s24 + $0x138] sm:$0xff] }
  0x6c   :  { %2463 = vmatpush.bf16.msrb.mxu2 %v12744_v24  ;;  %v12856_v24 = vor.u32 %v16142_v8, %v12853_v9  ;;  %v11684_v34 = vor.u32 %v15852_v27, %v11683_v25  ;;  %v15887_v8 = vld [vmem:[%s24004_s30 + $0x288] sm:$0xf0]  ;;  %v12019_v27 = vld [vmem:[%s24004_s30 + $0x3f8] sm:$0xf] }
  0x6d   :  { %2451 = vmatpush.bf16.msra.mxu3 %v12492_v31  ;;  %v12160_v31 = vor.u32 %v15971_v20, %v12159_v14  ;;  %v12271_v14 = vld [vmem:[%s24004_s30 + $0x5f0] sm:$0xf]  ;;  %v11571_v20 = vld [vmem:[%s24004_s30 + $0x78] sm:$0xf] }
  0x6e   :  { %2426 = vmatpush.bf16.msra.mxu0 %v12016_v39  ;;  %v11908_v39 = vor.u32 %v15908_v30, %v11907_v29  ;;  %v15936_v29 = vld [vmem:[%s24004_s30 + $0x410] sm:$0xf0]  ;;  %v12243_v30 = vld [vmem:[%s24004_s30 + $0x5b8] sm:$0xf] }
  0x6f   :  { %2439 = vmatpush.bf16.msra.mxu1 %v12240_v40  ;;  %v11655_v40 = vld [vmem:[%s24004_s30 + $0x120] sm:$0xf] }
  0x70   :  { %2464 = vmatpush.bf16.msrb.mxu2 %v12716_v38  ;;  %v16020_v38 = vld [vmem:[%s24004_s30 + $0x6b0] sm:$0xf0]  ;;  %v11656_v48 = vor.u32 %v15845_v41, %v11655_v40  ;;  %v11991_v40 = vld [vmem:[%s24004_s30 + $0x3c0] sm:$0xf]  ;;  %v15929_v41 = vld [vmem:[%s24004_s30 + $0x3d8] sm:$0xf0] }
  0x71   :  { %2452 = vmatpush.bf16.msra.mxu3 %v12464_v45  ;;  %v12132_v45 = vor.u32 %v15964_v35, %v12131_v33  ;;  %v12356_v46 = vor.u32 %v16020_v38, %v12355_v36  ;;  %v11543_v33 = vld [vmem:[%s24004_s30 + $0x40] sm:$0xf]  ;;  %v15873_v36 = vld [vmem:[%s24004_s30 + $0x218] sm:$0xf0]  ;;  %v12020_v38 = vor.u32 %v15936_v29, %v12019_v27 }
  0x72   :  { %2427 = vmatpush.bf16.msra.mxu0 %v11988_v54  ;;  %v15838_v54 = vld [vmem:[%s24004_s30 + $0x100] sm:$0xf0]  ;;  %v11767_v35 = vld [vmem:[%s24004_s30 + $0x200] sm:$0xf] }
  0x73   :  { %2440 = vmatpush.bf16.msra.mxu1 %v12212_v55  ;;  %v11851_v55 = vld [vmem:[%s24004_s30 + $0x2a8] sm:$0xf]  ;;  %v11628_v62 = vor.u32 %v15838_v54, %v11627_v53  ;;  %v11768_v47 = vor.u32 %v15873_v36, %v11767_v35  ;;  %v12831_v53 = vld [vmem:[%s24004_s30 + $0xa50] sm:$0xf]  ;;  %v11992_v54 = vor.u32 %v15929_v41, %v11991_v40  ;;  %v12551_v27 = vld [vmem:[%s24004_s30 + $0x820] sm:$0xf] }
  0x74   :  { %2465 = vmatpush.bf16.msrb.mxu2 %v12688_v51  ;;  %v16013_v51 = vld [vmem:[%s24004_s30 + $0x678] sm:$0xf0]  ;;  %v11852_v3 = vor.u32 %v15894_v57, %v11851_v55  ;;  %v16139_v57 = vld [vmem:[%s24004_s30 + $0xa68] sm:$0xf0]  ;;  %v15842_v36 = vld [vmem:[%s24004_s30 + $0x124] sm:$0xf] }
  0x75   :  { %2453 = vmatpush.bf16.msra.mxu3 %v12436_v60  ;;  %v12328_v59 = vor.u32 %v16013_v51, %v12327_v50  ;;  %v12075_v60 = vld [vmem:[%s24004_s30 + $0x468] sm:$0xf]  ;;  %v15866_v50 = vld [vmem:[%s24004_s30 + $0x1e0] sm:$0xf0]  ;;  %v12607_v51 = vld [vmem:[%s24004_s30 + $0x890] sm:$0xf] }
  0x76   :  { %2428 = vmatpush.bf16.msra.mxu0 %v11960_v10  ;;  %v12076_v9 = vor.u32 %v15950_v63, %v12075_v60  ;;  %v12300_v10 = vor.u32 %v16006_v1, %v12299_v0  ;;  %v15978_v63 = vld [vmem:[%s24004_s30 + $0x560] sm:$0xf0]  ;;  %v15856_v0 = vld [vmem:[%s24004_s30 + $0x194] sm:$0xf]  ;;  %v11740_v1 = vor.u32 %v15866_v50, %v11739_v49  ;;  %v12523_v40 = vld [vmem:[%s24004_s30 + $0x7e8] sm:$0xf] }
  0x77   :  { %2441 = vmatpush.bf16.msra.mxu1 %v12184_v11  ;;  %v12047_v11 = vld [vmem:[%s24004_s30 + $0x430] sm:$0xf]  ;;  %v16062_v41 = vld [vmem:[%s24004_s30 + $0x800] sm:$0xf0]  ;;  %v15835_v50 = vld [vmem:[%s24004_s30 + $0xec] sm:$0xf] }
  0x78   :  { %2466 = vmatpush.bf16.msrb.mxu2 %v12660_v6  ;;  %v15831_v6 = vld [vmem:[%s24004_s30 + $0xc8] sm:$0xf0]  ;;  %v12524_v49 = vor.u32 %v16062_v41, %v12523_v40  ;;  %v12161_v40 = vld [vmem:[%s24004_s30 + $0x52c] sm:$0xf0]  ;;  %v16024_v41 = vld [vmem:[%s24004_s30 + $0x6d4] sm:$0xf] }
  0x79   :  { %2454 = vmatpush.bf16.msra.mxu3 %v12408_v18  ;;  %2429 = vmatmul.bf16.vlgmr.msra.gmra.mxu0 %v17316_v56  ;;  %v11600_v12 = vor.u32 %v15831_v6, %v11599_v4  ;;  %v15999_v18 = vld [vmem:[%s24004_s30 + $0x608] sm:$0xf0]  ;;  %v11713_v4 = vld [vmem:[%s24004_s30 + $0x1ac] sm:$0xf0]  ;;  %v12859_v6 = vld [vmem:[%s24004_s30 + $0xa88] sm:$0xf] }
  0x7a   :  { %2480 = vmatpush.bf16.msrb.mxu0 %v12856_v24  ;;  %2442 = vmatmul.bf16.vlgmr.msra.gmra.mxu1 %v17384_v26  ;;  %v12048_v24 = vor.u32 %v15943_v13, %v12047_v11  ;;  %v12272_v25 = vor.u32 %v15999_v18, %v12271_v14  ;;  %v12803_v13 = vld [vmem:[%s24004_s30 + $0xa18] sm:$0xf]  ;;  %v16132_v14 = vld [vmem:[%s24004_s30 + $0xa30] sm:$0xf0]  ;;  %v11716_v18 = vor.u32 %v15856_v0, %v11713_v4 }
  0x7b   :  { %2486 = vmatpush.bf16.msrb.mxu1 %v11712_v19  ;;  %v11824_v19 = vor.u32 %v15887_v8, %v11823_v7  ;;  %v16146_v7 = vld [vmem:[%s24004_s30 + $0xaa0] sm:$0xf0]  ;;  %v12832_v8 = vor.u32 %v16139_v57, %v12831_v53  ;;  %v12495_v53 = vld [vmem:[%s24004_s30 + $0x7b0] sm:$0xf]  ;;  %v15828_v0 = vld [vmem:[%s24004_s30 + $0xb4] sm:$0xf] }
  0x7c   :  { %2467 = vmatpush.bf16.msrb.mxu2 %v12632_v28  ;;  %2455 = vmatmul.bf16.vlgmr.msra.gmra.mxu3 %v17524_v37  ;;  %v11572_v28 = vor.u32 %v15824_v21, %v11571_v20  ;;  %v15912_v20 = vld [vmem:[%s24004_s30 + $0x354] sm:$0xf]  ;;  %v11937_v21 = vld [vmem:[%s24004_s30 + $0x36c] sm:$0xf0]  ;;  %v12467_v4 = vld [vmem:[%s24004_s30 + $0x778] sm:$0xf] }
  0x7d   :  { %2499 = vmatpush.bf16.msrb.mxu3 %v11936_v23  ;;  %v15880_v23 = vld [vmem:[%s24004_s30 + $0x250] sm:$0xf0]  ;;  %v11940_v29 = vor.u32 %v15912_v20, %v11937_v21  ;;  %v12719_v57 = vld [vmem:[%s24004_s30 + $0x970] sm:$0xf]  ;;  %v12439_v20 = vld [vmem:[%s24004_s30 + $0x740] sm:$0xf] }
  0x7e   :  { %2512 = vmatpush.bf16.msra.mxu0 %v12160_v31  ;;  %v15992_v31 = vld [vmem:[%s24004_s30 + $0x5d0] sm:$0xf0]  ;;  %v16041_v21 = vld [vmem:[%s24004_s30 + $0x758] sm:$0xf0] }
  0x7f   :  { %2487 = vmatpush.bf16.msrb.mxu1 %v11684_v34  ;;  %2468 = vmatmul.bf16.vlgmr.msrb.gmra.mxu2 %v17535_v42  ;;  %v15817_v34 = vld [vmem:[%s24004_s30 + $0x58] sm:$0xf0] }
  0x80   :  { %2525 = vmatpush.bf16.msra.mxu2 %v12384_v32  ;;  %v11796_v32 = vor.u32 %v15880_v23, %v11795_v22  ;;  %v11544_v43 = vor.u32 %v15817_v34, %v11543_v33  ;;  %v15849_v23 = vld [vmem:[%s24004_s30 + $0x15c] sm:$0xf]  ;;  %v11909_v34 = vld [vmem:[%s24004_s30 + $0x334] sm:$0xf0] }
  0x81   :  { %2500 = vmatpush.bf16.msrb.mxu3 %v11908_v39  ;;  %v12244_v39 = vor.u32 %v15992_v31, %v12243_v30  ;;  %v12775_v30 = vld [vmem:[%s24004_s30 + $0x9e0] sm:$0xf]  ;;  %v16125_v31 = vld [vmem:[%s24004_s30 + $0x9f8] sm:$0xf0] }
  0x82   :  { %2513 = vmatpush.bf16.msra.mxu0 %v12132_v45  ;;  %v15985_v45 = vld [vmem:[%s24004_s30 + $0x598] sm:$0xf0] }
  0x83   :  { %2488 = vmatpush.bf16.msrb.mxu1 %v11656_v48  ;;  %v15810_v48 = vld [vmem:[%s24004_s30 + $0x20] sm:$0xf0]  ;;  %v12216_v55 = vor.u32 %v15985_v45, %v12215_v44  ;;  %v15905_v33 = vld [vmem:[%s24004_s30 + $0x31c] sm:$0xf]  ;;  %v12747_v44 = vld [vmem:[%s24004_s30 + $0x9a8] sm:$0xf] }
  0x84   :  { %2526 = vmatpush.bf16.msra.mxu2 %v12356_v46  ;;  %v11515_v46 = vld [vmem:[%s24004_s30 + $0x8] sm:$0xf]  ;;  %v16118_v45 = vld [vmem:[%s24004_s30 + $0x9c0] sm:$0xf0] }
  0x85   :  { %2501 = vmatpush.bf16.msrb.mxu3 %v11880_v52  ;;  %v16083_v52 = vld [vmem:[%s24004_s30 + $0x8a8] sm:$0xf0]  ;;  %v11516_v60 = vor.u32 %v15810_v48, %v11515_v46  ;;  %v11881_v48 = vld [vmem:[%s24004_s30 + $0x2fc] sm:$0xf0] }
  0x86   :  { %2514 = vmatpush.bf16.msra.mxu0 %v12104_v58  ;;  %v11963_v58 = vld [vmem:[%s24004_s30 + $0x388] sm:$0xf] }
  0x87   :  { %2489 = vmatpush.bf16.msrb.mxu1 %v11628_v62  ;;  %v12187_v62 = vld [vmem:[%s24004_s30 + $0x548] sm:$0xf] }
  0x88   :  { %2527 = vmatpush.bf16.msra.mxu2 %v12328_v59  ;;  %v15922_v59 = vld [vmem:[%s24004_s30 + $0x3a0] sm:$0xf0] }
  0x89   :  { %2502 = vmatpush.bf16.msrb.mxu3 %v11852_v3  ;;  %12878 = vmatmul.msk.bf16.vlgmr.msrb.gmra.mxu0 %vm2300_vm0, %v17492_v15  ;;  %v12608_v3 = vor.u32 %v16083_v52, %v12607_v51  ;;  %v11964_v11 = vor.u32 %v15922_v59, %v11963_v58  ;;  %v11629_v51 = vld [vmem:[%s24004_s30 + $0x104] sm:$0xf0]  ;;  %v12748_v52 = vor.u32 %v16118_v45, %v12747_v44  ;;  %v16111_v58 = vld [vmem:[%s24004_s30 + $0x988] sm:$0xf0]  ;;  %v12385_v44 = vld [vmem:[%s24004_s30 + $0x6ec] sm:$0xf0] }
  0x8a   :  { %2515 = vmatpush.bf16.msra.mxu0 %v12076_v9  ;;  %v12579_v9 = vld [vmem:[%s24004_s30 + $0x858] sm:$0xf]  ;;  %v11632_v59 = vor.u32 %v15835_v50, %v11629_v51  ;;  %v15870_v45 = vld [vmem:[%s24004_s30 + $0x204] sm:$0xf] }
  0x8b   :  { %2490 = vmatpush.bf16.msrb.mxu1 %v11600_v12  ;;  %v12188_v12 = vor.u32 %v15978_v63, %v12187_v62  ;;  %v11853_v62 = vld [vmem:[%s24004_s30 + $0x2c4] sm:$0xf0] }
  0x8c   :  { %2528 = vmatpush.bf16.msra.mxu2 %v12300_v10  ;;  %v16076_v10 = vld [vmem:[%s24004_s30 + $0x870] sm:$0xf0] }
  0x8d   :  { %2503 = vmatpush.bf16.msrb.mxu3 %v11824_v19  ;;  %v12860_v19 = vor.u32 %v16146_v7, %v12859_v6  ;;  %v12580_v22 = vor.u32 %v16076_v10, %v12579_v9  ;;  %v16048_v6 = vld [vmem:[%s24004_s30 + $0x790] sm:$0xf0] }
  0x8e   :  { %2516 = vmatpush.bf16.msra.mxu0 %v12048_v24  ;;  %v11685_v24 = vld [vmem:[%s24004_s30 + $0x174] sm:$0xf0]  ;;  %v16104_v9 = vld [vmem:[%s24004_s30 + $0x950] sm:$0xf0] }
  0x8f   :  { %2491 = vmatpush.bf16.msrb.mxu1 %v11572_v28  ;;  %v16069_v28 = vld [vmem:[%s24004_s30 + $0x838] sm:$0xf0] }
  0x90   :  { %2529 = vmatpush.bf16.msra.mxu2 %v12272_v25  ;;  %v12804_v25 = vor.u32 %v16132_v14, %v12803_v13  ;;  %v12552_v35 = vor.u32 %v16069_v28, %v12551_v27  ;;  %v12468_v13 = vor.u32 %v16048_v6, %v12467_v4  ;;  %v15821_v14 = vld [vmem:[%s24004_s30 + $0x7c] sm:$0xf]  ;;  %v11797_v28 = vld [vmem:[%s24004_s30 + $0x254] sm:$0xf0]  ;;  %v12833_v4 = vld [vmem:[%s24004_s30 + $0xa6c] sm:$0xf0] }
  0x91   :  { %2504 = vmatpush.bf16.msrb.mxu3 %v11796_v32  ;;  %v11688_v32 = vor.u32 %v15849_v23, %v11685_v24  ;;  %v12663_v23 = vld [vmem:[%s24004_s30 + $0x900] sm:$0xf]  ;;  %v16097_v24 = vld [vmem:[%s24004_s30 + $0x918] sm:$0xf0] }
  0x92   :  { %2517 = vmatpush.bf16.msra.mxu0 %v12020_v38  ;;  %v11657_v38 = vld [vmem:[%s24004_s30 + $0x13c] sm:$0xf0]  ;;  %v15877_v27 = vld [vmem:[%s24004_s30 + $0x23c] sm:$0xf] }
  0x93   :  { %2492 = vmatpush.bf16.msrb.mxu1 %v11544_v43  ;;  %v11912_v43 = vor.u32 %v15905_v33, %v11909_v34  ;;  %v11660_v46 = vor.u32 %v15842_v36, %v11657_v38  ;;  %v12664_v33 = vor.u32 %v16097_v24, %v12663_v23  ;;  %v16034_v34 = vld [vmem:[%s24004_s30 + $0x720] sm:$0xf0]  ;;  %v11800_v38 = vor.u32 %v15877_v27, %v11797_v28  ;;  %v12553_v24 = vld [vmem:[%s24004_s30 + $0x83c] sm:$0xf0]  ;;  %v15947_v27 = vld [vmem:[%s24004_s30 + $0x46c] sm:$0xf] }
  0x94   :  { %2530 = vmatpush.bf16.msra.mxu2 %v12244_v39  ;;  %v12776_v39 = vor.u32 %v16125_v31, %v12775_v30  ;;  %v15814_v30 = vld [vmem:[%s24004_s30 + $0x44] sm:$0xf]  ;;  %v11545_v31 = vld [vmem:[%s24004_s30 + $0x5c] sm:$0xf0]  ;;  %v12077_v28 = vld [vmem:[%s24004_s30 + $0x484] sm:$0xf0] }
  0x95   :  { %2505 = vmatpush.bf16.msrb.mxu3 %v11768_v47  ;;  %v15898_v47 = vld [vmem:[%s24004_s30 + $0x2e4] sm:$0xf] }
  0x96   :  { %2518 = vmatpush.bf16.msra.mxu0 %v11992_v54  ;;  %v16055_v54 = vld [vmem:[%s24004_s30 + $0x7c8] sm:$0xf0]  ;;  %v16090_v36 = vld [vmem:[%s24004_s30 + $0x8e0] sm:$0xf0] }
  0x97   :  { %2493 = vmatpush.bf16.msrb.mxu1 %v11516_v60  ;;  %v15891_v60 = vld [vmem:[%s24004_s30 + $0x2ac] sm:$0xf]  ;;  %v12496_v63 = vor.u32 %v16055_v54, %v12495_v53  ;;  %v12609_v53 = vld [vmem:[%s24004_s30 + $0x8ac] sm:$0xf0]  ;;  %v12388_v54 = vor.u32 %v16024_v41, %v12385_v44  ;;  %v16066_v23 = vld [vmem:[%s24004_s30 + $0x824] sm:$0xf] }
  0x98   :  { %2531 = vmatpush.bf16.msra.mxu2 %v12216_v55  ;;  %v11884_v55 = vor.u32 %v15898_v47, %v11881_v48  ;;  %v11856_v7 = vor.u32 %v15891_v60, %v11853_v62  ;;  %v15807_v48 = vld [vmem:[%s24004_s30 + $0xc] sm:$0xf]  ;;  %v12357_v62 = vld [vmem:[%s24004_s30 + $0x6b4] sm:$0xf0]  ;;  %v12049_v41 = vld [vmem:[%s24004_s30 + $0x44c] sm:$0xf0] }
  0x99   :  { %2506 = vmatpush.bf16.msrb.mxu3 %v11740_v1  ;;  %v11601_v1 = vld [vmem:[%s24004_s30 + $0xcc] sm:$0xf0]  ;;  %v15996_v44 = vld [vmem:[%s24004_s30 + $0x5f4] sm:$0xf] }
  0x9a   :  { %2519 = vmatpush.bf16.msra.mxu0 %v11964_v11  ;;  %2494 = vmatmul.bf16.vlgmr.msrb.gmra.mxu1 %v17330_v2  ;;  %v11604_v10 = vor.u32 %v15828_v0, %v11601_v1  ;;  %v15884_v11 = vld [vmem:[%s24004_s30 + $0x274] sm:$0xf]  ;;  %v11741_v0 = vld [vmem:[%s24004_s30 + $0x1e4] sm:$0xf0] }
  0x9b   :  { %2538 = vmatpush.bf16.msra.mxu1 %v12608_v3  ;;  %v12720_v3 = vor.u32 %v16111_v58, %v12719_v57  ;;  %v15961_v57 = vld [vmem:[%s24004_s30 + $0x4dc] sm:$0xf]  ;;  %v12133_v58 = vld [vmem:[%s24004_s30 + $0x4f4] sm:$0xf0] }
  0x9c   :  { %2532 = vmatpush.bf16.msra.mxu2 %v12188_v12  ;;  %2507 = vmatmul.bf16.vlgmr.msrb.gmra.mxu3 %v17360_v16  ;;  %v11825_v12 = vld [vmem:[%s24004_s30 + $0x28c] sm:$0xf0]  ;;  %v12136_v6 = vor.u32 %v15961_v57, %v12133_v58  ;;  %v15989_v58 = vld [vmem:[%s24004_s30 + $0x5bc] sm:$0xf] }
  0x9d   :  { %2551 = vmatpush.bf16.msra.mxu3 %v12832_v8  ;;  %2520 = vmatmul.bf16.vlgmr.msra.gmra.mxu0 %v17316_v56  ;;  %v12691_v8 = vld [vmem:[%s24004_s30 + $0x938] sm:$0xf] }
  0x9e   :  { %2571 = vmatpush.bf16.msrb.mxu0 %v12860_v19  ;;  %v12692_v19 = vor.u32 %v16104_v9, %v12691_v8  ;;  %v12581_v8 = vld [vmem:[%s24004_s30 + $0x874] sm:$0xf0] }
  0x9f   :  { %2539 = vmatpush.bf16.msra.mxu1 %v12580_v22  ;;  %2533 = vmatmul.bf16.vlgmr.msra.gmra.mxu2 %v17384_v26  ;;  %v11828_v22 = vor.u32 %v15884_v11, %v11825_v12  ;;  %v15954_v11 = vld [vmem:[%s24004_s30 + $0x4a4] sm:$0xf]  ;;  %v12105_v12 = vld [vmem:[%s24004_s30 + $0x4bc] sm:$0xf0] }
  0xa0   :  { %2577 = vmatpush.bf16.msrb.mxu2 %v11716_v18  ;;  %v11573_v18 = vld [vmem:[%s24004_s30 + $0x94] sm:$0xf0] }
  0xa1   :  { %2552 = vmatpush.bf16.msra.mxu3 %v12804_v25  ;;  %v11576_v25 = vor.u32 %v15821_v14, %v11573_v18  ;;  %v16010_v14 = vld [vmem:[%s24004_s30 + $0x664] sm:$0xf]  ;;  %v12329_v18 = vld [vmem:[%s24004_s30 + $0x67c] sm:$0xf0] }
  0xa2   :  { %2590 = vmatpush.bf16.msra.mxu0 %v11940_v29  ;;  %v12440_v29 = vor.u32 %v16041_v21, %v12439_v20  ;;  %v16129_v20 = vld [vmem:[%s24004_s30 + $0xa1c] sm:$0xf]  ;;  %v12805_v21 = vld [vmem:[%s24004_s30 + $0xa34] sm:$0xf0] }
  0xa3   :  { %2540 = vmatpush.bf16.msra.mxu1 %v12552_v35  ;;  %v12635_v35 = vld [vmem:[%s24004_s30 + $0x8c8] sm:$0xf] }
  0xa4   :  { %2578 = vmatpush.bf16.msrb.mxu2 %v11688_v32  ;;  %v12411_v32 = vld [vmem:[%s24004_s30 + $0x708] sm:$0xf]  ;;  %v12636_v50 = vor.u32 %v16090_v36, %v12635_v35  ;;  %v12080_v35 = vor.u32 %v15947_v27, %v12077_v28  ;;  %v16059_v36 = vld [vmem:[%s24004_s30 + $0x7ec] sm:$0xf] }
  0xa5   :  { %2553 = vmatpush.bf16.msra.mxu3 %v12776_v39  ;;  %v15968_v39 = vld [vmem:[%s24004_s30 + $0x514] sm:$0xf]  ;;  %v12412_v47 = vor.u32 %v16034_v34, %v12411_v32  ;;  %v12556_v32 = vor.u32 %v16066_v23, %v12553_v24  ;;  %v12777_v34 = vld [vmem:[%s24004_s30 + $0x9fc] sm:$0xf0]  ;;  %v15919_v23 = vld [vmem:[%s24004_s30 + $0x38c] sm:$0xf] }
  0xa6   :  { %2591 = vmatpush.bf16.msra.mxu0 %v11912_v43  ;;  %v11548_v43 = vor.u32 %v15814_v30, %v11545_v31  ;;  %v12164_v51 = vor.u32 %v15968_v39, %v12161_v40  ;;  %v16003_v30 = vld [vmem:[%s24004_s30 + $0x62c] sm:$0xf]  ;;  %v12301_v31 = vld [vmem:[%s24004_s30 + $0x644] sm:$0xf0]  ;;  %v15940_v40 = vld [vmem:[%s24004_s30 + $0x434] sm:$0xf] }
  0xa7   :  { %2541 = vmatpush.bf16.msra.mxu1 %v12524_v49  ;;  %v11517_v49 = vld [vmem:[%s24004_s30 + $0x24] sm:$0xf0]  ;;  %v12304_v39 = vor.u32 %v16003_v30, %v12301_v31  ;;  %v15975_v27 = vld [vmem:[%s24004_s30 + $0x54c] sm:$0xf]  ;;  %v11719_v30 = vld [vmem:[%s24004_s30 + $0x198] sm:$0xf] }
  0xa8   :  { %2579 = vmatpush.bf16.msrb.mxu2 %v11660_v46  ;;  %v11769_v46 = vld [vmem:[%s24004_s30 + $0x21c] sm:$0xf0]  ;;  %v11520_v60 = vor.u32 %v15807_v48, %v11517_v49  ;;  %v12749_v48 = vld [vmem:[%s24004_s30 + $0x9c4] sm:$0xf0]  ;;  %v16143_v31 = vld [vmem:[%s24004_s30 + $0xa8c] sm:$0xf] }
  0xa9   :  { %2554 = vmatpush.bf16.msra.mxu3 %v12748_v52  ;;  %v16080_v52 = vld [vmem:[%s24004_s30 + $0x894] sm:$0xf]  ;;  %v12189_v28 = vld [vmem:[%s24004_s30 + $0x564] sm:$0xf0] }
  0xaa   :  { %2592 = vmatpush.bf16.msra.mxu0 %v11884_v55  ;;  %v11772_v55 = vor.u32 %v15870_v45, %v11769_v46  ;;  %v12612_v1 = vor.u32 %v16080_v52, %v12609_v53  ;;  %v12273_v45 = vld [vmem:[%s24004_s30 + $0x60c] sm:$0xf0] }
  0xab   :  { %2542 = vmatpush.bf16.msra.mxu1 %v12496_v63  ;;  %v15863_v63 = vld [vmem:[%s24004_s30 + $0x1cc] sm:$0xf]  ;;  %v12497_v52 = vld [vmem:[%s24004_s30 + $0x7cc] sm:$0xf0]  ;;  %v12276_v53 = vor.u32 %v15996_v44, %v12273_v45  ;;  %v12192_v44 = vor.u32 %v15975_v27, %v12189_v28  ;;  %v15958_v27 = vld [vmem:[%s24004_s30 + $0x4c0] sm:$0xf0] }
  0xac   :  { %2580 = vmatpush.bf16.msrb.mxu2 %v11632_v59  ;;  %v16017_v59 = vld [vmem:[%s24004_s30 + $0x69c] sm:$0xf]  ;;  %v11635_v28 = vld [vmem:[%s24004_s30 + $0xf0] sm:$0xf] }
  0xad   :  { %2555 = vmatpush.bf16.msra.mxu3 %v12720_v3  ;;  %12879 = vmatmul.msk.bf16.vlgmr.msrb.gmra.mxu0 %vm2300_vm0, %v17492_v15  ;;  %v16136_v3 = vld [vmem:[%s24004_s30 + $0xa54] sm:$0xf]  ;;  %v12360_v9 = vor.u32 %v16017_v59, %v12357_v62  ;;  %v12245_v59 = vld [vmem:[%s24004_s30 + $0x5d4] sm:$0xf0] }
  0xae   :  { %2593 = vmatpush.bf16.msra.mxu0 %v11856_v7  ;;  %v16073_v7 = vld [vmem:[%s24004_s30 + $0x85c] sm:$0xf]  ;;  %v16108_v62 = vld [vmem:[%s24004_s30 + $0x974] sm:$0xf] }
  0xaf   :  { %2543 = vmatpush.bf16.msra.mxu1 %v12468_v13  ;;  %v12836_v13 = vor.u32 %v16136_v3, %v12833_v4  ;;  %v16045_v3 = vld [vmem:[%s24004_s30 + $0x77c] sm:$0xf]  ;;  %v12469_v4 = vld [vmem:[%s24004_s30 + $0x794] sm:$0xf0] }
  0xb0   :  { %2581 = vmatpush.bf16.msrb.mxu2 %v11604_v10  ;;  %v11744_v10 = vor.u32 %v15863_v63, %v11741_v0  ;;  %v12721_v63 = vld [vmem:[%s24004_s30 + $0x98c] sm:$0xf0] }
  0xb1   :  { %2556 = vmatpush.bf16.msra.mxu3 %v12692_v19  ;;  %v12584_v19 = vor.u32 %v16073_v7, %v12581_v8  ;;  %v15926_v7 = vld [vmem:[%s24004_s30 + $0x3c4] sm:$0xf]  ;;  %v11993_v8 = vld [vmem:[%s24004_s30 + $0x3dc] sm:$0xf0] }
  0xb2   :  { %2594 = vmatpush.bf16.msra.mxu0 %v11828_v22  ;;  %v12108_v22 = vor.u32 %v15954_v11, %v12105_v12  ;;  %v15982_v11 = vld [vmem:[%s24004_s30 + $0x584] sm:$0xf]  ;;  %v12217_v12 = vld [vmem:[%s24004_s30 + $0x59c] sm:$0xf0] }
  0xb3   :  { %2544 = vmatpush.bf16.msra.mxu1 %v12440_v29  ;;  %v12808_v29 = vor.u32 %v16129_v20, %v12805_v21  ;;  %v11996_v20 = vor.u32 %v15926_v7, %v11993_v8  ;;  %v16038_v21 = vld [vmem:[%s24004_s30 + $0x744] sm:$0xf]  ;;  %v12220_v24 = vor.u32 %v15982_v11, %v12217_v12  ;;  %v12139_v7 = vld [vmem:[%s24004_s30 + $0x4e0] sm:$0xf]  ;;  %v15965_v8 = vld [vmem:[%s24004_s30 + $0x4f8] sm:$0xf0] }
  0xb4   :  { %2582 = vmatpush.bf16.msrb.mxu2 %v11576_v25  ;;  %v12332_v25 = vor.u32 %v16010_v14, %v12329_v18  ;;  %v16101_v14 = vld [vmem:[%s24004_s30 + $0x93c] sm:$0xf]  ;;  %v12693_v18 = vld [vmem:[%s24004_s30 + $0x954] sm:$0xf0]  ;;  %v11663_v11 = vld [vmem:[%s24004_s30 + $0x128] sm:$0xf] }
  0xb5   :  { %2557 = vmatpush.bf16.msra.mxu3 %v12664_v33  ;;  %v16122_v33 = vld [vmem:[%s24004_s30 + $0x9e4] sm:$0xf] }
  0xb6   :  { %2595 = vmatpush.bf16.msra.mxu0 %v11800_v38  ;;  %v12525_v38 = vld [vmem:[%s24004_s30 + $0x804] sm:$0xf0]  ;;  %v18217_v49 = vpop.f32.mrf.mxu0  ;;  %v15846_v12 = vld [vmem:[%s24004_s30 + $0x140] sm:$0xf0] }
  0xb7   :  { %2545 = vmatpush.bf16.msra.mxu1 %v12412_v47  ;;  %v12528_v46 = vor.u32 %v16059_v36, %v12525_v38  ;;  %v16115_v47 = vld [vmem:[%s24004_s30 + $0x9ac] sm:$0xf]  ;;  %v12665_v36 = vld [vmem:[%s24004_s30 + $0x91c] sm:$0xf0] }
  0xb8   :  { %2583 = vmatpush.bf16.msrb.mxu2 %v11548_v43  ;;  %v12780_v43 = vor.u32 %v16122_v33, %v12777_v34  ;;  %v12752_v57 = vor.u32 %v16115_v47, %v12749_v48  ;;  %v15860_v34 = vld [vmem:[%s24004_s30 + $0x1b0] sm:$0xf0] }
  0xb9   :  { %2558 = vmatpush.bf16.msra.mxu3 %v12636_v50  ;;  %v12052_v50 = vor.u32 %v15940_v40, %v12049_v41  ;;  %v18243_v0 = vpop.f32.mrf.mxu1  ;;  %v16031_v40 = vld [vmem:[%s24004_s30 + $0x70c] sm:$0xf]  ;;  %v12413_v41 = vld [vmem:[%s24004_s30 + $0x724] sm:$0xf0]  ;;  %v15916_v47 = vld [vmem:[%s24004_s30 + $0x370] sm:$0xf0] }
  0xba   :  { %2596 = vmatpush.bf16.msra.mxu0 %v11772_v55  ;;  %2546 = vmatmul.bf16.vlgmr.msra.gmra.mxu1 %v17524_v37  ;;  %v12021_v55 = vld [vmem:[%s24004_s30 + $0x414] sm:$0xf0] }
  0xbb   :  { %2603 = vmatpush.bf16.msrb.mxu1 %v12164_v51  ;;  %v16052_v51 = vld [vmem:[%s24004_s30 + $0x7b4] sm:$0xf] }
  0xbc   :  { %2584 = vmatpush.bf16.msrb.mxu2 %v11520_v60  ;;  %2559 = vmatmul.bf16.vlgmr.msra.gmra.mxu3 %v17535_v42  ;;  %v12500_v60 = vor.u32 %v16052_v51, %v12497_v52  ;;  %v12167_v52 = vld [vmem:[%s24004_s30 + $0x518] sm:$0xf] }
  0xbd   :  { %2616 = vmatpush.bf16.msrb.mxu3 %v12388_v54  ;;  %v15933_v54 = vld [vmem:[%s24004_s30 + $0x3fc] sm:$0xf] }
  0xbe   :  { %2597 = vmatpush.bf16.msra.mxu0 %v11744_v10  ;;  %v12724_v10 = vor.u32 %v16108_v62, %v12721_v63  ;;  %v12391_v62 = vld [vmem:[%s24004_s30 + $0x6d8] sm:$0xf] }
  0xbf   :  { %2604 = vmatpush.bf16.msrb.mxu1 %v12136_v6  ;;  %2585 = vmatmul.bf16.vlgmr.msrb.gmra.mxu2 %v17330_v2  ;;  %v12248_v6 = vor.u32 %v15989_v58, %v12245_v59  ;;  %v16087_v59 = vld [vmem:[%s24004_s30 + $0x8cc] sm:$0xf] }
  0xc0   :  { %2629 = vmatpush.bf16.msra.mxu2 %v12612_v1  ;;  %v12024_v1 = vor.u32 %v15933_v54, %v12021_v55  ;;  %v12416_v54 = vor.u32 %v16031_v40, %v12413_v41  ;;  %v11691_v55 = vld [vmem:[%s24004_s30 + $0x160] sm:$0xf]  ;;  %v15951_v40 = vld [vmem:[%s24004_s30 + $0x488] sm:$0xf0] }
  0xc1   :  { %2617 = vmatpush.bf16.msrb.mxu3 %v12360_v9  ;;  %2598 = vmatmul.bf16.vlgmr.msra.gmra.mxu0 %v17360_v16  ;;  %v18257_v9 = vpop.f32.mrf.mxu2  ;;  %v2328_v38 = vpop.f32.mrf.mxu1 }
  0xc2   :  { %2642 = vmatpush.bf16.msrb.mxu0 %v12836_v13  ;;  %v12472_v13 = vor.u32 %v16045_v3, %v12469_v4  ;;  %v11915_v3 = vld [vmem:[%s24004_s30 + $0x320] sm:$0xf]  ;;  %v15909_v4 = vld [vmem:[%s24004_s30 + $0x338] sm:$0xf0] }
  0xc3   :  { %2605 = vmatpush.bf16.msrb.mxu1 %v12108_v22  ;;  %v12441_v22 = vld [vmem:[%s24004_s30 + $0x75c] sm:$0xf0] }
  0xc4   :  { %2630 = vmatpush.bf16.msra.mxu2 %v12584_v19  ;;  %v2315_v19 = vpop.f32.mrf.mxu0  ;;  %v12444_v33 = vor.u32 %v16038_v21, %v12441_v22  ;;  %v16021_v21 = vld [vmem:[%s24004_s30 + $0x6b8] sm:$0xf0]  ;;  %v11887_v22 = vld [vmem:[%s24004_s30 + $0x2e8] sm:$0xf] }
  0xc5   :  { %2618 = vmatpush.bf16.msrb.mxu3 %v12332_v25  ;;  %v11965_v25 = vld [vmem:[%s24004_s30 + $0x3a4] sm:$0xf0] }
  0xc6   :  { %2643 = vmatpush.bf16.msrb.mxu0 %v12808_v29  ;;  %v12696_v29 = vor.u32 %v16101_v14, %v12693_v18  ;;  %v11916_v14 = vor.u32 %v15909_v4, %v11915_v3  ;;  %v12363_v18 = vld [vmem:[%s24004_s30 + $0x6a0] sm:$0xf]  ;;  %v12279_v3 = vld [vmem:[%s24004_s30 + $0x5f8] sm:$0xf] }
  0xc7   :  { %2606 = vmatpush.bf16.msrb.mxu1 %v12080_v35  ;;  %v16094_v35 = vld [vmem:[%s24004_s30 + $0x904] sm:$0xf] }
  0xc8   :  { %2631 = vmatpush.bf16.msra.mxu2 %v12556_v32  ;;  %v12861_v32 = vld [vmem:[%s24004_s30 + $0xaa4] sm:$0xf0]  ;;  %v12668_v51 = vor.u32 %v16094_v35, %v12665_v36  ;;  %v11859_v35 = vld [vmem:[%s24004_s30 + $0x2b0] sm:$0xf]  ;;  %v15895_v36 = vld [vmem:[%s24004_s30 + $0x2c8] sm:$0xf0] }
  0xc9   :  { %2619 = vmatpush.bf16.msrb.mxu3 %v12304_v39  ;;  %v11968_v39 = vor.u32 %v15919_v23, %v11965_v25  ;;  %v12864_v45 = vor.u32 %v16143_v31, %v12861_v32  ;;  %v2341_v48 = vpop.f32.mrf.mxu2  ;;  %v15902_v23 = vld [vmem:[%s24004_s30 + $0x300] sm:$0xf0]  ;;  %v12111_v25 = vld [vmem:[%s24004_s30 + $0x4a8] sm:$0xf] }
  0xca   :  { %2644 = vmatpush.bf16.msrb.mxu0 %v12780_v43  ;;  %v18313_v43 = vpop.f32.mrf.mxu3  ;;  %v11888_v31 = vor.u32 %v15902_v23, %v11887_v22  ;;  %v12335_v32 = vld [vmem:[%s24004_s30 + $0x668] sm:$0xf]  ;;  %v12251_v22 = vld [vmem:[%s24004_s30 + $0x5c0] sm:$0xf] }
  0xcb   :  { %2607 = vmatpush.bf16.msrb.mxu1 %v12052_v50  ;;  %v11720_v50 = vor.u32 %v15860_v34, %v11719_v30  ;;  %v12364_v30 = vor.u32 %v16021_v21, %v12363_v18  ;;  %v16014_v34 = vld [vmem:[%s24004_s30 + $0x680] sm:$0xf0] }
  0xcc   :  { %2632 = vmatpush.bf16.msra.mxu2 %v12528_v46  ;;  %v11943_v46 = vld [vmem:[%s24004_s30 + $0x358] sm:$0xf] }
  0xcd   :  { %2620 = vmatpush.bf16.msrb.mxu3 %v12276_v53  ;;  %v15972_v53 = vld [vmem:[%s24004_s30 + $0x530] sm:$0xf0]  ;;  %v11944_v58 = vor.u32 %v15916_v47, %v11943_v46  ;;  %v12336_v47 = vor.u32 %v16014_v34, %v12335_v32  ;;  %v15930_v32 = vld [vmem:[%s24004_s30 + $0x3e0] sm:$0xf0]  ;;  %v15811_v34 = vld [vmem:[%s24004_s30 + $0x28] sm:$0xf0] }
  0xce   :  { %2645 = vmatpush.bf16.msrb.mxu0 %v12752_v57  ;;  %v15853_v57 = vld [vmem:[%s24004_s30 + $0x178] sm:$0xf0]  ;;  %v12168_v63 = vor.u32 %v15972_v53, %v12167_v52  ;;  %v16007_v53 = vld [vmem:[%s24004_s30 + $0x648] sm:$0xf0] }
  0xcf   :  { %2608 = vmatpush.bf16.msrb.mxu1 %v12024_v1  ;;  %v16028_v1 = vld [vmem:[%s24004_s30 + $0x6f0] sm:$0xf0] }
  0xd0   :  { %2633 = vmatpush.bf16.msra.mxu2 %v12500_v60  ;;  %v12637_v60 = vld [vmem:[%s24004_s30 + $0x8e4] sm:$0xf0] }
  0xd1   :  { %2621 = vmatpush.bf16.msrb.mxu3 %v12248_v6  ;;  %v11692_v6 = vor.u32 %v15853_v57, %v11691_v55  ;;  %v18419_v48 = vpop.f32.mrf.mxu2  ;;  %v15888_v55 = vld [vmem:[%s24004_s30 + $0x290] sm:$0xf0] }
  0xd2   :  { %2646 = vmatpush.bf16.msrb.mxu0 %v12724_v10  ;;  %v12640_v10 = vor.u32 %v16087_v59, %v12637_v60  ;;  %v2354_v19 = vpop.f32.mrf.mxu3  ;;  %v15944_v59 = vld [vmem:[%s24004_s30 + $0x450] sm:$0xf0]  ;;  %v11579_v60 = vld [vmem:[%s24004_s30 + $0x80] sm:$0xf] }
  0xd3   :  { %2609 = vmatpush.bf16.msrb.mxu1 %v11996_v20  ;;  %v12140_v20 = vor.u32 %v15965_v8, %v12139_v7  ;;  %v11803_v7 = vld [vmem:[%s24004_s30 + $0x240] sm:$0xf]  ;;  %v15881_v8 = vld [vmem:[%s24004_s30 + $0x258] sm:$0xf0] }
  0xd4   :  { %2634 = vmatpush.bf16.msra.mxu2 %v12472_v13  ;;  %v12392_v13 = vor.u32 %v16028_v1, %v12391_v62  ;;  %v15825_v62 = vld [vmem:[%s24004_s30 + $0x98] sm:$0xf0]  ;;  %v11804_v21 = vor.u32 %v15881_v8, %v11803_v7  ;;  %v12195_v7 = vld [vmem:[%s24004_s30 + $0x550] sm:$0xf]  ;;  %v15979_v8 = vld [vmem:[%s24004_s30 + $0x568] sm:$0xf0] }
  0xd5   :  { %2622 = vmatpush.bf16.msrb.mxu3 %v12220_v24  ;;  %v11664_v24 = vor.u32 %v15846_v12, %v11663_v11  ;;  %v12027_v11 = vld [vmem:[%s24004_s30 + $0x400] sm:$0xf]  ;;  %v15937_v12 = vld [vmem:[%s24004_s30 + $0x418] sm:$0xf0] }
  0xd6   :  { %2647 = vmatpush.bf16.msrb.mxu0 %v12696_v29  ;;  %v15839_v29 = vld [vmem:[%s24004_s30 + $0x108] sm:$0xf0]  ;;  %v18409_v41 = vpop.f32.mrf.mxu0 }
  0xd7   :  { %2610 = vmatpush.bf16.msrb.mxu1 %v11968_v39  ;;  %v11636_v38 = vor.u32 %v15839_v29, %v11635_v28  ;;  %v12083_v39 = vld [vmem:[%s24004_s30 + $0x470] sm:$0xf]  ;;  %v18417_v46 = vpop.f32.mrf.mxu1  ;;  %v11775_v28 = vld [vmem:[%s24004_s30 + $0x208] sm:$0xf]  ;;  %v15874_v29 = vld [vmem:[%s24004_s30 + $0x220] sm:$0xf0] }
  0xd8   :  { %2635 = vmatpush.bf16.msra.mxu2 %v12444_v33  ;;  %v12112_v33 = vor.u32 %v15958_v27, %v12111_v25  ;;  %v12084_v52 = vor.u32 %v15951_v40, %v12083_v39  ;;  %v12028_v25 = vor.u32 %v15937_v12, %v12027_v11  ;;  %v15993_v27 = vld [vmem:[%s24004_s30 + $0x5d8] sm:$0xf0]  ;;  %v16084_v39 = vld [vmem:[%s24004_s30 + $0x8b0] sm:$0xf0]  ;;  %v12223_v40 = vld [vmem:[%s24004_s30 + $0x588] sm:$0xf] }
  0xd9   :  { %2623 = vmatpush.bf16.msrb.mxu3 %v12192_v44  ;;  %v11607_v44 = vld [vmem:[%s24004_s30 + $0xb8] sm:$0xf]  ;;  %v2393_v23 = vpop.f32.mrf.mxu2 }
  0xda   :  { %2648 = vmatpush.bf16.msrb.mxu0 %v12668_v51  ;;  %2611 = vmatmul.bf16.vlgmr.msrb.gmra.mxu1 %v17316_v56  ;;  %v12307_v51 = vld [vmem:[%s24004_s30 + $0x630] sm:$0xf]  ;;  %v12196_v23 = vor.u32 %v15979_v8, %v12195_v7 }
  0xdb   :  { %2662 = vmatpush.bf16.msra.mxu1 %v12864_v45  ;;  %v15832_v45 = vld [vmem:[%s24004_s30 + $0xd0] sm:$0xf0]  ;;  %v11861_v7 = vld [vmem:[%s24004_s30 + $0x2cc] sm:$0xf0] }
  0xdc   :  { %2636 = vmatpush.bf16.msra.mxu2 %v12416_v54  ;;  %2624 = vmatmul.bf16.vlgmr.msrb.gmra.mxu3 %v17384_v26  ;;  %v11831_v54 = vld [vmem:[%s24004_s30 + $0x278] sm:$0xf]  ;;  %v11608_v57 = vor.u32 %v15832_v45, %v11607_v44  ;;  %v15986_v44 = vld [vmem:[%s24004_s30 + $0x5a0] sm:$0xf0] }
  0xdd   :  { %2668 = vmatpush.bf16.msra.mxu3 %v11720_v50  ;;  %v11860_v50 = vor.u32 %v15895_v36, %v11859_v35  ;;  %v11832_v1 = vor.u32 %v15888_v55, %v11831_v54  ;;  %v12615_v35 = vld [vmem:[%s24004_s30 + $0x898] sm:$0xf]  ;;  %v12252_v36 = vor.u32 %v15993_v27, %v12251_v22  ;;  %v16140_v55 = vld [vmem:[%s24004_s30 + $0xa70] sm:$0xf0]  ;;  %v16133_v22 = vld [vmem:[%s24004_s30 + $0xa38] sm:$0xf0] }
  0xde   :  { %2649 = vmatpush.bf16.msrb.mxu0 %v12640_v10  ;;  %v11580_v10 = vor.u32 %v15825_v62, %v11579_v60  ;;  %v2367_v18 = vpop.f32.mrf.mxu0  ;;  %v12839_v54 = vld [vmem:[%s24004_s30 + $0xa58] sm:$0xf]  ;;  %v12224_v62 = vor.u32 %v15986_v44, %v12223_v40 }
  0xdf   :  { %2681 = vmatpush.bf16.msrb.mxu1 %v11944_v58  ;;  %2637 = vmatmul.bf16.vlgmr.msra.gmra.mxu2 %v17524_v37  ;;  %v12055_v58 = vld [vmem:[%s24004_s30 + $0x438] sm:$0xf]  ;;  %v18471_v19 = vpop.f32.mrf.mxu3 }
  0xe0   :  { %2694 = vmatpush.bf16.msrb.mxu2 %v12168_v63  ;;  %v12308_v63 = vor.u32 %v16007_v53, %v12307_v51  ;;  %v12056_v4 = vor.u32 %v15944_v59, %v12055_v58  ;;  %v11971_v51 = vld [vmem:[%s24004_s30 + $0x390] sm:$0xf]  ;;  %v15923_v53 = vld [vmem:[%s24004_s30 + $0x3a8] sm:$0xf0]  ;;  %v11945_v18 = vld [vmem:[%s24004_s30 + $0x374] sm:$0xf0] }
  0xe1   :  { %2669 = vmatpush.bf16.msra.mxu3 %v11692_v6  ;;  %2650 = vmatmul.bf16.vlgmr.msrb.gmra.mxu0 %v17535_v42  ;;  %v16000_v6 = vld [vmem:[%s24004_s30 + $0x610] sm:$0xf0]  ;;  %v12867_v58 = vld [vmem:[%s24004_s30 + $0xa90] sm:$0xf]  ;;  %v16147_v59 = vld [vmem:[%s24004_s30 + $0xaa8] sm:$0xf0] }
  0xe2   :  { %2707 = vmatpush.bf16.msra.mxu0 %v12392_v13  ;;  %v11551_v13 = vld [vmem:[%s24004_s30 + $0x48] sm:$0xf]  ;;  %v18548_v11 = vpop.f32.mrf.mxu2  ;;  %v12868_v12 = vor.u32 %v16147_v59, %v12867_v58  ;;  %v12503_v58 = vld [vmem:[%s24004_s30 + $0x7b8] sm:$0xf]  ;;  %v16056_v59 = vld [vmem:[%s24004_s30 + $0x7d0] sm:$0xf0] }
  0xe3   :  { %2682 = vmatpush.bf16.msrb.mxu1 %v11916_v14  ;;  %v15818_v14 = vld [vmem:[%s24004_s30 + $0x60] sm:$0xf0]  ;;  %v12504_v8 = vor.u32 %v16056_v59, %v12503_v58  ;;  %v15969_v58 = vld [vmem:[%s24004_s30 + $0x51c] sm:$0xf]  ;;  %v12169_v59 = vld [vmem:[%s24004_s30 + $0x534] sm:$0xf0] }
  0xe4   :  { %2695 = vmatpush.bf16.msrb.mxu2 %v12140_v20  ;;  %v12280_v20 = vor.u32 %v16000_v6, %v12279_v3  ;;  %v16077_v3 = vld [vmem:[%s24004_s30 + $0x878] sm:$0xf0]  ;;  %v12840_v6 = vor.u32 %v16140_v55, %v12839_v54  ;;  %v12755_v55 = vld [vmem:[%s24004_s30 + $0x9b0] sm:$0xf] }
  0xe5   :  { %2670 = vmatpush.bf16.msra.mxu3 %v11664_v24  ;;  %v2380_v24 = vpop.f32.mrf.mxu1 }
  0xe6   :  { %2708 = vmatpush.bf16.msra.mxu0 %v12364_v30  ;;  %v11552_v30 = vor.u32 %v15818_v14, %v11551_v13  ;;  %v11721_v13 = vld [vmem:[%s24004_s30 + $0x1b4] sm:$0xf0]  ;;  %v15913_v14 = vld [vmem:[%s24004_s30 + $0x35c] sm:$0xf]  ;;  %v12559_v24 = vld [vmem:[%s24004_s30 + $0x828] sm:$0xf] }
  0xe7   :  { %2683 = vmatpush.bf16.msrb.mxu1 %v11888_v31  ;;  %v11999_v31 = vld [vmem:[%s24004_s30 + $0x3c8] sm:$0xf]  ;;  %v2406_v60 = vpop.f32.mrf.mxu3 }
  0xe8   :  { %2696 = vmatpush.bf16.msrb.mxu2 %v12112_v33  ;;  %v11523_v33 = vld [vmem:[%s24004_s30 + $0x10] sm:$0xf]  ;;  %v12000_v45 = vor.u32 %v15930_v32, %v11999_v31  ;;  %v11693_v31 = vld [vmem:[%s24004_s30 + $0x17c] sm:$0xf0]  ;;  %v15906_v32 = vld [vmem:[%s24004_s30 + $0x324] sm:$0xf] }
  0xe9   :  { %2671 = vmatpush.bf16.msra.mxu3 %v11636_v38  ;;  %v11776_v38 = vor.u32 %v15874_v29, %v11775_v28  ;;  %v11948_v28 = vor.u32 %v15913_v14, %v11945_v18  ;;  %v15850_v29 = vld [vmem:[%s24004_s30 + $0x164] sm:$0xf]  ;;  %v16049_v14 = vld [vmem:[%s24004_s30 + $0x798] sm:$0xf0] }
  0xea   :  { %2709 = vmatpush.bf16.msra.mxu0 %v12336_v47  ;;  %12880 = vmatmul.msk.bf16.vlgmr.msra.gmra.mxu1 %vm2300_vm0, %v17492_v15  ;;  %v11747_v47 = vld [vmem:[%s24004_s30 + $0x1d0] sm:$0xf]  ;;  %v11696_v40 = vor.u32 %v15850_v29, %v11693_v31  ;;  %v12699_v29 = vld [vmem:[%s24004_s30 + $0x940] sm:$0xf]  ;;  %v12447_v31 = vld [vmem:[%s24004_s30 + $0x748] sm:$0xf] }
  0xeb   :  { %2684 = vmatpush.bf16.msrb.mxu1 %v11860_v50  ;;  %v15867_v50 = vld [vmem:[%s24004_s30 + $0x1e8] sm:$0xf0] }
  0xec   :  { %2697 = vmatpush.bf16.msrb.mxu2 %v12084_v52  ;;  %v11524_v52 = vor.u32 %v15811_v34, %v11523_v33  ;;  %v11917_v33 = vld [vmem:[%s24004_s30 + $0x33c] sm:$0xf0] }
  0xed   :  { %2672 = vmatpush.bf16.msra.mxu3 %v11608_v57  ;;  %v12616_v57 = vor.u32 %v16084_v39, %v12615_v35  ;;  %v12783_v35 = vld [vmem:[%s24004_s30 + $0x9e8] sm:$0xf]  ;;  %v16063_v39 = vld [vmem:[%s24004_s30 + $0x808] sm:$0xf0]  ;;  %v11920_v44 = vor.u32 %v15906_v32, %v11917_v33  ;;  %v16042_v32 = vld [vmem:[%s24004_s30 + $0x760] sm:$0xf0] }
  0xee   :  { %2710 = vmatpush.bf16.msra.mxu0 %v12308_v63  ;;  %v11748_v63 = vor.u32 %v15867_v50, %v11747_v47  ;;  %v2419_v47 = vpop.f32.mrf.mxu2 }
  0xef   :  { %2685 = vmatpush.bf16.msrb.mxu1 %v11832_v1  ;;  %v12587_v1 = vld [vmem:[%s24004_s30 + $0x860] sm:$0xf] }
  0xf0   :  { %2698 = vmatpush.bf16.msrb.mxu2 %v12056_v4  ;;  %v11972_v4 = vor.u32 %v15923_v53, %v11971_v51  ;;  %v11665_v51 = vld [vmem:[%s24004_s30 + $0x144] sm:$0xf0]  ;;  %v11805_v47 = vld [vmem:[%s24004_s30 + $0x25c] sm:$0xf0] }
  0xf1   :  { %2673 = vmatpush.bf16.msra.mxu3 %v11580_v10  ;;  %v15857_v10 = vld [vmem:[%s24004_s30 + $0x19c] sm:$0xf]  ;;  %v11889_v53 = vld [vmem:[%s24004_s30 + $0x304] sm:$0xf0] }
  0xf2   :  { %2711 = vmatpush.bf16.msra.mxu0 %v12280_v20  ;;  %v12588_v20 = vor.u32 %v16077_v3, %v12587_v1  ;;  %v11724_v27 = vor.u32 %v15857_v10, %v11721_v13  ;;  %v15836_v1 = vld [vmem:[%s24004_s30 + $0xf4] sm:$0xf]  ;;  %v12727_v10 = vld [vmem:[%s24004_s30 + $0x978] sm:$0xf]  ;;  %v12475_v13 = vld [vmem:[%s24004_s30 + $0x780] sm:$0xf] }
  0xf3   :  { %2686 = vmatpush.bf16.msrb.mxu1 %v11804_v21  ;;  %v12811_v21 = vld [vmem:[%s24004_s30 + $0xa20] sm:$0xf] }
  0xf4   :  { %2699 = vmatpush.bf16.msrb.mxu2 %v12028_v25  ;;  %v16070_v25 = vld [vmem:[%s24004_s30 + $0x840] sm:$0xf0] }
  0xf5   :  { %2674 = vmatpush.bf16.msra.mxu3 %v11552_v30  ;;  %v12812_v30 = vor.u32 %v16133_v22, %v12811_v21  ;;  %v12560_v34 = vor.u32 %v16070_v25, %v12559_v24  ;;  %v15829_v22 = vld [vmem:[%s24004_s30 + $0xbc] sm:$0xf]  ;;  %v11609_v24 = vld [vmem:[%s24004_s30 + $0xd4] sm:$0xf0] }
  0xf6   :  { %2712 = vmatpush.bf16.msra.mxu0 %v12252_v36  ;;  %v16126_v36 = vld [vmem:[%s24004_s30 + $0xa00] sm:$0xf0]  ;;  %v18623_v60 = vpop.f32.mrf.mxu0  ;;  %v15885_v25 = vld [vmem:[%s24004_s30 + $0x27c] sm:$0xf] }
  0xf7   :  { %2687 = vmatpush.bf16.msrb.mxu1 %v11776_v38  ;;  %v12531_v38 = vld [vmem:[%s24004_s30 + $0x7f0] sm:$0xf]  ;;  %v12784_v50 = vor.u32 %v16126_v36, %v12783_v35  ;;  %v18649_v21 = vpop.f32.mrf.mxu1 }
  0xf8   :  { %2700 = vmatpush.bf16.msrb.mxu2 %v12000_v45  ;;  %v15843_v45 = vld [vmem:[%s24004_s30 + $0x12c] sm:$0xf]  ;;  %v12532_v54 = vor.u32 %v16063_v39, %v12531_v38  ;;  %v15822_v38 = vld [vmem:[%s24004_s30 + $0x84] sm:$0xf] }
  0xf9   :  { %2675 = vmatpush.bf16.msra.mxu3 %v11524_v52  ;;  %v15899_v52 = vld [vmem:[%s24004_s30 + $0x2ec] sm:$0xf] }
  0xfa   :  { %2713 = vmatpush.bf16.msra.mxu0 %v12224_v62  ;;  %v11668_v62 = vor.u32 %v15843_v45, %v11665_v51  ;;  %v15878_v45 = vld [vmem:[%s24004_s30 + $0x244] sm:$0xf]  ;;  %v12671_v51 = vld [vmem:[%s24004_s30 + $0x908] sm:$0xf] }
  0xfb   :  { %2688 = vmatpush.bf16.msrb.mxu1 %v11748_v63  ;;  %v11892_v63 = vor.u32 %v15899_v52, %v11889_v53  ;;  %v16098_v52 = vld [vmem:[%s24004_s30 + $0x920] sm:$0xf0]  ;;  %v12419_v53 = vld [vmem:[%s24004_s30 + $0x710] sm:$0xf] }
  0xfc   :  { %2701 = vmatpush.bf16.msrb.mxu2 %v11972_v4  ;;  %2676 = vmatmul.bf16.vlgmr.msra.gmra.mxu3 %v17330_v2  ;;  %v11637_v4 = vld [vmem:[%s24004_s30 + $0x10c] sm:$0xf0] }
  0xfd   :  { %2720 = vmatpush.bf16.msrb.mxu3 %v12616_v57  ;;  %v16119_v57 = vld [vmem:[%s24004_s30 + $0x9c8] sm:$0xf0]  ;;  %v11640_v18 = vor.u32 %v15836_v1, %v11637_v4  ;;  %v12672_v1 = vor.u32 %v16098_v52, %v12671_v51 }
  0xfe   :  { %2689 = vmatmul.bf16.vlgmr.msrb.gmra.mxu1 %v17360_v16  ;;  %2714 = vmatpush.bf16.msra.mxu0 %v12196_v23  ;;  %v12756_v3 = vor.u32 %v16119_v57, %v12755_v55  ;;  %v2432_v33 = vpop.f32.mrf.mxu0  ;;  %v11808_v57 = vor.u32 %v15878_v45, %v11805_v47  ;;  %v15871_v4 = vld [vmem:[%s24004_s30 + $0x20c] sm:$0xf]  ;;  %v16018_v45 = vld [vmem:[%s24004_s30 + $0x6a4] sm:$0xf]  ;;  %v12365_v47 = vld [vmem:[%s24004_s30 + $0x6bc] sm:$0xf0] }
  0xff   :  { %2733 = vmatpush.bf16.msra.mxu1 %v12840_v6  ;;  %2702 = vmatmul.bf16.vlgmr.msrb.gmra.mxu2 %v17316_v56  ;;  %v15892_v6 = vld [vmem:[%s24004_s30 + $0x2b4] sm:$0xf]  ;;  %v18675_v36 = vpop.f32.mrf.mxu3  ;;  %v15955_v52 = vld [vmem:[%s24004_s30 + $0x4ac] sm:$0xf] }
 0x100   :  { %2753 = vmatpush.bf16.msra.mxu2 %v12868_v12  ;;  %v16112_v12 = vld [vmem:[%s24004_s30 + $0x990] sm:$0xf0] }
 0x101   :  { %2721 = vmatpush.bf16.msrb.mxu3 %v12588_v20  ;;  %2715 = vmatmul.bf16.vlgmr.msra.gmra.mxu0 %v17384_v26  ;;  %v11864_v20 = vor.u32 %v15892_v6, %v11861_v7  ;;  %v12728_v23 = vor.u32 %v16112_v12, %v12727_v10  ;;  %v11777_v6 = vld [vmem:[%s24004_s30 + $0x224] sm:$0xf0]  ;;  %v16091_v10 = vld [vmem:[%s24004_s30 + $0x8e8] sm:$0xf0]  ;;  %v12172_v12 = vor.u32 %v15969_v58, %v12169_v59  ;;  %v12589_v59 = vld [vmem:[%s24004_s30 + $0x87c] sm:$0xf0] }
 0x102   :  { %2759 = vmatpush.bf16.msrb.mxu0 %v11724_v27  ;;  %v11833_v27 = vld [vmem:[%s24004_s30 + $0x294] sm:$0xf0]  ;;  %v12368_v58 = vor.u32 %v16018_v45, %v12365_v47  ;;  %v15997_v47 = vld [vmem:[%s24004_s30 + $0x5fc] sm:$0xf] }
 0x103   :  { %2734 = vmatpush.bf16.msra.mxu1 %v12812_v30  ;;  %v16105_v30 = vld [vmem:[%s24004_s30 + $0x958] sm:$0xf0]  ;;  %v11836_v35 = vor.u32 %v15885_v25, %v11833_v27  ;;  %v15808_v25 = vld [vmem:[%s24004_s30 + $0x14] sm:$0xf]  ;;  %v11525_v27 = vld [vmem:[%s24004_s30 + $0x2c] sm:$0xf0] }
 0x104   :  { %2772 = vmatpush.bf16.msrb.mxu2 %v11948_v28  ;;  %v12476_v28 = vor.u32 %v16049_v14, %v12475_v13  ;;  %v12700_v39 = vor.u32 %v16105_v30, %v12699_v29  ;;  %v16025_v13 = vld [vmem:[%s24004_s30 + $0x6dc] sm:$0xf]  ;;  %v12393_v14 = vld [vmem:[%s24004_s30 + $0x6f4] sm:$0xf0]  ;;  %v15864_v30 = vld [vmem:[%s24004_s30 + $0x1d4] sm:$0xf] }
 0x105   :  { %2722 = vmatpush.bf16.msrb.mxu3 %v12560_v34  ;;  %v11612_v34 = vor.u32 %v15829_v22, %v11609_v24  ;;  %v12141_v24 = vld [vmem:[%s24004_s30 + $0x4fc] sm:$0xf0] }
 0x106   :  { %2760 = vmatpush.bf16.msrb.mxu0 %v11696_v40  ;;  %v18680_v40 = vpop.f32.mrf.mxu2 }
 0x107   :  { %2735 = vmatpush.bf16.msra.mxu1 %v12784_v50  ;;  %v12448_v50 = vor.u32 %v16042_v32, %v12447_v31  ;;  %v11749_v31 = vld [vmem:[%s24004_s30 + $0x1ec] sm:$0xf0]  ;;  %v16081_v32 = vld [vmem:[%s24004_s30 + $0x89c] sm:$0xf] }
 0x108   :  { %2773 = vmatpush.bf16.msrb.mxu2 %v11920_v44  ;;  %v11581_v44 = vld [vmem:[%s24004_s30 + $0x9c] sm:$0xf0]  ;;  %v11752_v51 = vor.u32 %v15864_v30, %v11749_v31 }
 0x109   :  { %2723 = vmatpush.bf16.msrb.mxu3 %v12532_v54  ;;  %v16035_v54 = vld [vmem:[%s24004_s30 + $0x728] sm:$0xf0]  ;;  %v11584_v55 = vor.u32 %v15822_v38, %v11581_v44  ;;  %v16137_v38 = vld [vmem:[%s24004_s30 + $0xa5c] sm:$0xf]  ;;  %v18834_v30 = vld [vmem:[%s24010_s27] sm:$0x7f] }
 0x10a   :  { %2761 = vmatpush.bf16.msrb.mxu0 %v11668_v62  ;;  %v15815_v62 = vld [vmem:[%s24004_s30 + $0x4c] sm:$0xf]  ;;  %v12420_v7 = vor.u32 %v16035_v54, %v12419_v53  ;;  %v12113_v53 = vld [vmem:[%s24004_s30 + $0x4c4] sm:$0xf0] }
 0x10b   :  { %2736 = vmatpush.bf16.msra.mxu1 %v12756_v3  ;;  %v11553_v3 = vld [vmem:[%s24004_s30 + $0x64] sm:$0xf0] }
 0x10c   :  { %2774 = vmatpush.bf16.msrb.mxu2 %v11892_v63  ;;  %v2445_v63 = vpop.f32.mrf.mxu1  ;;  %v11556_v22 = vor.u32 %v15815_v62, %v11553_v3  ;;  %v16130_v62 = vld [vmem:[%s24004_s30 + $0xa24] sm:$0xf]  ;;  %v16011_v3 = vld [vmem:[%s24004_s30 + $0x66c] sm:$0xf] }
 0x10d   :  { %2724 = vmatpush.bf16.msrb.mxu3 %v12504_v8  ;;  %v12643_v8 = vld [vmem:[%s24004_s30 + $0x8d0] sm:$0xf]  ;;  %v12813_v63 = vld [vmem:[%s24004_s30 + $0xa3c] sm:$0xf0] }
 0x10e   :  { %2762 = vmatpush.bf16.msrb.mxu0 %v11640_v18  ;;  %v15962_v18 = vld [vmem:[%s24004_s30 + $0x4e4] sm:$0xf]  ;;  %v12644_v29 = vor.u32 %v16091_v10, %v12643_v8  ;;  %v2471_v33 = vpop.f32.mrf.mxu2 }
 0x10f   :  { %2737 = vmatpush.bf16.msra.mxu1 %v12728_v23  ;;  %12881 = vmatmul.msk.bf16.vlgmr.msra.gmra.mxu2 %vm2300_vm0, %v17492_v15  ;;  %v11780_v23 = vor.u32 %v15871_v4, %v11777_v6  ;;  %v12144_v44 = vor.u32 %v15962_v18, %v12141_v24  ;;  %v12337_v4 = vld [vmem:[%s24004_s30 + $0x684] sm:$0xf0]  ;;  %v15948_v6 = vld [vmem:[%s24004_s30 + $0x474] sm:$0xf] }
 0x110   :  { %2775 = vmatpush.bf16.msrb.mxu2 %v11864_v20  ;;  %v18738_v20 = vpop.f32.mrf.mxu0  ;;  %v12561_v18 = vld [vmem:[%s24004_s30 + $0x844] sm:$0xf0]  ;;  %v16060_v33 = vld [vmem:[%s24004_s30 + $0x7f4] sm:$0xf] }
 0x111   :  { %2725 = vmatpush.bf16.msrb.mxu3 %v12476_v28  ;;  %v2458_v28 = vpop.f32.mrf.mxu3 }
 0x112   :  { %2763 = vmatpush.bf16.msrb.mxu0 %v11612_v34  ;;  %v12396_v34 = vor.u32 %v16025_v13, %v12393_v14  ;;  %v16067_v13 = vld [vmem:[%s24004_s30 + $0x82c] sm:$0xf]  ;;  %v12340_v14 = vor.u32 %v16011_v3, %v12337_v4  ;;  %v15941_v28 = vld [vmem:[%s24004_s30 + $0x43c] sm:$0xf] }
 0x113   :  { %2738 = vmatpush.bf16.msra.mxu1 %v12700_v39  ;;  %v12841_v39 = vld [vmem:[%s24004_s30 + $0xa74] sm:$0xf0]  ;;  %v12564_v31 = vor.u32 %v16067_v13, %v12561_v18 }
 0x114   :  { %2776 = vmatpush.bf16.msrb.mxu2 %v11836_v35  ;;  %v12617_v35 = vld [vmem:[%s24004_s30 + $0x8b4] sm:$0xf0] }
 0x115   :  { %2726 = vmatpush.bf16.msrb.mxu3 %v12448_v50  ;;  %v11528_v50 = vor.u32 %v15808_v25, %v11525_v27  ;;  %v12620_v54 = vor.u32 %v16081_v32, %v12617_v35  ;;  %v16004_v25 = vld [vmem:[%s24004_s30 + $0x634] sm:$0xf]  ;;  %v12309_v27 = vld [vmem:[%s24004_s30 + $0x64c] sm:$0xf0] }
 0x116   :  { %2764 = vmatpush.bf16.msrb.mxu0 %v11584_v55  ;;  %v12844_v55 = vor.u32 %v16137_v38, %v12841_v39  ;;  %v12312_v35 = vor.u32 %v16004_v25, %v12309_v27  ;;  %v16116_v38 = vld [vmem:[%s24004_s30 + $0x9b4] sm:$0xf]  ;;  %v12757_v39 = vld [vmem:[%s24004_s30 + $0x9cc] sm:$0xf0]  ;;  %v12701_v25 = vld [vmem:[%s24004_s30 + $0x95c] sm:$0xf0] }
 0x117   :  { %2739 = vmatpush.bf16.msra.mxu1 %v12672_v1  ;;  %v12116_v1 = vor.u32 %v15955_v52, %v12113_v53  ;;  %v12029_v52 = vld [vmem:[%s24004_s30 + $0x41c] sm:$0xf0] }
 0x118   :  { %2777 = vmatpush.bf16.msrb.mxu2 %v11808_v57  ;;  %v16074_v57 = vld [vmem:[%s24004_s30 + $0x864] sm:$0xf]  ;;  %v2484_v8 = vpop.f32.mrf.mxu0 }
 0x119   :  { %2727 = vmatpush.bf16.msrb.mxu3 %v12420_v7  ;;  %v12085_v7 = vld [vmem:[%s24004_s30 + $0x48c] sm:$0xf0]  ;;  %v12592_v10 = vor.u32 %v16074_v57, %v12589_v59  ;;  %v16053_v57 = vld [vmem:[%s24004_s30 + $0x7bc] sm:$0xf]  ;;  %v15927_v8 = vld [vmem:[%s24004_s30 + $0x3cc] sm:$0xf] }
 0x11a   :  { %2765 = vmatpush.bf16.msrb.mxu0 %v11556_v22  ;;  %v16123_v22 = vld [vmem:[%s24004_s30 + $0x9ec] sm:$0xf]  ;;  %v12088_v24 = vor.u32 %v15948_v6, %v12085_v7  ;;  %v15990_v6 = vld [vmem:[%s24004_s30 + $0x5c4] sm:$0xf]  ;;  %v12253_v7 = vld [vmem:[%s24004_s30 + $0x5dc] sm:$0xf0] }
 0x11b   :  { %2740 = vmatpush.bf16.msra.mxu1 %v12644_v29  ;;  %v12057_v29 = vld [vmem:[%s24004_s30 + $0x454] sm:$0xf0] }
 0x11c   :  { %2778 = vmatpush.bf16.msrb.mxu2 %v11780_v23  ;;  %2728 = vmatmul.bf16.vlgmr.msrb.gmra.mxu3 %v17524_v37  ;;  %v12785_v23 = vld [vmem:[%s24004_s30 + $0xa04] sm:$0xf0]  ;;  %v12060_v45 = vor.u32 %v15941_v28, %v12057_v29  ;;  %v15983_v29 = vld [vmem:[%s24004_s30 + $0x58c] sm:$0xf] }
 0x11d   :  { %2785 = vmatpush.bf16.msra.mxu3 %v12172_v12  ;;  %v12816_v12 = vor.u32 %v16130_v62, %v12813_v63  ;;  %v12788_v32 = vor.u32 %v16123_v22, %v12785_v23  ;;  %v12505_v62 = vld [vmem:[%s24004_s30 + $0x7d4] sm:$0xf0]  ;;  %v16109_v63 = vld [vmem:[%s24004_s30 + $0x97c] sm:$0xf]  ;;  %v12256_v22 = vor.u32 %v15990_v6, %v12253_v7  ;;  %v12477_v23 = vld [vmem:[%s24004_s30 + $0x79c] sm:$0xf0] }
 0x11e   :  { %2766 = vmatpush.bf16.msrb.mxu0 %v11528_v50  ;;  %2741 = vmatmul.bf16.vlgmr.msra.gmra.mxu1 %v17535_v42  ;;  %v12281_v50 = vld [vmem:[%s24004_s30 + $0x614] sm:$0xf0]  ;;  %v15917_v6 = vld [vmem:[%s24004_s30 + $0x378] sm:$0xf0] }
 0x11f   :  { %2798 = vmatpush.bf16.msrb.mxu1 %v12396_v34  ;;  %v12533_v34 = vld [vmem:[%s24004_s30 + $0x80c] sm:$0xf0]  ;;  %v12284_v59 = vor.u32 %v15997_v47, %v12281_v50  ;;  %v2508_v18 = vpop.f32.mrf.mxu3 }
 0x120   :  { %2779 = vmatpush.bf16.msrb.mxu2 %v11752_v51  ;;  %v15934_v51 = vld [vmem:[%s24004_s30 + $0x404] sm:$0xf]  ;;  %v2521_v53 = vpop.f32.mrf.mxu0  ;;  %v12869_v47 = vld [vmem:[%s24004_s30 + $0xaac] sm:$0xf0] }
 0x121   :  { %2786 = vmatpush.bf16.msra.mxu3 %v12144_v44  ;;  %2767 = vmatmul.bf16.vlgmr.msrb.gmra.mxu0 %v17330_v2  ;;  %v524_v44 = vperm.slane %v18834_v30, 2  ;;  %v12032_v4 = vor.u32 %v15934_v51, %v12029_v52 }
 0x122   :  { %2811 = vmatpush.bf16.msra.mxu0 %v12620_v54  ;;  %v12536_v54 = vor.u32 %v16060_v33, %v12533_v34  ;;  %v11973_v33 = vld [vmem:[%s24004_s30 + $0x3ac] sm:$0xf0]  ;;  %v2534_v51 = vpop.f32.mrf.mxu2 }
 0x123   :  { %2799 = vmatpush.bf16.msrb.mxu1 %v12368_v58  ;;  %2780 = vmatmul.bf16.vlgmr.msrb.gmra.mxu2 %v17360_v16  ;;  %v2495_v58 = vpop.f32.mrf.mxu1 }
 0x124   :  { %2824 = vmatpush.bf16.msra.mxu2 %v12844_v55  ;;  %v12760_v55 = vor.u32 %v16116_v38, %v12757_v39  ;;  %v2496_v3 = vadd.f32 %v2495_v58, %v524_v44  ;;  %v16039_v44 = vld [vmem:[%s24004_s30 + $0x74c] sm:$0xf] }
 0x125   :  { %2787 = vmatpush.bf16.msra.mxu3 %v12116_v1  ;;  %v12729_v1 = vld [vmem:[%s24004_s30 + $0x994] sm:$0xf0] }
 0x126   :  { %2812 = vmatpush.bf16.msra.mxu0 %v12592_v10  ;;  %v12001_v10 = vld [vmem:[%s24004_s30 + $0x3e4] sm:$0xf0]  ;;  %v12732_v13 = vor.u32 %v16109_v63, %v12729_v1  ;;  %v2509_v27 = vadd.f32 %v2508_v18, %v2496_v3  ;;  %v11727_v63 = vld [vmem:[%s24004_s30 + $0x1a0] sm:$0xf]  ;;  %v15861_v3 = vld [vmem:[%s24004_s30 + $0x1b8] sm:$0xf0] }
 0x127   :  { %2800 = vmatpush.bf16.msrb.mxu1 %v12340_v14  ;;  %v16046_v14 = vld [vmem:[%s24004_s30 + $0x784] sm:$0xf]  ;;  %v12004_v28 = vor.u32 %v15927_v8, %v12001_v10  ;;  %v16032_v10 = vld [vmem:[%s24004_s30 + $0x714] sm:$0xf] }
 0x128   :  { %2825 = vmatpush.bf16.msra.mxu2 %v12816_v12  ;;  %v12508_v12 = vor.u32 %v16053_v57, %v12505_v62  ;;  %v2523_v34 = vpop.f32.mrf.mxu0  ;;  %v12480_v38 = vor.u32 %v16046_v14, %v12477_v23  ;;  %v12197_v62 = vld [vmem:[%s24004_s30 + $0x56c] sm:$0xf0]  ;;  %v2510_v14 = vpop.f32.mrf.mxu3  ;;  %v12175_v23 = vld [vmem:[%s24004_s30 + $0x520] sm:$0xf] }
 0x129   :  { %2788 = vmatpush.bf16.msra.mxu3 %v12088_v24  ;;  %v16102_v24 = vld [vmem:[%s24004_s30 + $0x944] sm:$0xf]  ;;  %v15840_v14 = vld [vmem:[%s24004_s30 + $0x110] sm:$0xf0] }
 0x12a   :  { %2813 = vmatpush.bf16.msra.mxu0 %v12564_v31  ;;  %v12225_v31 = vld [vmem:[%s24004_s30 + $0x5a4] sm:$0xf0]  ;;  %v12704_v39 = vor.u32 %v16102_v24, %v12701_v25  ;;  %v15973_v24 = vld [vmem:[%s24004_s30 + $0x538] sm:$0xf0]  ;;  %v11728_v25 = vor.u32 %v15861_v3, %v11727_v63  ;;  %v15910_v34 = vld [vmem:[%s24004_s30 + $0x340] sm:$0xf0] }
 0x12b   :  { %2801 = vmatpush.bf16.msrb.mxu1 %v12312_v35  ;;  %v2522_v35 = vadd.f32 %v2521_v53, %v2509_v27  ;;  %v2497_v50 = vpop.f32.mrf.mxu1  ;;  %v12228_v52 = vor.u32 %v15983_v29, %v12225_v31  ;;  %v12449_v53 = vld [vmem:[%s24004_s30 + $0x764] sm:$0xf0]  ;;  %v16029_v29 = vld [vmem:[%s24004_s30 + $0x6f8] sm:$0xf0]  ;;  %v15903_v63 = vld [vmem:[%s24004_s30 + $0x308] sm:$0xf0] }
 0x12c   :  { %2826 = vmatpush.bf16.msra.mxu2 %v12788_v32  ;;  %v15920_v32 = vld [vmem:[%s24004_s30 + $0x394] sm:$0xf]  ;;  %v12452_v7 = vor.u32 %v16039_v44, %v12449_v53  ;;  %v11699_v31 = vld [vmem:[%s24004_s30 + $0x168] sm:$0xf]  ;;  %v2536_v44 = vpop.f32.mrf.mxu2 }
 0x12d   :  { %2789 = vmatpush.bf16.msra.mxu3 %v12060_v45  ;;  %v16144_v45 = vld [vmem:[%s24004_s30 + $0xa94] sm:$0xf]  ;;  %v18927_v57 = vadd.f32 %v2534_v51, %v2522_v35  ;;  %v11976_v58 = vor.u32 %v15920_v32, %v11973_v33  ;;  %v15854_v32 = vld [vmem:[%s24004_s30 + $0x180] sm:$0xf0]  ;;  %v11923_v33 = vld [vmem:[%s24004_s30 + $0x328] sm:$0xf] }
 0x12e   :  { %2814 = vmatpush.bf16.msra.mxu0 %v12536_v54  ;;  %v16095_v54 = vld [vmem:[%s24004_s30 + $0x90c] sm:$0xf]  ;;  %v12872_v1 = vor.u32 %v16144_v45, %v12869_v47  ;;  %v12176_v45 = vor.u32 %v15973_v24, %v12175_v23  ;;  %v12147_v50 = vld [vmem:[%s24004_s30 + $0x4e8] sm:$0xf]  ;;  %v15966_v51 = vld [vmem:[%s24004_s30 + $0x500] sm:$0xf0]  ;;  %v11924_v53 = vor.u32 %v15910_v34, %v11923_v33 }
 0x12f   :  { %2802 = vmatpush.bf16.msrb.mxu1 %v12284_v59  ;;  %v15976_v59 = vld [vmem:[%s24004_s30 + $0x554] sm:$0xf]  ;;  %v522_v24 = vperm.slane %v18834_v30, 0  ;;  %v12091_v33 = vld [vmem:[%s24004_s30 + $0x478] sm:$0xf] }
 0x130   :  { %2827 = vmatpush.bf16.msra.mxu2 %v12760_v55  ;;  %v12673_v55 = vld [vmem:[%s24004_s30 + $0x924] sm:$0xf0]  ;;  %v12200_v18 = vor.u32 %v15976_v59, %v12197_v62  ;;  %v18983_v35 = vpop.f32.mrf.mxu0  ;;  %v15847_v59 = vld [vmem:[%s24004_s30 + $0x148] sm:$0xf0]  ;;  %v11895_v62 = vld [vmem:[%s24004_s30 + $0x2f0] sm:$0xf] }
 0x131   :  { %2790 = vmatpush.bf16.msra.mxu3 %v12032_v4  ;;  %v11951_v4 = vld [vmem:[%s24004_s30 + $0x360] sm:$0xf]  ;;  %v12676_v8 = vor.u32 %v16095_v54, %v12673_v55  ;;  %v12371_v54 = vld [vmem:[%s24004_s30 + $0x6a8] sm:$0xf]  ;;  %v16022_v55 = vld [vmem:[%s24004_s30 + $0x6c0] sm:$0xf0] }
 0x132   :  { %2815 = vmatpush.bf16.msra.mxu0 %v12508_v12  ;;  %v12421_v12 = vld [vmem:[%s24004_s30 + $0x72c] sm:$0xf0]  ;;  %v11952_v27 = vor.u32 %v15917_v6, %v11951_v4  ;;  %v12372_v3 = vor.u32 %v16022_v55, %v12371_v54  ;;  %v15959_v6 = vld [vmem:[%s24004_s30 + $0x4c8] sm:$0xf0]  ;;  %v15952_v34 = vld [vmem:[%s24004_s30 + $0x490] sm:$0xf0] }
 0x133   :  { %2803 = vmatpush.bf16.msrb.mxu1 %v12256_v22  ;;  %v12645_v22 = vld [vmem:[%s24004_s30 + $0x8ec] sm:$0xf0]  ;;  %v15833_v44 = vld [vmem:[%s24004_s30 + $0xd8] sm:$0xf0]  ;;  %v12063_v55 = vld [vmem:[%s24004_s30 + $0x440] sm:$0xf] }
 0x134   :  { %2828 = vmatpush.bf16.msra.mxu2 %v12732_v13  ;;  %v16088_v13 = vld [vmem:[%s24004_s30 + $0x8d4] sm:$0xf]  ;;  %v12119_v4 = vld [vmem:[%s24004_s30 + $0x4b0] sm:$0xf] }
 0x135   :  { %2791 = vmatpush.bf16.msra.mxu3 %v12004_v28  ;;  %v12399_v28 = vld [vmem:[%s24004_s30 + $0x6e0] sm:$0xf] }
 0x136   :  { %2816 = vmatpush.bf16.msra.mxu0 %v12480_v38  ;;  %v12424_v38 = vor.u32 %v16032_v10, %v12421_v12  ;;  %v12400_v47 = vor.u32 %v16029_v29, %v12399_v28  ;;  %v12343_v10 = vld [vmem:[%s24004_s30 + $0x670] sm:$0xf]  ;;  %v16015_v12 = vld [vmem:[%s24004_s30 + $0x688] sm:$0xf0] }
 0x137   :  { %2804 = vmatpush.bf16.msrb.mxu1 %v12228_v52  ;;  %v11700_v52 = vor.u32 %v15854_v32, %v11699_v31  ;;  %v12344_v28 = vor.u32 %v16015_v12, %v12343_v10 }
 0x138   :  { %2829 = vmatpush.bf16.msra.mxu2 %v12704_v39  ;;  %v12648_v39 = vor.u32 %v16088_v13, %v12645_v22  ;;  %v11643_v13 = vld [vmem:[%s24004_s30 + $0xf8] sm:$0xf]  ;;  %v15896_v22 = vld [vmem:[%s24004_s30 + $0x2d0] sm:$0xf0]  ;;  %v2575_v23 = vpop.f32.mrf.mxu0 }
 0x139   :  { %2792 = vmatpush.bf16.msra.mxu3 %v11976_v58  ;;  %v11671_v58 = vld [vmem:[%s24004_s30 + $0x130] sm:$0xf]  ;;  %v11644_v31 = vor.u32 %v15840_v14, %v11643_v13  ;;  %v12035_v23 = vld [vmem:[%s24004_s30 + $0x408] sm:$0xf] }
 0x13a   :  { %2817 = vmatpush.bf16.msra.mxu0 %v12452_v7  ;;  %v11672_v7 = vor.u32 %v15847_v59, %v11671_v58  ;;  %v15945_v58 = vld [vmem:[%s24004_s30 + $0x458] sm:$0xf0] }
 0x13b   :  { %2805 = vmatpush.bf16.msrb.mxu1 %v12200_v18  ;;  %v11867_v18 = vld [vmem:[%s24004_s30 + $0x2b8] sm:$0xf]  ;;  %v12064_v12 = vor.u32 %v15945_v58, %v12063_v55  ;;  %v12623_v55 = vld [vmem:[%s24004_s30 + $0x8a0] sm:$0xf]  ;;  %v16085_v58 = vld [vmem:[%s24004_s30 + $0x8b8] sm:$0xf0] }
 0x13c   :  { %2830 = vmatpush.bf16.msra.mxu2 %v12676_v8  ;;  %2793 = vmatmul.bf16.vlgmr.msra.gmra.mxu3 %v17316_v56  ;;  %v11896_v8 = vor.u32 %v15903_v63, %v11895_v62  ;;  %v11868_v32 = vor.u32 %v15896_v22, %v11867_v18  ;;  %v16001_v62 = vld [vmem:[%s24004_s30 + $0x618] sm:$0xf0]  ;;  %v11587_v63 = vld [vmem:[%s24004_s30 + $0x88] sm:$0xf] }
 0x13d   :  { %2844 = vmatpush.bf16.msrb.mxu3 %v12872_v1  ;;  %v12148_v1 = vor.u32 %v15966_v51, %v12147_v50  ;;  %v2314_v50 = vadd.f32 %v18217_v49, %v522_v24  ;;  %v523_v51 = vperm.slane %v18834_v30, 1  ;;  %v12287_v49 = vld [vmem:[%s24004_s30 + $0x600] sm:$0xf]  ;;  %v12259_v24 = vld [vmem:[%s24004_s30 + $0x5c8] sm:$0xf] }
 0x13e   :  { %2818 = vmatpush.bf16.msra.mxu0 %v12424_v38  ;;  %2806 = vmatmul.bf16.vlgmr.msrb.gmra.mxu1 %v17384_v26  ;;  %v12315_v38 = vld [vmem:[%s24004_s30 + $0x638] sm:$0xf]  ;;  %v12288_v18 = vor.u32 %v16001_v62, %v12287_v49 }
 0x13f   :  { %2850 = vmatpush.bf16.msra.mxu1 %v11728_v25  ;;  %v2547_v25 = vpop.f32.mrf.mxu1  ;;  %v2405_v14 = vadd.f32 %v18471_v19, %v523_v51  ;;  %v15812_v51 = vld [vmem:[%s24004_s30 + $0x30] sm:$0xf0] }
 0x140   :  { %2831 = vmatpush.bf16.msra.mxu2 %v12648_v39  ;;  %v2548_v29 = vadd.f32 %v2547_v25, %v18927_v57  ;;  %v16008_v57 = vld [vmem:[%s24004_s30 + $0x650] sm:$0xf0]  ;;  %v11615_v39 = vld [vmem:[%s24004_s30 + $0xc0] sm:$0xf] }
 0x141   :  { %2863 = vmatpush.bf16.msra.mxu3 %v11952_v27  ;;  %2819 = vmatmul.bf16.vlgmr.msra.gmra.mxu0 %v17524_v37  ;;  %v12120_v27 = vor.u32 %v15959_v6, %v12119_v4  ;;  %v11616_v54 = vor.u32 %v15833_v44, %v11615_v39  ;;  %v2560_v4 = vpop.f32.mrf.mxu3  ;;  %v11811_v6 = vld [vmem:[%s24004_s30 + $0x248] sm:$0xf] }
 0x142   :  { %2876 = vmatpush.bf16.msrb.mxu0 %v12176_v45  ;;  %v11839_v45 = vld [vmem:[%s24004_s30 + $0x280] sm:$0xf]  ;;  %v2561_v10 = vadd.f32 %v2560_v4, %v2548_v29  ;;  %v15819_v29 = vld [vmem:[%s24004_s30 + $0x68] sm:$0xf0] }
 0x143   :  { %2851 = vmatpush.bf16.msra.mxu1 %v11700_v52  ;;  %2832 = vmatmul.bf16.vlgmr.msra.gmra.mxu2 %v17535_v42  ;;  %v12092_v52 = vor.u32 %v15952_v34, %v12091_v33 }
 0x144   :  { %2889 = vmatpush.bf16.msrb.mxu2 %v12400_v47  ;;  %v15889_v47 = vld [vmem:[%s24004_s30 + $0x298] sm:$0xf0]  ;;  %v19105_v25 = vadd.f32 %v18983_v35, %v2561_v10  ;;  %v11783_v35 = vld [vmem:[%s24004_s30 + $0x210] sm:$0xf]  ;;  %v12203_v10 = vld [vmem:[%s24004_s30 + $0x558] sm:$0xf] }
 0x145   :  { %2864 = vmatpush.bf16.msra.mxu3 %v11924_v53  ;;  %v12316_v53 = vor.u32 %v16008_v57, %v12315_v38  ;;  %v11840_v59 = vor.u32 %v15889_v47, %v11839_v45  ;;  %v12007_v38 = vld [vmem:[%s24004_s30 + $0x3d0] sm:$0xf]  ;;  %v2418_v57 = vadd.f32 %v18548_v11, %v2405_v14  ;;  %v15931_v45 = vld [vmem:[%s24004_s30 + $0x3e8] sm:$0xf0]  ;;  %v11531_v11 = vld [vmem:[%s24004_s30 + $0x18] sm:$0xf] }
 0x146   :  { %2877 = vmatpush.bf16.msrb.mxu0 %v12148_v1  ;;  %v15826_v1 = vld [vmem:[%s24004_s30 + $0xa0] sm:$0xf0]  ;;  %v15987_v47 = vld [vmem:[%s24004_s30 + $0x5a8] sm:$0xf0]  ;;  %v12008_v62 = vor.u32 %v15931_v45, %v12007_v38  ;;  %v12875_v14 = vld [vmem:[%s24004_s30 + $0xa98] sm:$0xf] }
 0x147   :  { %2852 = vmatpush.bf16.msra.mxu1 %v11672_v7  ;;  %v15882_v7 = vld [vmem:[%s24004_s30 + $0x260] sm:$0xf0]  ;;  %v2549_v13 = vpop.f32.mrf.mxu1  ;;  %v11588_v22 = vor.u32 %v15826_v1, %v11587_v63  ;;  %v12847_v63 = vld [vmem:[%s24004_s30 + $0xa60] sm:$0xf]  ;;  %v16141_v1 = vld [vmem:[%s24004_s30 + $0xa78] sm:$0xf0]  ;;  %v2431_v4 = vadd.f32 %v18623_v60, %v2418_v57 }
 0x148   :  { %2890 = vmatpush.bf16.msrb.mxu2 %v12372_v3  ;;  %v19083_v3 = vpop.f32.mrf.mxu0  ;;  %v11812_v19 = vor.u32 %v15882_v7, %v11811_v6  ;;  %v11532_v7 = vor.u32 %v15812_v51, %v11531_v11  ;;  %v12624_v13 = vor.u32 %v16085_v58, %v12623_v55  ;;  %v15980_v60 = vld [vmem:[%s24004_s30 + $0x570] sm:$0xf0]  ;;  %v12567_v57 = vld [vmem:[%s24004_s30 + $0x830] sm:$0xf]  ;;  %v12539_v11 = vld [vmem:[%s24004_s30 + $0x7f8] sm:$0xf] }
 0x149   :  { %2865 = vmatpush.bf16.msra.mxu3 %v11896_v8  ;;  %v2327_v8 = vadd.f32 %v18243_v0, %v2314_v50  ;;  %v15938_v0 = vld [vmem:[%s24004_s30 + $0x420] sm:$0xf0]  ;;  %v2562_v49 = vpop.f32.mrf.mxu3  ;;  %v16064_v51 = vld [vmem:[%s24004_s30 + $0x810] sm:$0xf0] }
 0x14a   :  { %2878 = vmatpush.bf16.msrb.mxu0 %v12120_v27  ;;  %v15994_v27 = vld [vmem:[%s24004_s30 + $0x5e0] sm:$0xf0]  ;;  %v12036_v34 = vor.u32 %v15938_v0, %v12035_v23  ;;  %v12848_v23 = vor.u32 %v16141_v1, %v12847_v63  ;;  %v12595_v0 = vld [vmem:[%s24004_s30 + $0x868] sm:$0xf]  ;;  %v12735_v1 = vld [vmem:[%s24004_s30 + $0x980] sm:$0xf] }
 0x14b   :  { %2853 = vmatpush.bf16.msra.mxu1 %v11644_v31  ;;  %v19116_v31 = vpop.f32.mrf.mxu2  ;;  %v2340_v33 = vadd.f32 %v18257_v9, %v2327_v8  ;;  %v12260_v39 = vor.u32 %v15994_v27, %v12259_v24  ;;  %v12231_v9 = vld [vmem:[%s24004_s30 + $0x590] sm:$0xf]  ;;  %v15924_v8 = vld [vmem:[%s24004_s30 + $0x3b0] sm:$0xf0]  ;;  %v16078_v24 = vld [vmem:[%s24004_s30 + $0x880] sm:$0xf0] }
 0x14c   :  { %2891 = vmatpush.bf16.msrb.mxu2 %v12344_v28  ;;  %12882 = vmatmul.msk.bf16.vlgmr.msrb.gmra.mxu3 %vm2300_vm0, %v17492_v15  ;;  %v11559_v28 = vld [vmem:[%s24004_s30 + $0x50] sm:$0xf]  ;;  %v12232_v6 = vor.u32 %v15987_v47, %v12231_v9  ;;  %v19262_v49 = vld [vmem:[%s24011_s24 + $0x60] sm:$0xff] }
 0x14d   :  { %2866 = vmatpush.bf16.msra.mxu3 %v11868_v32  ;;  %v15875_v32 = vld [vmem:[%s24004_s30 + $0x228] sm:$0xf0]  ;;  %v11560_v44 = vor.u32 %v15819_v29, %v11559_v28  ;;  %v12819_v28 = vld [vmem:[%s24004_s30 + $0xa28] sm:$0xf]  ;;  %v16134_v29 = vld [vmem:[%s24004_s30 + $0xa40] sm:$0xf0] }
 0x14e   :  { %2879 = vmatpush.bf16.msrb.mxu0 %v12092_v52  ;;  %v11784_v50 = vor.u32 %v15875_v32, %v11783_v35  ;;  %v11755_v52 = vld [vmem:[%s24004_s30 + $0x1d8] sm:$0xf]  ;;  %v2444_v35 = vadd.f32 %v18649_v21, %v2431_v4  ;;  %v12204_v32 = vor.u32 %v15980_v60, %v12203_v10  ;;  %v12820_v38 = vor.u32 %v16134_v29, %v12819_v28  ;;  %v16071_v21 = vld [vmem:[%s24004_s30 + $0x848] sm:$0xf0]  ;;  %v19219_v47 = vld [vmem:[%s24011_s24 + $0x70] sm:$0xff] }
 0x14f   :  { %2854 = vmatpush.bf16.msra.mxu1 %v11616_v54  ;;  %v15868_v54 = vld [vmem:[%s24004_s30 + $0x1f0] sm:$0xf0]  ;;  %v19288_v63 = vld [vmem:[%s24011_s24 + $0xe0] sm:$0xff]  ;;  %v16113_v4 = vld [vmem:[%s24004_s30 + $0x998] sm:$0xf0] }
 0x150   :  { %2892 = vmatpush.bf16.msrb.mxu2 %v12316_v53  ;;  %v2601_v53 = vpop.f32.mrf.mxu0  ;;  %v2457_v9 = vadd.f32 %v18675_v36, %v2444_v35  ;;  %v19312_v10 = vld [vmem:[%s24011_s24 + $0xd8] sm:$0xff]  ;;  %v16050_v60 = vld [vmem:[%s24004_s30 + $0x7a0] sm:$0xf0] }
 0x151   :  { %2867 = vmatpush.bf16.msra.mxu3 %v11840_v59  ;;  %v2353_v59 = vadd.f32 %v18313_v43, %v2340_v33  ;;  %v11979_v43 = vld [vmem:[%s24004_s30 + $0x398] sm:$0xf]  ;;  %v16120_v53 = vld [vmem:[%s24004_s30 + $0x9d0] sm:$0xf0]  ;;  %v19346_v28 = vld [vmem:[%s24011_s24 + $0x40] sm:$0xff] }
 0x152   :  { %2880 = vmatpush.bf16.msrb.mxu0 %v12064_v12  ;;  %v11756_v12 = vor.u32 %v15868_v54, %v11755_v52  ;;  %v11980_v27 = vor.u32 %v15924_v8, %v11979_v43  ;;  %v12763_v52 = vld [vmem:[%s24004_s30 + $0x9b8] sm:$0xf]  ;;  %v2470_v55 = vadd.f32 %v18680_v40, %v2457_v9  ;;  %v19305_v43 = vld [vmem:[%s24011_s24 + $0x50] sm:$0xff]  ;;  %v16099_v9 = vld [vmem:[%s24004_s30 + $0x928] sm:$0xf0] }
 0x153   :  { %2855 = vmatpush.bf16.msra.mxu1 %v11588_v22  ;;  %v2588_v22 = vpop.f32.mrf.mxu2  ;;  %v19276_v40 = vld [vmem:[%s24011_s24 + $0x58] sm:$0xff] }
 0x154   :  { %2893 = vmatpush.bf16.msrb.mxu2 %v12288_v18  ;;  %v16148_v18 = vld [vmem:[%s24004_s30 + $0xab0] sm:$0xf0] }
 0x155   :  { %2868 = vmatpush.bf16.msra.mxu3 %v11812_v19  ;;  %v2366_v19 = vadd.f32 %v18409_v41, %v2353_v59  ;;  %v12876_v33 = vor.u32 %v16148_v18, %v12875_v14  ;;  %v19199_v41 = vld [vmem:[%s24011_s24 + $0x78] sm:$0xff]  ;;  %v525_v59 = vperm.slane %v18834_v30, 3  ;;  %v12511_v30 = vld [vmem:[%s24004_s30 + $0x7c0] sm:$0xf]  ;;  %v19330_v22 = vld [vmem:[%s24011_s24 + $0xd0] sm:$0xff] }
 0x156   :  { %2881 = vmatpush.bf16.msrb.mxu0 %v12036_v34  ;;  %v12596_v34 = vor.u32 %v16078_v24, %v12595_v0  ;;  %v12707_v0 = vld [vmem:[%s24004_s30 + $0x948] sm:$0xf]  ;;  %v16106_v24 = vld [vmem:[%s24004_s30 + $0x960] sm:$0xf0] }
 0x157   :  { %2856 = vmatpush.bf16.msra.mxu1 %v11560_v44  ;;  %v16127_v44 = vld [vmem:[%s24004_s30 + $0xa08] sm:$0xf0]  ;;  %v2379_v45 = vadd.f32 %v18417_v46, %v2366_v19  ;;  %v19257_v58 = vpop.f32.mrf.mxu1  ;;  %v2587_v8 = vadd.f32 %v19116_v31, %v525_v59  ;;  %v12483_v31 = vld [vmem:[%s24004_s30 + $0x788] sm:$0xf] }
 0x158   :  { %2894 = vmatpush.bf16.msrb.mxu2 %v12260_v39  ;;  %v12791_v39 = vld [vmem:[%s24004_s30 + $0x9f0] sm:$0xf]  ;;  %v19231_v46 = vld [vmem:[%s24011_s24 + $0x68] sm:$0xff] }
 0x159   :  { %2869 = vmatpush.bf16.msra.mxu3 %v11784_v50  ;;  %v19224_v50 = vld [vmem:[%s24011_s24 + $0xf8] sm:$0xff]  ;;  %v12792_v36 = vor.u32 %v16127_v44, %v12791_v39  ;;  %v19253_v54 = vadd.f32 %v18419_v48, %v2379_v45  ;;  %v19270_v48 = vld [vmem:[%s24011_s24 + $0xe8] sm:$0xff]  ;;  %v2600_v29 = vadd.f32 %v19083_v3, %v2587_v8  ;;  %v12455_v3 = vld [vmem:[%s24004_s30 + $0x750] sm:$0xf] }
 0x15a   :  { %2882 = vmatpush.bf16.msrb.mxu0 %v12008_v62  ;;  %v16057_v62 = vld [vmem:[%s24004_s30 + $0x7d8] sm:$0xf0]  ;;  %v19371_v44 = vld [vmem:[%s24011_s24 + $0xc0] sm:$0xff]  ;;  %v12679_v45 = vld [vmem:[%s24004_s30 + $0x910] sm:$0xf] }
 0x15b   :  { %2857 = vmatpush.bf16.msra.mxu1 %v11532_v7  ;;  %v19299_v7 = vadd.f32 %v18738_v20, %v2470_v55  ;;  %v19318_v20 = vld [vmem:[%s24011_s24 + $0x48] sm:$0xff]  ;;  %v12427_v55 = vld [vmem:[%s24004_s30 + $0x718] sm:$0xf] }
 0x15c   :  { %2895 = vmatpush.bf16.msrb.mxu2 %v12232_v6  ;;  %v2942_v6 = vsel %vm2941_vm1, %v19253_v54, 0.0 }
 0x15d   :  { %2870 = vmatpush.bf16.msra.mxu3 %v11756_v12  ;;  %v12512_v12 = vor.u32 %v16057_v62, %v12511_v30  ;;  %v2943_v14 = vrot.slane %v2942_v6, 4  ;;  %v2949_v19 = vsel %vm2941_vm1, %v19299_v7, 0.0  ;;  %v12651_v30 = vld [vmem:[%s24004_s30 + $0x8d8] sm:$0xf]  ;;  %v16092_v62 = vld [vmem:[%s24004_s30 + $0x8f0] sm:$0xf0] }
 0x15e   :  { %2883 = vmatpush.bf16.msrb.mxu0 %v11980_v27  ;;  %2858 = vmatmul.bf16.vlgmr.msra.gmra.mxu1 %v17330_v2  ;;  %v12568_v2 = vor.u32 %v16071_v21, %v12567_v57  ;;  %v16043_v57 = vld [vmem:[%s24004_s30 + $0x768] sm:$0xf0]  ;;  %v2950_v39 = vrot.slane %v2949_v19, 4 }
 0x15f   :  { %2902 = vmatpush.bf16.msrb.mxu1 %v12624_v13  ;;  %v12736_v13 = vor.u32 %v16113_v4, %v12735_v1  ;;  %v2625_v18 = vpop.f32.mrf.mxu3  ;;  %v2614_v27 = vpop.f32.mrf.mxu1  ;;  %v2944_v21 = vadd.f32 %v2943_v14, %v2942_v6  ;;  %v19422_v6 = vld [vmem:[%s24011_s24 + $0x20] sm:$0xff]  ;;  %v12652_v14 = vor.u32 %v16092_v62, %v12651_v30  ;;  %v19533_v30 = vld [vmem:[%s24011_s24 + $0x278] sm:$0xff] }
 0x160   :  { %2896 = vmatpush.bf16.msrb.mxu2 %v12204_v32  ;;  %2871 = vmatmul.bf16.vlgmr.msra.gmra.mxu3 %v17360_v16  ;;  %v12540_v16 = vor.u32 %v16064_v51, %v12539_v11  ;;  %v19353_v32 = vld [vmem:[%s24011_s24 + $0xc8] sm:$0xff]  ;;  %v19390_v11 = vld [vmem:[%s24011_s24 + $0xb8] sm:$0xff]  ;;  %v12456_v51 = vor.u32 %v16043_v57, %v12455_v3  ;;  %24018 = vst [vmem:[#allocation14_spill] sm:$0xff] %v19533_v30  ;;  %v19539_v62 = vld [vmem:[%s24011_s24 + $0x80] sm:$0xff] }
 0x161   :  { %2915 = vmatpush.bf16.msrb.mxu3 %v12848_v23  ;;  %2884 = vmatmul.bf16.vlgmr.msrb.gmra.mxu0 %v17316_v56  ;;  %v19244_v56 = vld [vmem:[%s24011_s24 + $0xf0] sm:$0xff]  ;;  %v19332_v23 = vpop.f32.mrf.mxu0  ;;  %v2945_v59 = vrot.slane %v2944_v21, 2  ;;  %v19451_v27 = vld [vmem:[%s24011_s24 + $0x178] sm:$0xff] }
 0x162   :  { %2935 = vmatpush.bf16.msra.mxu0 %v12876_v33  ;;  %v2638_v35 = vpop.f32.mrf.mxu2  ;;  %v12484_v33 = vor.u32 %v16050_v60, %v12483_v31  ;;  %v19434_v60 = vld [vmem:[%s24011_s24 + $0x18] sm:$0xff] }
 0x163   :  { %2903 = vmatpush.bf16.msrb.mxu1 %v12596_v34  ;;  %2897 = vmatmul.bf16.vlgmr.msrb.gmra.mxu2 %v17384_v26  ;;  %v12764_v26 = vor.u32 %v16120_v53, %v12763_v52  ;;  %v19359_v34 = vld [vmem:[%s24011_s24 + $0x38] sm:$0xff]  ;;  %v19396_v52 = vld [vmem:[%s24011_s24 + $0x28] sm:$0xff]  ;;  %v12680_v53 = vor.u32 %v16099_v9, %v12679_v45  ;;  %v19487_v45 = vld [vmem:[%s24011_s24 + $0x90] sm:$0xff] }
 0x164   :  { %3149 = vmatpush.msra.mxu2 %v19199_v41 }
 0x165   :  { %2916 = vmatpush.bf16.msrb.mxu3 %v12820_v38  ;;  %v12708_v38 = vor.u32 %v16106_v24, %v12707_v0  ;;  %v19440_v24 = vld [vmem:[%s24011_s24 + $0xa0] sm:$0xff] }
 0x166   :  { %3150 = vmatpush.msra.mxu2 %v19219_v47  ;;  %3169 = vmatpush.msrb.mxu0 %v19224_v50 }
 0x167   :  { %2904 = vmatpush.bf16.msrb.mxu1 %v12568_v2  ;;  %v19383_v2 = vld [vmem:[%s24011_s24 + $0x30] sm:$0xff]  ;;  %v2627_v1 = vpop.f32.mrf.mxu3 }
 0x168   :  { %3151 = vmatpush.msra.mxu2 %v19231_v46  ;;  %3170 = vmatpush.msrb.mxu0 %v19244_v56  ;;  %v19544_v1 = vld [vmem:[%s24011_s24 + $0x158] sm:$0xff] }
 0x169   :  { %2917 = vmatpush.bf16.msrb.mxu3 %v12792_v36  ;;  %v2613_v36 = vadd.f32 %v19257_v58, %v2600_v29  ;;  %v16036_v58 = vld [vmem:[%s24004_s30 + $0x730] sm:$0xf0]  ;;  %v2653_v4 = vpop.f32.mrf.mxu0  ;;  %s24083_s30 = sld [smem:[#allocation47_spill]] }
 0x16a   :  { %3152 = vmatpush.msra.mxu2 %v19262_v49  ;;  %3171 = vmatpush.msrb.mxu0 %v19270_v48  ;;  %v2640_v31 = vpop.f32.mrf.mxu2  ;;  %v2956_v4 = vsel %vm2941_vm1, %v19105_v25, 0.0 }
 0x16b   :  { %2905 = vmatpush.bf16.msrb.mxu1 %v12540_v16  ;;  %v2951_v16 = vadd.f32 %v2950_v39, %v2949_v19  ;;  %v2626_v8 = vadd.f32 %v2625_v18, %v2613_v36  ;;  %v2946_v18 = vadd.f32 %v2945_v59, %v2944_v21  ;;  %v19446_v19 = vld [vmem:[%s24011_s24 + $0x10] sm:$0xff]  ;;  %v19521_v59 = vld [vmem:[%s24011_s24 + $0x160] sm:$0xff] }
 0x16c   :  { %3153 = vmatpush.msra.mxu2 %v19276_v40  ;;  %3172 = vmatpush.msrb.mxu0 %v19288_v63  ;;  %v19475_v21 = vld [vmem:[%s24011_s24 + $0x170] sm:$0xff] }
 0x16d   :  { %2918 = vmatpush.bf16.msrb.mxu3 %v12764_v26  ;;  %v19410_v26 = vld [vmem:[%s24011_s24 + $0xb0] sm:$0xff]  ;;  %v2952_v0 = vrot.slane %v2951_v16, 2  ;;  %v2639_v29 = vadd.f32 %v2638_v35, %v2626_v8  ;;  %v2947_v3 = vrot.slane %v2946_v18, 1  ;;  %v19470_v35 = vld [vmem:[%s24011_s24 + $0x8] sm:$0xff] }
 0x16e   :  { %3154 = vmatpush.msra.mxu2 %v19305_v43  ;;  %3173 = vmatpush.msrb.mxu0 %v19312_v10  ;;  %v19482_v39 = vld [vmem:[%s24011_s24 + $0x1f0] sm:$0xff] }
 0x16f   :  { %2906 = vmatpush.bf16.msrb.mxu1 %v12512_v12  ;;  %v19428_v12 = vld [vmem:[%s24011_s24 + $0xa8] sm:$0xff]  ;;  %v2953_v57 = vadd.f32 %v2952_v0, %v2951_v16  ;;  %24013 = vst [vmem:[#allocation9_spill] sm:$0xff] %v19482_v39  ;;  %v2652_v36 = vadd.f32 %v19332_v23, %v2639_v29  ;;  %v19528_v16 = vld [vmem:[%s24011_s24 + $0x1e0] sm:$0xff]  ;;  %v19562_v31 = vld [vmem:[%s24011_s24 + $0x150] sm:$0xff]  ;;  %v2957_v29 = vrot.slane %v2956_v4, 4 }
 0x170   :  { %3155 = vmatpush.msra.mxu2 %v19318_v20  ;;  %3174 = vmatpush.msrb.mxu0 %v19330_v22  ;;  %24017 = vst [vmem:[#allocation13_spill] sm:$0xff] %v19528_v16 }
 0x171   :  { %2919 = vmatpush.bf16.msrb.mxu3 %v12736_v13  ;;  %12883 = vmatmul.msk.bf16.vlgmr.msra.gmra.mxu0 %vm2300_vm0, %v17492_v15  ;;  %v2664_v15 = vpop.f32.mrf.mxu1  ;;  %v12428_v13 = vor.u32 %v16036_v58, %v12427_v55  ;;  %v2954_v23 = vrot.slane %v2953_v57, 1  ;;  %v19516_v58 = vld [vmem:[%s24011_s24 + $0x88] sm:$0xff]  ;;  %v2958_v17 = vadd.f32 %v2957_v29, %v2956_v4  ;;  %v19632_v4 = vld [vmem:[%s24011_s24 + $0x1b8] sm:$0xff]  ;;  %v19638_v29 = vld [vmem:[%s24011_s24 + $0x130] sm:$0xff] }
 0x172   :  { %3156 = vmatpush.msra.mxu2 %v19346_v28  ;;  %3175 = vmatpush.msrb.mxu0 %v19353_v32  ;;  %v19509_v55 = vadd.f32 %v2664_v15, %v2652_v36  ;;  %v19553_v15 = vld [vmem:[%s24011_s24 + $0x1d8] sm:$0xff]  ;;  %v19594_v36 = vld [vmem:[%s24011_s24 + $0x1c8] sm:$0xff]  ;;  %24027 = vst [vmem:[#allocation23_spill] sm:$0xff] %v19632_v4 }
 0x173   :  { %2907 = vmatpush.bf16.msrb.mxu1 %v12484_v33  ;;  %v19457_v33 = vld [vmem:[%s24011_s24 + $0x1f8] sm:$0xff]  ;;  %24019 = vst [vmem:[#allocation15_spill] sm:$0xff] %v19553_v15  ;;  %v2955_v8 = vadd.f32 %v2954_v23, %v2953_v57  ;;  %v19587_v57 = vld [vmem:[%s24011_s24 + $0x268] sm:$0xff]  ;;  %v19605_v23 = vld [vmem:[%s24011_s24 + $0x260] sm:$0xff] }
 0x174   :  { %3157 = vmatpush.msra.mxu2 %v19359_v34  ;;  %3176 = vmatpush.msrb.mxu0 %v19371_v44  ;;  %24012 = vst [vmem:[#allocation8_spill] sm:$0xff] %v19457_v33 }
 0x175   :  { %2920 = vmatpush.bf16.msrb.mxu3 %v12708_v38  ;;  %v19462_v38 = vld [vmem:[%s24011_s24 + $0x98] sm:$0xff]  ;;  %24016 = vst [vmem:[#allocation12_spill] sm:$0xff] %v19509_v55 }
 0x176   :  { %3158 = vmatpush.msra.mxu2 %v19383_v2  ;;  %3177 = vmatpush.msrb.mxu0 %v19390_v11  ;;  %24022 = vst [vmem:[#allocation18_spill] sm:$0xff] %v19587_v57 }
 0x177   :  { %2908 = vmatpush.bf16.msrb.mxu1 %v12456_v51  ;;  %v19495_v51 = vld [vmem:[%s24011_s24] sm:$0xff]  ;;  %24023 = vst [vmem:[#allocation19_spill] sm:$0xff] %v19594_v36 }
 0x178   :  { %3159 = vmatpush.msra.mxu2 %v19396_v52  ;;  %3178 = vmatpush.msrb.mxu0 %v19410_v26  ;;  %24014 = vst [vmem:[#allocation10_spill] sm:$0xff] %v19495_v51 }
 0x179   :  { %2921 = vmatpush.bf16.msrb.mxu3 %v12680_v53  ;;  %v2666_v9 = vpop.f32.mrf.mxu1  ;;  %v19500_v53 = vld [vmem:[%s24011_s24 + $0x168] sm:$0xff]  ;;  %24024 = vst [vmem:[#allocation20_spill] sm:$0xff] %v19605_v23 }
 0x17a   :  { %3160 = vmatpush.msra.mxu2 %v19422_v6  ;;  %3179 = vmatpush.msrb.mxu0 %v19428_v12 }
 0x17b   :  { %2909 = vmatpush.bf16.msrb.mxu1 %v12428_v13  ;;  %v2963_v13 = vsel %vm2941_vm1, %v19509_v55, 0.0  ;;  %v19625_v55 = vld [vmem:[%s24011_s24 + $0x258] sm:$0xff] }
 0x17c   :  { %3161 = vmatpush.msra.mxu2 %v19434_v60  ;;  %3180 = vmatpush.msrb.mxu0 %v19440_v24  ;;  %v2964_v9 = vrot.slane %v2963_v13, 4  ;;  %24026 = vst [vmem:[#allocation22_spill] sm:$0xff] %v19625_v55 }
 0x17d   :  { %2922 = vmatpush.bf16.msrb.mxu3 %v12652_v14  ;;  %v19567_v14 = vld [vmem:[%s24011_s24 + $0x270] sm:$0xff] }
 0x17e   :  { %3162 = vmatpush.msra.mxu2 %v19446_v19  ;;  %3181 = vmatpush.msrb.mxu0 %v19462_v38  ;;  %24020 = vst [vmem:[#allocation16_spill] sm:$0xff] %v19567_v14  ;;  %v19614_v61 = vpop.f32.mrf.mxu0 }
 0x17f   :  { %3189 = vmatpush.msra.mxu1 %v19451_v27 }
 0x180   :  { %2910 = vmatmul.bf16.vlgmr.msrb.gmra.mxu1 %v17524_v37  ;;  %2923 = vmatmul.bf16.vlgmr.msrb.gmra.mxu3 %v17535_v42  ;;  %v19507_v37 = vld [vmem:[%s24011_s24 + $0x1e8] sm:$0xff]  ;;  %v2948_v42 = vadd.f32 %v2947_v3, %v2946_v18  ;;  %v19574_v18 = vld [vmem:[%s24011_s24 + $0x1d0] sm:$0xff] }
 0x181   :  { %3209 = vmatpush.msra.mxu3 %v19457_v33  ;;  %3163 = vmatpush.msra.mxu2 %v19470_v35  ;;  %24015 = vst [vmem:[#allocation11_spill] sm:$0xff] %v19507_v37  ;;  %v19576_v0 = vpop.f32.mrf.mxu1  ;;  %v19582_v3 = vld [vmem:[%s24011_s24 + $0x148] sm:$0xff] }
 0x182   :  { %3190 = vmatpush.msra.mxu1 %v19475_v21  ;;  %3182 = vmatpush.msrb.mxu0 %v19487_v45  ;;  %24021 = vst [vmem:[#allocation17_spill] sm:$0xff] %v19574_v18 }
 0x183   :  { %3210 = vmatpush.msra.mxu3 %v19482_v39  ;;  %3164 = vmatpush.msra.mxu2 %v19495_v51  ;;  %v19663_v39 = vld [vmem:[%s24011_s24 + $0x248] sm:$0xff]  ;;  %v19754_v51 = vld [vmem:[%s24011_s24 + $0x100] sm:$0xff] }
 0x184   :  { %3191 = vmatpush.msra.mxu1 %v19500_v53  ;;  %3165 = vmatmul.f32.vlgmr.msra.gmra.mxu2 %v2948_v42  ;;  %v19600_v42 = vld [vmem:[%s24011_s24 + $0x140] sm:$0xff]  ;;  %24030 = vst [vmem:[#allocation26_spill] sm:$0xff] %v19663_v39 }
 0x185   :  { %3211 = vmatpush.msra.mxu3 %v19507_v37  ;;  %3183 = vmatpush.msrb.mxu0 %v19516_v58  ;;  %v19658_v37 = vld [vmem:[%s24011_s24 + $0x128] sm:$0xff] }
 0x186   :  { %3192 = vmatpush.msra.mxu1 %v19521_v59  ;;  %3229 = vmatpush.msrb.mxu2 %v19533_v30 }
 0x187   :  { %3212 = vmatpush.msra.mxu3 %v19528_v16  ;;  %3184 = vmatpush.msrb.mxu0 %v19539_v62  ;;  %v2959_v16 = vrot.slane %v2958_v17, 2 }
 0x188   :  { %3193 = vmatpush.msra.mxu1 %v19544_v1  ;;  %3185 = vmatmul.f32.vlgmr.msrb.gmra.mxu0 %v2955_v8  ;;  %v19612_v8 = vld [vmem:[%s24011_s24 + $0x1c0] sm:$0xff] }
 0x189   :  { %3213 = vmatpush.msra.mxu3 %v19553_v15  ;;  %3230 = vmatpush.msrb.mxu2 %v19567_v14  ;;  %24025 = vst [vmem:[#allocation21_spill] sm:$0xff] %v19612_v8  ;;  %v2965_v15 = vadd.f32 %v2964_v9, %v2963_v13  ;;  %v19643_v13 = vld [vmem:[%s24011_s24 + $0x250] sm:$0xff]  ;;  %v19645_v9 = vpop.f32.mrf.mxu2  ;;  %v19699_v14 = vld [vmem:[%s24011_s24 + $0x238] sm:$0xff] }
 0x18a   :  { %3194 = vmatpush.msra.mxu1 %v19562_v31  ;;  %24028 = vst [vmem:[#allocation24_spill] sm:$0xff] %v19643_v13 }
 0x18b   :  { %3214 = vmatpush.msra.mxu3 %v19574_v18  ;;  %3231 = vmatpush.msrb.mxu2 %v19587_v57  ;;  %v2677_v18 = vpop.f32.mrf.mxu3  ;;  %v2966_v33 = vrot.slane %v2965_v15, 2  ;;  %v19694_v57 = vld [vmem:[%s24011_s24 + $0x118] sm:$0xff]  ;;  %24036 = vst [vmem:[#allocation32_spill] sm:$0xff] %v19699_v14 }
 0x18c   :  { %3195 = vmatpush.msra.mxu1 %v19582_v3  ;;  %24035 = vst [vmem:[#allocation31_spill] sm:$0xff] %v19694_v57 }
 0x18d   :  { %3215 = vmatpush.msra.mxu3 %v19594_v36  ;;  %3232 = vmatpush.msrb.mxu2 %v19605_v23  ;;  %v2692_v36 = vpop.f32.mrf.mxu1  ;;  %v2960_v23 = vadd.f32 %v2959_v16, %v2958_v17  ;;  %v2967_v30 = vadd.f32 %v2966_v33, %v2965_v15  ;;  %v19706_v17 = vld [vmem:[%s24011_s24 + $0x198] sm:$0xff]  ;;  %v19711_v16 = vld [vmem:[%s24010_s27] sm:$0x7f]  ;;  %v19718_v33 = vld [vmem:[%s24011_s24 + $0x110] sm:$0xff]  ;;  %s24080_s27 = sld [smem:[#allocation45_spill]] }
 0x18e   :  { %3196 = vmatpush.msra.mxu1 %v19600_v42  ;;  %v19670_v36 = vld [vmem:[%s24011_s24 + $0x1a8] sm:$0xff]  ;;  %24037 = vst [vmem:[#allocation33_spill] sm:$0xff] %v19706_v17 }
 0x18f   :  { %3216 = vmatpush.msra.mxu3 %v19612_v8  ;;  %3233 = vmatpush.msrb.mxu2 %v19625_v55  ;;  %v19652_v8 = vld [vmem:[%s24011_s24 + $0x1b0] sm:$0xff]  ;;  %24031 = vst [vmem:[#allocation27_spill] sm:$0xff] %v19670_v36  ;;  %v19681_v55 = vld [vmem:[%s24011_s24 + $0x240] sm:$0xff] }
 0x190   :  { %3197 = vmatpush.msra.mxu1 %v19620_v5  ;;  %24029 = vst [vmem:[#allocation25_spill] sm:$0xff] %v19652_v8 }
 0x191   :  { %3217 = vmatpush.msra.mxu3 %v19632_v4  ;;  %3234 = vmatpush.msrb.mxu2 %v19643_v13  ;;  %v19676_v4 = vld [vmem:[%s24011_s24 + $0x120] sm:$0xff]  ;;  %24033 = vst [vmem:[#allocation29_spill] sm:$0xff] %v19681_v55  ;;  %v2705_v15 = vpop.f32.mrf.mxu2 }
 0x192   :  { %3198 = vmatpush.msra.mxu1 %v19638_v29  ;;  %24032 = vst [vmem:[#allocation28_spill] sm:$0xff] %v19676_v4  ;;  %v19688_v13 = vld [vmem:[%s24011_s24 + $0x1a0] sm:$0xff]  ;;  %v19741_v15 = vld [vmem:[%s24011_s24 + $0x228] sm:$0xff] }
 0x193   :  { %3218 = vmatpush.msra.mxu3 %v19652_v8  ;;  %3235 = vmatpush.msrb.mxu2 %v19663_v39  ;;  %24034 = vst [vmem:[#allocation30_spill] sm:$0xff] %v19688_v13  ;;  %v2718_v8 = vpop.f32.mrf.mxu0  ;;  %v2679_v39 = vpop.f32.mrf.mxu3 }
 0x194   :  { %3199 = vmatpush.msra.mxu1 %v19658_v37  ;;  %v526_v8 = vperm.slane %v19711_v16, 4  ;;  %v19723_v39 = vld [vmem:[%s24011_s24 + $0x230] sm:$0xff]  ;;  %24041 = vst [vmem:[#allocation37_spill] sm:$0xff] %v19741_v15 }
 0x195   :  { %3219 = vmatpush.msra.mxu3 %v19670_v36  ;;  %3236 = vmatpush.msrb.mxu2 %v19681_v55  ;;  %24038 = vst [vmem:[#allocation34_spill] sm:$0xff] %v19723_v39  ;;  %v19730_v36 = vld [vmem:[%s24011_s24 + $0x190] sm:$0xff]  ;;  %v19736_v55 = vld [vmem:[%s24011_s24 + $0x108] sm:$0xff] }
 0x196   :  { %3200 = vmatpush.msra.mxu1 %v19676_v4  ;;  %24039 = vst [vmem:[#allocation35_spill] sm:$0xff] %v19730_v36  ;;  %v19759_v4 = vld [vmem:[%s24011_s24 + $0x220] sm:$0xff] }
 0x197   :  { %3220 = vmatpush.msra.mxu3 %v19688_v13  ;;  %3237 = vmatpush.msrb.mxu2 %v19699_v14  ;;  %v2961_v13 = vrot.slane %v2960_v23, 1  ;;  %24040 = vst [vmem:[#allocation36_spill] sm:$0xff] %v19736_v55  ;;  %v2678_v14 = vadd.f32 %v2677_v18, %v526_v8  ;;  %v19766_v18 = vld [vmem:[%s24011_s24 + $0x180] sm:$0xff] }
 0x198   :  { %3201 = vmatpush.msra.mxu1 %v19694_v57  ;;  %v2968_v57 = vrot.slane %v2967_v30, 1 }
 0x199   :  { %3221 = vmatpush.msra.mxu3 %v19706_v17  ;;  %3238 = vmatpush.msrb.mxu2 %v19723_v39  ;;  %v19748_v17 = vld [vmem:[%s24011_s24 + $0x188] sm:$0xff]  ;;  %v2962_v8 = vadd.f32 %v2961_v13, %v2960_v23  ;;  %v2691_v39 = vadd.f32 %v19576_v0, %v2678_v14  ;;  %v2993_v14 = vmul.f32 %v19299_v7, %v19299_v7 }
 0x19a   :  { %3202 = vmatpush.msra.mxu1 %v19718_v33 }
 0x19b   :  { %3222 = vmatpush.msra.mxu3 %v19730_v36  ;;  %3239 = vmatpush.msrb.mxu2 %v19741_v15  ;;  %v2969_v36 = vadd.f32 %v2968_v57, %v2967_v30  ;;  %v2755_v15 = vpop.f32.mrf.mxu2  ;;  %v19782_v30 = vld [vmem:[%s24011_s24 + $0x210] sm:$0xff]  ;;  %v2704_v0 = vadd.f32 %v19645_v9, %v2691_v39  ;;  %v2992_v57 = vmul.f32 %v19253_v54, %v19253_v54  ;;  %v2742_v9 = vpop.f32.mrf.mxu1 }
 0x19c   :  { %3203 = vmatpush.msra.mxu1 %v19736_v55  ;;  %v19775_v55 = vld [vmem:[%s24011_s24 + $0x218] sm:$0xff] }
 0x19d   :  { %3223 = vmatpush.msra.mxu3 %v19748_v17  ;;  %3240 = vmatpush.msrb.mxu2 %v19759_v4  ;;  %v2717_v23 = vadd.f32 %v19614_v61, %v2704_v0  ;;  %v2994_v61 = vmul.f32 %v19105_v25, %v19105_v25 }
 0x19e   :  { %3204 = vmatpush.msra.mxu1 %v19754_v51 }
 0x19f   :  { %3224 = vmatpush.msra.mxu3 %v19766_v18  ;;  %3205 = vmatmul.f32.vlgmr.msra.gmra.mxu1 %v2962_v8  ;;  %v2729_v13 = vpop.f32.mrf.mxu3 }
 0x1a0   :  { %3225 = vmatmul.f32.vlgmr.msra.gmra.mxu3 %v2969_v36  ;;  %3313 = vmatpush.msrb.mxu1 %v19224_v50  ;;  %v19793_v50 = vld [vmem:[%s24011_s24 + $0x208] sm:$0xff] }
 0x1a1   :  { %3293 = vmatpush.msrb.mxu3 %v19199_v41  ;;  %3241 = vmatpush.msrb.mxu2 %v19775_v55  ;;  %v19803_v41 = vld [vmem:[%s24011_s24 + $0x200] sm:$0xff] }
 0x1a2   :  { %3314 = vmatpush.msrb.mxu1 %v19244_v56  ;;  %v3006_v56 = vsel %vm2941_vm1, %v2993_v14, 0.0  ;;  %v19860_v14 = vld [vmem:[%s24011_s24 + $0x2e0] sm:$0xff] }
 0x1a3   :  { %3294 = vmatpush.msrb.mxu3 %v19219_v47  ;;  %3242 = vmatpush.msrb.mxu2 %v19782_v30  ;;  %v2999_v47 = vsel %vm2941_vm1, %v2992_v57, 0.0  ;;  %v2744_v8 = vpop.f32.mrf.mxu1 }
 0x1a4   :  { %3315 = vmatpush.msrb.mxu1 %v19270_v48  ;;  %v2757_v48 = vpop.f32.mrf.mxu2  ;;  %v3000_v36 = vrot.slane %v2999_v47, 4 }
 0x1a5   :  { %3295 = vmatpush.msrb.mxu3 %v19231_v46  ;;  %3243 = vmatpush.msrb.mxu2 %v19793_v50  ;;  %v3007_v46 = vrot.slane %v3006_v56, 4 }
 0x1a6   :  { %3316 = vmatpush.msrb.mxu1 %v19288_v63  ;;  %v19820_v63 = vpop.f32.mrf.mxu0 }
 0x1a7   :  { %3296 = vmatpush.msrb.mxu3 %v19262_v49  ;;  %3244 = vmatpush.msrb.mxu2 %v19803_v41  ;;  %v2730_v49 = vadd.f32 %v2729_v13, %v2717_v23  ;;  %v24045_v13 = vld [vmem:[#allocation14_spill] sm:$0xff] }
 0x1a8   :  { %3317 = vmatpush.msrb.mxu1 %v19312_v10  ;;  %v19826_v10 = vld [vmem:[%s24011_s24 + $0x2f8] sm:$0xff] }
 0x1a9   :  { %3333 = vmatpush.msra.mxu2 %v19451_v27  ;;  %3297 = vmatpush.msrb.mxu3 %v19276_v40  ;;  %v2743_v40 = vadd.f32 %v2742_v9, %v2730_v49  ;;  %v3008_v27 = vadd.f32 %v3007_v46, %v3006_v56  ;;  %v24043_v46 = vld [vmem:[#allocation10_spill] sm:$0xff]  ;;  %v24047_v49 = vld [vmem:[#allocation36_spill] sm:$0xff] }
 0x1aa   :  { %3318 = vmatpush.msrb.mxu1 %v19330_v22  ;;  %3249 = vmatpush.msra.mxu0 %v19826_v10  ;;  %v19835_v22 = vld [vmem:[%s24011_s24 + $0x2f0] sm:$0xff] }
 0x1ab   :  { %3334 = vmatpush.msra.mxu2 %v19475_v21  ;;  %3298 = vmatpush.msrb.mxu3 %v19305_v43  ;;  %v3001_v43 = vadd.f32 %v3000_v36, %v2999_v47  ;;  %v3013_v21 = vsel %vm2941_vm1, %v2994_v61, 0.0  ;;  %v24046_v36 = vld [vmem:[#allocation16_spill] sm:$0xff]  ;;  %v3133_v61 = vld [vmem:[%s24011_s24 + $0x2a8] sm:$0xff] }
 0x1ac   :  { %3319 = vmatpush.msrb.mxu1 %v19353_v32  ;;  %v19840_v32 = vadd.f32 %v2755_v15, %v2743_v40  ;;  %3250 = vmatpush.msra.mxu0 %v19835_v22  ;;  %v3014_v39 = vrot.slane %v3013_v21, 4  ;;  %v3132_v40 = vld [vmem:[%s24011_s24 + $0x2a0] sm:$0xff] }
 0x1ad   :  { %3335 = vmatpush.msra.mxu2 %v19500_v53  ;;  %3299 = vmatpush.msrb.mxu3 %v19318_v20  ;;  %v19847_v20 = vld [vmem:[%s24011_s24 + $0x2e8] sm:$0xff]  ;;  %v3002_v0 = vrot.slane %v3001_v43, 2 }
 0x1ae   :  { %3320 = vmatpush.msrb.mxu1 %v19371_v44  ;;  %v2970_v53 = vsel %vm2941_vm1, %v19840_v32, 0.0  ;;  %v19853_v44 = vpop.f32.mrf.mxu2  ;;  %3251 = vmatpush.msra.mxu0 %v19847_v20  ;;  %v3015_v56 = vadd.f32 %v3014_v39, %v3013_v21  ;;  %v2996_v9 = vmul.f32 %v19840_v32, %v19840_v32  ;;  %v24049_v21 = vld [vmem:[#allocation20_spill] sm:$0xff] }
 0x1af   :  { %3336 = vmatpush.msra.mxu2 %v19521_v59  ;;  %3300 = vmatpush.msrb.mxu3 %v19346_v28  ;;  %v3009_v59 = vrot.slane %v3008_v27, 2  ;;  %v2971_v15 = vrot.slane %v2970_v53, 4  ;;  %v2731_v28 = vpop.f32.mrf.mxu3 }
 0x1b0   :  { %3321 = vmatpush.msrb.mxu1 %v19390_v11  ;;  %v2770_v11 = vpop.f32.mrf.mxu0  ;;  %3252 = vmatpush.msra.mxu0 %v19860_v14  ;;  %v3016_v47 = vrot.slane %v3015_v56, 2  ;;  %v3129_v28 = vld [vmem:[%s24011_s24 + $0x288] sm:$0xff] }
 0x1b1   :  { %3337 = vmatpush.msra.mxu2 %v19544_v1  ;;  %3301 = vmatpush.msrb.mxu3 %v19359_v34  ;;  %v2972_v1 = vadd.f32 %v2971_v15, %v2970_v53  ;;  %v19869_v34 = vld [vmem:[%s24011_s24 + $0x2d8] sm:$0xff]  ;;  %v3010_v57 = vadd.f32 %v3009_v59, %v3008_v27  ;;  %v3128_v11 = vld [vmem:[%s24011_s24 + $0x280] sm:$0xff] }
 0x1b2   :  { %3322 = vmatpush.msrb.mxu1 %v19410_v26  ;;  %3253 = vmatpush.msra.mxu0 %v19869_v34  ;;  %v24051_v15 = vld [vmem:[#allocation24_spill] sm:$0xff] }
 0x1b3   :  { %3338 = vmatpush.msra.mxu2 %v19562_v31  ;;  %3302 = vmatpush.msrb.mxu3 %v19383_v2  ;;  %v2973_v26 = vrot.slane %v2972_v1, 2  ;;  %v19878_v2 = vld [vmem:[%s24011_s24 + $0x2d0] sm:$0xff]  ;;  %v3003_v31 = vadd.f32 %v3002_v0, %v3001_v43  ;;  %v3011_v23 = vrot.slane %v3010_v57, 1  ;;  %v3027_v43 = vsel %vm2941_vm1, %v2996_v9, 0.0 }
 0x1b4   :  { %3323 = vmatpush.msrb.mxu1 %v19428_v12  ;;  %3254 = vmatpush.msra.mxu0 %v19878_v2  ;;  %v3028_v39 = vrot.slane %v3027_v43, 4 }
 0x1b5   :  { %3339 = vmatpush.msra.mxu2 %v19582_v3  ;;  %3303 = vmatpush.msrb.mxu3 %v19396_v52  ;;  %v2974_v12 = vadd.f32 %v2973_v26, %v2972_v1  ;;  %v19887_v52 = vld [vmem:[%s24011_s24 + $0x2c8] sm:$0xff]  ;;  %v3012_v48 = vadd.f32 %v3011_v23, %v3010_v57 }
 0x1b6   :  { %3324 = vmatpush.msrb.mxu1 %v19440_v24  ;;  %v2783_v3 = vpop.f32.mrf.mxu2  ;;  %3255 = vmatpush.msra.mxu0 %v19887_v52  ;;  %v3029_v1 = vadd.f32 %v3028_v39, %v3027_v43 }
 0x1b7   :  { %3340 = vmatpush.msra.mxu2 %v19600_v42  ;;  %3304 = vmatpush.msrb.mxu3 %v19422_v6  ;;  %v2975_v24 = vrot.slane %v2974_v12, 1  ;;  %v19896_v6 = vld [vmem:[%s24011_s24 + $0x2c0] sm:$0xff]  ;;  %v3004_v42 = vrot.slane %v3003_v31, 1  ;;  %v24055_v3 = vld [vmem:[#allocation34_spill] sm:$0xff] }
 0x1b8   :  { %3325 = vmatpush.msrb.mxu1 %v19462_v38  ;;  %3256 = vmatpush.msra.mxu0 %v19896_v6 }
 0x1b9   :  { %3341 = vmatpush.msra.mxu2 %v19620_v5  ;;  %3305 = vmatpush.msrb.mxu3 %v19434_v60  ;;  %v2976_v38 = vadd.f32 %v2975_v24, %v2974_v12  ;;  %v3017_v5 = vadd.f32 %v3016_v47, %v3015_v56  ;;  %v527_v60 = vperm.slane %v19711_v16, 5  ;;  %v24053_v56 = vld [vmem:[#allocation29_spill] sm:$0xff]  ;;  %v3030_v12 = vrot.slane %v3029_v1, 2 }
 0x1ba   :  { %3326 = vmatpush.msrb.mxu1 %v19487_v45  ;;  %v3005_v45 = vadd.f32 %v3004_v42, %v3003_v31  ;;  %v24054_v31 = vld [vmem:[#allocation32_spill] sm:$0xff]  ;;  %v24056_v24 = vld [vmem:[#allocation37_spill] sm:$0xff] }
 0x1bb   :  { %3342 = vmatpush.msra.mxu2 %v19638_v29  ;;  %3306 = vmatpush.msrb.mxu3 %v19446_v19  ;;  %v24042_v29 = vld [vmem:[#allocation28_spill] sm:$0xff] }
 0x1bc   :  { %3327 = vmatpush.msrb.mxu1 %v19516_v58  ;;  %3245 = vmatmul.f32.vlgmr.msrb.gmra.mxu2 %v2976_v38  ;;  %v3135_v19 = vld [vmem:[%s24011_s24 + $0x2b8] sm:$0xff]  ;;  %v2769_v58 = vadd.f32 %v19820_v63, %v527_v60 }
 0x1bd   :  { %3343 = vmatpush.msra.mxu2 %v19658_v37  ;;  %3307 = vmatpush.msrb.mxu3 %v19470_v35  ;;  %v24044_v37 = vld [vmem:[#allocation31_spill] sm:$0xff]  ;;  %v3018_v35 = vrot.slane %v3017_v5, 1 }
 0x1be   :  { %3328 = vmatpush.msrb.mxu1 %v19539_v62  ;;  %v3134_v62 = vld [vmem:[%s24011_s24 + $0x2b0] sm:$0xff]  ;;  %3257 = vmatpush.msra.mxu0 %v3135_v19  ;;  %v2782_v63 = vadd.f32 %v19853_v44, %v2769_v58  ;;  %v2820_v53 = vpop.f32.mrf.mxu0  ;;  %v3131_v44 = vld [vmem:[%s24011_s24 + $0x298] sm:$0xff] }
 0x1bf   :  { %3344 = vmatpush.msra.mxu2 %v24042_v29  ;;  %3308 = vmatpush.msrb.mxu3 %v24043_v46  ;;  %v2794_v27 = vpop.f32.mrf.mxu3 }
 0x1c0   :  { %3329 = vmatmul.f32.vlgmr.msrb.gmra.mxu1 %v3012_v48  ;;  %3309 = vmatmul.f32.vlgmr.msrb.gmra.mxu3 %v3005_v45  ;;  %v2795_v59 = vadd.f32 %v2794_v27, %v2782_v63 }
 0x1c1   :  { %3345 = vmatpush.msra.mxu2 %v24044_v37  ;;  %3373 = vmatpush.msra.mxu3 %v24045_v13 }
 0x1c2   :  { %3393 = vmatpush.msra.mxu1 %v19826_v10  ;;  %3258 = vmatpush.msra.mxu0 %v3134_v62  ;;  %v24048_v10 = vld [vmem:[#allocation18_spill] sm:$0xff] }
 0x1c3   :  { %3346 = vmatpush.msra.mxu2 %v19718_v33  ;;  %3374 = vmatpush.msra.mxu3 %v24046_v36  ;;  %v3019_v33 = vadd.f32 %v3018_v35, %v3017_v5 }
 0x1c4   :  { %3394 = vmatpush.msra.mxu1 %v19835_v22  ;;  %v2807_v22 = vpop.f32.mrf.mxu1  ;;  %3259 = vmatpush.msra.mxu0 %v3133_v61 }
 0x1c5   :  { %3347 = vmatpush.msra.mxu2 %v24047_v49  ;;  %3375 = vmatpush.msra.mxu3 %v24048_v10  ;;  %v2808_v0 = vadd.f32 %v2807_v22, %v2795_v59  ;;  %v24057_v10 = vld [vmem:[#allocation8_spill] sm:$0xff]  ;;  %v24059_v22 = vld [vmem:[#allocation11_spill] sm:$0xff] }
 0x1c6   :  { %3395 = vmatpush.msra.mxu1 %v19847_v20  ;;  %3260 = vmatpush.msra.mxu0 %v3132_v40  ;;  %v24050_v20 = vld [vmem:[#allocation22_spill] sm:$0xff]  ;;  %v2833_v8 = vpop.f32.mrf.mxu2  ;;  %v2822_v26 = vpop.f32.mrf.mxu0 }
 0x1c7   :  { %3348 = vmatpush.msra.mxu2 %v19754_v51  ;;  %3376 = vmatpush.msra.mxu3 %v24049_v21  ;;  %v3130_v51 = vld [vmem:[%s24011_s24 + $0x290] sm:$0xff]  ;;  %v24060_v21 = vld [vmem:[#allocation13_spill] sm:$0xff] }
 0x1c8   :  { %3349 = vmatmul.f32.vlgmr.msra.gmra.mxu2 %v3019_v33  ;;  %3396 = vmatpush.msra.mxu1 %v19860_v14  ;;  %v24052_v14 = vld [vmem:[#allocation26_spill] sm:$0xff]  ;;  %v24058_v33 = vld [vmem:[#allocation9_spill] sm:$0xff] }
 0x1c9   :  { %3377 = vmatpush.msra.mxu3 %v24050_v20  ;;  %3261 = vmatpush.msra.mxu0 %v3131_v44  ;;  %v24062_v20 = vld [vmem:[#allocation17_spill] sm:$0xff] }
 0x1ca   :  { %3397 = vmatpush.msra.mxu1 %v19869_v34  ;;  %v2796_v34 = vpop.f32.mrf.mxu3  ;;  %v24069_v26 = vld [vmem:[#allocation33_spill] sm:$0xff] }
 0x1cb   :  { %3378 = vmatpush.msra.mxu3 %v24051_v15  ;;  %3262 = vmatpush.msra.mxu0 %v3130_v51 }
 0x1cc   :  { %3398 = vmatpush.msra.mxu1 %v19878_v2  ;;  %v2809_v57 = vpop.f32.mrf.mxu1  ;;  %v2821_v2 = vadd.f32 %v2820_v53, %v2808_v0  ;;  %v24061_v53 = vld [vmem:[#allocation15_spill] sm:$0xff] }
 0x1cd   :  { %3379 = vmatpush.msra.mxu3 %v24052_v14  ;;  %3263 = vmatpush.msra.mxu0 %v3129_v28  ;;  %v24065_v14 = vld [vmem:[#allocation23_spill] sm:$0xff] }
 0x1ce   :  { %3399 = vmatpush.msra.mxu1 %v19887_v52  ;;  %v2835_v23 = vpop.f32.mrf.mxu2  ;;  %v2834_v47 = vadd.f32 %v2833_v8, %v2821_v2  ;;  %v3031_v52 = vadd.f32 %v3030_v12, %v3029_v1  ;;  %v24064_v8 = vld [vmem:[#allocation21_spill] sm:$0xff]  ;;  %v24067_v1 = vld [vmem:[#allocation27_spill] sm:$0xff]  ;;  %v24070_v2 = vld [vmem:[#allocation12_spill] sm:$0xff] }
 0x1cf   :  { %3380 = vmatpush.msra.mxu3 %v24053_v56  ;;  %3264 = vmatpush.msra.mxu0 %v3128_v11 }
 0x1d0   :  { %3400 = vmatpush.msra.mxu1 %v19896_v6  ;;  %v3032_v60 = vrot.slane %v3031_v52, 1 }
 0x1d1   :  { %3381 = vmatpush.msra.mxu3 %v24054_v31  ;;  %v2995_v31 = vmul.f32 %v24070_v2, %v24070_v2 }
 0x1d2   :  { %3401 = vmatpush.msra.mxu1 %v3135_v19  ;;  %v2846_v42 = vpop.f32.mrf.mxu3  ;;  %v3033_v37 = vadd.f32 %v3032_v60, %v3031_v52 }
 0x1d3   :  { %3382 = vmatpush.msra.mxu3 %v24055_v3  ;;  %v19962_v38 = vadd.f32 %v2846_v42, %v2834_v47  ;;  %v24071_v3 = vld [vmem:[#allocation35_spill] sm:$0xff] }
 0x1d4   :  { %3402 = vmatpush.msra.mxu1 %v3134_v62 }
 0x1d5   :  { %3383 = vmatpush.msra.mxu3 %v24056_v24  ;;  %v2977_v6 = vsel %vm2941_vm1, %v19962_v38, 0.0  ;;  %v2997_v5 = vmul.f32 %v19962_v38, %v19962_v38  ;;  %v3020_v24 = vsel %vm2941_vm1, %v2995_v31, 0.0 }
 0x1d6   :  { %3403 = vmatpush.msra.mxu1 %v3133_v61  ;;  %v2978_v48 = vrot.slane %v2977_v6, 4 }
 0x1d7   :  { %3384 = vmatpush.msra.mxu3 %v19759_v4  ;;  %v3034_v45 = vsel %vm2941_vm1, %v2997_v5, 0.0  ;;  %v3021_v5 = vrot.slane %v3020_v24, 4 }
 0x1d8   :  { %3404 = vmatpush.msra.mxu1 %v3132_v40  ;;  %v2979_v29 = vadd.f32 %v2978_v48, %v2977_v6  ;;  %v3035_v4 = vrot.slane %v3034_v45, 4 }
 0x1d9   :  { %3385 = vmatpush.msra.mxu3 %v19775_v55  ;;  %v3145_v55 = vld [vmem:[%s24011_s24 + $0x308] sm:$0xff] }
 0x1da   :  { %3405 = vmatpush.msra.mxu1 %v3131_v44  ;;  %3283 = vmatpush.msrb.mxu0 %v3145_v55  ;;  %v2980_v46 = vrot.slane %v2979_v29, 2  ;;  %v3036_v19 = vadd.f32 %v3035_v4, %v3034_v45  ;;  %v2848_v35 = vpop.f32.mrf.mxu3  ;;  %v528_v44 = vperm.slane %v19711_v16, 6  ;;  %v24068_v16 = vld [vmem:[#allocation30_spill] sm:$0xff] }
 0x1db   :  { %3386 = vmatpush.msra.mxu3 %v19782_v30  ;;  %3427 = vmatpush.msrb.mxu2 %v3145_v55  ;;  %v3144_v30 = vld [vmem:[%s24011_s24 + $0x300] sm:$0xff]  ;;  %v2859_v62 = vpop.f32.mrf.mxu1 }
 0x1dc   :  { %3406 = vmatpush.msra.mxu1 %v3130_v51  ;;  %v2981_v58 = vadd.f32 %v2980_v46, %v2979_v29  ;;  %v3037_v13 = vrot.slane %v3036_v19, 2  ;;  %3284 = vmatpush.msrb.mxu0 %v3144_v30  ;;  %v24063_v51 = vld [vmem:[#allocation19_spill] sm:$0xff]  ;;  %v3022_v29 = vadd.f32 %v3021_v5, %v3020_v24  ;;  %v3472_v24 = vld.sshfl [vmem:[#allocation1 + $0x20] sm:$0xff pattern:$0x75316420] }
 0x1dd   :  { %3387 = vmatpush.msra.mxu3 %v19793_v50  ;;  %3428 = vmatpush.msrb.mxu2 %v3144_v30  ;;  %v3456_v5 = vld [vmem:[%s24006_s10 + $0x18] sm:$0xf] }
 0x1de   :  { %3407 = vmatpush.msra.mxu1 %v3129_v28  ;;  %v2982_v50 = vrot.slane %v2981_v58, 1  ;;  %v3038_v9 = vadd.f32 %v3037_v13, %v3036_v19  ;;  %v2885_v36 = vpop.f32.mrf.mxu0  ;;  %v2860_v28 = vadd.f32 %v2859_v62, %v528_v44  ;;  %3467 = vst [vmem:[#allocation1 + $0x30] ss:$2 sm:$0xff] %v3456_v5 }
 0x1df   :  { %3388 = vmatpush.msra.mxu3 %v19803_v41 }
 0x1e0   :  { %3389 = vmatmul.f32.vlgmr.msra.gmra.mxu3 %v3033_v37  ;;  %3408 = vmatpush.msra.mxu1 %v3128_v11  ;;  %v2983_v61 = vadd.f32 %v2982_v50, %v2981_v58  ;;  %v3039_v49 = vrot.slane %v3038_v9, 1  ;;  %v24066_v11 = vld [vmem:[#allocation25_spill] sm:$0xff]  ;;  %v3023_v37 = vrot.slane %v3022_v29, 2 }
 0x1e2   :  { %3265 = vmatmul.f32.vlgmr.msra.gmra.mxu0 %v2983_v61  ;;  %v3040_v63 = vadd.f32 %v3039_v49, %v3038_v9  ;;  %v3024_v62 = vadd.f32 %v3023_v37, %v3022_v29 }
 0x1e3   :  { %3353 = vmatpush.msra.mxu0 %v24057_v10  ;;  %v2861_v41 = vpop.f32.mrf.mxu1  ;;  %v2872_v40 = vpop.f32.mrf.mxu3 }
 0x1e4   :  { %3409 = vmatmul.f32.vlgmr.msra.gmra.mxu1 %v3040_v63  ;;  %v2873_v0 = vadd.f32 %v2872_v40, %v2860_v28  ;;  %v3025_v61 = vrot.slane %v3024_v62, 1 }
 0x1e5   :  { %3354 = vmatpush.msra.mxu0 %v24058_v33  ;;  %v3474_v37 = vld.sshfl [vmem:[#allocation1 + $0x30] sm:$0xff pattern:$0x75316420] }
 0x1e6   :  { %v2887_v27 = vpop.f32.mrf.mxu0  ;;  %v2898_v43 = vpop.f32.mrf.mxu2  ;;  %v2886_v57 = vadd.f32 %v2885_v36, %v2873_v0  ;;  %v3026_v49 = vadd.f32 %v3025_v61, %v3024_v62  ;;  %3654 = vst [vmem:[#allocation1 + $0x30] ss:$2 sm:$0xff] %v3456_v5  ;;  %v20045_v62 = vld [vmem:[%s23914_s21 + $0x10] sm:$0xff] }
 0x1e7   :  { %3355 = vmatpush.msra.mxu0 %v24059_v22  ;;  %24078 = vst [vmem:[#allocation14_spill] sm:$0xff] %v20045_v62 }
 0x1e8   :  { %v2899_v12 = vadd.f32 %v2898_v43, %v2886_v57  ;;  %v3468_v57 = vld.sshfl [vmem:[#allocation1] sm:$0xff pattern:$0x75316420] }
 0x1e9   :  { %3356 = vmatpush.msra.mxu0 %v24060_v21  ;;  %12886 = vmatpush.msk.msra.mxu2 %vm3479_vm3, %v3468_v57 }
 0x1eb   :  { %3357 = vmatpush.msra.mxu0 %v24061_v53  ;;  %v2874_v59 = vpop.f32.mrf.mxu3 }
 0x1ed   :  { %3358 = vmatpush.msra.mxu0 %v24062_v20  ;;  %v3661_v61 = vld.sshfl [vmem:[#allocation1 + $0x30] sm:$0xff pattern:$0x75316420] }
 0x1ee   :  { %v2937_v39 = vpop.f32.mrf.mxu0  ;;  %v2900_v15 = vpop.f32.mrf.mxu2 }
 0x1ef   :  { %3359 = vmatpush.msra.mxu0 %v24063_v51 }
 0x1f1   :  { %3360 = vmatpush.msra.mxu0 %v24064_v8 }
 0x1f3   :  { %3361 = vmatpush.msra.mxu0 %v24065_v14 }
 0x1f5   :  { %3362 = vmatpush.msra.mxu0 %v24066_v11 }
 0x1f6   :  { %v2939_v34 = vpop.f32.mrf.mxu0 }
 0x1f7   :  { %3363 = vmatpush.msra.mxu0 %v24067_v1 }
 0x1f9   :  { %3364 = vmatpush.msra.mxu0 %v24068_v16 }
 0x1fb   :  { %3365 = vmatpush.msra.mxu0 %v24069_v26  ;;  %v3471_v26 = vld.sshfl [vmem:[#allocation1 + $0x18] sm:$0xff pattern:$0x75316420] }
 0x1fc   :  { %12892 = vmatpush.msk.msrb.mxu3 %vm3479_vm3, %v3471_v26  ;;  %v16267_v26 = vld [vmem:[%s24081_s3 + $0x3ac] sm:$0xf0] }
 0x1fd   :  { %v2911_v56 = vpop.f32.mrf.mxu1  ;;  %3366 = vmatpush.msra.mxu0 %v24071_v3  ;;  %v3473_v3 = vld.sshfl [vmem:[#allocation1 + $0x28] sm:$0xff pattern:$0x75316420] }
 0x1fe   :  { %v2912_v23 = vadd.f32 %v2911_v56, %v2899_v12  ;;  %v3469_v56 = vld.sshfl [vmem:[#allocation1 + $0x8] sm:$0xff pattern:$0x75316420]  ;;  %v24072_v12 = vld [vmem:[#allocation5_spill] sm:$0xff]  ;;  %12896 = vmatpush.msk.msrb.mxu1 %vm3479_vm3, %v3473_v3  ;;  %v16243_v3 = vld [vmem:[%s24081_s3 + $0x2ec] sm:$0xf0] }
 0x1ff   :  { %3367 = vmatpush.msra.mxu0 %v19748_v17  ;;  %3648 = vst [vmem:[#allocation1] ss:$2 sm:$0xff] %v24072_v12  ;;  %v13284_v12 = vld [vmem:[%s24081_s3 + $0x2e0] sm:$0xf] }
 0x200   :  { %v13285_v5 = vor.u32 %v16243_v3, %v13284_v12  ;;  %v16307_v12 = vld [vmem:[%s24081_s3 + $0x4ec] sm:$0xf0] }
 0x201   :  { %3368 = vmatpush.msra.mxu0 %v19766_v18 }
 0x203   :  { %v2924_v47 = vpop.f32.mrf.mxu3 }
 0x204   :  { %v2925_v52 = vadd.f32 %v2924_v47, %v2912_v23  ;;  %v3470_v47 = vld.sshfl [vmem:[#allocation1 + $0x10] sm:$0xff pattern:$0x75316420] }
 0x205   :  { %v2913_v42 = vpop.f32.mrf.mxu1  ;;  %v3186_v63 = vpop.f32.mrf.mxu0 }
 0x206   :  { %v19999_v6 = vadd.f32 %v2937_v39, %v2925_v52  ;;  %v24073_v42 = vld [vmem:[#allocation6_spill] sm:$0xff]  ;;  %v3655_v29 = vld.sshfl [vmem:[#allocation1] sm:$0xff pattern:$0x75316420] }
 0x207   :  { %v3166_v10 = vpop.f32.mrf.mxu2  ;;  %3650 = vst [vmem:[#allocation1 + $0x10] ss:$2 sm:$0xff] %v24073_v42  ;;  %12900 = vmatpush.msk.msra.mxu3 %vm3479_vm3, %v3655_v29  ;;  %v16239_v29 = vld [vmem:[%s24081_s3 + $0x2cc] sm:$0xf0] }
 0x208   :  { %v2985_v60 = vsel %vm2984_vm2, %v19999_v6, 0.0  ;;  %v2998_v48 = vmul.f32 %v19999_v6, %v19999_v6  ;;  %v3187_v22 = vadd.f32 %v3186_v63, %v3166_v10 }
 0x209   :  { %v2986_v45 = vrot.slane %v2985_v60, 4 }
 0x20a   :  { %v3041_v17 = vsel %vm2984_vm2, %v2998_v48, 0.0 }
 0x20b   :  { %v2987_v4 = vadd.f32 %v2986_v45, %v2985_v60  ;;  %v3042_v55 = vrot.slane %v3041_v17, 4  ;;  %v2926_v46 = vpop.f32.mrf.mxu3  ;;  %v24074_v60 = vld [vmem:[#allocation7_spill] sm:$0xff] }
 0x20c   :  { %3652 = vst [vmem:[#allocation1 + $0x20] ss:$2 sm:$0xff] %v24074_v60  ;;  %v16199_v60 = vld [vmem:[%s24081_s3 + $0x18c] sm:$0xf0] }
 0x20d   :  { %v2988_v19 = vrot.slane %v2987_v4, 2  ;;  %v3043_v18 = vadd.f32 %v3042_v55, %v3041_v17 }
 0x20e   :  { %v3657_v55 = vld.sshfl [vmem:[#allocation1 + $0x10] sm:$0xff pattern:$0x75316420] }
 0x20f   :  { %v2989_v35 = vadd.f32 %v2988_v19, %v2987_v4  ;;  %v3044_v30 = vrot.slane %v3043_v18, 2  ;;  %12904 = vmatpush.msk.msra.mxu1 %vm3479_vm3, %v3657_v55  ;;  %v3656_v19 = vld.sshfl [vmem:[#allocation1 + $0x8] sm:$0xff pattern:$0x75316420] }
 0x211   :  { %v2990_v58 = vrot.slane %v2989_v35, 1  ;;  %v3045_v13 = vadd.f32 %v3044_v30, %v3043_v18  ;;  %v20029_v18 = vld [vmem:[%s23914_s21] sm:$0xff]  ;;  %v20035_v30 = vld [vmem:[%s23914_s21 + $0x18] sm:$0xf] }
 0x212   :  { %24075 = vst [vmem:[#allocation28_spill] sm:$0xff] %v20029_v18 }
 0x213   :  { %v2991_v50 = vadd.f32 %v2990_v58, %v2989_v35  ;;  %v3046_v9 = vrot.slane %v3045_v13, 1  ;;  %8145 = vst [vmem:[#allocation1] ss:$2 sm:$0xff] %v20029_v18  ;;  %v3659_v35 = vld.sshfl [vmem:[#allocation1 + $0x20] sm:$0xff pattern:$0x75316420] }
 0x214   :  { %24076 = vst [vmem:[#allocation10_spill] sm:$0xff] %v20035_v30  ;;  %v3658_v58 = vld.sshfl [vmem:[#allocation1 + $0x18] sm:$0xff pattern:$0x75316420] }
 0x215   :  { %v3047_v36 = vadd.f32 %v3046_v9, %v3045_v13  ;;  %12884 = vmatmul.msk.f32.vlgmr.msrb.gmra.mxu0 %vm2300_vm0, %v2991_v50  ;;  %v20040_v13 = vld [vmem:[%s23914_s21 + $0x8] sm:$0xff]  ;;  %8151 = vst [vmem:[#allocation1 + $0x30] ss:$2 sm:$0xff] %v20035_v30  ;;  %v23194_v30 = vld [vmem:[%s23913_s20 + $0x278] sm:$0xff] }
 0x216   :  { %12888 = vmatpush.msk.msrb.mxu0 %vm3479_vm3, %v3469_v56  ;;  %24077 = vst [vmem:[#allocation31_spill] sm:$0xff] %v20040_v13  ;;  %v3660_v9 = vld.sshfl [vmem:[#allocation1 + $0x28] sm:$0xff pattern:$0x75316420]  ;;  %v13380_v56 = vld [vmem:[%s24081_s3 + $0x3a0] sm:$0xf] }
 0x217   :  { %12885 = vmatmul.msk.f32.vlgmr.msrb.gmra.mxu2 %vm2300_vm0, %v3047_v36  ;;  %8147 = vst [vmem:[#allocation1 + $0x10] ss:$2 sm:$0xff] %v20040_v13  ;;  %v13381_v42 = vor.u32 %v16267_v26, %v13380_v56  ;;  %v12916_v56 = vld [vmem:[%s24081_s3] sm:$0xf]  ;;  %v16151_v26 = vld [vmem:[%s24081_s3 + $0xc] sm:$0xf0] }
 0x218   :  { %12890 = vmatpush.msk.msrb.mxu2 %vm3479_vm3, %v3470_v47  ;;  %8149 = vst [vmem:[#allocation1 + $0x20] ss:$2 sm:$0xff] %v20045_v62  ;;  %v16175_v47 = vld [vmem:[%s24081_s3 + $0xcc] sm:$0xf0]  ;;  %v12917_v3 = vor.u32 %v16151_v26, %v12916_v56  ;;  %v13460_v26 = vld [vmem:[%s24081_s3 + $0x440] sm:$0xf] }
 0x219   :  { %24098 = vst [vmem:[#allocation11_spill] sm:$0xff] %v23194_v30  ;;  %v23200_v62 = vld [vmem:[%s23913_s20 + $0x130] sm:$0xff] }
 0x21c   :  { %v3206_v27 = vpop.f32.mrf.mxu1 }
 0x21d   :  { %3369 = vmatmul.f32.vlgmr.msra.gmra.mxu0 %v3026_v49  ;;  %v3207_v43 = vadd.f32 %v3206_v27, %v3187_v22  ;;  %v3450_v22 = vld [vmem:[%s24080_s27] sm:$0x1] }
 0x21e   :  { %12894 = vmatpush.msk.msra.mxu0 %vm3479_vm3, %v3472_v24 }
 0x223   :  { %v3226_v33 = vpop.f32.mrf.mxu3 }
 0x224   :  { %v3227_v53 = vadd.f32 %v3226_v33, %v3207_v43 }
 0x23d   :  { %v3330_v59 = vpop.f32.mrf.mxu1 }
 0x23f   :  { %v3246_v40 = vpop.f32.mrf.mxu2 }
 0x240   :  { %v3247_v20 = vadd.f32 %v3246_v40, %v3227_v53  ;;  %v16211_v53 = vld [vmem:[%s24081_s3 + $0x1ec] sm:$0xf0] }
 0x243   :  { %v3310_v44 = vpop.f32.mrf.mxu3 }
 0x244   :  { %v3331_v39 = vadd.f32 %v3330_v59, %v3310_v44  ;;  %v13412_v44 = vld [vmem:[%s24081_s3 + $0x3e0] sm:$0xf] }
 0x24b   :  { %v3350_v51 = vpop.f32.mrf.mxu2 }
 0x24c   :  { %v3351_v28 = vadd.f32 %v3350_v51, %v3331_v39  ;;  %v13140_v39 = vld [vmem:[%s24081_s3 + $0x1c0] sm:$0xf] }
 0x25f   :  { %v3266_v41 = vpop.f32.mrf.mxu0 }
 0x260   :  { %v3267_v15 = vadd.f32 %v3266_v41, %v3247_v20  ;;  %v3437_v41 = vld [vmem:[%s24079_s5] sm:$0x1]  ;;  %v16275_v20 = vld [vmem:[%s24081_s3 + $0x3ec] sm:$0xf0] }
 0x261   :  { %v3410_v16 = vpop.f32.mrf.mxu1 }
 0x263   :  { %v3390_v11 = vpop.f32.mrf.mxu3 }
 0x292   :  { %v3286_v21 = vpop.f32.mrf.mxu0 }
 0x293   :  { %v3287_v8 = vadd.f32 %v3286_v21, %v3267_v15  ;;  %v13156_v21 = vld [vmem:[%s24081_s3 + $0x1e0] sm:$0xf]  ;;  %v13413_v15 = vor.u32 %v16275_v20, %v13412_v44  ;;  %v16187_v44 = vld [vmem:[%s24081_s3 + $0x12c] sm:$0xf0] }
 0x294   :  { %v13157_v51 = vor.u32 %v16211_v53, %v13156_v21  ;;  %v13060_v53 = vld [vmem:[%s24081_s3 + $0x120] sm:$0xf] }
 0x295   :  { %v20008_v1 = vmul.f32 0.0025510204, %v3287_v8  ;;  %v13396_v8 = vld [vmem:[%s24081_s3 + $0x3c0] sm:$0xf] }
 0x297   :  { %v3434_v48 = vmul.f32 %v20008_v1, %v20008_v1 }
 0x29a   :  { %v3370_v14 = vpop.f32.mrf.mxu0  ;;  %v3430_v23 = vpop.f32.mrf.mxu2 }
 0x29b   :  { %v3371_v0 = vadd.f32 %v3370_v14, %v3351_v28  ;;  %v16207_v28 = vld [vmem:[%s24081_s3 + $0x1cc] sm:$0xf0] }
 0x29c   :  { %v16271_v14 = vld [vmem:[%s24081_s3 + $0x3cc] sm:$0xf0] }
 0x29d   :  { %v3391_v34 = vadd.f32 %v3390_v11, %v3371_v0  ;;  %v13028_v0 = vld [vmem:[%s24081_s3 + $0xe0] sm:$0xf]  ;;  %v16179_v11 = vld [vmem:[%s24081_s3 + $0xec] sm:$0xf0]  ;;  %v13397_v57 = vor.u32 %v16271_v14, %v13396_v8 }
 0x29e   :  { %v13668_v8 = vld [vmem:[%s24081_s3 + $0x5e0] sm:$0xf]  ;;  %v16339_v14 = vld [vmem:[%s24081_s3 + $0x5ec] sm:$0xf0] }
 0x29f   :  { %v3411_v31 = vadd.f32 %v3410_v16, %v3391_v34  ;;  %v13124_v34 = vld [vmem:[%s24081_s3 + $0x1a0] sm:$0xf]  ;;  %v16203_v16 = vld [vmem:[%s24081_s3 + $0x1ac] sm:$0xf0] }
 0x2a0   :  { %v13125_v24 = vor.u32 %v16203_v16, %v13124_v34 }
 0x2a1   :  { %v3431_v52 = vadd.f32 %v3430_v23, %v3411_v31  ;;  %v13029_v31 = vor.u32 %v16179_v11, %v13028_v0  ;;  %v13012_v23 = vld [vmem:[%s24081_s3 + $0xc0] sm:$0xf] }
 0x2a2   :  { %v12932_v11 = vld [vmem:[%s24081_s3 + $0x20] sm:$0xf] }
 0x2a3   :  { %v3433_v45 = vmul.f32 0.0025510204, %v3431_v52  ;;  %v13108_v52 = vld [vmem:[%s24081_s3 + $0x180] sm:$0xf] }
 0x2a5   :  { %v3435_v17 = vsub.f32 %v3433_v45, %v3434_v48  ;;  %v13364_v48 = vld [vmem:[%s24081_s3 + $0x380] sm:$0xf]  ;;  %v16263_v45 = vld [vmem:[%s24081_s3 + $0x38c] sm:$0xf0] }
 0x2a7   :  { %v3436_v4 = vmax.f32 %v3435_v17, 0.0  ;;  %v13268_v17 = vld [vmem:[%s24081_s3 + $0x2c0] sm:$0xf] }
 0x2a8   :  { %v13269_v55 = vor.u32 %v16239_v29, %v13268_v17  ;;  %v13332_v17 = vld [vmem:[%s24081_s3 + $0x340] sm:$0xf] }
 0x2a9   :  { %v3438_v46 = vadd.f32 1e-05, %v3436_v4  ;;  %v13013_v4 = vor.u32 %v16175_v47, %v13012_v23  ;;  %v13524_v47 = vld [vmem:[%s24081_s3 + $0x4c0] sm:$0xf] }
 0x2ab   :  { %16861 = vrsqrt.f32 %v3438_v46  ;;  %vm3445_vm5 = vweird.f32 %v3438_v46 }
 0x2b1   :  { %v16862_v50 = vpop.eup %16861 }
 0x2b2   :  { %v3440_v36 = vmul.f32 %v16862_v50, %v3438_v46  ;;  %vm3446_vm4 = vweird.f32 %v16862_v50  ;;  %v12996_v46 = vld [vmem:[%s24081_s3 + $0xa0] sm:$0xf] }
 0x2b3   :  { %vm3447_vm6 = vmor %vm3445_vm5, %vm3446_vm4 }
 0x2b4   :  { %v3441_v49 = vmul.f32 %v16862_v50, %v3440_v36  ;;  %v16259_v36 = vld [vmem:[%s24081_s3 + $0x36c] sm:$0xf0] }
 0x2b6   :  { %v3442_v63 = vmul.f32 0.5, %v3441_v49  ;;  %v12980_v49 = vld [vmem:[%s24081_s3 + $0x80] sm:$0xf] }
 0x2b8   :  { %v3443_v10 = vsub.f32 1.5, %v3442_v63  ;;  %v16167_v63 = vld [vmem:[%s24081_s3 + $0x8c] sm:$0xf0] }
 0x2ba   :  { %v3444_v33 = vmul.f32 %v16862_v50, %v3443_v10 }
 0x2bc   :  { %v3448_v40 = vsel %vm3447_vm6, %v16862_v50, %v3444_v33  ;;  %v16195_v50 = vld [vmem:[%s24081_s3 + $0x16c] sm:$0xf0]  ;;  %v13076_v33 = vld [vmem:[%s24081_s3 + $0x140] sm:$0xf] }
 0x2bd   :  { %v3449_v27 = vmul.f32 %v3448_v40, %v3437_v41  ;;  %v16191_v40 = vld [vmem:[%s24081_s3 + $0x14c] sm:$0xf0] }
 0x2be   :  { %v13077_v21 = vor.u32 %v16191_v40, %v13076_v33  ;;  %v16295_v33 = vld [vmem:[%s24081_s3 + $0x48c] sm:$0xf0] }
 0x2bf   :  { %12887 = vmatmul.msk.f32.vlgmr.msra.gmra.mxu2 %vm3475_vm7, %v3449_v27  ;;  %12889 = vmatmul.msk.f32.vlgmr.msrb.gmra.mxu0 %vm3475_vm7, %v3449_v27  ;;  %v3451_v43 = vmul.f32 %v3449_v27, %v20008_v1  ;;  %v13141_v1 = vor.u32 %v16207_v28, %v13140_v39  ;;  %v13061_v39 = vor.u32 %v16187_v44, %v13060_v53  ;;  %v16183_v28 = vld [vmem:[%s24081_s3 + $0x10c] sm:$0xf0]  ;;  %v13300_v44 = vld [vmem:[%s24081_s3 + $0x300] sm:$0xf] }
 0x2c0   :  { %12893 = vmatmul.msk.f32.vlgmr.msrb.gmra.mxu3 %vm3475_vm7, %v3449_v27  ;;  %12897 = vmatmul.msk.f32.vlgmr.msrb.gmra.mxu1 %vm3475_vm7, %v3449_v27  ;;  %v16227_v53 = vld [vmem:[%s24081_s3 + $0x26c] sm:$0xf0] }
 0x2c1   :  { %12898 = vmatpush.msk.msra.mxu2 %vm3479_vm3, %v3474_v37  ;;  %12902 = vmatpush.msk.msrb.mxu0 %vm3479_vm3, %v3656_v19  ;;  %v20077_v59 = vsub.f32 %v3450_v22, %v3451_v43  ;;  %v16171_v19 = vld [vmem:[%s24081_s3 + $0xac] sm:$0xf0]  ;;  %v13109_v37 = vor.u32 %v16199_v60, %v13108_v52  ;;  %v12964_v22 = vld [vmem:[%s24081_s3 + $0x60] sm:$0xf] }
 0x2c2   :  { %12908 = vmatpush.msk.msrb.mxu3 %vm3479_vm3, %v3659_v35  ;;  %12912 = vmatpush.msk.msrb.mxu1 %vm3479_vm3, %v3661_v61  ;;  %v13092_v35 = vld [vmem:[%s24081_s3 + $0x160] sm:$0xf]  ;;  %v12997_v61 = vor.u32 %v16171_v19, %v12996_v46  ;;  %v16163_v43 = vld [vmem:[%s24081_s3 + $0x6c] sm:$0xf0] }
 0x2c3   :  { %v13093_v10 = vor.u32 %v16195_v50, %v13092_v35  ;;  %v12965_v20 = vor.u32 %v16163_v43, %v12964_v22  ;;  %v16299_v46 = vld [vmem:[%s24081_s3 + $0x4ac] sm:$0xf0]  ;;  %v13636_v35 = vld [vmem:[%s24081_s3 + $0x5a0] sm:$0xf] }
 0x2c4   :  { %v13236_v50 = vld [vmem:[%s24081_s3 + $0x280] sm:$0xf]  ;;  %v16327_v22 = vld [vmem:[%s24081_s3 + $0x58c] sm:$0xf0] }
 0x2c7   :  { %12891 = vmatmul.msk.f32.vlgmr.msrb.gmra.mxu2 %vm3475_vm7, %v3449_v27  ;;  %12895 = vmatmul.msk.f32.vlgmr.msra.gmra.mxu0 %vm3475_vm7, %v3449_v27 }
 0x2c8   :  { %12901 = vmatmul.msk.f32.vlgmr.msra.gmra.mxu3 %vm3475_vm7, %v20077_v59  ;;  %12905 = vmatmul.msk.f32.vlgmr.msra.gmra.mxu1 %vm3475_vm7, %v20077_v59 }
 0x2c9   :  { %12906 = vmatpush.msk.msrb.mxu2 %vm3479_vm3, %v3658_v58  ;;  %12910 = vmatpush.msk.msra.mxu0 %vm3479_vm3, %v3660_v9  ;;  %v13365_v58 = vor.u32 %v16263_v45, %v13364_v48  ;;  %v13348_v9 = vld [vmem:[%s24081_s3 + $0x360] sm:$0xf]  ;;  %v16235_v45 = vld [vmem:[%s24081_s3 + $0x2ac] sm:$0xf0] }
 0x2ca   :  { %5049 = vmatpush.bf16.msra.mxu3 %v13157_v51  ;;  %5075 = vmatpush.bf16.msra.mxu1 %v13413_v15  ;;  %v13349_v41 = vor.u32 %v16259_v36, %v13348_v9  ;;  %v16159_v51 = vld [vmem:[%s24081_s3 + $0x4c] sm:$0xf0]  ;;  %v13044_v15 = vld [vmem:[%s24081_s3 + $0x100] sm:$0xf] }
 0x2cb   :  { %v13045_v34 = vor.u32 %v16183_v28, %v13044_v15  ;;  %v13252_v48 = vld [vmem:[%s24081_s3 + $0x2a0] sm:$0xf]  ;;  %v16231_v36 = vld [vmem:[%s24081_s3 + $0x28c] sm:$0xf0] }
 0x2cc   :  { %v13253_v29 = vor.u32 %v16235_v45, %v13252_v48  ;;  %v13444_v45 = vld [vmem:[%s24081_s3 + $0x420] sm:$0xf] }
 0x2ce   :  { %5050 = vmatpush.bf16.msra.mxu3 %v13141_v1  ;;  %5076 = vmatpush.bf16.msra.mxu1 %v13397_v57  ;;  %v16155_v1 = vld [vmem:[%s24081_s3 + $0x2c] sm:$0xf0]  ;;  %v13669_v57 = vor.u32 %v16339_v14, %v13668_v8  ;;  %v16177_v8 = vld [vmem:[%s24081_s3 + $0xe4] sm:$0xf]  ;;  %v13030_v14 = vld [vmem:[%s24081_s3 + $0xf0] sm:$0xf0] }
 0x2cf   :  { %12899 = vmatmul.msk.f32.vlgmr.msra.gmra.mxu2 %vm3475_vm7, %v3449_v27  ;;  %12903 = vmatmul.msk.f32.vlgmr.msrb.gmra.mxu0 %vm3475_vm7, %v20077_v59  ;;  %v12981_v27 = vor.u32 %v16167_v63, %v12980_v49  ;;  %v12933_v16 = vor.u32 %v16155_v1, %v12932_v11  ;;  %v16251_v49 = vld [vmem:[%s24081_s3 + $0x32c] sm:$0xf0]  ;;  %v13237_v63 = vor.u32 %v16231_v36, %v13236_v50  ;;  %v13428_v36 = vld [vmem:[%s24081_s3 + $0x400] sm:$0xf] }
 0x2d0   :  { %12909 = vmatmul.msk.f32.vlgmr.msrb.gmra.mxu3 %vm3475_vm7, %v20077_v59  ;;  %12913 = vmatmul.msk.f32.vlgmr.msrb.gmra.mxu1 %vm3475_vm7, %v20077_v59  ;;  %v13033_v11 = vor.u32 %v16177_v8, %v13030_v14  ;;  %v16323_v1 = vld [vmem:[%s24081_s3 + $0x56c] sm:$0xf0]  ;;  %v12934_v14 = vld [vmem:[%s24081_s3 + $0x30] sm:$0xf0] }
 0x2d1   :  { %5036 = vmatpush.bf16.msra.mxu2 %v13029_v31  ;;  %5062 = vmatpush.bf16.msrb.mxu0 %v13285_v5  ;;  %v13540_v31 = vld [vmem:[%s24081_s3 + $0x4e0] sm:$0xf]  ;;  %v16335_v5 = vld [vmem:[%s24081_s3 + $0x5cc] sm:$0xf0] }
 0x2d2   :  { %5051 = vmatpush.bf16.msra.mxu3 %v13125_v24  ;;  %5077 = vmatpush.bf16.msra.mxu1 %v13381_v42  ;;  %v13541_v23 = vor.u32 %v16307_v12, %v13540_v31  ;;  %v16303_v24 = vld [vmem:[%s24081_s3 + $0x4cc] sm:$0xf0]  ;;  %v13652_v42 = vld [vmem:[%s24081_s3 + $0x5c0] sm:$0xf]  ;;  %v16173_v12 = vld [vmem:[%s24081_s3 + $0xc4] sm:$0xf] }
 0x2d3   :  { %v13525_v52 = vor.u32 %v16303_v24, %v13524_v47  ;;  %v13653_v60 = vor.u32 %v16335_v5, %v13652_v42  ;;  %v16287_v31 = vld [vmem:[%s24081_s3 + $0x44c] sm:$0xf0]  ;;  %v13588_v24 = vld [vmem:[%s24081_s3 + $0x540] sm:$0xf] }
 0x2d4   :  { %v13188_v5 = vld [vmem:[%s24081_s3 + $0x220] sm:$0xf]  ;;  %v16215_v50 = vld [vmem:[%s24081_s3 + $0x20c] sm:$0xf0] }
 0x2d5   :  { %5037 = vmatpush.bf16.msra.mxu2 %v13013_v4  ;;  %5063 = vmatpush.bf16.msrb.mxu0 %v13269_v55  ;;  %v16255_v4 = vld [vmem:[%s24081_s3 + $0x34c] sm:$0xf0]  ;;  %v13508_v55 = vld [vmem:[%s24081_s3 + $0x4a0] sm:$0xf] }
 0x2d6   :  { %5052 = vmatpush.bf16.msra.mxu3 %v13109_v37  ;;  %5078 = vmatpush.bf16.msra.mxu1 %v13365_v58  ;;  %v13333_v19 = vor.u32 %v16255_v4, %v13332_v17  ;;  %v13509_v37 = vor.u32 %v16299_v46, %v13508_v55  ;;  %v16331_v58 = vld [vmem:[%s24081_s3 + $0x5ac] sm:$0xf0]  ;;  %v12998_v55 = vld [vmem:[%s24081_s3 + $0xb0] sm:$0xf0] }
 0x2d7   :  { %12907 = vmatmul.msk.f32.vlgmr.msrb.gmra.mxu2 %vm3475_vm7, %v20077_v59  ;;  %12911 = vmatmul.msk.f32.vlgmr.msra.gmra.mxu0 %vm3475_vm7, %v20077_v59  ;;  %v12948_v59 = vld [vmem:[%s24081_s3 + $0x40] sm:$0xf]  ;;  %v13637_v9 = vor.u32 %v16331_v58, %v13636_v35  ;;  %v16283_v17 = vld [vmem:[%s24081_s3 + $0x42c] sm:$0xf0] }
 0x2d8   :  { %v12949_v0 = vor.u32 %v16159_v51, %v12948_v59  ;;  %v16247_v59 = vld [vmem:[%s24081_s3 + $0x30c] sm:$0xf0]  ;;  %v13476_v51 = vld [vmem:[%s24081_s3 + $0x460] sm:$0xf]  ;;  %v13445_v4 = vor.u32 %v16283_v17, %v13444_v45 }
 0x2d9   :  { %5038 = vmatpush.bf16.msra.mxu2 %v12997_v61  ;;  %5064 = vmatpush.bf16.msrb.mxu0 %v13253_v29  ;;  %v13316_v61 = vld [vmem:[%s24081_s3 + $0x320] sm:$0xf]  ;;  %v13301_v15 = vor.u32 %v16247_v59, %v13300_v44  ;;  %v16169_v29 = vld [vmem:[%s24081_s3 + $0xa4] sm:$0xf]  ;;  %v12966_v44 = vld [vmem:[%s24081_s3 + $0x70] sm:$0xf0] }
 0x2da   :  { %5053 = vmatpush.bf16.msra.mxu3 %v13093_v10  ;;  %5079 = vmatpush.bf16.msra.mxu1 %v13349_v41  ;;  %v13317_v10 = vor.u32 %v16251_v49, %v13316_v61  ;;  %v13492_v41 = vld [vmem:[%s24081_s3 + $0x480] sm:$0xf]  ;;  %v13001_v46 = vor.u32 %v16169_v29, %v12998_v55  ;;  %v16279_v61 = vld [vmem:[%s24081_s3 + $0x40c] sm:$0xf0]  ;;  %v16165_v49 = vld [vmem:[%s24081_s3 + $0x84] sm:$0xf] }
 0x2db   :  { %v13493_v40 = vor.u32 %v16295_v33, %v13492_v41  ;;  %v13172_v58 = vld [vmem:[%s24081_s3 + $0x200] sm:$0xf]  ;;  %v16157_v59 = vld [vmem:[%s24081_s3 + $0x44] sm:$0xf] }
 0x2dc   :  { %v13556_v33 = vld [vmem:[%s24081_s3 + $0x500] sm:$0xf]  ;;  %v16241_v29 = vld [vmem:[%s24081_s3 + $0x2e4] sm:$0xf] }
 0x2dd   :  { %5039 = vmatpush.bf16.msra.mxu2 %v12981_v27  ;;  %5065 = vmatpush.bf16.msrb.mxu0 %v13237_v63  ;;  %v13620_v27 = vld [vmem:[%s24081_s3 + $0x580] sm:$0xf]  ;;  %v13429_v63 = vor.u32 %v16279_v61, %v13428_v36 }
 0x2de   :  { %5054 = vmatpush.bf16.msra.mxu3 %v13077_v21  ;;  %5080 = vmatpush.bf16.msra.mxu1 %v13333_v19  ;;  %v13621_v43 = vor.u32 %v16327_v22, %v13620_v27  ;;  %v13220_v21 = vld [vmem:[%s24081_s3 + $0x260] sm:$0xf] }
 0x2df   :  { %v13572_v19 = vld [vmem:[%s24081_s3 + $0x520] sm:$0xf] }
 0x2e0   :  { %v13684_v27 = vld [vmem:[%s24081_s3 + $0x600] sm:$0xf] }
 0x2e1   :  { %5040 = vmatpush.bf16.msra.mxu2 %v12965_v20  ;;  %v13221_v20 = vor.u32 %v16227_v53, %v13220_v21  ;;  %v16161_v53 = vld [vmem:[%s24081_s3 + $0x64] sm:$0xf] }
 0x2e2   :  { %5055 = vmatpush.bf16.msra.mxu3 %v13061_v39  ;;  %5081 = vmatpush.bf16.msra.mxu1 %v13317_v10  ;;  %v16291_v39 = vld [vmem:[%s24081_s3 + $0x46c] sm:$0xf0]  ;;  %v12982_v10 = vld [vmem:[%s24081_s3 + $0x90] sm:$0xf0] }
 0x2e3   :  { %v13477_v28 = vor.u32 %v16291_v39, %v13476_v51  ;;  %5066 = vmatpush.bf16.msrb.mxu0 %v13221_v20  ;;  %v12985_v41 = vor.u32 %v16165_v49, %v12982_v10  ;;  %v12969_v20 = vor.u32 %v16161_v53, %v12966_v44  ;;  %v12950_v51 = vld [vmem:[%s24081_s3 + $0x50] sm:$0xf0]  ;;  %v16237_v49 = vld [vmem:[%s24081_s3 + $0x2c4] sm:$0xf] }
 0x2e4   :  { %v16205_v44 = vld [vmem:[%s24081_s3 + $0x1c4] sm:$0xf] }
 0x2e5   :  { %5041 = vmatpush.bf16.msra.mxu2 %v12949_v0  ;;  %v13604_v0 = vld [vmem:[%s24081_s3 + $0x560] sm:$0xf] }
 0x2e6   :  { %5056 = vmatpush.bf16.msra.mxu3 %v13045_v34  ;;  %v13204_v34 = vld [vmem:[%s24081_s3 + $0x240] sm:$0xf]  ;;  %5082 = vmatpush.bf16.msra.mxu1 %v13301_v15  ;;  %v12953_v15 = vor.u32 %v16157_v59, %v12950_v51 }
 0x2e9   :  { %5042 = vmatpush.bf16.msra.mxu2 %v12933_v16  ;;  %v13605_v16 = vor.u32 %v16323_v1, %v13604_v0 }
 0x2ea   :  { %5101 = vmatpush.bf16.msrb.mxu3 %v13669_v57  ;;  %v16223_v57 = vld [vmem:[%s24081_s3 + $0x24c] sm:$0xf0]  ;;  %5127 = vmatpush.bf16.msrb.mxu1 %v13033_v11 }
 0x2eb   :  { %v13205_v56 = vor.u32 %v16223_v57, %v13204_v34  ;;  %v16149_v34 = vld [vmem:[%s24081_s3 + $0x4] sm:$0xf]  ;;  %v12918_v57 = vld [vmem:[%s24081_s3 + $0x10] sm:$0xf0] }
 0x2ed   :  { %5043 = vmatpush.bf16.msra.mxu2 %v12917_v3  ;;  %v13461_v3 = vor.u32 %v16287_v31, %v13460_v26  ;;  %5067 = vmatpush.bf16.msrb.mxu0 %v13205_v56  ;;  %v12921_v56 = vor.u32 %v16149_v34, %v12918_v57  ;;  %v16265_v57 = vld [vmem:[%s24081_s3 + $0x3a4] sm:$0xf] }
 0x2ee   :  { %5102 = vmatpush.bf16.msrb.mxu3 %v13653_v60  ;;  %v16219_v60 = vld [vmem:[%s24081_s3 + $0x22c] sm:$0xf0] }
 0x2ef   :  { %v13189_v48 = vor.u32 %v16219_v60, %v13188_v5 }
 0x2f1   :  { %5088 = vmatpush.bf16.msrb.mxu2 %v13541_v23  ;;  %v13014_v23 = vld [vmem:[%s24081_s3 + $0xd0] sm:$0xf0]  ;;  %5068 = vmatpush.bf16.msrb.mxu0 %v13189_v48 }
 0x2f2   :  { %5103 = vmatpush.bf16.msrb.mxu3 %v13637_v9  ;;  %v13017_v47 = vor.u32 %v16173_v12, %v13014_v23  ;;  %v13173_v9 = vor.u32 %v16215_v50, %v13172_v58 }
 0x2f4   :  { %5128 = vmatpush.bf16.msrb.mxu1 %v13017_v47 }
 0x2f5   :  { %5089 = vmatpush.bf16.msrb.mxu2 %v13525_v52  ;;  %v16319_v52 = vld [vmem:[%s24081_s3 + $0x54c] sm:$0xf0]  ;;  %5069 = vmatpush.bf16.msrb.mxu0 %v13173_v9 }
 0x2f6   :  { %5104 = vmatpush.bf16.msrb.mxu3 %v13621_v43  ;;  %v13589_v42 = vor.u32 %v16319_v52, %v13588_v24  ;;  %v16343_v43 = vld [vmem:[%s24081_s3 + $0x60c] sm:$0xf0] }
 0x2f7   :  { %v13685_v21 = vor.u32 %v16343_v43, %v13684_v27  ;;  %v16269_v27 = vld [vmem:[%s24081_s3 + $0x3c4] sm:$0xf] }
 0x2f8   :  { %5129 = vmatpush.bf16.msrb.mxu1 %v13001_v46 }
 0x2f9   :  { %5090 = vmatpush.bf16.msrb.mxu2 %v13509_v37  ;;  %v16315_v37 = vld [vmem:[%s24081_s3 + $0x52c] sm:$0xf0]  ;;  %5121 = vmatpush.bf16.msra.mxu0 %v13685_v21 }
 0x2fa   :  { %5105 = vmatpush.bf16.msrb.mxu3 %v13605_v16  ;;  %v13573_v35 = vor.u32 %v16315_v37, %v13572_v19  ;;  %v16209_v19 = vld [vmem:[%s24081_s3 + $0x1e4] sm:$0xf]  ;;  %v13158_v37 = vld [vmem:[%s24081_s3 + $0x1f0] sm:$0xf0] }
 0x2fc   :  { %5130 = vmatpush.bf16.msrb.mxu1 %v12985_v41 }
 0x2fd   :  { %5091 = vmatpush.bf16.msrb.mxu2 %v13493_v40  ;;  %v16311_v40 = vld [vmem:[%s24081_s3 + $0x50c] sm:$0xf0] }
 0x2fe   :  { %5106 = vmatpush.bf16.msrb.mxu3 %v13589_v42  ;;  %v13557_v22 = vor.u32 %v16311_v40, %v13556_v33  ;;  %v13161_v40 = vor.u32 %v16209_v19, %v13158_v37  ;;  %v16225_v19 = vld [vmem:[%s24081_s3 + $0x264] sm:$0xf]  ;;  %v13222_v37 = vld [vmem:[%s24081_s3 + $0x270] sm:$0xf0] }
 0x300   :  { %5131 = vmatpush.bf16.msrb.mxu1 %v12969_v20  ;;  %v13142_v20 = vld [vmem:[%s24081_s3 + $0x1d0] sm:$0xf0] }
 0x301   :  { %5092 = vmatpush.bf16.msrb.mxu2 %v13477_v28  ;;  %v16153_v28 = vld [vmem:[%s24081_s3 + $0x24] sm:$0xf]  ;;  %v13145_v34 = vor.u32 %v16205_v44, %v13142_v20 }
 0x302   :  { %5107 = vmatpush.bf16.msrb.mxu3 %v13573_v35  ;;  %v12937_v0 = vor.u32 %v16153_v28, %v12934_v14  ;;  %v16233_v28 = vld [vmem:[%s24081_s3 + $0x2a4] sm:$0xf]  ;;  %v13254_v14 = vld [vmem:[%s24081_s3 + $0x2b0] sm:$0xf0] }
 0x303   :  { %v16221_v20 = vld [vmem:[%s24081_s3 + $0x244] sm:$0xf] }
 0x304   :  { %5132 = vmatpush.bf16.msrb.mxu1 %v12953_v15 }
 0x305   :  { %5093 = vmatpush.bf16.msrb.mxu2 %v13461_v3 }
 0x306   :  { %5108 = vmatpush.bf16.msrb.mxu3 %v13557_v22  ;;  %v13398_v22 = vld [vmem:[%s24081_s3 + $0x3d0] sm:$0xf0] }
 0x307   :  { %v13401_v15 = vor.u32 %v16269_v27, %v13398_v22  ;;  %v13225_v22 = vor.u32 %v16225_v19, %v13222_v37  ;;  %v13670_v19 = vld [vmem:[%s24081_s3 + $0x5f0] sm:$0xf0] }
 0x308   :  { %5133 = vmatpush.bf16.msrb.mxu1 %v12937_v0 }
 0x309   :  { %5094 = vmatpush.bf16.msrb.mxu2 %v13445_v4  ;;  %v13286_v4 = vld [vmem:[%s24081_s3 + $0x2f0] sm:$0xf0] }
 0x30a   :  { %v13289_v50 = vor.u32 %v16241_v29, %v13286_v4  ;;  %v16197_v29 = vld [vmem:[%s24081_s3 + $0x184] sm:$0xf] }
 0x30c   :  { %5134 = vmatpush.bf16.msrb.mxu1 %v12921_v56 }
 0x30d   :  { %5095 = vmatpush.bf16.msrb.mxu2 %v13429_v63  ;;  %v13270_v63 = vld [vmem:[%s24081_s3 + $0x2d0] sm:$0xf0] }
 0x30e   :  { %v13273_v51 = vor.u32 %v16237_v49, %v13270_v63 }
 0x33c   :  { %v3531_v39 = vpop.f32.mrf.mxu0 }
 0x33d   :  { %v20419_v8 = vpop.f32.mrf.mxu1  ;;  %v3635_v31 = vperm.slane %v3531_v39, 0 }
 0x33e   :  { %v3639_v59 = vperm.slane %v20419_v8, 0 }
 0x33f   :  { %v3642_v5 = vmul.f32 %v3635_v31, %v19299_v7  ;;  %v13126_v31 = vld [vmem:[%s24081_s3 + $0x1b0] sm:$0xf0] }
 0x342   :  { %v3511_v11 = vpop.f32.mrf.mxu2 }
 0x343   :  { %v20424_v1 = vpop.f32.mrf.mxu3  ;;  %v3634_v26 = vperm.slane %v3511_v11, 0 }
 0x344   :  { %v20432_v16 = vpop.f32.mrf.mxu0  ;;  %v3637_v0 = vperm.slane %v20424_v1, 0  ;;  %v16201_v1 = vld [vmem:[%s24081_s3 + $0x1a4] sm:$0xf] }
 0x345   :  { %v3736_v12 = vpop.f32.mrf.mxu1  ;;  %v3641_v24 = vmul.f32 %v3634_v26, %v19253_v54  ;;  %v16273_v54 = vld [vmem:[%s24081_s3 + $0x3e4] sm:$0xf]  ;;  %v3638_v43 = vperm.slane %v20432_v16, 0  ;;  %v13382_v16 = vld [vmem:[%s24081_s3 + $0x3b0] sm:$0xf0] }
 0x346   :  { %v3821_v60 = vperm.slane %v3736_v12, 0  ;;  %v3646_v12 = vmul.f32 %v3639_v59, %v19962_v38  ;;  %v13206_v59 = vld [vmem:[%s24081_s3 + $0x250] sm:$0xf0] }
 0x347   :  { %v3645_v56 = vmul.f32 %v3638_v43, %v19840_v32  ;;  %v16229_v32 = vld [vmem:[%s24081_s3 + $0x284] sm:$0xf] }
 0x348   :  { %v16301_v43 = vld [vmem:[%s24081_s3 + $0x4c4] sm:$0xf] }
 0x34a   :  { %v3551_v3 = vpop.f32.mrf.mxu2 }
 0x34b   :  { %v3636_v23 = vperm.slane %v3551_v3, 0  ;;  %v3696_v47 = vpop.f32.mrf.mxu3  ;;  %v13257_v3 = vor.u32 %v16233_v28, %v13254_v14  ;;  %v13334_v28 = vld [vmem:[%s24081_s3 + $0x350] sm:$0xf0] }
 0x34c   :  { %v3819_v52 = vperm.slane %v3696_v47, 0  ;;  %v3716_v42 = vpop.f32.mrf.mxu0 }
 0x34d   :  { %v3643_v48 = vmul.f32 %v3636_v23, %v19105_v25  ;;  %v3820_v45 = vperm.slane %v3716_v42, 0  ;;  %v13414_v25 = vld [vmem:[%s24081_s3 + $0x3f0] sm:$0xf0]  ;;  %v3816_v8 = vpop.f32.mrf.mxu1  ;;  %v3644_v42 = vmul.f32 %v3637_v0, %v24070_v2 }
 0x34e   :  { %v3826_v17 = vadd.f32 %v3819_v52, %v3641_v24  ;;  %v13417_v61 = vor.u32 %v16273_v54, %v13414_v25  ;;  %v3825_v23 = vperm.slane %v3816_v8, 0  ;;  %v13385_v52 = vor.u32 %v16265_v57, %v13382_v16  ;;  %v13110_v2 = vld [vmem:[%s24081_s3 + $0x190] sm:$0xf0]  ;;  %v16189_v8 = vld [vmem:[%s24081_s3 + $0x144] sm:$0xf] }
 0x34f   :  { %v3828_v55 = vadd.f32 %v3821_v60, %v3643_v48  ;;  %v3827_v46 = vadd.f32 %v3820_v45, %v3642_v5  ;;  %v13129_v60 = vor.u32 %v16201_v1, %v13126_v31  ;;  %v16261_v48 = vld [vmem:[%s24081_s3 + $0x384] sm:$0xf]  ;;  %v13366_v45 = vld [vmem:[%s24081_s3 + $0x390] sm:$0xf0] }
 0x350   :  { %v3833_v7 = vmax.f32 %v3826_v17, 0.0  ;;  %v13542_v54 = vld [vmem:[%s24081_s3 + $0x4f0] sm:$0xf0]  ;;  %v16297_v57 = vld [vmem:[%s24081_s3 + $0x4a4] sm:$0xf] }
 0x351   :  { %v3835_v35 = vmax.f32 %v3828_v55, 0.0  ;;  %v3834_v58 = vmax.f32 %v3827_v46, 0.0  ;;  %v16305_v46 = vld [vmem:[%s24081_s3 + $0x4e4] sm:$0xf]  ;;  %v13510_v16 = vld [vmem:[%s24081_s3 + $0x4b0] sm:$0xf0] }
 0x352   :  { %v20455_v9 = vpack.c.bf16 %v3833_v7, %v3833_v7  ;;  %v3631_v36 = vpop.f32.mrf.mxu2  ;;  %v13369_v7 = vor.u32 %v16261_v48, %v13366_v45  ;;  %v13545_v63 = vor.u32 %v16305_v46, %v13542_v54  ;;  %v13190_v1 = vld [vmem:[%s24081_s3 + $0x230] sm:$0xf0]  ;;  %v16245_v48 = vld [vmem:[%s24081_s3 + $0x304] sm:$0xf]  ;;  %v13036_v46 = vld [vmem:[%s24081_s3 + $0xe8] sm:$0xf] }
 0x353   :  { %v20463_v10 = vpack.c.bf16 %v3835_v35, %v3835_v35  ;;  %v20465_v41 = vpack.c.bf16 %v3834_v58, %v3834_v58  ;;  %v3776_v33 = vpop.f32.mrf.mxu3  ;;  %v3640_v21 = vperm.slane %v3631_v36, 0  ;;  %v16257_v36 = vld [vmem:[%s24081_s3 + $0x364] sm:$0xf]  ;;  %v16180_v54 = vld [vmem:[%s24081_s3 + $0xf4] sm:$0xf0] }
 0x354   :  { %5044 = vmatmul.bf16.vlgmr.msra.gmra.mxu2 %v20455_v9  ;;  %v3796_v53 = vpop.f32.mrf.mxu0  ;;  %v3823_v39 = vperm.slane %v3776_v33, 0  ;;  %v16193_v33 = vld [vmem:[%s24081_s3 + $0x164] sm:$0xf] }
 0x355   :  { %5153 = vmatpush.bf16.msra.mxu2 %v13289_v50  ;;  %5057 = vmatmul.bf16.vlgmr.msra.gmra.mxu3 %v20465_v41  ;;  %v3824_v11 = vperm.slane %v3796_v53, 0  ;;  %v3647_v26 = vmul.f32 %v3640_v21, %v19999_v6  ;;  %v13238_v6 = vld [vmem:[%s24081_s3 + $0x290] sm:$0xf0]  ;;  %v13113_v50 = vor.u32 %v16197_v29, %v13110_v2  ;;  %v16341_v29 = vld [vmem:[%s24081_s3 + $0x604] sm:$0xf] }
 0x356   :  { %5070 = vmatmul.bf16.vlgmr.msrb.gmra.mxu0 %v20463_v10  ;;  %5166 = vmatpush.bf16.msra.mxu3 %v13417_v61  ;;  %v3830_v47 = vadd.f32 %v3823_v39, %v3645_v56  ;;  %v13241_v55 = vor.u32 %v16229_v32, %v13238_v6  ;;  %v13350_v61 = vld [vmem:[%s24081_s3 + $0x370] sm:$0xf0]  ;;  %v16213_v32 = vld [vmem:[%s24081_s3 + $0x204] sm:$0xf] }
 0x357   :  { %5140 = vmatpush.bf16.msrb.mxu0 %v13161_v40  ;;  %v3831_v5 = vadd.f32 %v3824_v11, %v3646_v12  ;;  %v3832_v17 = vadd.f32 %v3825_v23, %v3647_v26  ;;  %v13094_v40 = vld [vmem:[%s24081_s3 + $0x170] sm:$0xf0]  ;;  %v13353_v44 = vor.u32 %v16257_v36, %v13350_v61  ;;  %v16217_v26 = vld [vmem:[%s24081_s3 + $0x224] sm:$0xf]  ;;  %v13513_v23 = vor.u32 %v16297_v57, %v13510_v16  ;;  %v13004_v16 = vld [vmem:[%s24081_s3 + $0xa8] sm:$0xf] }
 0x358   :  { %v3837_v25 = vmax.f32 %v3830_v47, 0.0  ;;  %v13526_v21 = vld [vmem:[%s24081_s3 + $0x4d0] sm:$0xf0]  ;;  %v13097_v39 = vor.u32 %v16193_v33, %v13094_v40  ;;  %v16249_v12 = vld [vmem:[%s24081_s3 + $0x324] sm:$0xf]  ;;  %v13037_v61 = vor.u32 %v16180_v54, %v13036_v46 }
 0x359   :  { %5154 = vmatpush.bf16.msra.mxu2 %v13273_v51  ;;  %v3838_v35 = vmax.f32 %v3831_v5, 0.0  ;;  %v3839_v49 = vmax.f32 %v3832_v17, 0.0  ;;  %v13529_v0 = vor.u32 %v16301_v43, %v13526_v21  ;;  %v13078_v11 = vld [vmem:[%s24081_s3 + $0x150] sm:$0xf0]  ;;  %v16185_v47 = vld [vmem:[%s24081_s3 + $0x124] sm:$0xf] }
 0x35a   :  { %5167 = vmatpush.bf16.msra.mxu3 %v13401_v15  ;;  %v3756_v24 = vpop.f32.mrf.mxu2  ;;  %v20557_v53 = vpack.c.bf16 %v3837_v25, %v3837_v25  ;;  %v16253_v15 = vld [vmem:[%s24081_s3 + $0x344] sm:$0xf]  ;;  %v13081_v31 = vor.u32 %v16189_v8, %v13078_v11  ;;  %v13302_v17 = vld [vmem:[%s24081_s3 + $0x310] sm:$0xf0]  ;;  %v13020_v21 = vld [vmem:[%s24081_s3 + $0xc8] sm:$0xf] }
 0x35b   :  { %5141 = vmatpush.bf16.msrb.mxu0 %v13145_v34  ;;  %v3822_v38 = vperm.slane %v3756_v24, 0  ;;  %v20565_v51 = vpack.c.bf16 %v3838_v35, %v3838_v35  ;;  %v20574_v14 = vpack.c.bf16 %v3839_v49, %v3839_v49  ;;  %v13209_v34 = vor.u32 %v16221_v20, %v13206_v59  ;;  %v13062_v24 = vld [vmem:[%s24081_s3 + $0x130] sm:$0xf0]  ;;  %v16293_v6 = vld [vmem:[%s24081_s3 + $0x484] sm:$0xf] }
 0x35c   :  { %v13337_v56 = vor.u32 %v16253_v15, %v13334_v28  ;;  %v13065_v45 = vor.u32 %v16185_v47, %v13062_v24  ;;  %v13686_v2 = vld [vmem:[%s24081_s3 + $0x610] sm:$0xf0]  ;;  %v13305_v37 = vor.u32 %v16245_v48, %v13302_v17  ;;  %v13292_v49 = vld [vmem:[%s24081_s3 + $0x2e8] sm:$0xf]  ;;  %v16333_v40 = vld [vmem:[%s24081_s3 + $0x5c4] sm:$0xf] }
 0x35d   :  { %v3829_v4 = vadd.f32 %v3822_v38, %v3644_v42  ;;  %5155 = vmatpush.bf16.msra.mxu2 %v13257_v3  ;;  %v13318_v3 = vld [vmem:[%s24081_s3 + $0x330] sm:$0xf0]  ;;  %v13689_v35 = vor.u32 %v16341_v29, %v13686_v2  ;;  %v16285_v59 = vld [vmem:[%s24081_s3 + $0x444] sm:$0xf]  ;;  %v13276_v15 = vld [vmem:[%s24081_s3 + $0x2c8] sm:$0xf] }
 0x35e   :  { %5168 = vmatpush.bf16.msra.mxu3 %v13385_v52  ;;  %v13193_v52 = vor.u32 %v16217_v26, %v13190_v1  ;;  %v13494_v42 = vld [vmem:[%s24081_s3 + $0x490] sm:$0xf0]  ;;  %v13321_v5 = vor.u32 %v16249_v12, %v13318_v3  ;;  %v16240_v28 = vld [vmem:[%s24081_s3 + $0x2d4] sm:$0xf0]  ;;  %v16329_v11 = vld [vmem:[%s24081_s3 + $0x5a4] sm:$0xf] }
 0x35f   :  { %v3836_v58 = vmax.f32 %v3829_v4, 0.0  ;;  %5142 = vmatpush.bf16.msrb.mxu0 %v13129_v60  ;;  %v13174_v38 = vld [vmem:[%s24081_s3 + $0x210] sm:$0xf0]  ;;  %v16181_v60 = vld [vmem:[%s24081_s3 + $0x104] sm:$0xf]  ;;  %v13497_v4 = vor.u32 %v16293_v6, %v13494_v42  ;;  %v13277_v26 = vor.u32 %v16240_v28, %v13276_v15 }
 0x360   :  { %v13177_v25 = vor.u32 %v16213_v32, %v13174_v38  ;;  %v13654_v43 = vld [vmem:[%s24081_s3 + $0x5d0] sm:$0xf0]  ;;  %v16281_v1 = vld [vmem:[%s24081_s3 + $0x424] sm:$0xf]  ;;  %v13260_v12 = vld [vmem:[%s24081_s3 + $0x2a8] sm:$0xf] }
 0x361   :  { %v20549_v27 = vpack.c.bf16 %v3836_v58, %v3836_v58  ;;  %5156 = vmatpush.bf16.msra.mxu2 %v13241_v55  ;;  %v13046_v55 = vld [vmem:[%s24081_s3 + $0x110] sm:$0xf0]  ;;  %v16289_v58 = vld [vmem:[%s24081_s3 + $0x464] sm:$0xf]  ;;  %v16236_v3 = vld [vmem:[%s24081_s3 + $0x2b4] sm:$0xf0] }
 0x362   :  { %5169 = vmatpush.bf16.msra.mxu3 %v13369_v7  ;;  %v16337_v7 = vld [vmem:[%s24081_s3 + $0x5e4] sm:$0xf]  ;;  %v13049_v36 = vor.u32 %v16181_v60, %v13046_v55  ;;  %v13638_v57 = vld [vmem:[%s24081_s3 + $0x5b0] sm:$0xf0]  ;;  %v12988_v6 = vld [vmem:[%s24081_s3 + $0x88] sm:$0xf] }
 0x363   :  { %5143 = vmatpush.bf16.msrb.mxu0 %v13113_v50  ;;  %5083 = vmatmul.bf16.vlgmr.msra.gmra.mxu1 %v20549_v27  ;;  %v13478_v50 = vld [vmem:[%s24081_s3 + $0x470] sm:$0xf0]  ;;  %v13673_v33 = vor.u32 %v16337_v7, %v13670_v19  ;;  %v16325_v24 = vld [vmem:[%s24081_s3 + $0x584] sm:$0xf]  ;;  %v16168_v42 = vld [vmem:[%s24081_s3 + $0x94] sm:$0xf0] }
 0x364   :  { %5096 = vmatmul.bf16.vlgmr.msrb.gmra.mxu2 %v20557_v53  ;;  %5179 = vmatpush.bf16.msra.mxu1 %v13545_v63  ;;  %v16244_v63 = vld [vmem:[%s24081_s3 + $0x2f4] sm:$0xf0]  ;;  %v13622_v32 = vld [vmem:[%s24081_s3 + $0x590] sm:$0xf0]  ;;  %v16277_v38 = vld [vmem:[%s24081_s3 + $0x404] sm:$0xf] }
 0x365   :  { %5157 = vmatpush.bf16.msra.mxu2 %v13225_v22  ;;  %5109 = vmatmul.bf16.vlgmr.msrb.gmra.mxu3 %v20565_v51  ;;  %v13481_v22 = vor.u32 %v16289_v58, %v13478_v50  ;;  %v13293_v20 = vor.u32 %v16244_v63, %v13292_v49  ;;  %v13430_v60 = vld [vmem:[%s24081_s3 + $0x410] sm:$0xf0]  ;;  %v13244_v48 = vld [vmem:[%s24081_s3 + $0x288] sm:$0xf]  ;;  %v16212_v29 = vld [vmem:[%s24081_s3 + $0x1f4] sm:$0xf0]  ;;  %v13625_v2 = vor.u32 %v16325_v24, %v13622_v32 }
 0x366   :  { %13698 = vmatmul.msk.bf16.vlgmr.msra.gmra.mxu0 %vm2300_vm0, %v20574_v14  ;;  %5170 = vmatpush.bf16.msra.mxu3 %v13353_v44  ;;  %v16176_v44 = vld [vmem:[%s24081_s3 + $0xd4] sm:$0xf0]  ;;  %v13164_v17 = vld [vmem:[%s24081_s3 + $0x1e8] sm:$0xf]  ;;  %v16321_v55 = vld [vmem:[%s24081_s3 + $0x564] sm:$0xf]  ;;  %v13433_v46 = vor.u32 %v16277_v38, %v13430_v60 }
 0x367   :  { %5144 = vmatpush.bf16.msrb.mxu0 %v13097_v39  ;;  %v13462_v39 = vld [vmem:[%s24081_s3 + $0x450] sm:$0xf0]  ;;  %v13021_v8 = vor.u32 %v16176_v44, %v13020_v21  ;;  %v16164_v7 = vld [vmem:[%s24081_s3 + $0x74] sm:$0xf0]  ;;  %v13148_v50 = vld [vmem:[%s24081_s3 + $0x1c8] sm:$0xf] }
 0x368   :  { %5180 = vmatpush.bf16.msra.mxu1 %v13529_v0  ;;  %v13657_v0 = vor.u32 %v16333_v40, %v13654_v43  ;;  %v13606_v54 = vld [vmem:[%s24081_s3 + $0x570] sm:$0xf0]  ;;  %v16228_v58 = vld [vmem:[%s24081_s3 + $0x274] sm:$0xf0]  ;;  %v16317_v63 = vld [vmem:[%s24081_s3 + $0x544] sm:$0xf] }
 0x369   :  { %5158 = vmatpush.bf16.msra.mxu2 %v13209_v34  ;;  %v13465_v34 = vor.u32 %v16285_v59, %v13462_v39  ;;  %v12956_v40 = vld [vmem:[%s24081_s3 + $0x48] sm:$0xf]  ;;  %v16204_v39 = vld [vmem:[%s24081_s3 + $0x1b4] sm:$0xf0] }
 0x36a   :  { %5171 = vmatpush.bf16.msra.mxu3 %v13337_v56  ;;  %v16172_v56 = vld [vmem:[%s24081_s3 + $0xb4] sm:$0xf0]  ;;  %v13212_v44 = vld [vmem:[%s24081_s3 + $0x248] sm:$0xf] }
 0x36b   :  { %5145 = vmatpush.bf16.msrb.mxu0 %v13081_v31  ;;  %v13446_v31 = vld [vmem:[%s24081_s3 + $0x430] sm:$0xf0]  ;;  %v13005_v47 = vor.u32 %v16172_v56, %v13004_v16  ;;  %v13132_v59 = vld [vmem:[%s24081_s3 + $0x1a8] sm:$0xf]  ;;  %v16276_v38 = vld [vmem:[%s24081_s3 + $0x3f4] sm:$0xf0] }
 0x36c   :  { %5181 = vmatpush.bf16.msra.mxu1 %v13513_v23  ;;  %v13641_v23 = vor.u32 %v16329_v11, %v13638_v57  ;;  %v12940_v11 = vld [vmem:[%s24081_s3 + $0x28] sm:$0xf]  ;;  %v13133_v16 = vor.u32 %v16204_v39, %v13132_v59  ;;  %v16300_v39 = vld [vmem:[%s24081_s3 + $0x4b4] sm:$0xf0] }
 0x36d   :  { %5159 = vmatpush.bf16.msra.mxu2 %v13193_v52  ;;  %v13449_v52 = vor.u32 %v16281_v1, %v13446_v31  ;;  %v13196_v56 = vld [vmem:[%s24081_s3 + $0x228] sm:$0xf]  ;;  %v16200_v31 = vld [vmem:[%s24081_s3 + $0x194] sm:$0xf0] }
 0x36e   :  { %5172 = vmatpush.bf16.msra.mxu3 %v13321_v5  ;;  %v13261_v5 = vor.u32 %v16236_v3, %v13260_v12  ;;  %v13116_v1 = vld [vmem:[%s24081_s3 + $0x188] sm:$0xf] }
 0x36f   :  { %5146 = vmatpush.bf16.msrb.mxu0 %v13065_v45  ;;  %v16232_v45 = vld [vmem:[%s24081_s3 + $0x294] sm:$0xf0]  ;;  %v12924_v24 = vld [vmem:[%s24081_s3 + $0x8] sm:$0xf] }
 0x370   :  { %5182 = vmatpush.bf16.msra.mxu1 %v13497_v4  ;;  %v12989_v4 = vor.u32 %v16168_v42, %v12988_v6  ;;  %v13245_v19 = vor.u32 %v16232_v45, %v13244_v48  ;;  %v13180_v32 = vld [vmem:[%s24081_s3 + $0x208] sm:$0xf]  ;;  %v16308_v48 = vld [vmem:[%s24081_s3 + $0x4f4] sm:$0xf0] }
 0x371   :  { %5160 = vmatpush.bf16.msra.mxu2 %v13177_v25  ;;  %v12972_v25 = vld [vmem:[%s24081_s3 + $0x68] sm:$0xf]  ;;  %v16216_v45 = vld [vmem:[%s24081_s3 + $0x214] sm:$0xf0] }
 0x372   :  { %5173 = vmatpush.bf16.msra.mxu3 %v13305_v37  ;;  %v13165_v37 = vor.u32 %v16212_v29, %v13164_v17  ;;  %v12973_v49 = vor.u32 %v16164_v7, %v12972_v25  ;;  %v13420_v6 = vld [vmem:[%s24081_s3 + $0x3e8] sm:$0xf]  ;;  %v16196_v29 = vld [vmem:[%s24081_s3 + $0x174] sm:$0xf0]  ;;  %v13181_v7 = vor.u32 %v16216_v45, %v13180_v32 }
 0x373   :  { %5147 = vmatpush.bf16.msrb.mxu0 %v13049_v36  ;;  %5135 = vmatmul.bf16.vlgmr.msrb.gmra.mxu1 %v20455_v9  ;;  %v16208_v36 = vld [vmem:[%s24081_s3 + $0x1d4] sm:$0xf0]  ;;  %v13548_v60 = vld [vmem:[%s24081_s3 + $0x4e8] sm:$0xf] }
 0x374   :  { %5161 = vmatmul.bf16.vlgmr.msra.gmra.mxu2 %v20463_v10  ;;  %5183 = vmatpush.bf16.msra.mxu1 %v13481_v22  ;;  %v16160_v22 = vld [vmem:[%s24081_s3 + $0x54] sm:$0xf0]  ;;  %v13149_v21 = vor.u32 %v16208_v36, %v13148_v50  ;;  %v13100_v17 = vld [vmem:[%s24081_s3 + $0x168] sm:$0xf]  ;;  %v16210_v36 = vld [vmem:[%s24081_s3 + $0x1ec] sm:$0xf] }
 0x375   :  { %5212 = vmatpush.bf16.msrb.mxu2 %v13689_v35  ;;  %5174 = vmatmul.bf16.vlgmr.msra.gmra.mxu3 %v20549_v27  ;;  %v13228_v35 = vld [vmem:[%s24081_s3 + $0x268] sm:$0xf]  ;;  %v12957_v28 = vor.u32 %v16160_v22, %v12956_v40  ;;  %v16344_v25 = vld [vmem:[%s24081_s3 + $0x614] sm:$0xf0] }
 0x376   :  { %5218 = vmatpush.bf16.msrb.mxu3 %v13037_v61  ;;  %5148 = vmatmul.bf16.vlgmr.msrb.gmra.mxu0 %v20465_v41  ;;  %v13609_v61 = vor.u32 %v16321_v55, %v13606_v54  ;;  %v13229_v43 = vor.u32 %v16228_v58, %v13228_v35  ;;  %v13421_v55 = vor.u32 %v16276_v38, %v13420_v6  ;;  %v13692_v54 = vld [vmem:[%s24081_s3 + $0x608] sm:$0xf]  ;;  %v16272_v35 = vld [vmem:[%s24081_s3 + $0x3d4] sm:$0xf0] }
 0x377   :  { %5192 = vmatpush.bf16.msra.mxu0 %v13673_v33  ;;  %v13590_v33 = vld [vmem:[%s24081_s3 + $0x550] sm:$0xf0]  ;;  %v13532_v58 = vld [vmem:[%s24081_s3 + $0x4c8] sm:$0xf]  ;;  %v16304_v50 = vld [vmem:[%s24081_s3 + $0x4d4] sm:$0xf0] }
 0x378   :  { %5184 = vmatpush.bf16.msra.mxu1 %v13465_v34  ;;  %v13593_v15 = vor.u32 %v16317_v63, %v13590_v33  ;;  %v16156_v34 = vld [vmem:[%s24081_s3 + $0x34] sm:$0xf0]  ;;  %v13084_v63 = vld [vmem:[%s24081_s3 + $0x148] sm:$0xf]  ;;  %v13533_v22 = vor.u32 %v16304_v50, %v13532_v58  ;;  %v16194_v50 = vld [vmem:[%s24081_s3 + $0x16c] sm:$0xf] }
 0x379   :  { %5244 = vmatpush.bf16.msra.mxu2 %v13293_v20  ;;  %v16224_v20 = vld [vmem:[%s24081_s3 + $0x254] sm:$0xf0]  ;;  %v12941_v3 = vor.u32 %v16156_v34, %v12940_v11 }
 0x37a   :  { %5219 = vmatpush.bf16.msrb.mxu3 %v13021_v8  ;;  %v13574_v8 = vld [vmem:[%s24081_s3 + $0x530] sm:$0xf0]  ;;  %v13213_v57 = vor.u32 %v16224_v20, %v13212_v44  ;;  %v16192_v33 = vld [vmem:[%s24081_s3 + $0x154] sm:$0xf0]  ;;  %v13516_v20 = vld [vmem:[%s24081_s3 + $0x4a8] sm:$0xf] }
 0x37b   :  { %5193 = vmatpush.bf16.msra.mxu0 %v13657_v0  ;;  %v16313_v0 = vld [vmem:[%s24081_s3 + $0x524] sm:$0xf]  ;;  %v16268_v44 = vld [vmem:[%s24081_s3 + $0x3b4] sm:$0xf0]  ;;  %v13085_v59 = vor.u32 %v16192_v33, %v13084_v63  ;;  %v13517_v34 = vor.u32 %v16300_v39, %v13516_v20  ;;  %v13086_v39 = vld [vmem:[%s24081_s3 + $0x158] sm:$0xf0] }
 0x37c   :  { %5185 = vmatpush.bf16.msra.mxu1 %v13449_v52  ;;  %v13577_v12 = vor.u32 %v16313_v0, %v13574_v8  ;;  %v16152_v52 = vld [vmem:[%s24081_s3 + $0x14] sm:$0xf0]  ;;  %v13068_v0 = vld [vmem:[%s24081_s3 + $0x128] sm:$0xf] }
 0x37d   :  { %5245 = vmatpush.bf16.msra.mxu2 %v13277_v26  ;;  %v16220_v26 = vld [vmem:[%s24081_s3 + $0x234] sm:$0xf0] }
 0x37e   :  { %5220 = vmatpush.bf16.msrb.mxu3 %v13005_v47  ;;  %v13558_v47 = vld [vmem:[%s24081_s3 + $0x510] sm:$0xf0]  ;;  %v13197_v42 = vor.u32 %v16220_v26, %v13196_v56  ;;  %v16188_v8 = vld [vmem:[%s24081_s3 + $0x134] sm:$0xf0]  ;;  %v13500_v26 = vld [vmem:[%s24081_s3 + $0x488] sm:$0xf] }
 0x37f   :  { %5194 = vmatpush.bf16.msra.mxu0 %v13641_v23  ;;  %v16309_v23 = vld [vmem:[%s24081_s3 + $0x504] sm:$0xf]  ;;  %v16264_v56 = vld [vmem:[%s24081_s3 + $0x394] sm:$0xf0] }
 0x380   :  { %5186 = vmatpush.bf16.msra.mxu1 %v13433_v46  ;;  %v13549_v46 = vor.u32 %v16308_v48, %v13548_v60  ;;  %v16340_v32 = vld [vmem:[%s24081_s3 + $0x5f4] sm:$0xf0]  ;;  %v13484_v48 = vld [vmem:[%s24081_s3 + $0x468] sm:$0xf] }
 0x381   :  { %5246 = vmatpush.bf16.msra.mxu2 %v13261_v5  ;;  %v13117_v5 = vor.u32 %v16200_v31, %v13116_v1  ;;  %v13069_v1 = vor.u32 %v16188_v8, %v13068_v0  ;;  %v16296_v31 = vld [vmem:[%s24081_s3 + $0x494] sm:$0xf0]  ;;  %v13308_v8 = vld [vmem:[%s24081_s3 + $0x308] sm:$0xf] }
 0x382   :  { %5221 = vmatpush.bf16.msrb.mxu3 %v12989_v4  ;;  %v12925_v4 = vor.u32 %v16152_v52, %v12924_v24  ;;  %v13676_v52 = vld [vmem:[%s24081_s3 + $0x5e8] sm:$0xf]  ;;  %v13501_v6 = vor.u32 %v16296_v31, %v13500_v26  ;;  %v16260_v38 = vld [vmem:[%s24081_s3 + $0x374] sm:$0xf0]  ;;  %v16186_v26 = vld [vmem:[%s24081_s3 + $0x12c] sm:$0xf] }
 0x383   :  { %5195 = vmatpush.bf16.msra.mxu0 %v13625_v2  ;;  %5187 = vmatmul.bf16.vlgmr.msra.gmra.mxu1 %v20557_v53  ;;  %v13561_v2 = vor.u32 %v16309_v23, %v13558_v47  ;;  %v13052_v23 = vld [vmem:[%s24081_s3 + $0x108] sm:$0xf]  ;;  %v16184_v47 = vld [vmem:[%s24081_s3 + $0x114] sm:$0xf0]  ;;  %v13038_v31 = vld [vmem:[%s24081_s3 + $0xf8] sm:$0xf0] }
 0x384   :  { %5231 = vmatpush.bf16.msrb.mxu1 %v13165_v37  ;;  %13699 = vmatmul.msk.bf16.vlgmr.msrb.gmra.mxu2 %vm2300_vm0, %v20574_v14  ;;  %v13404_v37 = vld [vmem:[%s24081_s3 + $0x3c8] sm:$0xf]  ;;  %v13053_v60 = vor.u32 %v16184_v47, %v13052_v23  ;;  %v16292_v45 = vld [vmem:[%s24081_s3 + $0x474] sm:$0xf0]  ;;  %v16242_v23 = vld [vmem:[%s24081_s3 + $0x2ec] sm:$0xf] }
 0x385   :  { %5247 = vmatpush.bf16.msra.mxu2 %v13245_v19  ;;  %v13101_v19 = vor.u32 %v16196_v29, %v13100_v17  ;;  %v13405_v40 = vor.u32 %v16272_v35, %v13404_v37  ;;  %v13677_v17 = vor.u32 %v16340_v32, %v13676_v52  ;;  %v16198_v29 = vld [vmem:[%s24081_s3 + $0x18c] sm:$0xf]  ;;  %v13468_v37 = vld [vmem:[%s24081_s3 + $0x448] sm:$0xf]  ;;  %v16288_v35 = vld [vmem:[%s24081_s3 + $0x454] sm:$0xf0] }
 0x386   :  { %5222 = vmatpush.bf16.msrb.mxu3 %v12973_v49  ;;  %v13693_v49 = vor.u32 %v16344_v25, %v13692_v54  ;;  %v13485_v54 = vor.u32 %v16292_v45, %v13484_v48  ;;  %v13340_v25 = vld [vmem:[%s24081_s3 + $0x348] sm:$0xf]  ;;  %v16332_v63 = vld [vmem:[%s24081_s3 + $0x5b4] sm:$0xf0]  ;;  %v13469_v33 = vor.u32 %v16288_v35, %v13468_v37  ;;  %v13294_v47 = vld [vmem:[%s24081_s3 + $0x2f8] sm:$0xf0] }
 0x387   :  { %5196 = vmatpush.bf16.msra.mxu0 %v13609_v61  ;;  %v13166_v61 = vld [vmem:[%s24081_s3 + $0x1f8] sm:$0xf0]  ;;  %v16328_v0 = vld [vmem:[%s24081_s3 + $0x594] sm:$0xf0]  ;;  %v13612_v52 = vld [vmem:[%s24081_s3 + $0x568] sm:$0xf] }
 0x388   :  { %5232 = vmatpush.bf16.msrb.mxu1 %v13149_v21  ;;  %v13388_v21 = vld [vmem:[%s24081_s3 + $0x3a8] sm:$0xf]  ;;  %v16324_v32 = vld [vmem:[%s24081_s3 + $0x574] sm:$0xf0]  ;;  %v13054_v48 = vld [vmem:[%s24081_s3 + $0x118] sm:$0xf0] }
 0x389   :  { %5248 = vmatpush.bf16.msra.mxu2 %v13229_v43  ;;  %v13169_v43 = vor.u32 %v16210_v36, %v13166_v61  ;;  %v13389_v11 = vor.u32 %v16268_v44, %v13388_v21  ;;  %v13102_v36 = vld [vmem:[%s24081_s3 + $0x178] sm:$0xf0]  ;;  %v13452_v21 = vld [vmem:[%s24081_s3 + $0x428] sm:$0xf]  ;;  %v16284_v44 = vld [vmem:[%s24081_s3 + $0x434] sm:$0xf0] }
 0x38a   :  { %5223 = vmatpush.bf16.msrb.mxu3 %v12957_v28  ;;  %v13150_v28 = vld [vmem:[%s24081_s3 + $0x1d8] sm:$0xf0]  ;;  %v16174_v45 = vld [vmem:[%s24081_s3 + $0xcc] sm:$0xf] }
 0x38b   :  { %5197 = vmatpush.bf16.msra.mxu0 %v13593_v15  ;;  %v16206_v15 = vld [vmem:[%s24081_s3 + $0x1cc] sm:$0xf] }
 0x38c   :  { %5233 = vmatpush.bf16.msrb.mxu1 %v13133_v16  ;;  %v13372_v16 = vld [vmem:[%s24081_s3 + $0x388] sm:$0xf]  ;;  %v16170_v35 = vld [vmem:[%s24081_s3 + $0xac] sm:$0xf] }
 0x38d   :  { %5249 = vmatpush.bf16.msra.mxu2 %v13213_v57  ;;  %v13153_v57 = vor.u32 %v16206_v15, %v13150_v28  ;;  %v13373_v24 = vor.u32 %v16264_v56, %v13372_v16  ;;  %v13628_v28 = vld [vmem:[%s24081_s3 + $0x588] sm:$0xf]  ;;  %v16280_v16 = vld [vmem:[%s24081_s3 + $0x414] sm:$0xf0] }
 0x38e   :  { %5224 = vmatpush.bf16.msrb.mxu3 %v12941_v3  ;;  %v13134_v3 = vld [vmem:[%s24081_s3 + $0x1b8] sm:$0xf0] }
 0x38f   :  { %5198 = vmatpush.bf16.msra.mxu0 %v13577_v12  ;;  %v16202_v12 = vld [vmem:[%s24081_s3 + $0x1ac] sm:$0xf] }
 0x390   :  { %5234 = vmatpush.bf16.msrb.mxu1 %v13117_v5  ;;  %v13356_v5 = vld [vmem:[%s24081_s3 + $0x368] sm:$0xf] }
 0x391   :  { %5250 = vmatpush.bf16.msra.mxu2 %v13197_v42  ;;  %v13137_v42 = vor.u32 %v16202_v12, %v13134_v3  ;;  %v13629_v12 = vor.u32 %v16328_v0, %v13628_v28  ;;  %v13070_v3 = vld [vmem:[%s24081_s3 + $0x138] sm:$0xf0]  ;;  %v16330_v0 = vld [vmem:[%s24081_s3 + $0x5ac] sm:$0xf] }
 0x392   :  { %5225 = vmatpush.bf16.msrb.mxu3 %v12925_v4  ;;  %v13357_v4 = vor.u32 %v16260_v38, %v13356_v5  ;;  %v16182_v5 = vld [vmem:[%s24081_s3 + $0x10c] sm:$0xf]  ;;  %v13073_v38 = vor.u32 %v16186_v26, %v13070_v3  ;;  %v13246_v28 = vld [vmem:[%s24081_s3 + $0x298] sm:$0xf0] }
 0x393   :  { %5199 = vmatpush.bf16.msra.mxu0 %v13561_v2  ;;  %v13118_v2 = vld [vmem:[%s24081_s3 + $0x198] sm:$0xf0]  ;;  %v16226_v3 = vld [vmem:[%s24081_s3 + $0x26c] sm:$0xf] }
 0x394   :  { %5235 = vmatpush.bf16.msrb.mxu1 %v13101_v19  ;;  %v13121_v19 = vor.u32 %v16198_v29, %v13118_v2  ;;  %v13613_v29 = vor.u32 %v16324_v32, %v13612_v52  ;;  %v16238_v2 = vld [vmem:[%s24081_s3 + $0x2cc] sm:$0xf]  ;;  %v13630_v52 = vld [vmem:[%s24081_s3 + $0x598] sm:$0xf0] }
 0x395   :  { %5251 = vmatpush.bf16.msra.mxu2 %v13181_v7  ;;  %5226 = vmatmul.bf16.vlgmr.msrb.gmra.mxu3 %v20455_v9  ;;  %v16256_v7 = vld [vmem:[%s24081_s3 + $0x354] sm:$0xf0] }
 0x396   :  { %5270 = vmatpush.bf16.msra.mxu3 %v13549_v46  ;;  %5200 = vmatmul.bf16.vlgmr.msra.gmra.mxu0 %v20565_v51  ;;  %v16336_v46 = vld [vmem:[%s24081_s3 + $0x5d4] sm:$0xf0]  ;;  %v13341_v61 = vor.u32 %v16256_v7, %v13340_v25 }
 0x397   :  { %5257 = vmatpush.bf16.msrb.mxu0 %v13421_v55  ;;  %v13660_v55 = vld [vmem:[%s24081_s3 + $0x5c8] sm:$0xf]  ;;  %v16320_v25 = vld [vmem:[%s24081_s3 + $0x554] sm:$0xf0] }
 0x398   :  { %5252 = vmatmul.bf16.vlgmr.msra.gmra.mxu2 %v20463_v10  ;;  %5236 = vmatpush.bf16.msrb.mxu1 %v13085_v59  ;;  %v13661_v58 = vor.u32 %v16336_v46, %v13660_v55  ;;  %v16190_v59 = vld [vmem:[%s24081_s3 + $0x14c] sm:$0xf]  ;;  %v13678_v46 = vld [vmem:[%s24081_s3 + $0x5f8] sm:$0xf0] }
 0x399   :  { %5303 = vmatpush.bf16.msrb.mxu2 %v13693_v49  ;;  %v13644_v49 = vld [vmem:[%s24081_s3 + $0x5a8] sm:$0xf]  ;;  %v13089_v56 = vor.u32 %v16190_v59, %v13086_v39  ;;  %v16338_v55 = vld [vmem:[%s24081_s3 + $0x5ec] sm:$0xf] }
 0x39a   :  { %5271 = vmatpush.bf16.msra.mxu3 %v13533_v22  ;;  %v16252_v22 = vld [vmem:[%s24081_s3 + $0x334] sm:$0xf0]  ;;  %v13645_v20 = vor.u32 %v16332_v63, %v13644_v49  ;;  %v13262_v49 = vld [vmem:[%s24081_s3 + $0x2b8] sm:$0xf0]  ;;  %v16334_v63 = vld [vmem:[%s24081_s3 + $0x5cc] sm:$0xf] }
 0x39b   :  { %5258 = vmatpush.bf16.msrb.mxu0 %v13405_v40  ;;  %v13324_v40 = vld [vmem:[%s24081_s3 + $0x328] sm:$0xf] }
 0x39c   :  { %5237 = vmatpush.bf16.msrb.mxu1 %v13069_v1  ;;  %v13325_v15 = vor.u32 %v16252_v22, %v13324_v40  ;;  %v16178_v1 = vld [vmem:[%s24081_s3 + $0xec] sm:$0xf]  ;;  %v13580_v40 = vld [vmem:[%s24081_s3 + $0x528] sm:$0xf]  ;;  %v16316_v22 = vld [vmem:[%s24081_s3 + $0x534] sm:$0xf0] }
 0x39d   :  { %5322 = vmatpush.bf16.msra.mxu2 %v13169_v43  ;;  %v13105_v43 = vor.u32 %v16194_v50, %v13102_v36  ;;  %v13681_v50 = vor.u32 %v16338_v55, %v13678_v46  ;;  %v13581_v39 = vor.u32 %v16316_v22, %v13580_v40  ;;  %v16266_v46 = vld [vmem:[%s24081_s3 + $0x3ac] sm:$0xf] }
 0x39e   :  { %5272 = vmatpush.bf16.msra.mxu3 %v13517_v34  ;;  %v16248_v34 = vld [vmem:[%s24081_s3 + $0x314] sm:$0xf0]  ;;  %v16150_v40 = vld [vmem:[%s24081_s3 + $0xc] sm:$0xf] }
 0x39f   :  { %5259 = vmatpush.bf16.msrb.mxu0 %v13389_v11  ;;  %v13453_v11 = vor.u32 %v16284_v44, %v13452_v21  ;;  %v16166_v44 = vld [vmem:[%s24081_s3 + $0x8c] sm:$0xf] }
 0x3a0   :  { %5238 = vmatpush.bf16.msrb.mxu1 %v13053_v60  ;;  %v13297_v60 = vor.u32 %v16242_v23, %v13294_v47  ;;  %v13230_v23 = vld [vmem:[%s24081_s3 + $0x278] sm:$0xf0] }
 0x3a1   :  { %5323 = vmatpush.bf16.msra.mxu2 %v13153_v57  ;;  %v13436_v57 = vld [vmem:[%s24081_s3 + $0x408] sm:$0xf] }
 0x3a2   :  { %5273 = vmatpush.bf16.msra.mxu3 %v13501_v6  ;;  %v13437_v6 = vor.u32 %v16280_v16, %v13436_v57  ;;  %v16274_v16 = vld [vmem:[%s24081_s3 + $0x3ec] sm:$0xf] }
 0x3a3   :  { %5260 = vmatpush.bf16.msrb.mxu0 %v13373_v24  ;;  %5239 = vmatmul.bf16.vlgmr.msrb.gmra.mxu1 %v20465_v41  ;;  %v13309_v24 = vor.u32 %v16248_v34, %v13308_v8  ;;  %v13646_v8 = vld [vmem:[%s24081_s3 + $0x5b8] sm:$0xf0]  ;;  %v16312_v34 = vld [vmem:[%s24081_s3 + $0x514] sm:$0xf0] }
 0x3a4   :  { %5283 = vmatpush.bf16.msra.mxu1 %v13677_v17  ;;  %v13022_v17 = vld [vmem:[%s24081_s3 + $0xd8] sm:$0xf0] }
 0x3a5   :  { %5324 = vmatpush.bf16.msra.mxu2 %v13137_v42  ;;  %v13041_v42 = vor.u32 %v16178_v1, %v13038_v31  ;;  %v13025_v7 = vor.u32 %v16174_v45, %v13022_v17  ;;  %v16162_v1 = vld [vmem:[%s24081_s3 + $0x6c] sm:$0xf]  ;;  %v13649_v31 = vor.u32 %v16330_v0, %v13646_v8  ;;  %v13214_v17 = vld [vmem:[%s24081_s3 + $0x258] sm:$0xf0] }
 0x3a6   :  { %5274 = vmatpush.bf16.msra.mxu3 %v13485_v54  ;;  %v13596_v54 = vld [vmem:[%s24081_s3 + $0x548] sm:$0xf]  ;;  %v16222_v45 = vld [vmem:[%s24081_s3 + $0x24c] sm:$0xf]  ;;  %v13582_v0 = vld [vmem:[%s24081_s3 + $0x538] sm:$0xf0] }
 0x3a7   :  { %5261 = vmatpush.bf16.msrb.mxu0 %v13357_v4  ;;  %v13278_v4 = vld [vmem:[%s24081_s3 + $0x2d8] sm:$0xf0]  ;;  %v13597_v36 = vor.u32 %v16320_v25, %v13596_v54  ;;  %v13217_v25 = vor.u32 %v16222_v45, %v13214_v17  ;;  %v16342_v8 = vld [vmem:[%s24081_s3 + $0x60c] sm:$0xf] }
 0x3a8   :  { %5284 = vmatpush.bf16.msra.mxu1 %v13661_v58  ;;  %13700 = vmatmul.msk.bf16.vlgmr.msrb.gmra.mxu2 %vm2300_vm0, %v20574_v14  ;;  %v13281_v37 = vor.u32 %v16238_v2, %v13278_v4  ;;  %v13006_v58 = vld [vmem:[%s24081_s3 + $0xb8] sm:$0xf0]  ;;  %v16322_v2 = vld [vmem:[%s24081_s3 + $0x56c] sm:$0xf] }
 0x3a9   :  { %5325 = vmatpush.bf16.msra.mxu2 %v13121_v19  ;;  %v13057_v19 = vor.u32 %v16182_v5, %v13054_v48  ;;  %v13233_v5 = vor.u32 %v16226_v3, %v13230_v23  ;;  %v13614_v4 = vld [vmem:[%s24081_s3 + $0x578] sm:$0xf0]  ;;  %v16310_v23 = vld [vmem:[%s24081_s3 + $0x50c] sm:$0xf] }
 0x3aa   :  { %5275 = vmatpush.bf16.msra.mxu3 %v13469_v33  ;;  %v13662_v33 = vld [vmem:[%s24081_s3 + $0x5d8] sm:$0xf0]  ;;  %v16294_v17 = vld [vmem:[%s24081_s3 + $0x48c] sm:$0xf] }
 0x3ab   :  { %5262 = vmatpush.bf16.msrb.mxu0 %v13341_v61  ;;  %v16234_v61 = vld [vmem:[%s24081_s3 + $0x2ac] sm:$0xf]  ;;  %v13665_v59 = vor.u32 %v16334_v63, %v13662_v33  ;;  %v13390_v54 = vld [vmem:[%s24081_s3 + $0x3b8] sm:$0xf0] }
 0x3ac   :  { %5285 = vmatpush.bf16.msra.mxu1 %v13645_v20  ;;  %v13265_v21 = vor.u32 %v16234_v61, %v13262_v49  ;;  %v12990_v20 = vld [vmem:[%s24081_s3 + $0x98] sm:$0xf0]  ;;  %v16262_v63 = vld [vmem:[%s24081_s3 + $0x38c] sm:$0xf] }
 0x3ad   :  { %5326 = vmatpush.bf16.msra.mxu2 %v13105_v43  ;;  %v13009_v43 = vor.u32 %v16170_v35, %v13006_v58  ;;  %v12993_v57 = vor.u32 %v16166_v44, %v12990_v20  ;;  %v16218_v35 = vld [vmem:[%s24081_s3 + $0x22c] sm:$0xf]  ;;  %v13198_v58 = vld [vmem:[%s24081_s3 + $0x238] sm:$0xf0] }
 0x3ae   :  { %5276 = vmatpush.bf16.msra.mxu3 %v13453_v11  ;;  %v13564_v11 = vld [vmem:[%s24081_s3 + $0x508] sm:$0xf]  ;;  %v13598_v61 = vld [vmem:[%s24081_s3 + $0x558] sm:$0xf0]  ;;  %v13201_v22 = vor.u32 %v16218_v35, %v13198_v58 }
 0x3af   :  { %5263 = vmatpush.bf16.msrb.mxu0 %v13325_v15  ;;  %v16230_v15 = vld [vmem:[%s24081_s3 + $0x28c] sm:$0xf]  ;;  %v13374_v33 = vld [vmem:[%s24081_s3 + $0x398] sm:$0xf0] }
 0x3b0   :  { %5286 = vmatpush.bf16.msra.mxu1 %v13629_v12  ;;  %v13249_v26 = vor.u32 %v16230_v15, %v13246_v28  ;;  %v13565_v12 = vor.u32 %v16312_v34, %v13564_v11  ;;  %v13182_v44 = vld [vmem:[%s24081_s3 + $0x218] sm:$0xf0]  ;;  %v13377_v28 = vor.u32 %v16262_v63, %v13374_v33 }
 0x3b1   :  { %5327 = vmatpush.bf16.msra.mxu2 %v13089_v56  ;;  %v13422_v56 = vld [vmem:[%s24081_s3 + $0x3f8] sm:$0xf0] }
 0x3b2   :  { %5277 = vmatpush.bf16.msra.mxu3 %v13437_v6  ;;  %v13425_v47 = vor.u32 %v16274_v16, %v13422_v56  ;;  %v16270_v6 = vld [vmem:[%s24081_s3 + $0x3cc] sm:$0xf]  ;;  %v13550_v15 = vld [vmem:[%s24081_s3 + $0x4f8] sm:$0xf0] }
 0x3b3   :  { %5264 = vmatpush.bf16.msrb.mxu0 %v13309_v24  ;;  %v16326_v24 = vld [vmem:[%s24081_s3 + $0x58c] sm:$0xf]  ;;  %v13694_v11 = vld [vmem:[%s24081_s3 + $0x618] sm:$0xf0] }
 0x3b4   :  { %5287 = vmatpush.bf16.msra.mxu1 %v13613_v29  ;;  %v13633_v48 = vor.u32 %v16326_v24, %v13630_v52  ;;  %v13358_v16 = vld [vmem:[%s24081_s3 + $0x378] sm:$0xf0]  ;;  %v16254_v24 = vld [vmem:[%s24081_s3 + $0x34c] sm:$0xf] }
 0x3b5   :  { %5328 = vmatpush.bf16.msra.mxu2 %v13073_v38  ;;  %5278 = vmatmul.bf16.vlgmr.msra.gmra.mxu3 %v20557_v53  ;;  %v16158_v38 = vld [vmem:[%s24081_s3 + $0x4c] sm:$0xf]  ;;  %v13342_v52 = vld [vmem:[%s24081_s3 + $0x358] sm:$0xf0] }
 0x3b6   :  { %5335 = vmatpush.bf16.msrb.mxu3 %v13297_v60  ;;  %5265 = vmatmul.bf16.vlgmr.msrb.gmra.mxu0 %v20549_v27  ;;  %v12958_v60 = vld [vmem:[%s24081_s3 + $0x58] sm:$0xf0] }
 0x3b7   :  { %5309 = vmatpush.bf16.msra.mxu0 %v13041_v42  ;;  %v13406_v42 = vld [vmem:[%s24081_s3 + $0x3d8] sm:$0xf0]  ;;  %v12961_v55 = vor.u32 %v16158_v38, %v12958_v60  ;;  %v13345_v38 = vor.u32 %v16254_v24, %v13342_v52  ;;  %v16250_v60 = vld [vmem:[%s24081_s3 + $0x32c] sm:$0xf] }
 0x3b8   :  { %5288 = vmatpush.bf16.msra.mxu1 %v13597_v36  ;;  %v13409_v29 = vor.u32 %v16270_v6, %v13406_v42  ;;  %v16318_v36 = vld [vmem:[%s24081_s3 + $0x54c] sm:$0xf]  ;;  %v13470_v63 = vld [vmem:[%s24081_s3 + $0x458] sm:$0xf0] }
 0x3b9   :  { %5329 = vmatpush.bf16.msra.mxu2 %v13057_v19  ;;  %v12942_v19 = vld [vmem:[%s24081_s3 + $0x38] sm:$0xf0]  ;;  %v13601_v20 = vor.u32 %v16318_v36, %v13598_v61  ;;  %v16298_v42 = vld [vmem:[%s24081_s3 + $0x4ac] sm:$0xf] }
 0x3ba   :  { %5336 = vmatpush.bf16.msrb.mxu3 %v13281_v37  ;;  %v13617_v37 = vor.u32 %v16322_v2, %v13614_v4  ;;  %v16246_v2 = vld [vmem:[%s24081_s3 + $0x30c] sm:$0xf]  ;;  %v13310_v4 = vld [vmem:[%s24081_s3 + $0x318] sm:$0xf0] }
 0x3bb   :  { %5310 = vmatpush.bf16.msra.mxu0 %v13025_v7  ;;  %v16154_v7 = vld [vmem:[%s24081_s3 + $0x2c] sm:$0xf]  ;;  %v5472_v33 = vld [vmem:[%s24082_s6 + $0x58] sm:$0xff] }
 0x3bc   :  { %5330 = vmatmul.bf16.vlgmr.msra.gmra.mxu2 %v20465_v41  ;;  %v12974_v41 = vld [vmem:[%s24081_s3 + $0x78] sm:$0xf0]  ;;  %5289 = vmatpush.bf16.msra.mxu1 %v13581_v39  ;;  %v12945_v49 = vor.u32 %v16154_v7, %v12942_v19  ;;  %v16306_v39 = vld [vmem:[%s24081_s3 + $0x4ec] sm:$0xf]  ;;  %v13313_v19 = vor.u32 %v16246_v2, %v13310_v4 }
 0x3bd   :  { %5374 = vmatpush.bf16.msrb.mxu2 %v13681_v50  ;;  %v12977_v32 = vor.u32 %v16162_v1, %v12974_v41  ;;  %v13393_v50 = vor.u32 %v16266_v46, %v13390_v54  ;;  %v16302_v41 = vld [vmem:[%s24081_s3 + $0x4cc] sm:$0xf]  ;;  %v5475_v54 = vld [vmem:[%s24082_s6 + $0x70] sm:$0xff]  ;;  %v13486_v7 = vld [vmem:[%s24081_s3 + $0x478] sm:$0xf0] }
 0x3be   :  { %5337 = vmatpush.bf16.msrb.mxu3 %v13265_v21  ;;  %v16214_v21 = vld [vmem:[%s24081_s3 + $0x20c] sm:$0xf] }
 0x3bf   :  { %5311 = vmatpush.bf16.msra.mxu0 %v13009_v43  ;;  %v12926_v43 = vld [vmem:[%s24081_s3 + $0x18] sm:$0xf0]  ;;  %v13185_v56 = vor.u32 %v16214_v21, %v13182_v44  ;;  %v16282_v44 = vld [vmem:[%s24081_s3 + $0x42c] sm:$0xf] }
 0x3c0   :  { %5290 = vmatpush.bf16.msra.mxu1 %v13565_v12  ;;  %v12929_v34 = vor.u32 %v16150_v40, %v12926_v43  ;;  %v13697_v12 = vor.u32 %v16342_v8, %v13694_v11  ;;  %v5471_v43 = vld [vmem:[%s24082_s6 + $0x50] sm:$0xff]  ;;  %v16278_v11 = vld [vmem:[%s24081_s3 + $0x40c] sm:$0xf] }
 0x3c1   :  { %5375 = vmatpush.bf16.msrb.mxu2 %v13665_v59  ;;  %v16314_v59 = vld [vmem:[%s24081_s3 + $0x52c] sm:$0xf] }
 0x3c2   :  { %5338 = vmatpush.bf16.msrb.mxu3 %v13249_v26  ;;  %v13553_v26 = vor.u32 %v16306_v39, %v13550_v15  ;;  %v13585_v1 = vor.u32 %v16314_v59, %v13582_v0  ;;  %v5470_v59 = vld [vmem:[%s24082_s6 + $0x48] sm:$0xff]  ;;  %v5469_v15 = vld [vmem:[%s24082_s6 + $0x40] sm:$0xff] }
 0x3c3   :  { %5312 = vmatpush.bf16.msra.mxu0 %v12993_v57  ;;  %5291 = vmatmul.bf16.vlgmr.msra.gmra.mxu1 %v20565_v51  ;;  %v16258_v57 = vld [vmem:[%s24081_s3 + $0x36c] sm:$0xf] }
 0x3c4   :  { %5348 = vmatpush.bf16.msrb.mxu1 %v13425_v47  ;;  %v13361_v3 = vor.u32 %v16258_v57, %v13358_v16  ;;  %v13566_v47 = vld [vmem:[%s24081_s3 + $0x518] sm:$0xf0] }
 0x3c5   :  { %5376 = vmatpush.bf16.msrb.mxu2 %v13649_v31  ;;  %v13534_v31 = vld [vmem:[%s24081_s3 + $0x4d8] sm:$0xf0]  ;;  %v13569_v6 = vor.u32 %v16310_v23, %v13566_v47  ;;  %v5465_v47 = vld [vmem:[%s24082_s6 + $0x20] sm:$0xff] }
 0x3c6   :  { %5339 = vmatpush.bf16.msrb.mxu3 %v13233_v5  ;;  %v13518_v5 = vld [vmem:[%s24081_s3 + $0x4b8] sm:$0xf0] }
 0x3c7   :  { %5313 = vmatpush.bf16.msra.mxu0 %v12977_v32  ;;  %v13537_v32 = vor.u32 %v16302_v41, %v13534_v31  ;;  %v13521_v45 = vor.u32 %v16298_v42, %v13518_v5  ;;  %v5466_v31 = vld [vmem:[%s24082_s6 + $0x28] sm:$0xff]  ;;  %v5464_v42 = vld [vmem:[%s24082_s6 + $0x18] sm:$0xff] }
 0x3c8   :  { %5349 = vmatpush.bf16.msrb.mxu1 %v13409_v29 }
 0x3c9   :  { %5377 = vmatpush.bf16.msrb.mxu2 %v13633_v48  ;;  %v13326_v48 = vld [vmem:[%s24081_s3 + $0x338] sm:$0xf0] }
 0x3ca   :  { %5340 = vmatpush.bf16.msrb.mxu3 %v13217_v25  ;;  %v13329_v29 = vor.u32 %v16250_v60, %v13326_v48  ;;  %v16290_v25 = vld [vmem:[%s24081_s3 + $0x46c] sm:$0xf]  ;;  %v5463_v48 = vld [vmem:[%s24082_s6 + $0x10] sm:$0xff] }
 0x3cb   :  { %5314 = vmatpush.bf16.msra.mxu0 %v12961_v55  ;;  %v13489_v58 = vor.u32 %v16290_v25, %v13486_v7 }
 0x3cc   :  { %5350 = vmatpush.bf16.msrb.mxu1 %v13393_v50  ;;  %v5473_v50 = vld [vmem:[%s24082_s6 + $0x60] sm:$0xff] }
 0x3cd   :  { %5378 = vmatpush.bf16.msrb.mxu2 %v13617_v37  ;;  %v5474_v37 = vld [vmem:[%s24082_s6 + $0x68] sm:$0xff] }
 0x3ce   :  { %5341 = vmatpush.bf16.msrb.mxu3 %v13201_v22 }
 0x3cf   :  { %5315 = vmatpush.bf16.msra.mxu0 %v12945_v49  ;;  %v16286_v49 = vld [vmem:[%s24081_s3 + $0x44c] sm:$0xf] }
 0x3d0   :  { %5351 = vmatpush.bf16.msrb.mxu1 %v13377_v28  ;;  %v13473_v22 = vor.u32 %v16286_v49, %v13470_v63  ;;  %v21442_v63 = vld [vmem:[%s24082_s6 + $0xb0] sm:$0xff] }
 0x3d1   :  { %5379 = vmatpush.bf16.msrb.mxu2 %v13601_v20  ;;  %v13454_v20 = vld [vmem:[%s24081_s3 + $0x438] sm:$0xf0] }
 0x3d2   :  { %5342 = vmatpush.bf16.msrb.mxu3 %v13185_v56  ;;  %v13457_v39 = vor.u32 %v16282_v44, %v13454_v20  ;;  %v5467_v56 = vld [vmem:[%s24082_s6 + $0x30] sm:$0xff] }
 0x3d3   :  { %5316 = vmatpush.bf16.msra.mxu0 %v12929_v34  ;;  %v5071_v55 = vpop.f32.mrf.mxu0  ;;  %v5468_v34 = vld [vmem:[%s24082_s6 + $0x38] sm:$0xff] }
 0x3d4   :  { %5352 = vmatpush.bf16.msrb.mxu1 %v13361_v3 }
 0x3d5   :  { %5380 = vmatpush.bf16.msrb.mxu2 %v13585_v1  ;;  %5343 = vmatmul.bf16.vlgmr.msrb.gmra.mxu3 %v20463_v10  ;;  %v5476_v10 = vld [vmem:[%s24082_s6 + $0x78] sm:$0xff]  ;;  %v21367_v1 = vld [vmem:[%s24082_s6 + $0xf0] sm:$0xff] }
 0x3d6   :  { %5394 = vmatpush.bf16.msra.mxu3 %v13697_v12  ;;  %5317 = vmatmul.bf16.vlgmr.msra.gmra.mxu0 %v20455_v9  ;;  %v13502_v9 = vld [vmem:[%s24081_s3 + $0x498] sm:$0xf0]  ;;  %v21376_v12 = vld [vmem:[%s24082_s6 + $0xe8] sm:$0xff] }
 0x3d7   :  { %5361 = vmatpush.bf16.msrb.mxu0 %v13553_v26  ;;  %v13505_v46 = vor.u32 %v16294_v17, %v13502_v9  ;;  %v5045_v35 = vpop.f32.mrf.mxu2  ;;  %v21362_v26 = vld [vmem:[%s24082_s6 + $0xf8] sm:$0xff]  ;;  %v5462_v17 = vld [vmem:[%s24082_s6 + $0x8] sm:$0xff] }
 0x3d8   :  { %5353 = vmatpush.bf16.msrb.mxu1 %v13345_v38  ;;  %v5058_v61 = vpop.f32.mrf.mxu3  ;;  %v21395_v38 = vld [vmem:[%s24082_s6 + $0xd8] sm:$0xff] }
 0x3d9   :  { %5381 = vmatpush.bf16.msrb.mxu2 %v13569_v6  ;;  %v21386_v6 = vld [vmem:[%s24082_s6 + $0xe0] sm:$0xff] }
 0x3da   :  { %5534 = vmatpush.msrb.mxu3 %v21362_v26 }
 0x3db   :  { %5362 = vmatpush.bf16.msrb.mxu0 %v13537_v32  ;;  %v5073_v40 = vpop.f32.mrf.mxu0 }
 0x3dc   :  { %5382 = vmatmul.bf16.vlgmr.msrb.gmra.mxu2 %v20565_v51  ;;  %5354 = vmatpush.bf16.msrb.mxu1 %v13329_v29  ;;  %v21311_v51 = vld [vmem:[%s24083_s30] sm:$0xf]  ;;  %v21419_v29 = vld [vmem:[%s24082_s6 + $0xc8] sm:$0xff] }
 0x3dd   :  { %5598 = vmatpush.msra.mxu2 %v5476_v10  ;;  %v4045_v36 = vperm.slane %v21311_v51, 0  ;;  %5535 = vmatpush.msrb.mxu3 %v21367_v1 }
 0x3df   :  { %5363 = vmatpush.bf16.msrb.mxu0 %v13521_v45  ;;  %5599 = vmatpush.msra.mxu2 %v5475_v54  ;;  %v5046_v21 = vadd.f32 %v5045_v35, %v4045_v36  ;;  %v21436_v36 = vld [vmem:[%s24082_s6 + $0xb8] sm:$0xff] }
 0x3e0   :  { %5355 = vmatpush.bf16.msrb.mxu1 %v13313_v19  ;;  %v5060_v0 = vpop.f32.mrf.mxu3  ;;  %v5084_v8 = vpop.f32.mrf.mxu1  ;;  %5536 = vmatpush.msrb.mxu3 %v21376_v12 }
 0x3e1   :  { %5600 = vmatpush.msra.mxu2 %v5474_v37  ;;  %v5059_v28 = vadd.f32 %v5058_v61, %v5046_v21  ;;  %v21466_v0 = vld [vmem:[%s24082_s6 + $0x90] sm:$0xff] }
 0x3e2   :  { %5537 = vmatpush.msrb.mxu3 %v21386_v6 }
 0x3e3   :  { %5364 = vmatpush.bf16.msrb.mxu0 %v13505_v46  ;;  %5601 = vmatpush.msra.mxu2 %v5473_v50  ;;  %v5123_v57 = vpop.f32.mrf.mxu0  ;;  %v5072_v41 = vadd.f32 %v5071_v55, %v5059_v28  ;;  %v5461_v55 = vld [vmem:[%s24082_s6] sm:$0xff]  ;;  %v21460_v28 = vld [vmem:[%s24082_s6 + $0x98] sm:$0xff] }
 0x3e4   :  { %5514 = vmatpush.msra.mxu1 %v5476_v10  ;;  %5538 = vmatpush.msrb.mxu3 %v21395_v38 }
 0x3e5   :  { %5602 = vmatpush.msra.mxu2 %v5472_v33  ;;  %5356 = vmatmul.bf16.vlgmr.msrb.gmra.mxu1 %v20549_v27  ;;  %v5047_v27 = vpop.f32.mrf.mxu2  ;;  %v5085_v3 = vadd.f32 %v5084_v8, %v5072_v41  ;;  %v4046_v8 = vperm.slane %v21311_v51, 1 }
 0x3e6   :  { %5515 = vmatpush.msra.mxu1 %v5475_v54  ;;  %13701 = vmatmul.msk.bf16.vlgmr.msra.gmra.mxu3 %vm2300_vm0, %v20574_v14  ;;  %v13438_v14 = vld [vmem:[%s24081_s3 + $0x418] sm:$0xf0]  ;;  %v21454_v27 = vld [vmem:[%s24082_s6 + $0xa0] sm:$0xff] }
 0x3e7   :  { %5365 = vmatpush.bf16.msrb.mxu0 %v13489_v58  ;;  %5603 = vmatpush.msra.mxu2 %v5471_v43  ;;  %v13441_v16 = vor.u32 %v16278_v11, %v13438_v14  ;;  %v21473_v14 = vld [vmem:[%s24082_s6 + $0x88] sm:$0xff] }
 0x3e8   :  { %5516 = vmatpush.msra.mxu1 %v5474_v37  ;;  %v5086_v52 = vpop.f32.mrf.mxu1  ;;  %v5110_v32 = vpop.f32.mrf.mxu3  ;;  %v21430_v37 = vld [vmem:[%s24082_s6 + $0xc0] sm:$0xff] }
 0x3e9   :  { %5604 = vmatpush.msra.mxu2 %v5470_v59 }
 0x3ea   :  { %5517 = vmatpush.msra.mxu1 %v5473_v50 }
 0x3eb   :  { %5366 = vmatpush.bf16.msrb.mxu0 %v13473_v22  ;;  %5605 = vmatpush.msra.mxu2 %v5469_v15  ;;  %v5125_v60 = vpop.f32.mrf.mxu0 }
 0x3ec   :  { %5518 = vmatpush.msra.mxu1 %v5472_v33  ;;  %v5506_v60 = vld [vmem:[%s24082_s6 + $0x168] sm:$0xff] }
 0x3ed   :  { %5606 = vmatpush.msra.mxu2 %v5468_v34  ;;  %v5097_v23 = vpop.f32.mrf.mxu2 }
 0x3ee   :  { %5519 = vmatpush.msra.mxu1 %v5471_v43  ;;  %v5098_v24 = vadd.f32 %v5097_v23, %v5085_v3  ;;  %v21448_v43 = vld [vmem:[%s24082_s6 + $0xa8] sm:$0xff] }
 0x3ef   :  { %5367 = vmatpush.bf16.msrb.mxu0 %v13457_v39  ;;  %5607 = vmatpush.msra.mxu2 %v5467_v56 }
 0x3f0   :  { %5520 = vmatpush.msra.mxu1 %v5470_v59  ;;  %v5111_v5 = vadd.f32 %v5110_v32, %v5098_v24  ;;  %v5112_v54 = vpop.f32.mrf.mxu3  ;;  %v5136_v19 = vpop.f32.mrf.mxu1  ;;  %v5508_v24 = vld [vmem:[%s24082_s6 + $0x178] sm:$0xff] }
 0x3f1   :  { %5608 = vmatpush.msra.mxu2 %v5466_v31 }
 0x3f2   :  { %5521 = vmatpush.msra.mxu1 %v5469_v15  ;;  %v21401_v45 = vadd.f32 %v5123_v57, %v5111_v5  ;;  %v5507_v5 = vld [vmem:[%s24082_s6 + $0x170] sm:$0xff] }
 0x3f3   :  { %5368 = vmatpush.bf16.msrb.mxu0 %v13441_v16  ;;  %5609 = vmatpush.msra.mxu2 %v5465_v47  ;;  %v5149_v50 = vpop.f32.mrf.mxu0 }
 0x3f4   :  { %5522 = vmatpush.msra.mxu1 %v5468_v34  ;;  %v5400_v9 = vsel %vm2941_vm1, %v21401_v45, 0.0  ;;  %v5429_v10 = vmul.f32 %v21401_v45, %v21401_v45  ;;  %v21478_v34 = vld [vmem:[%s24082_s6 + $0x80] sm:$0xff] }
 0x3f5   :  { %5610 = vmatpush.msra.mxu2 %v5464_v42  ;;  %v5401_v2 = vrot.slane %v5400_v9, 4  ;;  %v5099_v4 = vpop.f32.mrf.mxu2 }
 0x3f6   :  { %5369 = vmatmul.bf16.vlgmr.msrb.gmra.mxu0 %v20557_v53  ;;  %v21406_v53 = vld [vmem:[%s24082_s6 + $0xd0] sm:$0xff]  ;;  %5523 = vmatpush.msra.mxu1 %v5467_v56  ;;  %v5433_v46 = vsel %vm2941_vm1, %v5429_v10, 0.0  ;;  %v5137_v56 = vadd.f32 %v5136_v19, %v4046_v8  ;;  %v5505_v10 = vld [vmem:[%s24082_s6 + $0x160] sm:$0xff]  ;;  %v5502_v19 = vld [vmem:[%s24082_s6 + $0x148] sm:$0xff] }
 0x3f7   :  { %5611 = vmatpush.msra.mxu2 %v5463_v48  ;;  %5539 = vmatpush.msrb.mxu3 %v21406_v53  ;;  %v5402_v25 = vadd.f32 %v5401_v2, %v5400_v9  ;;  %v5434_v7 = vrot.slane %v5433_v46, 4  ;;  %v5504_v2 = vld [vmem:[%s24082_s6 + $0x158] sm:$0xff] }
 0x3f8   :  { %5524 = vmatpush.msra.mxu1 %v5466_v31  ;;  %v5138_v21 = vpop.f32.mrf.mxu1  ;;  %v5175_v59 = vpop.f32.mrf.mxu3  ;;  %v5150_v41 = vadd.f32 %v5149_v50, %v5137_v56  ;;  %5554 = vmatpush.msra.mxu0 %v5508_v24  ;;  %v5501_v50 = vld [vmem:[%s24082_s6 + $0x140] sm:$0xff]  ;;  %v4047_v56 = vperm.slane %v21311_v51, 2 }
 0x3f9   :  { %5612 = vmatpush.msra.mxu2 %v5462_v17  ;;  %5540 = vmatpush.msrb.mxu3 %v21419_v29  ;;  %v5403_v35 = vrot.slane %v5402_v25, 2  ;;  %v5435_v58 = vadd.f32 %v5434_v7, %v5433_v46  ;;  %v5503_v7 = vld [vmem:[%s24082_s6 + $0x150] sm:$0xff] }
 0x3fa   :  { %5525 = vmatpush.msra.mxu1 %v5465_v47  ;;  %5555 = vmatpush.msra.mxu0 %v5507_v5 }
 0x3fb   :  { %5613 = vmatpush.msra.mxu2 %v5461_v55  ;;  %5541 = vmatpush.msrb.mxu3 %v21430_v37  ;;  %v5404_v61 = vadd.f32 %v5403_v35, %v5402_v25  ;;  %v5436_v49 = vrot.slane %v5435_v58, 2  ;;  %v5151_v39 = vpop.f32.mrf.mxu0 }
 0x3fc   :  { %5526 = vmatpush.msra.mxu1 %v5464_v42  ;;  %5556 = vmatpush.msra.mxu0 %v5506_v60 }
 0x3fd   :  { %5542 = vmatpush.msrb.mxu3 %v21436_v36  ;;  %v5405_v33 = vrot.slane %v5404_v61, 1  ;;  %v5437_v40 = vadd.f32 %v5436_v49, %v5435_v58  ;;  %v5162_v22 = vpop.f32.mrf.mxu2 }
 0x3fe   :  { %5527 = vmatpush.msra.mxu1 %v5463_v48  ;;  %v5163_v3 = vadd.f32 %v5162_v22, %v5150_v41  ;;  %5557 = vmatpush.msra.mxu0 %v5505_v10 }
 0x3ff   :  { %5543 = vmatpush.msrb.mxu3 %v21442_v63  ;;  %v5406_v44 = vadd.f32 %v5405_v33, %v5404_v61  ;;  %v5438_v20 = vrot.slane %v5437_v40, 1 }
 0x400   :  { %5528 = vmatpush.msra.mxu1 %v5462_v17  ;;  %v5177_v57 = vpop.f32.mrf.mxu3  ;;  %v5188_v16 = vpop.f32.mrf.mxu1  ;;  %v5176_v47 = vadd.f32 %v5175_v59, %v5163_v3  ;;  %5558 = vmatpush.msra.mxu0 %v5504_v2  ;;  %v5497_v59 = vld [vmem:[%s24082_s6 + $0x120] sm:$0xff] }
 0x401   :  { %5544 = vmatpush.msrb.mxu3 %v21448_v43  ;;  %v5439_v15 = vadd.f32 %v5438_v20, %v5437_v40  ;;  %v5500_v40 = vld [vmem:[%s24082_s6 + $0x138] sm:$0xff]  ;;  %v5498_v20 = vld [vmem:[%s24082_s6 + $0x128] sm:$0xff] }
 0x402   :  { %5529 = vmatpush.msra.mxu1 %v5461_v55  ;;  %v5189_v52 = vadd.f32 %v5188_v16, %v5176_v47  ;;  %5559 = vmatpush.msra.mxu0 %v5503_v7  ;;  %v5494_v57 = vld [vmem:[%s24082_s6 + $0x108] sm:$0xff]  ;;  %v5493_v16 = vld [vmem:[%s24082_s6 + $0x100] sm:$0xff] }
 0x403   :  { %5530 = vmatmul.f32.vlgmr.msra.gmra.mxu1 %v5406_v44  ;;  %5545 = vmatpush.msrb.mxu3 %v21454_v27  ;;  %v5499_v44 = vld [vmem:[%s24082_s6 + $0x130] sm:$0xff] }
 0x404   :  { %5614 = vmatmul.f32.vlgmr.msra.gmra.mxu2 %v5439_v15  ;;  %5560 = vmatpush.msra.mxu0 %v5502_v19  ;;  %v5496_v15 = vld [vmem:[%s24082_s6 + $0x118] sm:$0xff] }
 0x405   :  { %5546 = vmatpush.msrb.mxu3 %v21460_v28  ;;  %v5164_v11 = vpop.f32.mrf.mxu2 }
 0x406   :  { %5561 = vmatpush.msra.mxu0 %v5501_v50  ;;  %v5495_v11 = vld [vmem:[%s24082_s6 + $0x110] sm:$0xff] }
 0x407   :  { %5547 = vmatpush.msrb.mxu3 %v21466_v0 }
 0x408   :  { %v5190_v23 = vpop.f32.mrf.mxu1  ;;  %5562 = vmatpush.msra.mxu0 %v5500_v40 }
 0x409   :  { %5548 = vmatpush.msrb.mxu3 %v21473_v14 }
 0x40a   :  { %5563 = vmatpush.msra.mxu0 %v5499_v44 }
 0x40b   :  { %5549 = vmatpush.msrb.mxu3 %v21478_v34 }
 0x40c   :  { %5564 = vmatpush.msra.mxu0 %v5498_v20 }
 0x40d   :  { %v5214_v31 = vpop.f32.mrf.mxu2  ;;  %5638 = vmatpush.msra.mxu3 %v5508_v24 }
 0x40e   :  { %5565 = vmatpush.msra.mxu0 %v5497_v59 }
 0x40f   :  { %5639 = vmatpush.msra.mxu3 %v5507_v5 }
 0x410   :  { %5566 = vmatpush.msra.mxu0 %v5496_v15 }
 0x411   :  { %5640 = vmatpush.msra.mxu3 %v5506_v60 }
 0x412   :  { %5567 = vmatpush.msra.mxu0 %v5495_v11 }
 0x413   :  { %v5201_v32 = vpop.f32.mrf.mxu0  ;;  %5641 = vmatpush.msra.mxu3 %v5505_v10 }
 0x414   :  { %v5202_v48 = vadd.f32 %v5201_v32, %v5189_v52  ;;  %5568 = vmatpush.msra.mxu0 %v5494_v57 }
 0x415   :  { %v5216_v42 = vpop.f32.mrf.mxu2  ;;  %5642 = vmatpush.msra.mxu3 %v5504_v2 }
 0x416   :  { %v21491_v17 = vadd.f32 %v5214_v31, %v5202_v48  ;;  %5569 = vmatpush.msra.mxu0 %v5493_v16 }
 0x417   :  { %5643 = vmatpush.msra.mxu3 %v5503_v7 }
 0x418   :  { %v5407_v9 = vsel %vm2941_vm1, %v21491_v17, 0.0  ;;  %v5227_v55 = vpop.f32.mrf.mxu3 }
 0x419   :  { %v5408_v4 = vrot.slane %v5407_v9, 4  ;;  %5644 = vmatpush.msra.mxu3 %v5502_v19  ;;  %v5228_v3 = vadd.f32 %v5227_v55, %v4047_v56  ;;  %v5509_v55 = vld [vmem:[%s24082_s6 + $0x180] sm:$0xff] }
 0x41a   :  { %5589 = vmatpush.msrb.mxu1 %v5509_v55  ;;  %5673 = vmatpush.msrb.mxu0 %v5509_v55 }
 0x41b   :  { %v5409_v46 = vadd.f32 %v5408_v4, %v5407_v9  ;;  %v5203_v54 = vpop.f32.mrf.mxu0  ;;  %5645 = vmatpush.msra.mxu3 %v5501_v50 }
 0x41c   :  { %5618 = vmatpush.msra.mxu1 %v21362_v26 }
 0x41d   :  { %v5253_v25 = vpop.f32.mrf.mxu2  ;;  %v5410_v35 = vrot.slane %v5409_v46, 2  ;;  %5646 = vmatpush.msra.mxu3 %v5500_v40 }
 0x41e   :  { %5619 = vmatpush.msra.mxu1 %v21367_v1 }
 0x41f   :  { %v5411_v58 = vadd.f32 %v5410_v35, %v5409_v46  ;;  %5647 = vmatpush.msra.mxu3 %v5499_v44 }
 0x420   :  { %v5229_v49 = vpop.f32.mrf.mxu3  ;;  %v5240_v33 = vpop.f32.mrf.mxu1  ;;  %5620 = vmatpush.msra.mxu1 %v21376_v12 }
 0x421   :  { %v5412_v61 = vrot.slane %v5411_v58, 1  ;;  %5648 = vmatpush.msra.mxu3 %v5498_v20  ;;  %v5241_v23 = vadd.f32 %v5240_v33, %v5228_v3 }
 0x422   :  { %5621 = vmatpush.msra.mxu1 %v21386_v6 }
 0x423   :  { %v5413_v21 = vadd.f32 %v5412_v61, %v5411_v58  ;;  %5649 = vmatpush.msra.mxu3 %v5497_v59  ;;  %v5254_v52 = vadd.f32 %v5253_v25, %v5241_v23 }
 0x424   :  { %5622 = vmatpush.msra.mxu1 %v21395_v38 }
 0x425   :  { %v5255_v22 = vpop.f32.mrf.mxu2  ;;  %5550 = vmatmul.f32.vlgmr.msrb.gmra.mxu3 %v5413_v21 }
 0x426   :  { %5650 = vmatpush.msra.mxu3 %v5496_v15  ;;  %5623 = vmatpush.msra.mxu1 %v21406_v53  ;;  %v4048_v53 = vperm.slane %v21311_v51, 3 }
 0x428   :  { %v5242_v39 = vpop.f32.mrf.mxu1  ;;  %5651 = vmatpush.msra.mxu3 %v5495_v11  ;;  %5624 = vmatpush.msra.mxu1 %v21419_v29 }
 0x429   :  { %v5430_v39 = vmul.f32 %v21491_v17, %v21491_v17 }
 0x42a   :  { %5652 = vmatpush.msra.mxu3 %v5494_v57  ;;  %5625 = vmatpush.msra.mxu1 %v21430_v37 }
 0x42c   :  { %5653 = vmatpush.msra.mxu3 %v5493_v16  ;;  %5626 = vmatpush.msra.mxu1 %v21436_v36 }
 0x42d   :  { %v5305_v8 = vpop.f32.mrf.mxu2 }
 0x42e   :  { %5627 = vmatpush.msra.mxu1 %v21442_v63 }
 0x430   :  { %5628 = vmatpush.msra.mxu1 %v21448_v43 }
 0x432   :  { %5629 = vmatpush.msra.mxu1 %v21454_v27 }
 0x433   :  { %v5266_v41 = vpop.f32.mrf.mxu0 }
 0x434   :  { %v5267_v32 = vadd.f32 %v5266_v41, %v5254_v52  ;;  %5630 = vmatpush.msra.mxu1 %v21460_v28  ;;  %v5440_v28 = vsel %vm2941_vm1, %v5430_v39, 0.0  ;;  %v5917_v39 = vld [vmem:[%s23907_s14 + $0xe8] sm:$0xff] }
 0x435   :  { %v5307_v31 = vpop.f32.mrf.mxu2 }
 0x436   :  { %5631 = vmatpush.msra.mxu1 %v21466_v0 }
 0x438   :  { %v5279_v47 = vpop.f32.mrf.mxu3  ;;  %5632 = vmatpush.msra.mxu1 %v21473_v14  ;;  %v5441_v14 = vrot.slane %v5440_v28, 4 }
 0x439   :  { %v5280_v5 = vadd.f32 %v5279_v47, %v5267_v32 }
 0x43a   :  { %5633 = vmatpush.msra.mxu1 %v21478_v34  ;;  %v5442_v31 = vadd.f32 %v5441_v14, %v5440_v28 }
 0x43b   :  { %v5268_v24 = vpop.f32.mrf.mxu0 }
 0x43c   :  { %v5443_v52 = vrot.slane %v5442_v31, 2 }
 0x43f   :  { %v5331_v42 = vpop.f32.mrf.mxu2 }
 0x440   :  { %v5281_v60 = vpop.f32.mrf.mxu3  ;;  %v5292_v48 = vpop.f32.mrf.mxu1 }
 0x441   :  { %v5293_v9 = vadd.f32 %v5292_v48, %v5280_v5  ;;  %v5444_v48 = vadd.f32 %v5443_v52, %v5442_v31  ;;  %v5935_v52 = vld [vmem:[%s23907_s14 + $0x178] sm:$0xff] }
 0x443   :  { %v21535_v10 = vadd.f32 %v5305_v8, %v5293_v9 }
 0x445   :  { %v5414_v2 = vsel %vm2941_vm1, %v21535_v10, 0.0  ;;  %v5431_v4 = vmul.f32 %v21535_v10, %v21535_v10 }
 0x446   :  { %v5415_v54 = vrot.slane %v5414_v2, 4 }
 0x447   :  { %v5333_v46 = vpop.f32.mrf.mxu2  ;;  %v5447_v25 = vsel %vm2941_vm1, %v5431_v4, 0.0 }
 0x448   :  { %v5416_v7 = vadd.f32 %v5415_v54, %v5414_v2  ;;  %v5448_v19 = vrot.slane %v5447_v25, 4  ;;  %v5294_v35 = vpop.f32.mrf.mxu1  ;;  %v5445_v46 = vrot.slane %v5444_v48, 1 }
 0x44a   :  { %v5417_v58 = vrot.slane %v5416_v7, 2  ;;  %v5449_v50 = vadd.f32 %v5448_v19, %v5447_v25  ;;  %v5446_v55 = vadd.f32 %v5445_v46, %v5444_v48  ;;  %v5911_v48 = vld [vmem:[%s23907_s14 + $0xb8] sm:$0xff]  ;;  %v5933_v46 = vld [vmem:[%s23907_s14 + $0x168] sm:$0xff] }
 0x44c   :  { %v5418_v61 = vadd.f32 %v5417_v58, %v5416_v7  ;;  %v5450_v49 = vrot.slane %v5449_v50, 2 }
 0x44e   :  { %v5419_v33 = vrot.slane %v5418_v61, 1  ;;  %v5451_v40 = vadd.f32 %v5450_v49, %v5449_v50 }
 0x450   :  { %v5420_v21 = vadd.f32 %v5419_v33, %v5418_v61  ;;  %v5452_v26 = vrot.slane %v5451_v40, 1  ;;  %v5698_v33 = vld [vmem:[%s23904_s11] sm:$0xff] }
 0x452   :  { %5570 = vmatmul.f32.vlgmr.msra.gmra.mxu0 %v5420_v21  ;;  %v5453_v44 = vadd.f32 %v5452_v26, %v5451_v40  ;;  %v5699_v40 = vld [vmem:[%s23904_s11 + $0x8] sm:$0xff] }
 0x453   :  { %v5318_v22 = vpop.f32.mrf.mxu0  ;;  %5720 = vmatpush.msra.mxu0 %v5698_v33  ;;  %5740 = vmatpush.msrb.mxu2 %v5699_v40 }
 0x454   :  { %5654 = vmatmul.f32.vlgmr.msra.gmra.mxu3 %v5453_v44  ;;  %v5319_v29 = vadd.f32 %v5318_v22, %v4048_v53  ;;  %v5700_v53 = vld [vmem:[%s23904_s11 + $0x10] sm:$0xff] }
 0x456   :  { %v5332_v63 = vadd.f32 %v5331_v42, %v5319_v29 }
 0x458   :  { %v5344_v1 = vpop.f32.mrf.mxu3 }
 0x459   :  { %v5345_v43 = vadd.f32 %v5344_v1, %v5332_v63  ;;  %v5701_v1 = vld [vmem:[%s23904_s11 + $0x18] sm:$0xff]  ;;  %v5918_v63 = vld [vmem:[%s23907_s14 + $0xf0] sm:$0xff] }
 0x45a   :  { %5871 = vmatpush.msrb.mxu3 %v5701_v1  ;;  %5780 = vmatpush.msra.mxu2 %v5701_v1  ;;  %v5904_v1 = vld [vmem:[%s23907_s14 + $0x80] sm:$0xff] }
 0x45b   :  { %v5320_v12 = vpop.f32.mrf.mxu0 }
 0x45f   :  { %v5383_v6 = vpop.f32.mrf.mxu2 }
 0x460   :  { %v5346_v38 = vpop.f32.mrf.mxu3 }
 0x462   :  { %v5357_v20 = vpop.f32.mrf.mxu1 }
 0x463   :  { %v5358_v27 = vadd.f32 %v5357_v20, %v5345_v43 }
 0x467   :  { %v5385_v37 = vpop.f32.mrf.mxu2 }
 0x469   :  { %v5396_v59 = vpop.f32.mrf.mxu3 }
 0x46a   :  { %v5359_v36 = vpop.f32.mrf.mxu1 }
 0x471   :  { %v5398_v8 = vpop.f32.mrf.mxu3 }
 0x472   :  { %v5915_v8 = vld [vmem:[%s23907_s14 + $0xd8] sm:$0xff] }
 0x473   :  { %v5370_v15 = vpop.f32.mrf.mxu0 }
 0x474   :  { %v5371_v51 = vadd.f32 %v5370_v15, %v5358_v27  ;;  %v5916_v15 = vld [vmem:[%s23907_s14 + $0xe0] sm:$0xff] }
 0x476   :  { %v5384_v0 = vadd.f32 %v5383_v6, %v5371_v51 }
 0x478   :  { %v21565_v11 = vadd.f32 %v5396_v59, %v5384_v0  ;;  %v5919_v59 = vld [vmem:[%s23907_s14 + $0xf8] sm:$0xff]  ;;  %v5914_v0 = vld [vmem:[%s23907_s14 + $0xd0] sm:$0xff] }
 0x47a   :  { %v5422_v57 = vsel %vm5421_vm8, %v21565_v11, 0.0  ;;  %v5432_v34 = vmul.f32 %v21565_v11, %v21565_v11 }
 0x47b   :  { %v5423_v16 = vrot.slane %v5422_v57, 4  ;;  %v5372_v56 = vpop.f32.mrf.mxu0 }
 0x47c   :  { %v5454_v41 = vsel %vm5421_vm8, %v5432_v34, 0.0  ;;  %v5912_v56 = vld [vmem:[%s23907_s14 + $0xc0] sm:$0xff] }
 0x47d   :  { %v5424_v3 = vadd.f32 %v5423_v16, %v5422_v57  ;;  %v5455_v23 = vrot.slane %v5454_v41, 4  ;;  %v5913_v57 = vld [vmem:[%s23907_s14 + $0xc8] sm:$0xff]  ;;  %v5682_v16 = vld [vmem:[%s23905_s12] sm:$0x1] }
 0x47f   :  { %v5425_v47 = vrot.slane %v5424_v3, 2  ;;  %v5456_v24 = vadd.f32 %v5455_v23, %v5454_v41 }
 0x480   :  { %v5531_v54 = vpop.f32.mrf.mxu1 }
 0x481   :  { %v5426_v32 = vadd.f32 %v5425_v47, %v5424_v3  ;;  %v5457_v42 = vrot.slane %v5456_v24, 2  ;;  %v5695_v3 = vld [vmem:[%s23906_s13] sm:$0x1]  ;;  %s24084_s13 = sld [smem:[#allocation39_spill]] }
 0x483   :  { %v5427_v5 = vrot.slane %v5426_v32, 1  ;;  %v5458_v60 = vadd.f32 %v5457_v42, %v5456_v24  ;;  %v5903_v24 = vld [vmem:[%s23907_s14 + $0x78] sm:$0xff]  ;;  %v5901_v42 = vld [vmem:[%s23907_s14 + $0x68] sm:$0xff] }
 0x485   :  { %v5428_v9 = vadd.f32 %v5427_v5, %v5426_v32  ;;  %v5459_v2 = vrot.slane %v5458_v60, 1  ;;  %v5902_v32 = vld [vmem:[%s23907_s14 + $0x70] sm:$0xff]  ;;  %v5900_v5 = vld [vmem:[%s23907_s14 + $0x60] sm:$0xff] }
 0x487   :  { %v5460_v4 = vadd.f32 %v5459_v2, %v5458_v60  ;;  %13702 = vmatmul.msk.f32.vlgmr.msrb.gmra.mxu1 %vm5510_vm9, %v5428_v9  ;;  %v5615_v61 = vpop.f32.mrf.mxu2  ;;  %v5899_v60 = vld [vmem:[%s23907_s14 + $0x58] sm:$0xff]  ;;  %v5934_v9 = vld [vmem:[%s23907_s14 + $0x170] sm:$0xff] }
 0x488   :  { %5831 = vmatpush.msrb.mxu1 %v5699_v40  ;;  %v5898_v2 = vld [vmem:[%s23907_s14 + $0x50] sm:$0xff]  ;;  %v5929_v40 = vld [vmem:[%s23907_s14 + $0x148] sm:$0xff] }
 0x489   :  { %13703 = vmatmul.msk.f32.vlgmr.msrb.gmra.mxu0 %vm5510_vm9, %v5460_v4  ;;  %v5910_v4 = vld [vmem:[%s23907_s14 + $0xb0] sm:$0xff] }
 0x48a   :  { %5760 = vmatpush.msrb.mxu0 %v5700_v53 }
 0x48f   :  { %5634 = vmatmul.f32.vlgmr.msra.gmra.mxu1 %v5446_v55  ;;  %v5897_v55 = vld [vmem:[%s23907_s14 + $0x48] sm:$0xff] }
 0x490   :  { %5964 = vmatpush.msra.mxu1 %v5919_v59  ;;  %v5923_v59 = vld [vmem:[%s23907_s14 + $0x118] sm:$0xff] }
 0x492   :  { %5965 = vmatpush.msra.mxu1 %v5918_v63  ;;  %v5936_v63 = vld [vmem:[%s23907_s14 + $0x180] sm:$0xff] }
 0x493   :  { %6019 = vmatpush.msra.mxu3 %v5936_v63  ;;  %v16453_v63 = vld [vmem:[%s23911_s18 + $0x360] sm:$0xf0] }
 0x494   :  { %5966 = vmatpush.msra.mxu1 %v5917_v39  ;;  %v5921_v39 = vld [vmem:[%s23907_s14 + $0x108] sm:$0xff] }
 0x496   :  { %5967 = vmatpush.msra.mxu1 %v5916_v15 }
 0x498   :  { %5968 = vmatpush.msra.mxu1 %v5915_v8 }
 0x49a   :  { %5969 = vmatpush.msra.mxu1 %v5914_v0 }
 0x49c   :  { %5970 = vmatpush.msra.mxu1 %v5913_v57 }
 0x49e   :  { %5971 = vmatpush.msra.mxu1 %v5912_v56 }
 0x4a0   :  { %5972 = vmatpush.msra.mxu1 %v5911_v48 }
 0x4a2   :  { %5973 = vmatpush.msra.mxu1 %v5910_v4 }
 0x4a8   :  { %v5551_v25 = vpop.f32.mrf.mxu3 }
 0x4a9   :  { %v5552_v35 = vadd.f32 %v5551_v25, %v5531_v54  ;;  %v5909_v54 = vld [vmem:[%s23907_s14 + $0xa8] sm:$0xff]  ;;  %v5932_v25 = vld [vmem:[%s23907_s14 + $0x160] sm:$0xff] }
 0x4aa   :  { %5974 = vmatpush.msra.mxu1 %v5909_v54 }
 0x4cf   :  { %v5571_v19 = vpop.f32.mrf.mxu0 }
 0x4d0   :  { %v5572_v58 = vadd.f32 %v5571_v19, %v5552_v35  ;;  %v5908_v19 = vld [vmem:[%s23907_s14 + $0xa0] sm:$0xff]  ;;  %v5931_v35 = vld [vmem:[%s23907_s14 + $0x158] sm:$0xff] }
 0x4d1   :  { %5975 = vmatpush.msra.mxu1 %v5908_v19 }
 0x4d7   :  { %v5655_v21 = vpop.f32.mrf.mxu3 }
 0x504   :  { %v5591_v7 = vpop.f32.mrf.mxu1 }
 0x505   :  { %v5592_v50 = vadd.f32 %v5591_v7, %v5572_v58  ;;  %v5896_v7 = vld [vmem:[%s23907_s14 + $0x40] sm:$0xff]  ;;  %v5895_v58 = vld [vmem:[%s23907_s14 + $0x38] sm:$0xff] }
 0x506   :  { %v5675_v12 = vpop.f32.mrf.mxu0 }
 0x507   :  { %v5594_v26 = vmul.f32 0.010204081, %v5592_v50  ;;  %v5907_v50 = vld [vmem:[%s23907_s14 + $0x98] sm:$0xff] }
 0x508   :  { %5976 = vmatpush.msra.mxu1 %v5907_v50 }
 0x509   :  { %v5679_v38 = vmul.f32 %v5594_v26, %v5594_v26 }
 0x50c   :  { %v5635_v49 = vpop.f32.mrf.mxu1 }
 0x50d   :  { %v5636_v22 = vadd.f32 %v5635_v49, %v5615_v61  ;;  %v5930_v61 = vld [vmem:[%s23907_s14 + $0x150] sm:$0xff] }
 0x50e   :  { %v5894_v49 = vld [vmem:[%s23907_s14 + $0x30] sm:$0xff] }
 0x50f   :  { %v5656_v44 = vadd.f32 %v5655_v21, %v5636_v22  ;;  %v5893_v22 = vld [vmem:[%s23907_s14 + $0x28] sm:$0xff] }
 0x510   :  { %v5905_v21 = vld [vmem:[%s23907_s14 + $0x88] sm:$0xff] }
 0x511   :  { %v5676_v6 = vadd.f32 %v5675_v12, %v5656_v44  ;;  %v5892_v44 = vld [vmem:[%s23907_s14 + $0x20] sm:$0xff]  ;;  %v5927_v12 = vld [vmem:[%s23907_s14 + $0x138] sm:$0xff] }
 0x513   :  { %v5678_v20 = vmul.f32 0.010204081, %v5676_v6  ;;  %v5891_v6 = vld [vmem:[%s23907_s14 + $0x18] sm:$0xff] }
 0x515   :  { %v5680_v29 = vsub.f32 %v5678_v20, %v5679_v38  ;;  %v5926_v38 = vld [vmem:[%s23907_s14 + $0x130] sm:$0xff] }
 0x516   :  { %v5890_v20 = vld [vmem:[%s23907_s14 + $0x10] sm:$0xff] }
 0x517   :  { %v5681_v37 = vmax.f32 %v5680_v29, 0.0  ;;  %v5889_v29 = vld [vmem:[%s23907_s14 + $0x8] sm:$0xff] }
 0x519   :  { %v5683_v36 = vadd.f32 1e-05, %v5681_v37  ;;  %v5924_v37 = vld [vmem:[%s23907_s14 + $0x120] sm:$0xff] }
 0x51b   :  { %16863 = vrsqrt.f32 %v5683_v36  ;;  %vm5690_vm11 = vweird.f32 %v5683_v36 }
 0x521   :  { %v16864_v43 = vpop.eup %16863 }
 0x522   :  { %v5685_v27 = vmul.f32 %v16864_v43, %v5683_v36  ;;  %vm5691_vm10 = vweird.f32 %v16864_v43  ;;  %v5888_v36 = vld [vmem:[%s23907_s14] sm:$0xff] }
 0x523   :  { %vm5692_vm12 = vmor %vm5690_vm11, %vm5691_vm10 }
 0x524   :  { %v5686_v51 = vmul.f32 %v16864_v43, %v5685_v27  ;;  %v5920_v27 = vld [vmem:[%s23907_s14 + $0x100] sm:$0xff] }
 0x526   :  { %v5687_v28 = vmul.f32 0.5, %v5686_v51 }
 0x528   :  { %v5688_v14 = vsub.f32 1.5, %v5687_v28 }
 0x52a   :  { %v5689_v34 = vmul.f32 %v16864_v43, %v5688_v14 }
 0x52c   :  { %v5693_v41 = vsel %vm5692_vm12, %v16864_v43, %v5689_v34  ;;  %v5922_v43 = vld [vmem:[%s23907_s14 + $0x110] sm:$0xff] }
 0x52d   :  { %v5694_v31 = vmul.f32 %v5693_v41, %v5682_v16 }
 0x52f   :  { %13704 = vmatmul.msk.f32.vlgmr.msra.gmra.mxu0 %vm5510_vm9, %v5694_v31  ;;  %13705 = vmatmul.msk.f32.vlgmr.msrb.gmra.mxu2 %vm5510_vm9, %v5694_v31  ;;  %v5696_v23 = vmul.f32 %v5694_v31, %v5594_v26  ;;  %v5928_v26 = vld [vmem:[%s23907_s14 + $0x140] sm:$0xff] }
 0x530   :  { %5811 = vmatpush.msra.mxu0 %v5698_v33  ;;  %5851 = vmatpush.msrb.mxu2 %v5700_v53  ;;  %v5906_v33 = vld [vmem:[%s23907_s14 + $0x90] sm:$0xff]  ;;  %v5925_v53 = vld [vmem:[%s23907_s14 + $0x128] sm:$0xff] }
 0x531   :  { %v5697_v47 = vsub.f32 %v5695_v3, %v5696_v23  ;;  %5977 = vmatpush.msra.mxu1 %v5906_v33 }
 0x533   :  { %13709 = vmatmul.msk.f32.vlgmr.msrb.gmra.mxu1 %vm5510_vm9, %v5697_v47  ;;  %13711 = vmatmul.msk.f32.vlgmr.msrb.gmra.mxu3 %vm5510_vm9, %v5697_v47 }
 0x534   :  { %5978 = vmatpush.msra.mxu1 %v5905_v21  ;;  %v6036_v21 = vld [vmem:[%s23909_s16] sm:$0xff] }
 0x536   :  { %5979 = vmatpush.msra.mxu1 %v5904_v1  ;;  %v6037_v1 = vld [vmem:[%s23909_s16 + $0x8] sm:$0xff] }
 0x537   :  { %13706 = vmatmul.msk.f32.vlgmr.msrb.gmra.mxu0 %vm5510_vm9, %v5694_v31  ;;  %13707 = vmatmul.msk.f32.vlgmr.msra.gmra.mxu2 %vm5510_vm9, %v5694_v31 }
 0x538   :  { %5944 = vmatpush.msrb.mxu0 %v5903_v24  ;;  %5984 = vmatpush.msra.mxu2 %v5935_v52 }
 0x53a   :  { %5945 = vmatpush.msrb.mxu0 %v5902_v32  ;;  %5985 = vmatpush.msra.mxu2 %v5934_v9 }
 0x53c   :  { %5946 = vmatpush.msrb.mxu0 %v5901_v42  ;;  %5986 = vmatpush.msra.mxu2 %v5933_v46 }
 0x53e   :  { %5947 = vmatpush.msrb.mxu0 %v5900_v5  ;;  %5987 = vmatpush.msra.mxu2 %v5932_v25 }
 0x53f   :  { %13708 = vmatmul.msk.f32.vlgmr.msra.gmra.mxu0 %vm5510_vm9, %v5697_v47  ;;  %13710 = vmatmul.msk.f32.vlgmr.msrb.gmra.mxu2 %vm5510_vm9, %v5697_v47 }
 0x540   :  { %5948 = vmatpush.msrb.mxu0 %v5899_v60  ;;  %5988 = vmatpush.msra.mxu2 %v5931_v35 }
 0x542   :  { %5949 = vmatpush.msrb.mxu0 %v5898_v2  ;;  %5989 = vmatpush.msra.mxu2 %v5930_v61 }
 0x544   :  { %5950 = vmatpush.msrb.mxu0 %v5897_v55  ;;  %5990 = vmatpush.msra.mxu2 %v5929_v40  ;;  %v6040_v40 = vld [vmem:[%s23909_s16 + $0x20] sm:$0xff] }
 0x545   :  { %6071 = vmatpush.msrb.mxu3 %v6040_v40 }
 0x546   :  { %5951 = vmatpush.msrb.mxu0 %v5896_v7  ;;  %5991 = vmatpush.msra.mxu2 %v5928_v26  ;;  %v6039_v26 = vld [vmem:[%s23909_s16 + $0x18] sm:$0xff] }
 0x547   :  { %6072 = vmatpush.msrb.mxu3 %v6036_v21  ;;  %v14000_v21 = vld [vmem:[%s23911_s18 + $0x230] sm:$0xf] }
 0x548   :  { %5952 = vmatpush.msrb.mxu0 %v5895_v58  ;;  %5992 = vmatpush.msra.mxu2 %v5927_v12  ;;  %v13916_v12 = vld [vmem:[%s23911_s18 + $0x188] sm:$0xf] }
 0x54a   :  { %5953 = vmatpush.msrb.mxu0 %v5894_v49  ;;  %5993 = vmatpush.msra.mxu2 %v5926_v38  ;;  %v13888_v38 = vld [vmem:[%s23911_s18 + $0x150] sm:$0xf] }
 0x54c   :  { %5954 = vmatpush.msrb.mxu0 %v5893_v22  ;;  %5994 = vmatpush.msra.mxu2 %v5925_v53  ;;  %v6043_v22 = vld [vmem:[%s23909_s16 + $0x38] sm:$0xff]  ;;  %v16390_v53 = vld [vmem:[%s23911_s18 + $0x168] sm:$0xf0] }
 0x54e   :  { %5955 = vmatpush.msrb.mxu0 %v5892_v44  ;;  %5995 = vmatpush.msra.mxu2 %v5924_v37  ;;  %v6041_v44 = vld [vmem:[%s23909_s16 + $0x28] sm:$0xff]  ;;  %v13860_v37 = vld [vmem:[%s23911_s18 + $0x118] sm:$0xf] }
 0x550   :  { %5956 = vmatpush.msrb.mxu0 %v5891_v6  ;;  %5996 = vmatpush.msra.mxu2 %v5923_v59  ;;  %v16397_v6 = vld [vmem:[%s23911_s18 + $0x1a0] sm:$0xf0]  ;;  %v14140_v59 = vld [vmem:[%s23911_s18 + $0x348] sm:$0xf] }
 0x552   :  { %5957 = vmatpush.msrb.mxu0 %v5890_v20  ;;  %5997 = vmatpush.msra.mxu2 %v5922_v43  ;;  %v13917_v20 = vor.u32 %v16397_v6, %v13916_v12  ;;  %v21798_v43 = vld [vmem:[%s23911_s18 + $0x540] sm:$0xff] }
 0x553   :  { %v13834_v12 = vld [vmem:[%s23911_s18 + $0xfc] sm:$0xf0] }
 0x554   :  { %5958 = vmatpush.msrb.mxu0 %v5889_v29  ;;  %5998 = vmatpush.msra.mxu2 %v5921_v39  ;;  %v13889_v29 = vor.u32 %v16390_v53, %v13888_v38  ;;  %v14141_v39 = vor.u32 %v16453_v63, %v14140_v59  ;;  %v13720_v38 = vld [vmem:[%s23911_s18] sm:$0xf]  ;;  %v16366_v59 = vld [vmem:[%s23911_s18 + $0xac] sm:$0xf]  ;;  %v13806_v63 = vld [vmem:[%s23911_s18 + $0xc4] sm:$0xf0] }
 0x555   :  { %7263 = vmatpush.bf16.msrb.mxu1 %v13917_v20  ;;  %v16348_v20 = vld [vmem:[%s23911_s18 + $0x18] sm:$0xf0] }
 0x556   :  { %5959 = vmatpush.msrb.mxu0 %v5888_v36  ;;  %5999 = vmatpush.msra.mxu2 %v5920_v27  ;;  %v16383_v36 = vld [vmem:[%s23911_s18 + $0x130] sm:$0xf0]  ;;  %v6889_v27 = vunpack.c.l.b16 %v21798_v43 }
 0x558   :  { %6131 = vmatpush.msra.mxu0 %v6043_v22  ;;  %7276 = vmatpush.bf16.msrb.mxu2 %v14141_v39  ;;  %v13721_v39 = vor.u32 %v16348_v20, %v13720_v38  ;;  %v16401_v38 = vld [vmem:[%s23911_s18 + $0x1c4] sm:$0xf]  ;;  %v13946_v20 = vld [vmem:[%s23911_s18 + $0x1dc] sm:$0xf0] }
 0x559   :  { %7264 = vmatpush.bf16.msrb.mxu1 %v13889_v29  ;;  %v16450_v29 = vld [vmem:[%s23911_s18 + $0x34c] sm:$0xf] }
 0x55a   :  { %6132 = vmatpush.msra.mxu0 %v6039_v26  ;;  %v16418_v26 = vld [vmem:[%s23911_s18 + $0x248] sm:$0xf0] }
 0x55b   :  { %v14001_v53 = vor.u32 %v16418_v26, %v14000_v21  ;;  %v14280_v21 = vld [vmem:[%s23911_s18 + $0x460] sm:$0xf]  ;;  %v16488_v26 = vld [vmem:[%s23911_s18 + $0x478] sm:$0xf0] }
 0x5ac   :  { %v5722_v15 = vpop.f32.mrf.mxu0 }
 0x5ad   :  { %v5785_v16 = vperm.slane %v5722_v15, 0  ;;  %v14112_v15 = vld [vmem:[%s23911_s18 + $0x310] sm:$0xf] }
 0x5af   :  { %v5789_v47 = vmul.f32 %v5785_v16, %v21401_v45  ;;  %v16860_v45 = vld [vmem:[%s23908_s15] ss:$0 sm:$0xff]  ;;  %v16439_v16 = vld [vmem:[%s23911_s18 + $0x2f0] sm:$0xf0] }
 0x5b0   :  { %v5833_v51 = vpop.f32.mrf.mxu1 }
 0x5b1   :  { %v5877_v14 = vperm.slane %v5833_v51, 0  ;;  %v16446_v51 = vld [vmem:[%s23911_s18 + $0x328] sm:$0xf0] }
 0x5b2   :  { %v5742_v8 = vpop.f32.mrf.mxu2 }
 0x5b3   :  { %v5786_v28 = vperm.slane %v5742_v8, 0  ;;  %v13861_v8 = vor.u32 %v16383_v36, %v13860_v37  ;;  %v14142_v37 = vld [vmem:[%s23911_s18 + $0x364] sm:$0xf0] }
 0x5b4   :  { %v5762_v0 = vpop.f32.mrf.mxu0 }
 0x5b5   :  { %v5790_v57 = vmul.f32 %v5786_v28, %v21491_v17  ;;  %v5787_v42 = vperm.slane %v5762_v0, 0  ;;  %v13832_v28 = vld [vmem:[%s23911_s18 + $0xe0] sm:$0xf]  ;;  %v7064_v0 = vpack.c.b16 %v6889_v27, %v6889_v27  ;;  %7265 = vmatpush.bf16.msrb.mxu1 %v13861_v8  ;;  %v14145_v27 = vor.u32 %v16450_v29, %v14142_v37  ;;  %v14252_v29 = vld [vmem:[%s23911_s18 + $0x428] sm:$0xf] }
 0x5b6   :  { %v5873_v41 = vpop.f32.mrf.mxu3  ;;  %v13809_v8 = vor.u32 %v16366_v59, %v13806_v63  ;;  %v16481_v37 = vld [vmem:[%s23911_s18 + $0x440] sm:$0xf0]  ;;  %v14310_v63 = vld [vmem:[%s23911_s18 + $0x4b4] sm:$0xf0] }
 0x5b7   :  { %v5881_v34 = vadd.f32 %v5877_v14, %v5790_v57  ;;  %v5879_v24 = vperm.slane %v5873_v41, 0  ;;  %v5791_v2 = vmul.f32 %v5787_v42, %v21535_v10  ;;  %v14113_v14 = vor.u32 %v16446_v51, %v14112_v15  ;;  %v16376_v57 = vld [vmem:[%s23911_s18 + $0xf8] sm:$0xf0]  ;;  %v16369_v42 = vld [vmem:[%s23911_s18 + $0xc0] sm:$0xf0] }
 0x5b8   :  { %v7243_v41 = vsel %vm3479_vm3, %v7064_v0, 0  ;;  %v16443_v15 = vld [vmem:[%s23911_s18 + $0x314] sm:$0xf]  ;;  %v14114_v51 = vld [vmem:[%s23911_s18 + $0x32c] sm:$0xf0]  ;;  %v14253_v59 = vor.u32 %v16481_v37, %v14252_v29 }
 0x5b9   :  { %v5885_v56 = vmax.f32 %v5881_v34, 0.0  ;;  %v14084_v34 = vld [vmem:[%s23911_s18 + $0x2d8] sm:$0xf]  ;;  %7277 = vmatpush.bf16.msrb.mxu2 %v14113_v14  ;;  %v13778_v0 = vld [vmem:[%s23911_s18 + $0x8c] sm:$0xf0]  ;;  %v14117_v14 = vor.u32 %v16443_v15, %v14114_v51 }
 0x5ba   :  { %v5782_v31 = vpop.f32.mrf.mxu2  ;;  %v16474_v15 = vld [vmem:[%s23911_s18 + $0x408] sm:$0xf0]  ;;  %v16485_v51 = vld [vmem:[%s23911_s18 + $0x464] sm:$0xf]  ;;  %v13840_v37 = vld [vmem:[%s23911_s18 + $0xe8] sm:$0xf] }
 0x5bb   :  { %v5788_v3 = vperm.slane %v5782_v31, 0  ;;  %5980 = vmatmul.f32.vlgmr.msra.gmra.mxu1 %v5885_v56  ;;  %v6026_v56 = vld [vmem:[%s24084_s13] sm:$0x3]  ;;  %v16394_v31 = vld [vmem:[%s23911_s18 + $0x18c] sm:$0xf] }
 0x5bc   :  { %v5813_v23 = vpop.f32.mrf.mxu0 }
 0x5bd   :  { %v5792_v52 = vmul.f32 %v5788_v3, %v21565_v11  ;;  %v5876_v32 = vperm.slane %v5813_v23, 0  ;;  %v13918_v3 = vld [vmem:[%s23911_s18 + $0x1a4] sm:$0xf0] }
 0x5bf   :  { %v5883_v5 = vadd.f32 %v5879_v24, %v5792_v52  ;;  %v5880_v60 = vadd.f32 %v5876_v32, %v5789_v47  ;;  %v13833_v47 = vor.u32 %v16376_v57, %v13832_v28  ;;  %v14085_v24 = vor.u32 %v16439_v16, %v14084_v34  ;;  %v13804_v32 = vld [vmem:[%s23911_s18 + $0xa8] sm:$0xf]  ;;  %v16359_v28 = vld [vmem:[%s23911_s18 + $0x74] sm:$0xf]  ;;  %v16436_v57 = vld [vmem:[%s23911_s18 + $0x2dc] sm:$0xf] }
 0x5c0   :  { %v14086_v34 = vld [vmem:[%s23911_s18 + $0x2f4] sm:$0xf0]  ;;  %v13781_v16 = vor.u32 %v16359_v28, %v13778_v0  ;;  %v14282_v28 = vld [vmem:[%s23911_s18 + $0x47c] sm:$0xf0] }
 0x5c1   :  { %v5887_v48 = vmax.f32 %v5883_v5, 0.0  ;;  %v5884_v9 = vmax.f32 %v5880_v60, 0.0  ;;  %v13921_v5 = vor.u32 %v16394_v31, %v13918_v3  ;;  %v14056_v60 = vld [vmem:[%s23911_s18 + $0x2a0] sm:$0xf]  ;;  %7266 = vmatpush.bf16.msrb.mxu1 %v13833_v47  ;;  %7278 = vmatpush.bf16.msrb.mxu2 %v14085_v24  ;;  %v16411_v47 = vld [vmem:[%s23911_s18 + $0x210] sm:$0xf0]  ;;  %v14285_v0 = vor.u32 %v16485_v51, %v14282_v28 }
 0x5c2   :  { %v5853_v17 = vpop.f32.mrf.mxu2  ;;  %v14058_v31 = vld [vmem:[%s23911_s18 + $0x2bc] sm:$0xf0]  ;;  %v16422_v24 = vld [vmem:[%s23911_s18 + $0x26c] sm:$0xf] }
 0x5c3   :  { %v5878_v4 = vperm.slane %v5853_v17, 0  ;;  %5960 = vmatmul.f32.vlgmr.msrb.gmra.mxu0 %v5884_v9  ;;  %13712 = vmatmul.msk.f32.vlgmr.msra.gmra.mxu3 %vm5510_vm9, %v5887_v48  ;;  %v16432_v48 = vld [vmem:[%s23911_s18 + $0x2b8] sm:$0xf0]  ;;  %v6042_v17 = vld [vmem:[%s23909_s16 + $0x30] sm:$0xff] }
 0x5c4   :  { %6091 = vmatpush.msra.mxu3 %v6041_v44  ;;  %7309 = vmatpush.bf16.msrb.mxu0 %v7243_v41  ;;  %v16429_v41 = vld [vmem:[%s23911_s18 + $0x2a4] sm:$0xf] }
 0x5c5   :  { %v5882_v46 = vadd.f32 %v5878_v4, %v5791_v2  ;;  %v16387_v2 = vld [vmem:[%s23911_s18 + $0x154] sm:$0xf]  ;;  %v13890_v4 = vld [vmem:[%s23911_s18 + $0x16c] sm:$0xf0]  ;;  %v14061_v3 = vor.u32 %v16429_v41, %v14058_v31  ;;  %v14168_v31 = vld [vmem:[%s23911_s18 + $0x380] sm:$0xf] }
 0x5c6   :  { %6092 = vmatpush.msra.mxu3 %v6037_v1  ;;  %v16373_v1 = vld [vmem:[%s23911_s18 + $0xe4] sm:$0xf] }
 0x5c7   :  { %v5886_v55 = vmax.f32 %v5882_v46, 0.0  ;;  %v13805_v46 = vor.u32 %v16369_v42, %v13804_v32  ;;  %v13837_v36 = vor.u32 %v16373_v1, %v13834_v12  ;;  %v14030_v32 = vld [vmem:[%s23911_s18 + $0x284] sm:$0xf0]  ;;  %v14336_v42 = vld [vmem:[%s23911_s18 + $0x4d0] sm:$0xf]  ;;  %v14281_v1 = vor.u32 %v16488_v26, %v14280_v21 }
 0x5c8   :  { %v14338_v12 = vld [vmem:[%s23911_s18 + $0x4ec] sm:$0xf0]  ;;  %v13868_v26 = vld [vmem:[%s23911_s18 + $0x120] sm:$0xf] }
 0x5c9   :  { %6000 = vmatmul.f32.vlgmr.msra.gmra.mxu2 %v5886_v55  ;;  %v6038_v55 = vld [vmem:[%s23909_s16 + $0x10] sm:$0xff]  ;;  %7267 = vmatpush.bf16.msrb.mxu1 %v13805_v46  ;;  %v16404_v46 = vld [vmem:[%s23911_s18 + $0x1d8] sm:$0xf0] }
 0x638   :  { %v5981_v25 = vpop.f32.mrf.mxu1 }
 0x640   :  { %v5961_v11 = vpop.f32.mrf.mxu0 }
 0x641   :  { %v5962_v54 = vadd.f32 %v16860_v45, %v5961_v11  ;;  %v13776_v45 = vld [vmem:[%s23911_s18 + $0x70] sm:$0xf]  ;;  %v16362_v11 = vld [vmem:[%s23911_s18 + $0x88] sm:$0xf0] }
 0x643   :  { %v5982_v7 = vadd.f32 %v5981_v25, %v5962_v54  ;;  %v14057_v54 = vor.u32 %v16432_v48, %v14056_v60  ;;  %v13893_v25 = vor.u32 %v16387_v2, %v13890_v4  ;;  %v14033_v60 = vor.u32 %v16422_v24, %v14030_v32  ;;  %v13944_v4 = vld [vmem:[%s23911_s18 + $0x1c0] sm:$0xf]  ;;  %v14226_v24 = vld [vmem:[%s23911_s18 + $0x40c] sm:$0xf0] }
 0x644   :  { %v22071_v32 = vld [vmem:[%s23910_s17] sm:$0xf] }
 0x645   :  { %7279 = vmatpush.bf16.msrb.mxu2 %v14057_v54  ;;  %v14308_v54 = vld [vmem:[%s23911_s18 + $0x498] sm:$0xf] }
 0x646   :  { %v6021_v58 = vpop.f32.mrf.mxu3 }
 0x64c   :  { %v6001_v19 = vpop.f32.mrf.mxu2 }
 0x64d   :  { %v6002_v35 = vadd.f32 %v6001_v19, %v5982_v7  ;;  %v16380_v7 = vld [vmem:[%s23911_s18 + $0x11c] sm:$0xf]  ;;  %v14028_v19 = vld [vmem:[%s23911_s18 + $0x268] sm:$0xf] }
 0x64f   :  { %v6022_v50 = vadd.f32 %v6021_v58, %v6002_v35  ;;  %v16425_v35 = vld [vmem:[%s23911_s18 + $0x280] sm:$0xf0]  ;;  %v13862_v58 = vld [vmem:[%s23911_s18 + $0x134] sm:$0xf0] }
 0x650   :  { %v14029_v40 = vor.u32 %v16425_v35, %v14028_v19  ;;  %v13865_v22 = vor.u32 %v16380_v7, %v13862_v58  ;;  %v16506_v35 = vld [vmem:[%s23911_s18 + $0x50c] sm:$0xf]  ;;  %v14366_v58 = vld [vmem:[%s23911_s18 + $0x524] sm:$0xf0] }
 0x651   :  { %v13713_v10 = vclamps-f32 %v6022_v50, 4.0 }
 0x652   :  { %7280 = vmatpush.bf16.msrb.mxu2 %v14029_v40  ;;  %v13974_v40 = vld [vmem:[%s23911_s18 + $0x214] sm:$0xf0] }
 0x653   :  { %v6027_v61 = vmul.f32 0.5, %v13713_v10  ;;  %v16509_v10 = vld [vmem:[%s23911_s18 + $0x520] sm:$0xf0] }
 0x655   :  { %v6028_v49 = vmul.f32 1.442695, %v6027_v61  ;;  %v13777_v61 = vor.u32 %v16362_v11, %v13776_v45  ;;  %v13945_v45 = vor.u32 %v16404_v46, %v13944_v4  ;;  %v14002_v11 = vld [vmem:[%s23911_s18 + $0x24c] sm:$0xf0]  ;;  %v16457_v4 = vld [vmem:[%s23911_s18 + $0x384] sm:$0xf] }
 0x656   :  { %7281 = vmatpush.bf16.msrb.mxu2 %v14001_v53  ;;  %v13949_v53 = vor.u32 %v16401_v38, %v13946_v20  ;;  %v14170_v46 = vld [vmem:[%s23911_s18 + $0x39c] sm:$0xf0]  ;;  %v14344_v38 = vld [vmem:[%s23911_s18 + $0x4d8] sm:$0xf]  ;;  %v16503_v20 = vld [vmem:[%s23911_s18 + $0x4f0] sm:$0xf0] }
 0x657   :  { %16865 = vpow2.f32 %v6028_v49  ;;  %v13748_v49 = vld [vmem:[%s23911_s18 + $0x38] sm:$0xf]  ;;  %7268 = vmatpush.bf16.msrb.mxu1 %v13777_v61  ;;  %v13722_v61 = vld [vmem:[%s23911_s18 + $0x1c] sm:$0xf0] }
 0x65d   :  { %v16866_v33 = vpop.eup %16865 }
 0x65e   :  { %6031 = vrot.lane.b32.xlu0 %v16866_v33, %s16928_s28  ;;  %v16355_v33 = vld [vmem:[%s23911_s18 + $0x50] sm:$0xf0] }
 0x65f   :  { %v13749_v6 = vor.u32 %v16355_v33, %v13748_v49  ;;  %v16408_v33 = vld [vmem:[%s23911_s18 + $0x1fc] sm:$0xf] }
 0x661   :  { %7269 = vmatpush.bf16.msrb.mxu1 %v13749_v6 }
 0x665   :  { %7270 = vmatpush.bf16.msrb.mxu1 %v13721_v39 }
 0x669   :  { %7328 = vmatpush.bf16.msra.mxu1 %v14145_v27  ;;  %v14224_v27 = vld [vmem:[%s23911_s18 + $0x3f0] sm:$0xf] }
 0x66d   :  { %7329 = vmatpush.bf16.msra.mxu1 %v14117_v14  ;;  %v14196_v14 = vld [vmem:[%s23911_s18 + $0x3b8] sm:$0xf] }
 0x6d0   :  { %v6032_v23 = vpop.permute.xlu0 %6031 }
 0x6d1   :  { %v6034_v52 = vmul.f32 %v6032_v23, %v6026_v56  ;;  %v14089_v56 = vor.u32 %v16436_v57, %v14086_v34  ;;  %v13972_v23 = vld [vmem:[%s23911_s18 + $0x1f8] sm:$0xf]  ;;  %v16467_v57 = vld [vmem:[%s23911_s18 + $0x3d0] sm:$0xf0]  ;;  %v16478_v34 = vld [vmem:[%s23911_s18 + $0x42c] sm:$0xf] }
 0x6d3   :  { %v6035_v9 = vadd.f32 %v6034_v52, %v6022_v50  ;;  %v14364_v50 = vld [vmem:[%s23911_s18 + $0x508] sm:$0xf]  ;;  %7330 = vmatpush.bf16.msra.mxu1 %v14089_v56  ;;  %v13973_v52 = vor.u32 %v16411_v47, %v13972_v23  ;;  %v16471_v23 = vld [vmem:[%s23911_s18 + $0x3f4] sm:$0xf] }
 0x6d4   :  { %v14365_v44 = vor.u32 %v16509_v10, %v14364_v50  ;;  %v14369_v50 = vor.u32 %v16506_v35, %v14366_v58  ;;  %v16345_v10 = vld [vmem:[%s23911_s18 + $0x4] sm:$0xf]  ;;  %v14254_v56 = vld [vmem:[%s23911_s18 + $0x444] sm:$0xf0]  ;;  %v13896_v58 = vld [vmem:[%s23911_s18 + $0x158] sm:$0xf] }
 0x6d5   :  { %13714 = vmatmul.msk.f32.vlgmr.msrb.gmra.mxu3 %vm2300_vm0, %v6035_v9  ;;  %13717 = vmatmul.msk.f32.vlgmr.msra.gmra.mxu0 %vm2300_vm0, %v6035_v9  ;;  %v13725_v49 = vor.u32 %v16345_v10, %v13722_v61  ;;  %v14257_v41 = vor.u32 %v16478_v34, %v14254_v56  ;;  %v14288_v56 = vld [vmem:[%s23911_s18 + $0x468] sm:$0xf] }
 0x6d6   :  { %6111 = vmatpush.msrb.mxu3 %v6042_v17  ;;  %7315 = vmatpush.bf16.msra.mxu0 %v13921_v5  ;;  %v16502_v5 = vld [vmem:[%s23911_s18 + $0x4e8] sm:$0xf0]  ;;  %v13750_v17 = vld [vmem:[%s23911_s18 + $0x54] sm:$0xf0] }
 0x6d7   :  { %7331 = vmatpush.bf16.msra.mxu1 %v14061_v3  ;;  %v14337_v48 = vor.u32 %v16502_v5, %v14336_v42  ;;  %7282 = vmatpush.bf16.msrb.mxu2 %v13973_v52  ;;  %v16460_v3 = vld [vmem:[%s23911_s18 + $0x398] sm:$0xf0]  ;;  %v6890_v52 = vunpack.c.h.b16 %v21798_v43  ;;  %v14229_v42 = vor.u32 %v16471_v23, %v14226_v24  ;;  %v13784_v23 = vld [vmem:[%s23911_s18 + $0x78] sm:$0xf] }
 0x6d8   :  { %6112 = vmatpush.msrb.mxu3 %v6038_v55  ;;  %v16415_v55 = vld [vmem:[%s23911_s18 + $0x234] sm:$0xf]  ;;  %v14169_v47 = vor.u32 %v16460_v3, %v14168_v31 }
 0x6d9   :  { %v14005_v7 = vor.u32 %v16415_v55, %v14002_v11  ;;  %v7065_v5 = vpack.c.b16 %v6890_v52, %v6890_v52  ;;  %v16398_v11 = vld [vmem:[%s23911_s18 + $0x1a8] sm:$0xf0] }
 0x6da   :  { %7316 = vmatpush.bf16.msra.mxu0 %v13893_v25  ;;  %v16495_v25 = vld [vmem:[%s23911_s18 + $0x4b0] sm:$0xf0] }
 0x6db   :  { %7332 = vmatpush.bf16.msra.mxu1 %v14033_v60  ;;  %v14309_v19 = vor.u32 %v16495_v25, %v14308_v54  ;;  %7283 = vmatpush.bf16.msrb.mxu2 %v13945_v45  ;;  %v16464_v60 = vld [vmem:[%s23911_s18 + $0x3bc] sm:$0xf]  ;;  %v7246_v43 = vsel %vm3479_vm3, %v7065_v5, 0  ;;  %v13924_v45 = vld [vmem:[%s23911_s18 + $0x190] sm:$0xf]  ;;  %v14173_v54 = vor.u32 %v16457_v4, %v14170_v46 }
 0x6dc   :  { %v16454_v5 = vld [vmem:[%s23911_s18 + $0x368] sm:$0xf0] }
 0x6dd   :  { %13715 = vmatmul.msk.f32.vlgmr.msra.gmra.mxu3 %vm2300_vm0, %v6035_v9 }
 0x6de   :  { %7317 = vmatpush.bf16.msra.mxu0 %v13865_v22  ;;  %7289 = vmatpush.bf16.msra.mxu3 %v14365_v44  ;;  %v13977_v22 = vor.u32 %v16408_v33, %v13974_v40  ;;  %v16499_v44 = vld [vmem:[%s23911_s18 + $0x4d4] sm:$0xf]  ;;  %v16510_v33 = vld [vmem:[%s23911_s18 + $0x528] sm:$0xf0] }
 0x6df   :  { %7333 = vmatpush.bf16.msra.mxu1 %v14005_v7  ;;  %7341 = vmatpush.bf16.msra.mxu2 %v14369_v50  ;;  %v14341_v6 = vor.u32 %v16499_v44, %v14338_v12  ;;  %v6046_v7 = vperm.slane %v22071_v32, 0  ;;  %v16391_v50 = vld [vmem:[%s23911_s18 + $0x170] sm:$0xf0]  ;;  %v16384_v44 = vld [vmem:[%s23911_s18 + $0x138] sm:$0xf0] }
 0x6e0   :  { %v13897_v40 = vor.u32 %v16391_v50, %v13896_v58  ;;  %v13869_v29 = vor.u32 %v16384_v44, %v13868_v26  ;;  %v16349_v58 = vld [vmem:[%s23911_s18 + $0x20] sm:$0xf0]  ;;  %v16468_v26 = vld [vmem:[%s23911_s18 + $0x3d8] sm:$0xf0] }
 0x6e2   :  { %7318 = vmatpush.bf16.msra.mxu0 %v13837_v36  ;;  %7290 = vmatpush.bf16.msra.mxu3 %v14337_v48  ;;  %v16492_v36 = vld [vmem:[%s23911_s18 + $0x49c] sm:$0xf]  ;;  %v14198_v48 = vld [vmem:[%s23911_s18 + $0x3d4] sm:$0xf0] }
 0x6e3   :  { %7334 = vmatpush.bf16.msra.mxu1 %v13977_v22  ;;  %7342 = vmatpush.bf16.msra.mxu2 %v14341_v6  ;;  %v14313_v39 = vor.u32 %v16492_v36, %v14310_v63  ;;  %v22113_v22 = vld [vmem:[%s23911_s18 + $0x548] sm:$0xff]  ;;  %v6047_v6 = vperm.slane %v22071_v32, 1  ;;  %v16377_v36 = vld [vmem:[%s23911_s18 + $0x100] sm:$0xf0]  ;;  %v14345_v63 = vor.u32 %v16503_v20, %v14344_v38  ;;  %v14150_v38 = vld [vmem:[%s23911_s18 + $0x36c] sm:$0xf0] }
 0x6e4   :  { %v6892_v44 = vunpack.c.h.b16 %v22113_v22 }
 0x6e5   :  { %13716 = vmatmul.msk.f32.vlgmr.msrb.gmra.mxu3 %vm2300_vm0, %v6035_v9  ;;  %v16352_v9 = vld [vmem:[%s23911_s18 + $0x3c] sm:$0xf] }
 0x6e6   :  { %7319 = vmatpush.bf16.msra.mxu0 %v13809_v8  ;;  %v13753_v2 = vor.u32 %v16352_v9, %v13750_v17  ;;  %7291 = vmatpush.bf16.msra.mxu3 %v14309_v19  ;;  %v14225_v8 = vor.u32 %v16474_v15, %v14224_v27  ;;  %v6049_v9 = vperm.slane %v22071_v32, 3  ;;  %v14201_v17 = vor.u32 %v16464_v60, %v14198_v48  ;;  %v14316_v27 = vld [vmem:[%s23911_s18 + $0x4a0] sm:$0xf]  ;;  %v16496_v15 = vld [vmem:[%s23911_s18 + $0x4b8] sm:$0xf0] }
 0x6e7   :  { %7335 = vmatpush.bf16.msra.mxu1 %v13949_v53  ;;  %7343 = vmatpush.bf16.msra.mxu2 %v14313_v39  ;;  %v13925_v19 = vor.u32 %v16398_v11, %v13924_v45  ;;  %v6891_v53 = vunpack.c.l.b16 %v22113_v22  ;;  %v14260_v60 = vld [vmem:[%s23911_s18 + $0x430] sm:$0xf]  ;;  %v16482_v48 = vld [vmem:[%s23911_s18 + $0x448] sm:$0xf0]  ;;  %v16447_v11 = vld [vmem:[%s23911_s18 + $0x330] sm:$0xf0] }
 0x6e8   :  { %v14261_v46 = vor.u32 %v16482_v48, %v14260_v60  ;;  %v13898_v22 = vld [vmem:[%s23911_s18 + $0x174] sm:$0xf0]  ;;  %v13842_v60 = vld [vmem:[%s23911_s18 + $0x104] sm:$0xf0] }
 0x6e9   :  { %v7066_v51 = vpack.c.b16 %v6891_v53, %v6891_v53 }
 0x6ea   :  { %7320 = vmatpush.bf16.msra.mxu0 %v13781_v16  ;;  %7292 = vmatpush.bf16.msra.mxu3 %v14281_v1  ;;  %v14197_v16 = vor.u32 %v16467_v57, %v14196_v14  ;;  %v16370_v14 = vld [vmem:[%s23911_s18 + $0xc8] sm:$0xf0]  ;;  %v14317_v57 = vor.u32 %v16496_v15, %v14316_v27  ;;  %v16461_v27 = vld [vmem:[%s23911_s18 + $0x3a0] sm:$0xf0]  ;;  %v7067_v15 = vpack.c.b16 %v6892_v44, %v6892_v44  ;;  %v16360_v44 = vld [vmem:[%s23911_s18 + $0x7c] sm:$0xf] }
 0x6eb   :  { %7344 = vmatpush.bf16.msra.mxu2 %v14285_v0  ;;  %v13812_v0 = vld [vmem:[%s23911_s18 + $0xb0] sm:$0xf]  ;;  %v7249_v31 = vsel %vm3479_vm3, %v7066_v51, 0  ;;  %v16444_v51 = vld [vmem:[%s23911_s18 + $0x31c] sm:$0xf] }
 0x6ec   :  { %v13813_v3 = vor.u32 %v16370_v14, %v13812_v0 }
 0x6ee   :  { %7321 = vmatpush.bf16.msra.mxu0 %v13753_v2  ;;  %7293 = vmatpush.bf16.msra.mxu3 %v14253_v59 }
 0x6ef   :  { %7345 = vmatpush.bf16.msra.mxu2 %v14257_v41  ;;  %v16489_v41 = vld [vmem:[%s23911_s18 + $0x480] sm:$0xf0] }
 0x6f0   :  { %v14289_v52 = vor.u32 %v16489_v41, %v14288_v56  ;;  %v14036_v56 = vld [vmem:[%s23911_s18 + $0x270] sm:$0xf] }
 0x6f2   :  { %7322 = vmatpush.bf16.msra.mxu0 %v13725_v49  ;;  %7294 = vmatpush.bf16.msra.mxu3 %v14225_v8  ;;  %v14372_v49 = vld [vmem:[%s23911_s18 + $0x510] sm:$0xf]  ;;  %v13841_v8 = vor.u32 %v16377_v36, %v13840_v37  ;;  %v16388_v37 = vld [vmem:[%s23911_s18 + $0x15c] sm:$0xf]  ;;  %v14064_v36 = vld [vmem:[%s23911_s18 + $0x2a8] sm:$0xf] }
 0x6f3   :  { %7346 = vmatpush.bf16.msra.mxu2 %v14229_v42  ;;  %v14373_v1 = vor.u32 %v16510_v33, %v14372_v49  ;;  %v13926_v49 = vld [vmem:[%s23911_s18 + $0x1ac] sm:$0xf0]  ;;  %v14092_v33 = vld [vmem:[%s23911_s18 + $0x2e0] sm:$0xf] }
 0x6f6   :  { %7295 = vmatpush.bf16.msra.mxu3 %v14197_v16  ;;  %v6048_v16 = vperm.slane %v22071_v32, 2  ;;  %v14148_v32 = vld [vmem:[%s23911_s18 + $0x350] sm:$0xf] }
 0x6f7   :  { %7347 = vmatpush.bf16.msra.mxu2 %v14201_v17  ;;  %v13756_v17 = vld [vmem:[%s23911_s18 + $0x40] sm:$0xf]  ;;  %v14149_v4 = vor.u32 %v16454_v5, %v14148_v32  ;;  %v16374_v5 = vld [vmem:[%s23911_s18 + $0xec] sm:$0xf] }
 0x6fa   :  { %7296 = vmatpush.bf16.msra.mxu3 %v14169_v47  ;;  %v16363_v47 = vld [vmem:[%s23911_s18 + $0x90] sm:$0xf0] }
 0x6fb   :  { %7348 = vmatpush.bf16.msra.mxu2 %v14173_v54  ;;  %v14232_v54 = vld [vmem:[%s23911_s18 + $0x3f8] sm:$0xf] }
 0x6fe   :  { %7361 = vmatpush.bf16.msrb.mxu3 %v7246_v43 }
 0x752   :  { %v6134_v2 = vpop.f32.mrf.mxu0 }
 0x753   :  { %v6135_v55 = vadd.f32 %v6134_v2, %v6049_v9  ;;  %v13785_v9 = vor.u32 %v16363_v47, %v13784_v23  ;;  %v16356_v2 = vld [vmem:[%s23911_s18 + $0x58] sm:$0xf0]  ;;  %v16437_v23 = vld [vmem:[%s23911_s18 + $0x2e4] sm:$0xf]  ;;  %v14094_v47 = vld [vmem:[%s23911_s18 + $0x2fc] sm:$0xf0] }
 0x754   :  { %v14097_v48 = vor.u32 %v16437_v23, %v14094_v47  ;;  %v16346_v23 = vld [vmem:[%s23911_s18 + $0xc] sm:$0xf]  ;;  %v13730_v47 = vld [vmem:[%s23911_s18 + $0x24] sm:$0xf0] }
 0x755   :  { %v6140_v25 = vmax.f32 %v6135_v55, 0.0  ;;  %v14120_v55 = vld [vmem:[%s23911_s18 + $0x318] sm:$0xf] }
 0x756   :  { %v14121_v50 = vor.u32 %v16447_v11, %v14120_v55  ;;  %v16448_v55 = vld [vmem:[%s23911_s18 + $0x338] sm:$0xf0]  ;;  %v13845_v11 = vor.u32 %v16374_v5, %v13842_v60  ;;  %v13932_v5 = vld [vmem:[%s23911_s18 + $0x198] sm:$0xf]  ;;  %v16399_v60 = vld [vmem:[%s23911_s18 + $0x1b0] sm:$0xf0] }
 0x757   :  { %v22094_v35 = vpack.c.bf16 %v6140_v25, %v6140_v25  ;;  %v16475_v25 = vld [vmem:[%s23911_s18 + $0x410] sm:$0xf0] }
 0x758   :  { %v6074_v10 = vpop.f32.mrf.mxu3 }
 0x759   :  { %v6075_v61 = vadd.f32 %v6074_v10, %v6046_v7  ;;  %14390 = vmatmul.msk.bf16.vlgmr.msrb.gmra.mxu0 %vm5510_vm9, %v22094_v35  ;;  %v13757_v7 = vor.u32 %v16356_v2, %v13756_v17  ;;  %v14233_v10 = vor.u32 %v16475_v25, %v14232_v54  ;;  %v16419_v17 = vld [vmem:[%s23911_s18 + $0x250] sm:$0xf0]  ;;  %v16430_v2 = vld [vmem:[%s23911_s18 + $0x2ac] sm:$0xf] }
 0x75a   :  { %7367 = vmatpush.bf16.msrb.mxu0 %v13925_v19  ;;  %v13728_v19 = vld [vmem:[%s23911_s18 + $0x8] sm:$0xf]  ;;  %v16367_v25 = vld [vmem:[%s23911_s18 + $0xb4] sm:$0xf] }
 0x75b   :  { %v6137_v21 = vmax.f32 %v6075_v61, 0.0  ;;  %v16395_v61 = vld [vmem:[%s23911_s18 + $0x194] sm:$0xf] }
 0x75c   :  { %v13929_v20 = vor.u32 %v16395_v61, %v13926_v49  ;;  %v16423_v61 = vld [vmem:[%s23911_s18 + $0x274] sm:$0xf]  ;;  %v14038_v49 = vld [vmem:[%s23911_s18 + $0x28c] sm:$0xf0] }
 0x75d   :  { %v22121_v12 = vpack.c.bf16 %v6137_v21, %v6137_v21  ;;  %v14204_v21 = vld [vmem:[%s23911_s18 + $0x3c0] sm:$0xf] }
 0x75e   :  { %7368 = vmatpush.bf16.msrb.mxu0 %v13897_v40  ;;  %v16440_v40 = vld [vmem:[%s23911_s18 + $0x2f8] sm:$0xf0] }
 0x75f   :  { %7271 = vmatmul.bf16.vlgmr.msrb.gmra.mxu1 %v22121_v12  ;;  %v14093_v53 = vor.u32 %v16440_v40, %v14092_v33  ;;  %v14100_v33 = vld [vmem:[%s23911_s18 + $0x2e8] sm:$0xf]  ;;  %v16441_v40 = vld [vmem:[%s23911_s18 + $0x300] sm:$0xf0] }
 0x760   :  { %7393 = vmatpush.bf16.msrb.mxu1 %v14373_v1  ;;  %v6094_v59 = vpop.f32.mrf.mxu3  ;;  %v13729_v1 = vor.u32 %v16349_v58, %v13728_v19 }
 0x761   :  { %v6095_v39 = vadd.f32 %v6094_v59, %v6047_v6  ;;  %v16451_v6 = vld [vmem:[%s23911_s18 + $0x354] sm:$0xf] }
 0x762   :  { %7369 = vmatpush.bf16.msrb.mxu0 %v13869_v29  ;;  %v14205_v29 = vor.u32 %v16468_v26, %v14204_v21  ;;  %v14153_v59 = vor.u32 %v16451_v6, %v14150_v38  ;;  %v14041_v6 = vor.u32 %v16423_v61, %v14038_v49  ;;  %v14101_v38 = vor.u32 %v16441_v40, %v14100_v33  ;;  %v16413_v61 = vld [vmem:[%s23911_s18 + $0x220] sm:$0xf0]  ;;  %v16486_v49 = vld [vmem:[%s23911_s18 + $0x46c] sm:$0xf]  ;;  %v14290_v33 = vld [vmem:[%s23911_s18 + $0x484] sm:$0xf0] }
 0x763   :  { %v6138_v28 = vmax.f32 %v6095_v39, 0.0  ;;  %v14176_v39 = vld [vmem:[%s23911_s18 + $0x388] sm:$0xf]  ;;  %v14352_v40 = vld [vmem:[%s23911_s18 + $0x4e0] sm:$0xf] }
 0x764   :  { %7394 = vmatpush.bf16.msrb.mxu1 %v14345_v63  ;;  %v16433_v63 = vld [vmem:[%s23911_s18 + $0x2c0] sm:$0xf0]  ;;  %v14177_v14 = vor.u32 %v16461_v27, %v14176_v39  ;;  %v14374_v39 = vld [vmem:[%s23911_s18 + $0x52c] sm:$0xf0] }
 0x765   :  { %v22150_v34 = vpack.c.bf16 %v6138_v28, %v6138_v28  ;;  %v13901_v28 = vor.u32 %v16388_v37, %v13898_v22  ;;  %v14065_v0 = vor.u32 %v16433_v63, %v14064_v36  ;;  %v14010_v37 = vld [vmem:[%s23911_s18 + $0x254] sm:$0xf0]  ;;  %v14072_v22 = vld [vmem:[%s23911_s18 + $0x2b0] sm:$0xf]  ;;  %v16434_v36 = vld [vmem:[%s23911_s18 + $0x2c8] sm:$0xf0] }
 0x766   :  { %7370 = vmatpush.bf16.msrb.mxu0 %v13841_v8  ;;  %v14122_v8 = vld [vmem:[%s23911_s18 + $0x334] sm:$0xf0]  ;;  %v16507_v63 = vld [vmem:[%s23911_s18 + $0x514] sm:$0xf] }
 0x767   :  { %7284 = vmatmul.bf16.vlgmr.msrb.gmra.mxu2 %v22150_v34  ;;  %v14125_v41 = vor.u32 %v16444_v51, %v14122_v8  ;;  %v13758_v51 = vld [vmem:[%s23911_s18 + $0x5c] sm:$0xf0] }
 0x768   :  { %7395 = vmatpush.bf16.msrb.mxu1 %v14317_v57  ;;  %v6114_v24 = vpop.f32.mrf.mxu3  ;;  %7413 = vmatpush.bf16.msrb.mxu2 %v7249_v31  ;;  %v16381_v57 = vld [vmem:[%s23911_s18 + $0x124] sm:$0xf]  ;;  %v7252_v31 = vsel %vm3479_vm3, %v7067_v15, 0 }
 0x769   :  { %v6115_v42 = vadd.f32 %v6114_v24, %v6048_v16  ;;  %7323 = vmatmul.bf16.vlgmr.msra.gmra.mxu0 %v22121_v12  ;;  %v13870_v16 = vld [vmem:[%s23911_s18 + $0x13c] sm:$0xf0]  ;;  %v14156_v24 = vld [vmem:[%s23911_s18 + $0x358] sm:$0xf]  ;;  %v16353_v15 = vld [vmem:[%s23911_s18 + $0x44] sm:$0xf] }
 0x76a   :  { %7371 = vmatpush.bf16.msrb.mxu0 %v13813_v3  ;;  %v16426_v3 = vld [vmem:[%s23911_s18 + $0x288] sm:$0xf0]  ;;  %v13873_v32 = vor.u32 %v16381_v57, %v13870_v16  ;;  %v13982_v57 = vld [vmem:[%s23911_s18 + $0x21c] sm:$0xf0]  ;;  %v14044_v16 = vld [vmem:[%s23911_s18 + $0x278] sm:$0xf] }
 0x76b   :  { %v6139_v43 = vmax.f32 %v6115_v42, 0.0  ;;  %v14037_v42 = vor.u32 %v16426_v3, %v14036_v56  ;;  %v16427_v56 = vld [vmem:[%s23911_s18 + $0x290] sm:$0xf0]  ;;  %v14346_v3 = vld [vmem:[%s23911_s18 + $0x4f4] sm:$0xf0] }
 0x76c   :  { %7396 = vmatpush.bf16.msrb.mxu1 %v14289_v52  ;;  %v16455_v52 = vld [vmem:[%s23911_s18 + $0x370] sm:$0xf0] }
 0x76d   :  { %v22189_v45 = vpack.c.bf16 %v6139_v43, %v6139_v43  ;;  %v14008_v43 = vld [vmem:[%s23911_s18 + $0x238] sm:$0xf] }
 0x76e   :  { %7372 = vmatpush.bf16.msrb.mxu0 %v13785_v9  ;;  %v14157_v9 = vor.u32 %v16455_v52, %v14156_v24  ;;  %v14009_v54 = vor.u32 %v16419_v17, %v14008_v43  ;;  %v16402_v24 = vld [vmem:[%s23911_s18 + $0x1cc] sm:$0xf]  ;;  %v16420_v43 = vld [vmem:[%s23911_s18 + $0x258] sm:$0xf0]  ;;  %v16493_v17 = vld [vmem:[%s23911_s18 + $0x4a4] sm:$0xf] }
 0x76f   :  { %7297 = vmatmul.bf16.vlgmr.msra.gmra.mxu3 %v22189_v45  ;;  %7336 = vmatmul.bf16.vlgmr.msra.gmra.mxu1 %v22150_v34 }
 0x770   :  { %7380 = vmatpush.bf16.msra.mxu3 %v14149_v4  ;;  %7397 = vmatpush.bf16.msrb.mxu1 %v14261_v46  ;;  %v14066_v4 = vld [vmem:[%s23911_s18 + $0x2c4] sm:$0xf0]  ;;  %v14128_v46 = vld [vmem:[%s23911_s18 + $0x320] sm:$0xf] }
 0x771   :  { %v14069_v19 = vor.u32 %v16430_v2, %v14066_v4  ;;  %v14129_v58 = vor.u32 %v16448_v55, %v14128_v46  ;;  %v13733_v2 = vor.u32 %v16346_v23, %v13730_v47  ;;  %v14318_v4 = vld [vmem:[%s23911_s18 + $0x4bc] sm:$0xf0]  ;;  %v14380_v46 = vld [vmem:[%s23911_s18 + $0x518] sm:$0xf]  ;;  %v16511_v55 = vld [vmem:[%s23911_s18 + $0x530] sm:$0xf0] }
 0x772   :  { %7373 = vmatpush.bf16.msrb.mxu0 %v13757_v7  ;;  %v13814_v7 = vld [vmem:[%s23911_s18 + $0xcc] sm:$0xf0]  ;;  %v14354_v23 = vld [vmem:[%s23911_s18 + $0x4fc] sm:$0xf0]  ;;  %v13820_v47 = vld [vmem:[%s23911_s18 + $0xb8] sm:$0xf] }
 0x773   :  { %v13817_v21 = vor.u32 %v16367_v25, %v13814_v7  ;;  %v13904_v7 = vld [vmem:[%s23911_s18 + $0x160] sm:$0xf] }
 0x774   :  { %7381 = vmatpush.bf16.msra.mxu3 %v14121_v50  ;;  %7398 = vmatpush.bf16.msrb.mxu1 %v14233_v10  ;;  %v13980_v50 = vld [vmem:[%s23911_s18 + $0x200] sm:$0xf]  ;;  %v16412_v10 = vld [vmem:[%s23911_s18 + $0x218] sm:$0xf0] }
 0x775   :  { %v13981_v26 = vor.u32 %v16412_v10, %v13980_v50  ;;  %v14381_v50 = vor.u32 %v16511_v55, %v14380_v46  ;;  %v13988_v10 = vld [vmem:[%s23911_s18 + $0x208] sm:$0xf]  ;;  %v13792_v55 = vld [vmem:[%s23911_s18 + $0x80] sm:$0xf] }
 0x776   :  { %7374 = vmatpush.bf16.msrb.mxu0 %v13729_v1  ;;  %v13786_v1 = vld [vmem:[%s23911_s18 + $0x94] sm:$0xf0] }
 0x777   :  { %7349 = vmatmul.bf16.vlgmr.msra.gmra.mxu2 %v22189_v45 }
 0x778   :  { %7382 = vmatpush.bf16.msra.mxu3 %v14093_v53  ;;  %7399 = vmatpush.bf16.msrb.mxu1 %v14205_v29  ;;  %v16405_v53 = vld [vmem:[%s23911_s18 + $0x1e0] sm:$0xf0]  ;;  %v16416_v29 = vld [vmem:[%s23911_s18 + $0x23c] sm:$0xf] }
 0x779   :  { %7432 = vmatpush.bf16.msra.mxu2 %v14153_v59  ;;  %7375 = vmatmul.bf16.vlgmr.msrb.gmra.mxu0 %v22121_v12  ;;  %v13789_v59 = vor.u32 %v16360_v44, %v13786_v1  ;;  %v14013_v8 = vor.u32 %v16416_v29, %v14010_v37  ;;  %v13989_v44 = vor.u32 %v16413_v61, %v13988_v10  ;;  %v13876_v1 = vld [vmem:[%s23911_s18 + $0x128] sm:$0xf]  ;;  %v16406_v29 = vld [vmem:[%s23911_s18 + $0x1e8] sm:$0xf0]  ;;  %v16479_v37 = vld [vmem:[%s23911_s18 + $0x434] sm:$0xf] }
 0x77a   :  { %7419 = vmatpush.bf16.msra.mxu0 %v13929_v20  ;;  %v13952_v20 = vld [vmem:[%s23911_s18 + $0x1c8] sm:$0xf]  ;;  %v16476_v10 = vld [vmem:[%s23911_s18 + $0x418] sm:$0xf0] }
 0x77b   :  { %v13953_v27 = vor.u32 %v16405_v53, %v13952_v20  ;;  %v13960_v53 = vld [vmem:[%s23911_s18 + $0x1d0] sm:$0xf] }
 0x77c   :  { %7383 = vmatpush.bf16.msra.mxu3 %v14065_v0  ;;  %7400 = vmatpush.bf16.msrb.mxu1 %v14177_v14  ;;  %v16409_v0 = vld [vmem:[%s23911_s18 + $0x204] sm:$0xf]  ;;  %v14377_v14 = vor.u32 %v16507_v63, %v14374_v39  ;;  %v16508_v39 = vld [vmem:[%s23911_s18 + $0x51c] sm:$0xf] }
 0x77d   :  { %7433 = vmatpush.bf16.msra.mxu2 %v14125_v41  ;;  %v13761_v41 = vor.u32 %v16353_v15, %v13758_v51  ;;  %v13985_v52 = vor.u32 %v16409_v0, %v13982_v57  ;;  %v13961_v15 = vor.u32 %v16406_v29, %v13960_v53  ;;  %v13848_v51 = vld [vmem:[%s23911_s18 + $0xf0] sm:$0xf]  ;;  %v16396_v53 = vld [vmem:[%s23911_s18 + $0x19c] sm:$0xf]  ;;  %v13934_v29 = vld [vmem:[%s23911_s18 + $0x1b4] sm:$0xf0] }
 0x77e   :  { %7420 = vmatpush.bf16.msra.mxu0 %v13901_v28  ;;  %v14073_v28 = vor.u32 %v16434_v36, %v14072_v22  ;;  %v14262_v22 = vld [vmem:[%s23911_s18 + $0x44c] sm:$0xf0]  ;;  %v14324_v36 = vld [vmem:[%s23911_s18 + $0x4a8] sm:$0xf] }
 0x77f   :  { %14391 = vmatmul.msk.bf16.vlgmr.msrb.gmra.mxu3 %vm5510_vm9, %v22094_v35  ;;  %7401 = vmatmul.bf16.vlgmr.msrb.gmra.mxu1 %v22189_v45 }
 0x780   :  { %7465 = vmatpush.bf16.msra.mxu1 %v7252_v31  ;;  %7384 = vmatpush.bf16.msra.mxu3 %v14037_v42  ;;  %v16500_v31 = vld [vmem:[%s23911_s18 + $0x4dc] sm:$0xf]  ;;  %v13954_v42 = vld [vmem:[%s23911_s18 + $0x1e4] sm:$0xf0] }
 0x781   :  { %7434 = vmatpush.bf16.msra.mxu2 %v14097_v48  ;;  %v14349_v48 = vor.u32 %v16500_v31, %v14346_v3  ;;  %v16501_v3 = vld [vmem:[%s23911_s18 + $0x4e4] sm:$0xf] }
 0x782   :  { %7421 = vmatpush.bf16.msra.mxu0 %v13873_v32  ;;  %v14045_v32 = vor.u32 %v16427_v56, %v14044_v16  ;;  %v14234_v16 = vld [vmem:[%s23911_s18 + $0x414] sm:$0xf0]  ;;  %v14296_v56 = vld [vmem:[%s23911_s18 + $0x470] sm:$0xf] }
 0x784   :  { %7484 = vmatpush.bf16.msrb.mxu1 %v14157_v9  ;;  %7385 = vmatpush.bf16.msra.mxu3 %v14009_v54  ;;  %v14016_v9 = vld [vmem:[%s23911_s18 + $0x240] sm:$0xf]  ;;  %v13957_v54 = vor.u32 %v16402_v24, %v13954_v42  ;;  %v16371_v24 = vld [vmem:[%s23911_s18 + $0xd0] sm:$0xf0] }
 0x785   :  { %7435 = vmatpush.bf16.msra.mxu2 %v14069_v19  ;;  %v14017_v25 = vor.u32 %v16420_v43, %v14016_v9  ;;  %v16392_v19 = vld [vmem:[%s23911_s18 + $0x178] sm:$0xf0]  ;;  %v14268_v9 = vld [vmem:[%s23911_s18 + $0x438] sm:$0xf]  ;;  %v16483_v43 = vld [vmem:[%s23911_s18 + $0x450] sm:$0xf0] }
 0x786   :  { %7422 = vmatpush.bf16.msra.mxu0 %v13845_v11  ;;  %v13933_v11 = vor.u32 %v16399_v60, %v13932_v5  ;;  %v16465_v5 = vld [vmem:[%s23911_s18 + $0x3c4] sm:$0xf]  ;;  %v14357_v60 = vor.u32 %v16501_v3, %v14354_v23  ;;  %v14242_v3 = vld [vmem:[%s23911_s18 + $0x41c] sm:$0xf0] }
 0x787   :  { %14392 = vmatmul.msk.bf16.vlgmr.msrb.gmra.mxu2 %vm5510_vm9, %v22094_v35 }
 0x788   :  { %7485 = vmatpush.bf16.msrb.mxu1 %v14129_v58  ;;  %7386 = vmatpush.bf16.msra.mxu3 %v13981_v26  ;;  %v14321_v58 = vor.u32 %v16493_v17, %v14318_v4  ;;  %v13905_v26 = vor.u32 %v16392_v19, %v13904_v7  ;;  %v13821_v17 = vor.u32 %v16371_v24, %v13820_v47  ;;  %v14326_v4 = vld [vmem:[%s23911_s18 + $0x4c4] sm:$0xf0]  ;;  %v16458_v7 = vld [vmem:[%s23911_s18 + $0x38c] sm:$0xf] }
 0x789   :  { %7436 = vmatpush.bf16.msra.mxu2 %v14041_v6  ;;  %v16385_v6 = vld [vmem:[%s23911_s18 + $0x140] sm:$0xf0]  ;;  %v16382_v24 = vld [vmem:[%s23911_s18 + $0x12c] sm:$0xf] }
 0x78a   :  { %7423 = vmatpush.bf16.msra.mxu0 %v13817_v21  ;;  %v16504_v21 = vld [vmem:[%s23911_s18 + $0x4f8] sm:$0xf0]  ;;  %v13877_v63 = vor.u32 %v16385_v6, %v13876_v1  ;;  %v14212_v6 = vld [vmem:[%s23911_s18 + $0x3c8] sm:$0xf] }
 0x78b   :  { %v14353_v20 = vor.u32 %v16504_v21, %v14352_v40  ;;  %v13764_v21 = vld [vmem:[%s23911_s18 + $0x48] sm:$0xf] }
 0x78c   :  { %7486 = vmatpush.bf16.msrb.mxu1 %v14101_v38  ;;  %7387 = vmatpush.bf16.msra.mxu3 %v13953_v27  ;;  %v14293_v38 = vor.u32 %v16486_v49, %v14290_v33  ;;  %v14382_v27 = vld [vmem:[%s23911_s18 + $0x534] sm:$0xf0]  ;;  %v16487_v49 = vld [vmem:[%s23911_s18 + $0x474] sm:$0xf]  ;;  %v14298_v33 = vld [vmem:[%s23911_s18 + $0x48c] sm:$0xf0] }
 0x78d   :  { %7437 = vmatpush.bf16.msra.mxu2 %v14013_v8  ;;  %v16378_v8 = vld [vmem:[%s23911_s18 + $0x108] sm:$0xf0]  ;;  %v14385_v57 = vor.u32 %v16508_v39, %v14382_v27 }
 0x78e   :  { %7424 = vmatpush.bf16.msra.mxu0 %v13789_v59  ;;  %v16497_v59 = vld [vmem:[%s23911_s18 + $0x4c0] sm:$0xf0]  ;;  %v13849_v31 = vor.u32 %v16378_v8, %v13848_v51  ;;  %v16350_v39 = vld [vmem:[%s23911_s18 + $0x28] sm:$0xf0]  ;;  %v13937_v51 = vor.u32 %v16396_v53, %v13934_v29  ;;  %v14184_v8 = vld [vmem:[%s23911_s18 + $0x390] sm:$0xf] }
 0x78f   :  { %7388 = vmatmul.bf16.vlgmr.msra.gmra.mxu3 %v22150_v34  ;;  %14393 = vmatmul.msk.bf16.vlgmr.msra.gmra.mxu1 %vm5510_vm9, %v22094_v35  ;;  %v14325_v0 = vor.u32 %v16497_v59, %v14324_v36  ;;  %v16480_v36 = vld [vmem:[%s23911_s18 + $0x43c] sm:$0xf]  ;;  %v14270_v59 = vld [vmem:[%s23911_s18 + $0x454] sm:$0xf0] }
 0x790   :  { %7487 = vmatpush.bf16.msrb.mxu1 %v14073_v28  ;;  %7445 = vmatpush.bf16.msrb.mxu3 %v14377_v14  ;;  %v14265_v28 = vor.u32 %v16479_v37, %v14262_v22  ;;  %v16472_v14 = vld [vmem:[%s23911_s18 + $0x3fc] sm:$0xf]  ;;  %v13822_v29 = vld [vmem:[%s23911_s18 + $0xd4] sm:$0xf0] }
 0x791   :  { %7438 = vmatpush.bf16.msra.mxu2 %v13985_v52  ;;  %v22519_v52 = vld [vmem:[%s23911_s18 + $0x550] sm:$0xff]  ;;  %v16368_v53 = vld [vmem:[%s23911_s18 + $0xbc] sm:$0xf] }
 0x792   :  { %7425 = vmatpush.bf16.msra.mxu0 %v13761_v41  ;;  %v16490_v41 = vld [vmem:[%s23911_s18 + $0x488] sm:$0xf0]  ;;  %v6893_v46 = vunpack.c.l.b16 %v22519_v52  ;;  %v6894_v27 = vunpack.c.h.b16 %v22519_v52 }
 0x793   :  { %v14297_v42 = vor.u32 %v16490_v41, %v14296_v56  ;;  %v13906_v56 = vld [vmem:[%s23911_s18 + $0x17c] sm:$0xf0] }
 0x794   :  { %7488 = vmatpush.bf16.msrb.mxu1 %v14045_v32  ;;  %7446 = vmatpush.bf16.msrb.mxu3 %v14349_v48  ;;  %v14237_v32 = vor.u32 %v16472_v14, %v14234_v16  ;;  %v14206_v48 = vld [vmem:[%s23911_s18 + $0x3dc] sm:$0xf0]  ;;  %v7068_v40 = vpack.c.b16 %v6893_v46, %v6893_v46  ;;  %v14273_v14 = vor.u32 %v16480_v36, %v14270_v59  ;;  %v16389_v16 = vld [vmem:[%s23911_s18 + $0x164] sm:$0xf] }
 0x795   :  { %7439 = vmatpush.bf16.msra.mxu2 %v13957_v54  ;;  %v14209_v54 = vor.u32 %v16465_v5, %v14206_v48  ;;  %v7069_v47 = vpack.c.b16 %v6894_v27, %v6894_v27  ;;  %v14130_v5 = vld [vmem:[%s23911_s18 + $0x33c] sm:$0xf0]  ;;  %v14046_v27 = vld [vmem:[%s23911_s18 + $0x294] sm:$0xf0] }
 0x796   :  { %7426 = vmatpush.bf16.msra.mxu0 %v13733_v2  ;;  %v16494_v2 = vld [vmem:[%s23911_s18 + $0x4ac] sm:$0xf]  ;;  %v7255_v22 = vsel %vm3479_vm3, %v7068_v40, 0  ;;  %v14186_v40 = vld [vmem:[%s23911_s18 + $0x3ac] sm:$0xf0] }
 0x797   :  { %v14329_v19 = vor.u32 %v16494_v2, %v14326_v4  ;;  %v16466_v2 = vld [vmem:[%s23911_s18 + $0x3cc] sm:$0xf]  ;;  %v14214_v4 = vld [vmem:[%s23911_s18 + $0x3e4] sm:$0xf0]  ;;  %v7258_v46 = vsel %vm3479_vm3, %v7069_v47, 0 }
 0x798   :  { %7489 = vmatpush.bf16.msrb.mxu1 %v14017_v25  ;;  %7447 = vmatpush.bf16.msrb.mxu3 %v14321_v58  ;;  %v14269_v25 = vor.u32 %v16483_v43, %v14268_v9  ;;  %v14178_v58 = vld [vmem:[%s23911_s18 + $0x3a4] sm:$0xf0]  ;;  %v13940_v43 = vld [vmem:[%s23911_s18 + $0x1a0] sm:$0xf]  ;;  %v16372_v47 = vld [vmem:[%s23911_s18 + $0xd8] sm:$0xf0] }
 0x799   :  { %7497 = vmatpush.bf16.msrb.mxu2 %v14381_v50  ;;  %7427 = vmatmul.bf16.vlgmr.msra.gmra.mxu0 %v22121_v12  ;;  %v14240_v50 = vld [vmem:[%s23911_s18 + $0x400] sm:$0xf]  ;;  %v13878_v9 = vld [vmem:[%s23911_s18 + $0x144] sm:$0xf0] }
 0x79a   :  { %7471 = vmatpush.bf16.msrb.mxu0 %v13933_v11  ;;  %7440 = vmatmul.bf16.vlgmr.msra.gmra.mxu2 %v22150_v34  ;;  %v16364_v11 = vld [vmem:[%s23911_s18 + $0x98] sm:$0xf0]  ;;  %v14241_v1 = vor.u32 %v16476_v10, %v14240_v50  ;;  %v14217_v50 = vor.u32 %v16466_v2, %v14214_v4  ;;  %v13850_v10 = vld [vmem:[%s23911_s18 + $0x10c] sm:$0xf0] }
 0x79b   :  { %v13793_v61 = vor.u32 %v16364_v11, %v13792_v55  ;;  %v16456_v2 = vld [vmem:[%s23911_s18 + $0x378] sm:$0xf0] }
 0x79c   :  { %7490 = vmatpush.bf16.msrb.mxu1 %v13989_v44  ;;  %7448 = vmatpush.bf16.msrb.mxu3 %v14293_v38  ;;  %v14181_v44 = vor.u32 %v16458_v7, %v14178_v58  ;;  %v14301_v38 = vor.u32 %v16487_v49, %v14298_v33  ;;  %v16375_v7 = vld [vmem:[%s23911_s18 + $0xf4] sm:$0xf]  ;;  %v14102_v58 = vld [vmem:[%s23911_s18 + $0x304] sm:$0xf0]  ;;  %v16393_v49 = vld [vmem:[%s23911_s18 + $0x180] sm:$0xf0] }
 0x79d   :  { %7498 = vmatpush.bf16.msrb.mxu2 %v14353_v20  ;;  %v16469_v20 = vld [vmem:[%s23911_s18 + $0x3e0] sm:$0xf0]  ;;  %v16459_v33 = vld [vmem:[%s23911_s18 + $0x394] sm:$0xf] }
 0x79e   :  { %7472 = vmatpush.bf16.msrb.mxu0 %v13905_v26  ;;  %v16357_v26 = vld [vmem:[%s23911_s18 + $0x60] sm:$0xf0] }
 0x79f   :  { %v13765_v37 = vor.u32 %v16357_v26, %v13764_v21 }
 0x7a0   :  { %7491 = vmatpush.bf16.msrb.mxu1 %v13961_v15  ;;  %7449 = vmatpush.bf16.msrb.mxu3 %v14265_v28  ;;  %v14213_v15 = vor.u32 %v16469_v20, %v14212_v6  ;;  %v16452_v28 = vld [vmem:[%s23911_s18 + $0x35c] sm:$0xf]  ;;  %v16431_v6 = vld [vmem:[%s23911_s18 + $0x2b4] sm:$0xf]  ;;  %v14189_v20 = vor.u32 %v16459_v33, %v14186_v40  ;;  %v16449_v33 = vld [vmem:[%s23911_s18 + $0x340] sm:$0xf0] }
 0x7a1   :  { %7499 = vmatpush.bf16.msrb.mxu2 %v14325_v0  ;;  %v14158_v0 = vld [vmem:[%s23911_s18 + $0x374] sm:$0xf0] }
 0x7a2   :  { %7473 = vmatpush.bf16.msrb.mxu0 %v13877_v63  ;;  %v13736_v63 = vld [vmem:[%s23911_s18 + $0x10] sm:$0xf]  ;;  %v14161_v23 = vor.u32 %v16452_v28, %v14158_v0  ;;  %v13856_v28 = vld [vmem:[%s23911_s18 + $0xf8] sm:$0xf]  ;;  %v16379_v0 = vld [vmem:[%s23911_s18 + $0x110] sm:$0xf0] }
 0x7a3   :  { %7492 = vmatmul.bf16.vlgmr.msrb.gmra.mxu1 %v22150_v34  ;;  %v13737_v41 = vor.u32 %v16350_v39, %v13736_v63  ;;  %v13825_v63 = vor.u32 %v16368_v53, %v13822_v29  ;;  %v16424_v39 = vld [vmem:[%s23911_s18 + $0x27c] sm:$0xf]  ;;  %v16351_v53 = vld [vmem:[%s23911_s18 + $0x30] sm:$0xf0]  ;;  %v14108_v29 = vld [vmem:[%s23911_s18 + $0x2f0] sm:$0xf] }
 0x7a4   :  { %7549 = vmatpush.bf16.msra.mxu1 %v14385_v57  ;;  %7450 = vmatpush.bf16.msrb.mxu3 %v14237_v32  ;;  %v16462_v57 = vld [vmem:[%s23911_s18 + $0x3a8] sm:$0xf0]  ;;  %v13909_v32 = vor.u32 %v16389_v16, %v13906_v56  ;;  %v16417_v16 = vld [vmem:[%s23911_s18 + $0x244] sm:$0xf]  ;;  %v14018_v56 = vld [vmem:[%s23911_s18 + $0x25c] sm:$0xf0] }
 0x7a5   :  { %7500 = vmatpush.bf16.msrb.mxu2 %v14297_v42  ;;  %v14185_v52 = vor.u32 %v16462_v57, %v14184_v8  ;;  %v16445_v42 = vld [vmem:[%s23911_s18 + $0x324] sm:$0xf]  ;;  %v13794_v8 = vld [vmem:[%s23911_s18 + $0x9c] sm:$0xf0] }
 0x7a6   :  { %7474 = vmatpush.bf16.msrb.mxu0 %v13849_v31  ;;  %v16473_v31 = vld [vmem:[%s23911_s18 + $0x404] sm:$0xf]  ;;  %v14133_v55 = vor.u32 %v16445_v42, %v14130_v5  ;;  %v13990_v42 = vld [vmem:[%s23911_s18 + $0x224] sm:$0xf0] }
 0x7a7   :  { %v14245_v48 = vor.u32 %v16473_v31, %v14242_v3  ;;  %v16354_v31 = vld [vmem:[%s23911_s18 + $0x4c] sm:$0xf]  ;;  %v13766_v3 = vld [vmem:[%s23911_s18 + $0x64] sm:$0xf0] }
 0x7a8   :  { %7550 = vmatpush.bf16.msra.mxu1 %v14357_v60  ;;  %7451 = vmatpush.bf16.msrb.mxu3 %v14209_v54  ;;  %v6340_v60 = vld [vmem:[%s23911_s18 + $0x558] sm:$0xf]  ;;  %v13881_v54 = vor.u32 %v16382_v24, %v13878_v9  ;;  %v14021_v24 = vor.u32 %v16417_v16, %v14018_v56  ;;  %v13800_v9 = vld [vmem:[%s23911_s18 + $0x88] sm:$0xf]  ;;  %v14052_v16 = vld [vmem:[%s23911_s18 + $0x280] sm:$0xf] }
 0x7a9   :  { %7501 = vmatpush.bf16.msrb.mxu2 %v14269_v25  ;;  %v6895_v11 = vunpack.c.l.b16 %v6340_v60  ;;  %v16347_v60 = vld [vmem:[%s23911_s18 + $0x14] sm:$0xf]  ;;  %v16428_v56 = vld [vmem:[%s23911_s18 + $0x298] sm:$0xf0] }
 0x7aa   :  { %7475 = vmatpush.bf16.msrb.mxu0 %v13821_v17  ;;  %v16400_v17 = vld [vmem:[%s23911_s18 + $0x1b8] sm:$0xf0] }
 0x7ab   :  { %v13941_v25 = vor.u32 %v16400_v17, %v13940_v43  ;;  %v7070_v26 = vpack.c.b16 %v6895_v11, %v6895_v11  ;;  %v16365_v43 = vld [vmem:[%s23911_s18 + $0xa0] sm:$0xf0]  ;;  %v14164_v17 = vld [vmem:[%s23911_s18 + $0x360] sm:$0xf]  ;;  %v13962_v11 = vld [vmem:[%s23911_s18 + $0x1ec] sm:$0xf0] }
 0x7ac   :  { %7551 = vmatpush.bf16.msra.mxu1 %v14329_v19  ;;  %7452 = vmatpush.bf16.msrb.mxu3 %v14181_v44  ;;  %v16438_v19 = vld [vmem:[%s23911_s18 + $0x2ec] sm:$0xf]  ;;  %v13853_v44 = vor.u32 %v16375_v7, %v13850_v10  ;;  %v13801_v7 = vor.u32 %v16365_v43, %v13800_v9  ;;  %v22783_v10 = vld [vmem:[%s23913_s20 + $0x70] sm:$0xff] }
 0x7ad   :  { %7502 = vmatpush.bf16.msrb.mxu2 %v14241_v1  ;;  %v14105_v21 = vor.u32 %v16438_v19, %v14102_v58  ;;  %v7261_v59 = vsel %vm3479_vm3, %v7070_v26, 0  ;;  %v14165_v19 = vor.u32 %v16456_v2, %v14164_v17  ;;  %v16512_v58 = vld [vmem:[%s23911_s18 + $0x538] sm:$0xf0]  ;;  %v22799_v26 = vld [vmem:[%s23913_s20 + $0x68] sm:$0xff]  ;;  %v22918_v43 = vld [vmem:[%s23913_s20 + $0x30] sm:$0xff] }
 0x7ae   :  { %7476 = vmatpush.bf16.msrb.mxu0 %v13793_v61  ;;  %v13912_v61 = vld [vmem:[%s23911_s18 + $0x168] sm:$0xf]  ;;  %24090 = vst [vmem:[#allocation24_spill] sm:$0xff] %v22918_v43 }
 0x7af   :  { %7453 = vmatmul.bf16.vlgmr.msrb.gmra.mxu3 %v22189_v45  ;;  %v13913_v1 = vor.u32 %v16393_v49, %v13912_v61  ;;  %v16358_v61 = vld [vmem:[%s23911_s18 + $0x68] sm:$0xf0]  ;;  %v14136_v49 = vld [vmem:[%s23911_s18 + $0x328] sm:$0xf] }
 0x7b0   :  { %7552 = vmatpush.bf16.msra.mxu1 %v14301_v38  ;;  %7517 = vmatpush.bf16.msra.mxu3 %v7255_v22  ;;  %v14074_v38 = vld [vmem:[%s23911_s18 + $0x2cc] sm:$0xf0]  ;;  %v16386_v22 = vld [vmem:[%s23911_s18 + $0x148] sm:$0xf0]  ;;  %v14248_v2 = vld [vmem:[%s23911_s18 + $0x408] sm:$0xf] }
 0x7b1   :  { %7503 = vmatpush.bf16.msrb.mxu2 %v14213_v15  ;;  %v14077_v36 = vor.u32 %v16431_v6, %v14074_v38  ;;  %v13744_v6 = vld [vmem:[%s23911_s18 + $0x18] sm:$0xf]  ;;  %v14360_v38 = vld [vmem:[%s23911_s18 + $0x4e8] sm:$0xf] }
 0x7b2   :  { %7477 = vmatpush.bf16.msrb.mxu0 %v13765_v37  ;;  %v13884_v37 = vld [vmem:[%s23911_s18 + $0x130] sm:$0xf] }
 0x7b3   :  { %v13885_v15 = vor.u32 %v16386_v22, %v13884_v37  ;;  %v16442_v37 = vld [vmem:[%s23911_s18 + $0x308] sm:$0xf0]  ;;  %v22824_v22 = vld [vmem:[%s23913_s20 + $0x60] sm:$0xff] }
 0x7b4   :  { %7523 = vmatpush.bf16.msrb.mxu3 %v13937_v51  ;;  %7553 = vmatpush.bf16.msra.mxu1 %v14273_v14  ;;  %v16361_v51 = vld [vmem:[%s23911_s18 + $0x84] sm:$0xf]  ;;  %v14049_v14 = vor.u32 %v16424_v39, %v14046_v27  ;;  %v14332_v39 = vld [vmem:[%s23911_s18 + $0x4b0] sm:$0xf]  ;;  %v16498_v27 = vld [vmem:[%s23911_s18 + $0x4c8] sm:$0xf0] }
 0x7b5   :  { %7504 = vmatpush.bf16.msrb.mxu2 %v14185_v52  ;;  %v13797_v57 = vor.u32 %v16361_v51, %v13794_v8  ;;  %v13769_v52 = vor.u32 %v16354_v31, %v13766_v3  ;;  %v16435_v51 = vld [vmem:[%s23911_s18 + $0x2d0] sm:$0xf0]  ;;  %v22874_v31 = vld [vmem:[%s23913_s20 + $0xf8] sm:$0xff] }
 0x7b6   :  { %7478 = vmatpush.bf16.msrb.mxu0 %v13737_v41  ;;  %v13857_v41 = vor.u32 %v16379_v0, %v13856_v28  ;;  %v22850_v8 = vld [vmem:[%s23913_s20 + $0x50] sm:$0xff]  ;;  %v14333_v28 = vor.u32 %v16498_v27, %v14332_v39  ;;  %v23010_v39 = vld [vmem:[%s23913_s20 + $0x8] sm:$0xff]  ;;  %v23016_v27 = vld [vmem:[%s23913_s20 + $0xb8] sm:$0xff] }
 0x7b7   :  { %24086 = vst [vmem:[#allocation36_spill] sm:$0xff] %v22850_v8 }
 0x7b8   :  { %7524 = vmatpush.bf16.msrb.mxu3 %v13909_v32  ;;  %7554 = vmatpush.bf16.msra.mxu1 %v14245_v48  ;;  %v16410_v32 = vld [vmem:[%s23911_s18 + $0x20c] sm:$0xf]  ;;  %v13738_v48 = vld [vmem:[%s23911_s18 + $0x2c] sm:$0xf0]  ;;  %24095 = vst [vmem:[#allocation37_spill] sm:$0xff] %v23010_v39 }
 0x7b9   :  { %7479 = vmatmul.bf16.vlgmr.msrb.gmra.mxu0 %v22121_v12  ;;  %7569 = vmatpush.bf16.msra.mxu2 %v7258_v46  ;;  %v13993_v4 = vor.u32 %v16410_v32, %v13990_v42  ;;  %v16403_v46 = vld [vmem:[%s23911_s18 + $0x1d4] sm:$0xf]  ;;  %v16484_v32 = vld [vmem:[%s23911_s18 + $0x458] sm:$0xf0]  ;;  %v14024_v42 = vld [vmem:[%s23911_s18 + $0x248] sm:$0xf] }
 0x7ba   :  { %7536 = vmatpush.bf16.msra.mxu0 %v14161_v23  ;;  %7505 = vmatmul.bf16.vlgmr.msrb.gmra.mxu2 %v22189_v45  ;;  %v13828_v23 = vld [vmem:[%s23911_s18 + $0xc0] sm:$0xf]  ;;  %v13965_v40 = vor.u32 %v16403_v46, %v13962_v11  ;;  %v13996_v11 = vld [vmem:[%s23911_s18 + $0x210] sm:$0xf] }
 0x7bb   :  { %v13829_v5 = vor.u32 %v16372_v47, %v13828_v23  ;;  %v22882_v47 = vld [vmem:[%s23913_s20 + $0x40] sm:$0xff] }
 0x7bc   :  { %7525 = vmatpush.bf16.msrb.mxu3 %v13881_v54  ;;  %7555 = vmatpush.bf16.msra.mxu1 %v14217_v50  ;;  %v13772_v54 = vld [vmem:[%s23911_s18 + $0x50] sm:$0xf]  ;;  %v22778_v50 = vld [vmem:[%s23913_s20 + $0x78] sm:$0xff]  ;;  %24088 = vst [vmem:[#allocation20_spill] sm:$0xff] %v22882_v47  ;;  %v22930_v46 = vld [vmem:[%s23913_s20 + $0xe0] sm:$0xff] }
 0x7bd   :  { %7575 = vmatpush.bf16.msrb.mxu2 %v13941_v25  ;;  %v14388_v25 = vld [vmem:[%s23911_s18 + $0x520] sm:$0xf] }
 0x7be   :  { %7537 = vmatpush.bf16.msra.mxu0 %v14133_v55  ;;  %v13741_v55 = vor.u32 %v16347_v60, %v13738_v48  ;;  %v22906_v60 = vld [vmem:[%s23913_s20 + $0x38] sm:$0xff]  ;;  %v22912_v48 = vld [vmem:[%s23913_s20 + $0xe8] sm:$0xff] }
 0x7bf   :  { %14394 = vmatmul.msk.bf16.vlgmr.msra.gmra.mxu3 %vm5510_vm9, %v22094_v35  ;;  %24089 = vst [vmem:[#allocation22_spill] sm:$0xff] %v22906_v60 }
 0x7c0   :  { %7526 = vmatpush.bf16.msrb.mxu3 %v13853_v44  ;;  %7556 = vmatpush.bf16.msra.mxu1 %v14189_v20  ;;  %v13773_v44 = vor.u32 %v16358_v61, %v13772_v54  ;;  %v16505_v20 = vld [vmem:[%s23911_s18 + $0x500] sm:$0xf0]  ;;  %v16414_v54 = vld [vmem:[%s23911_s18 + $0x228] sm:$0xf0] }
 0x7c1   :  { %7576 = vmatpush.bf16.msrb.mxu2 %v13913_v1  ;;  %v14137_v1 = vor.u32 %v16449_v33, %v14136_v49  ;;  %v22956_v61 = vld [vmem:[%s23913_s20 + $0x20] sm:$0xff]  ;;  %v13997_v49 = vor.u32 %v16414_v54, %v13996_v11  ;;  %v14220_v33 = vld [vmem:[%s23911_s18 + $0x3d0] sm:$0xf] }
 0x7c2   :  { %7538 = vmatpush.bf16.msra.mxu0 %v14105_v21  ;;  %v14389_v21 = vor.u32 %v16512_v58, %v14388_v25  ;;  %v22944_v25 = vld [vmem:[%s23913_s20 + $0x28] sm:$0xff]  ;;  %24092 = vst [vmem:[#allocation29_spill] sm:$0xff] %v22956_v61  ;;  %v23106_v11 = vld [vmem:[%s23913_s20 + $0x90] sm:$0xff] }
 0x7c3   :  { %7557 = vmatmul.bf16.vlgmr.msra.gmra.mxu1 %v22189_v45  ;;  %24091 = vst [vmem:[#allocation26_spill] sm:$0xff] %v22944_v25 }
 0x7c4   :  { %7621 = vmatpush.bf16.msrb.mxu1 %v7261_v59  ;;  %7527 = vmatpush.bf16.msrb.mxu3 %v13825_v63  ;;  %v13745_v59 = vor.u32 %v16351_v53, %v13744_v6  ;;  %v14109_v63 = vor.u32 %v16442_v37, %v14108_v29  ;;  %v22980_v6 = vld [vmem:[%s23913_s20 + $0x18] sm:$0xff]  ;;  %v22992_v53 = vld [vmem:[%s23913_s20 + $0x10] sm:$0xff] }
 0x7c5   :  { %7577 = vmatpush.bf16.msrb.mxu2 %v13885_v15  ;;  %v22837_v15 = vld [vmem:[%s23913_s20 + $0x58] sm:$0xff]  ;;  %24093 = vst [vmem:[#allocation32_spill] sm:$0xff] %v22980_v6 }
 0x7c6   :  { %7539 = vmatpush.bf16.msra.mxu0 %v14077_v36  ;;  %v14361_v36 = vor.u32 %v16505_v20, %v14360_v38  ;;  %24085 = vst [vmem:[#allocation16_spill] sm:$0xff] %v22837_v15  ;;  %v22986_v38 = vld [vmem:[%s23913_s20 + $0xc8] sm:$0xff]  ;;  %v14192_v37 = vld [vmem:[%s23911_s18 + $0x398] sm:$0xf] }
 0x7c7   :  { %24094 = vst [vmem:[#allocation34_spill] sm:$0xff] %v22992_v53 }
 0x7c8   :  { %7528 = vmatpush.bf16.msrb.mxu3 %v13797_v57  ;;  %7833 = vmatpush.msra.mxu1 %v22778_v50  ;;  %v16491_v57 = vld [vmem:[%s23911_s18 + $0x490] sm:$0xf0] }
 0x7c9   :  { %7578 = vmatpush.bf16.msrb.mxu2 %v13857_v41  ;;  %v22869_v41 = vld [vmem:[%s23913_s20 + $0x48] sm:$0xff] }
 0x7ca   :  { %7540 = vmatpush.bf16.msra.mxu0 %v14049_v14  ;;  %14395 = vmatmul.msk.bf16.vlgmr.msra.gmra.mxu2 %vm5510_vm9, %v22094_v35  ;;  %v14304_v14 = vld [vmem:[%s23911_s18 + $0x478] sm:$0xf]  ;;  %24087 = vst [vmem:[#allocation18_spill] sm:$0xff] %v22869_v41 }
 0x7cb   :  { %7834 = vmatpush.msra.mxu1 %v22783_v10  ;;  %v14305_v23 = vor.u32 %v16491_v57, %v14304_v14  ;;  %v23036_v14 = vld [vmem:[%s23913_s20 + $0xb0] sm:$0xff]  ;;  %v23042_v57 = vld [vmem:[%s23913_s20 + $0x178] sm:$0xff] }
 0x7cc   :  { %7529 = vmatpush.bf16.msrb.mxu3 %v13769_v52  ;;  %v14276_v52 = vld [vmem:[%s23911_s18 + $0x440] sm:$0xf] }
 0x7cd   :  { %7579 = vmatpush.bf16.msrb.mxu2 %v13829_v5  ;;  %7835 = vmatpush.msra.mxu1 %v22799_v26  ;;  %v16421_v5 = vld [vmem:[%s23911_s18 + $0x260] sm:$0xf0]  ;;  %v14277_v9 = vor.u32 %v16484_v32, %v14276_v52 }
 0x7ce   :  { %7541 = vmatpush.bf16.msra.mxu0 %v14021_v24  ;;  %v14053_v24 = vor.u32 %v16428_v56, %v14052_v16  ;;  %v14025_v17 = vor.u32 %v16421_v5, %v14024_v42  ;;  %v23048_v56 = vld [vmem:[%s23913_s20 + $0xa8] sm:$0xff]  ;;  %v23068_v32 = vld [vmem:[%s23913_s20 + $0xa0] sm:$0xff]  ;;  %v23081_v5 = vld [vmem:[%s23913_s20 + $0x1f0] sm:$0xff] }
 0x7cf   :  { %7836 = vmatpush.msra.mxu1 %v22824_v22  ;;  %v23076_v42 = vld [vmem:[%s23913_s20 + $0x168] sm:$0xff] }
 0x7d0   :  { %7530 = vmatpush.bf16.msrb.mxu3 %v13741_v55 }
 0x7d1   :  { %7580 = vmatpush.bf16.msrb.mxu2 %v13801_v7  ;;  %7837 = vmatpush.msra.mxu1 %v22837_v15  ;;  %v22950_v7 = vld [vmem:[%s23913_s20 + $0xd8] sm:$0xff] }
 0x7d2   :  { %7542 = vmatpush.bf16.msra.mxu0 %v13993_v4  ;;  %v16477_v4 = vld [vmem:[%s23911_s18 + $0x420] sm:$0xf0] }
 0x7d3   :  { %7531 = vmatmul.bf16.vlgmr.msrb.gmra.mxu3 %v22121_v12  ;;  %14396 = vmatmul.msk.bf16.vlgmr.msrb.gmra.mxu1 %vm5510_vm9, %v22094_v35  ;;  %v14080_v35 = vld [vmem:[%s23911_s18 + $0x2b8] sm:$0xf]  ;;  %v14249_v58 = vor.u32 %v16477_v4, %v14248_v2  ;;  %v23095_v2 = vld [vmem:[%s23913_s20 + $0x160] sm:$0xff]  ;;  %v23100_v4 = vld [vmem:[%s23913_s20 + $0x1e8] sm:$0xff] }
 0x7d4   :  { %7588 = vmatpush.bf16.msra.mxu3 %v14165_v19  ;;  %v14081_v0 = vor.u32 %v16435_v51, %v14080_v35  ;;  %7838 = vmatpush.msra.mxu1 %v22850_v8 }
 0x7d5   :  { %7581 = vmatpush.bf16.msrb.mxu2 %v13773_v44  ;;  %v13968_v44 = vld [vmem:[%s23911_s18 + $0x1d8] sm:$0xf] }
 0x7d6   :  { %7543 = vmatpush.bf16.msra.mxu0 %v13965_v40  ;;  %v22877_v3 = vpop.f32.mrf.mxu0  ;;  %7839 = vmatpush.msra.mxu1 %v22869_v41  ;;  %v16470_v40 = vld [vmem:[%s23911_s18 + $0x3e8] sm:$0xf0]  ;;  %v23337_v41 = vld [vmem:[%s23913_s20 + $0x238] sm:$0xff] }
 0x7d7   :  { %v14221_v20 = vor.u32 %v16470_v40, %v14220_v33  ;;  %v23129_v40 = vld [vmem:[%s23913_s20 + $0x88] sm:$0xff]  ;;  %24108 = vst [vmem:[#allocation33_spill] sm:$0xff] %v23337_v41 }
 0x7d8   :  { %7589 = vmatpush.bf16.msra.mxu3 %v14137_v1  ;;  %7840 = vmatpush.msra.mxu1 %v22882_v47  ;;  %v16407_v1 = vld [vmem:[%s23911_s18 + $0x1f0] sm:$0xf0]  ;;  %v23332_v47 = vld [vmem:[%s23913_s20 + $0x180] sm:$0xff] }
 0x7d9   :  { %7544 = vmatmul.bf16.vlgmr.msra.gmra.mxu0 %v22150_v34  ;;  %7582 = vmatpush.bf16.msrb.mxu2 %v13745_v59  ;;  %v13969_v29 = vor.u32 %v16407_v1, %v13968_v44  ;;  %v23004_v59 = vld [vmem:[%s23913_s20 + $0xc0] sm:$0xff]  ;;  %v23136_v1 = vld [vmem:[%s23913_s20 + $0x150] sm:$0xff] }
 0x7da   :  { %7601 = vmatpush.bf16.msrb.mxu0 %v14389_v21  ;;  %7841 = vmatpush.msra.mxu1 %v22906_v60  ;;  %v22968_v21 = vld [vmem:[%s23913_s20 + $0xd0] sm:$0xff] }
 0x7dc   :  { %7590 = vmatpush.bf16.msra.mxu3 %v14109_v63  ;;  %7583 = vmatmul.bf16.vlgmr.msrb.gmra.mxu2 %v22121_v12  ;;  %v22894_v12 = vld [vmem:[%s23913_s20 + $0xf0] sm:$0xff]  ;;  %v22932_v55 = vpop.f32.mrf.mxu1 }
 0x7dd   :  { %7853 = vmatpush.msra.mxu2 %v22874_v31  ;;  %7842 = vmatpush.msra.mxu1 %v22918_v43  ;;  %v23326_v43 = vld [vmem:[%s23913_s20 + $0x100] sm:$0xff] }
 0x7de   :  { %7602 = vmatpush.bf16.msrb.mxu0 %v14361_v36  ;;  %v7313_v19 = vpop.f32.mrf.mxu0  ;;  %v16463_v36 = vld [vmem:[%s23911_s18 + $0x3b0] sm:$0xf0] }
 0x7df   :  { %7854 = vmatpush.msra.mxu2 %v22894_v12  ;;  %7843 = vmatpush.msra.mxu1 %v22944_v25  ;;  %v14193_v51 = vor.u32 %v16463_v36, %v14192_v37  ;;  %v23118_v19 = vld [vmem:[%s23913_s20 + $0x158] sm:$0xff]  ;;  %v23152_v36 = vld [vmem:[%s23913_s20 + $0x148] sm:$0xff] }
 0x7e0   :  { %7591 = vmatpush.bf16.msra.mxu3 %v14081_v0  ;;  %v23030_v0 = vld [vmem:[%s23912_s19] sm:$0x7f] }
 0x7e1   :  { %7855 = vmatpush.msra.mxu2 %v22912_v48  ;;  %7844 = vmatpush.msra.mxu1 %v22956_v61 }
 0x7e2   :  { %7603 = vmatpush.bf16.msrb.mxu0 %v14333_v28  ;;  %v23024_v28 = vld [vmem:[%s23913_s20] sm:$0xff] }
 0x7e3   :  { %7856 = vmatpush.msra.mxu2 %v22930_v46  ;;  %7845 = vmatpush.msra.mxu1 %v22980_v6  ;;  %24096 = vst [vmem:[#allocation8_spill] sm:$0xff] %v23024_v28 }
 0x7e4   :  { %7592 = vmatpush.bf16.msra.mxu3 %v14053_v24  ;;  %v7274_v63 = vpop.f32.mrf.mxu1  ;;  %v23056_v24 = vld [vmem:[%s23913_s20 + $0x170] sm:$0xff] }
 0x7e5   :  { %7857 = vmatpush.msra.mxu2 %v22950_v7  ;;  %7846 = vmatpush.msra.mxu1 %v22992_v53  ;;  %v23157_v63 = vld [vmem:[%s23913_s20 + $0x1d0] sm:$0xff]  ;;  %v23268_v53 = vld [vmem:[%s23913_s20 + $0x258] sm:$0xff] }
 0x7e6   :  { %7604 = vmatpush.bf16.msrb.mxu0 %v14305_v23  ;;  %v23018_v35 = vpop.f32.mrf.mxu0  ;;  %v6343_v23 = vperm.slane %v23030_v0, 0  ;;  %24102 = vst [vmem:[#allocation19_spill] sm:$0xff] %v23268_v53 }
 0x7e7   :  { %7858 = vmatpush.msra.mxu2 %v22968_v21  ;;  %7847 = vmatpush.msra.mxu1 %v23010_v39 }
 0x7e8   :  { %7593 = vmatpush.bf16.msra.mxu3 %v14025_v17  ;;  %v23087_v17 = vld [vmem:[%s23913_s20 + $0x98] sm:$0xff] }
 0x7e9   :  { %7859 = vmatpush.msra.mxu2 %v22986_v38  ;;  %7848 = vmatpush.msra.mxu1 %v23024_v28 }
 0x7ea   :  { %7605 = vmatpush.bf16.msrb.mxu0 %v14277_v9  ;;  %v7285_v16 = vpop.f32.mrf.mxu2 }
 0x7eb   :  { %7860 = vmatpush.msra.mxu2 %v23004_v59  ;;  %7913 = vmatpush.msrb.mxu1 %v23194_v30  ;;  %v23221_v30 = vld [vmem:[%s23913_s20 + $0x128] sm:$0xff] }
 0x7ec   :  { %7594 = vmatpush.bf16.msra.mxu3 %v13997_v49  ;;  %v23063_v52 = vpop.f32.mrf.mxu1 }
 0x7ed   :  { %7861 = vmatpush.msra.mxu2 %v23016_v27 }
 0x7ee   :  { %7606 = vmatpush.bf16.msrb.mxu0 %v14249_v58  ;;  %v7326_v9 = vpop.f32.mrf.mxu0  ;;  %v23123_v58 = vld [vmem:[%s23913_s20 + $0x1d8] sm:$0xff] }
 0x7ef   :  { %7862 = vmatpush.msra.mxu2 %v23036_v14 }
 0x7f0   :  { %7595 = vmatpush.bf16.msra.mxu3 %v13969_v29  ;;  %v23142_v29 = vld [vmem:[%s23913_s20 + $0x80] sm:$0xff] }
 0x7f1   :  { %7863 = vmatpush.msra.mxu2 %v23048_v56 }
 0x7f2   :  { %7607 = vmatpush.bf16.msrb.mxu0 %v14221_v20  ;;  %v7287_v49 = vpop.f32.mrf.mxu2  ;;  %v7298_v33 = vpop.f32.mrf.mxu3 }
 0x7f3   :  { %7596 = vmatmul.bf16.vlgmr.msra.gmra.mxu3 %v22150_v34  ;;  %v23061_v34 = vld [vmem:[%s23913_s20 + $0x1f8] sm:$0xff]  ;;  %7864 = vmatpush.msra.mxu2 %v23068_v32  ;;  %v23187_v49 = vld [vmem:[%s23913_s20 + $0x1c0] sm:$0xff] }
 0x7f4   :  { %7873 = vmatpush.msrb.mxu3 %v23042_v57  ;;  %v7339_v20 = vpop.f32.mrf.mxu1 }
 0x7f5   :  { %7865 = vmatpush.msra.mxu2 %v23087_v17 }
 0x7f6   :  { %7608 = vmatpush.bf16.msrb.mxu0 %v14193_v51  ;;  %7874 = vmatpush.msrb.mxu3 %v23056_v24  ;;  %v23159_v51 = vpop.f32.mrf.mxu0 }
 0x7f7   :  { %7866 = vmatpush.msra.mxu2 %v23106_v11 }
 0x7f8   :  { %7875 = vmatpush.msrb.mxu3 %v23076_v42 }
 0x7f9   :  { %7609 = vmatmul.bf16.vlgmr.msrb.gmra.mxu0 %v22189_v45  ;;  %v7273_v45 = vadd.f32 %v22932_v55, %v6343_v23  ;;  %v23112_v55 = vld [vmem:[%s23913_s20 + $0x1e0] sm:$0xff]  ;;  %7867 = vmatpush.msra.mxu2 %v23129_v40  ;;  %v23174_v23 = vld [vmem:[%s23913_s20 + $0x1c8] sm:$0xff] }
 0x7fa   :  { %7893 = vmatpush.msra.mxu0 %v23061_v34  ;;  %7876 = vmatpush.msrb.mxu3 %v23095_v2  ;;  %v7350_v20 = vpop.f32.mrf.mxu2 }
 0x7fb   :  { %v7286_v54 = vadd.f32 %v7285_v16, %v7273_v45  ;;  %7868 = vmatpush.msra.mxu2 %v23142_v29  ;;  %v23169_v16 = vld [vmem:[%s23913_s20 + $0x140] sm:$0xff]  ;;  %v6344_v45 = vperm.slane %v23030_v0, 1 }
 0x7fc   :  { %7894 = vmatpush.msra.mxu0 %v23081_v5  ;;  %7877 = vmatpush.msrb.mxu3 %v23118_v19  ;;  %v23215_v18 = vpop.f32.mrf.mxu1 }
 0x7fd   :  { %v7299_v44 = vadd.f32 %v7298_v33, %v7286_v54  ;;  %v23182_v54 = vld [vmem:[%s23913_s20 + $0x138] sm:$0xff]  ;;  %v7325_v13 = vadd.f32 %v23018_v35, %v6344_v45  ;;  %v23233_v35 = vld [vmem:[%s23913_s20 + $0x268] sm:$0xff] }
 0x7fe   :  { %7895 = vmatpush.msra.mxu0 %v23100_v4  ;;  %7878 = vmatpush.msrb.mxu3 %v23136_v1  ;;  %v7378_v39 = vpop.f32.mrf.mxu0  ;;  %24100 = vst [vmem:[#allocation15_spill] sm:$0xff] %v23233_v35 }
 0x7ff   :  { %v23146_v37 = vadd.f32 %v22877_v3, %v7299_v44  ;;  %v7300_v44 = vpop.f32.mrf.mxu3  ;;  %v7338_v45 = vadd.f32 %v23063_v52, %v7325_v13  ;;  %v23245_v39 = vld [vmem:[%s23913_s20 + $0x1a8] sm:$0xff]  ;;  %v23252_v13 = vld [vmem:[%s23913_s20 + $0x260] sm:$0xff] }
 0x800   :  { %7896 = vmatpush.msra.mxu0 %v23112_v55  ;;  %7879 = vmatpush.msrb.mxu3 %v23152_v36  ;;  %v23212_v44 = vld [vmem:[%s23913_s20 + $0x270] sm:$0xff]  ;;  %24101 = vst [vmem:[#allocation17_spill] sm:$0xff] %v23252_v13  ;;  %v23257_v52 = vld [vmem:[%s23913_s20 + $0x1a0] sm:$0xff] }
 0x801   :  { %24097 = vst [vmem:[#allocation9_spill] sm:$0xff] %v23146_v37  ;;  %v7627_v3 = vsel %vm2941_vm1, %v23146_v37, 0.0  ;;  %7914 = vmatpush.msrb.mxu1 %v23212_v44  ;;  %v23226_v37 = vld [vmem:[%s23913_s20 + $0x1b0] sm:$0xff] }
 0x802   :  { %7897 = vmatpush.msra.mxu0 %v23123_v58  ;;  %v7628_v9 = vrot.slane %v7627_v3, 4  ;;  %7880 = vmatpush.msrb.mxu3 %v23169_v16  ;;  %24099 = vst [vmem:[#allocation13_spill] sm:$0xff] %v23212_v44  ;;  %v23240_v44 = vld [vmem:[%s23913_s20 + $0x120] sm:$0xff]  ;;  %v7352_v6 = vpop.f32.mrf.mxu2 }
 0x803   :  { %7915 = vmatpush.msrb.mxu1 %v23233_v35  ;;  %v23263_v35 = vld [vmem:[%s23913_s20 + $0x118] sm:$0xff]  ;;  %v23288_v6 = vld [vmem:[%s23913_s20 + $0x250] sm:$0xff] }
 0x804   :  { %7898 = vmatpush.msra.mxu0 %v23157_v63  ;;  %v7629_v33 = vadd.f32 %v7628_v9, %v7627_v3  ;;  %v23205_v3 = vld [vmem:[%s23913_s20 + $0x1b8] sm:$0xff]  ;;  %7881 = vmatpush.msrb.mxu3 %v23182_v54  ;;  %24103 = vst [vmem:[#allocation21_spill] sm:$0xff] %v23288_v6 }
 0x805   :  { %7916 = vmatpush.msrb.mxu1 %v23252_v13  ;;  %v23283_v13 = vld [vmem:[%s23913_s20 + $0x110] sm:$0xff] }
 0x806   :  { %7899 = vmatpush.msra.mxu0 %v23174_v23  ;;  %v7630_v9 = vrot.slane %v7629_v33, 2  ;;  %7882 = vmatpush.msrb.mxu3 %v23200_v62 }
 0x807   :  { %v7363_v61 = vpop.f32.mrf.mxu3  ;;  %7917 = vmatpush.msrb.mxu1 %v23268_v53 }
 0x808   :  { %7900 = vmatpush.msra.mxu0 %v23187_v49  ;;  %v7631_v28 = vadd.f32 %v7630_v9, %v7629_v33  ;;  %7883 = vmatpush.msrb.mxu3 %v23221_v30  ;;  %v7351_v9 = vadd.f32 %v7350_v20, %v7338_v45  ;;  %v23275_v20 = vld [vmem:[%s23913_s20 + $0x198] sm:$0xff] }
 0x809   :  { %7918 = vmatpush.msrb.mxu1 %v23288_v6  ;;  %v23319_v6 = vld [vmem:[%s23913_s20 + $0x240] sm:$0xff] }
 0x80a   :  { %7901 = vmatpush.msra.mxu0 %v23205_v3  ;;  %v7632_v33 = vrot.slane %v7631_v28, 1  ;;  %7884 = vmatpush.msrb.mxu3 %v23240_v44  ;;  %v23277_v45 = vadd.f32 %v7363_v61, %v7351_v9  ;;  %v23294_v61 = vld [vmem:[%s23913_s20 + $0x190] sm:$0xff]  ;;  %v23303_v9 = vld [vmem:[%s23913_s20 + $0x108] sm:$0xff]  ;;  %24107 = vst [vmem:[#allocation30_spill] sm:$0xff] %v23319_v6  ;;  %v7415_v15 = vpop.f32.mrf.mxu2 }
 0x80b   :  { %24104 = vst [vmem:[#allocation23_spill] sm:$0xff] %v23294_v61 }
 0x80c   :  { %7902 = vmatpush.msra.mxu0 %v23226_v37  ;;  %v7633_v25 = vadd.f32 %v7632_v33, %v7631_v28  ;;  %7885 = vmatpush.msrb.mxu3 %v23263_v35  ;;  %v7634_v28 = vsel %vm2941_vm1, %v23277_v45, 0.0  ;;  %v7404_v33 = vpop.f32.mrf.mxu1 }
 0x80d   :  { %v7635_v53 = vrot.slane %v7634_v28, 4  ;;  %v23314_v33 = vld [vmem:[%s23913_s20 + $0x188] sm:$0xff] }
 0x80e   :  { %7903 = vmatpush.msra.mxu0 %v23245_v39  ;;  %7849 = vmatmul.f32.vlgmr.msra.gmra.mxu1 %v7633_v25  ;;  %v23308_v25 = vld [vmem:[%s23913_s20 + $0x248] sm:$0xff]  ;;  %24106 = vst [vmem:[#allocation27_spill] sm:$0xff] %v23314_v33 }
 0x80f   :  { %24105 = vst [vmem:[#allocation25_spill] sm:$0xff] %v23308_v25  ;;  %7886 = vmatpush.msrb.mxu3 %v23283_v13  ;;  %7919 = vmatpush.msrb.mxu1 %v23308_v25  ;;  %v7636_v60 = vadd.f32 %v7635_v53, %v7634_v28  ;;  %v7365_v8 = vpop.f32.mrf.mxu3  ;;  %v23345_v53 = vld [vmem:[%s23913_s20 + $0x230] sm:$0xff] }
 0x810   :  { %7904 = vmatpush.msra.mxu0 %v23257_v52  ;;  %v6345_v8 = vperm.slane %v23030_v0, 2 }
 0x811   :  { %7887 = vmatpush.msrb.mxu3 %v23303_v9  ;;  %7920 = vmatpush.msrb.mxu1 %v23319_v6  ;;  %v7637_v25 = vrot.slane %v7636_v60, 2  ;;  %v23353_v6 = vld [vmem:[%s23913_s20 + $0x228] sm:$0xff] }
 0x812   :  { %7905 = vmatpush.msra.mxu0 %v23275_v20 }
 0x813   :  { %7888 = vmatpush.msrb.mxu3 %v23326_v43  ;;  %7921 = vmatpush.msrb.mxu1 %v23337_v41  ;;  %v7638_v28 = vadd.f32 %v7637_v25, %v7636_v60  ;;  %v23370_v60 = vld [vmem:[%s23913_s20 + $0x2f8] sm:$0xff]  ;;  %v7377_v25 = vadd.f32 %v23159_v51, %v6345_v8 }
 0x814   :  { %7906 = vmatpush.msra.mxu0 %v23294_v61  ;;  %7933 = vmatpush.msrb.mxu2 %v23370_v60 }
 0x815   :  { %7922 = vmatpush.msrb.mxu1 %v23345_v53  ;;  %v7639_v61 = vrot.slane %v7638_v28, 1 }
 0x816   :  { %7907 = vmatpush.msra.mxu0 %v23314_v33  ;;  %v23356_v33 = vpop.f32.mrf.mxu1  ;;  %v23388_v8 = vpop.f32.mrf.mxu0 }
 0x817   :  { %7923 = vmatpush.msrb.mxu1 %v23353_v6  ;;  %v7640_v41 = vadd.f32 %v7639_v61, %v7638_v28  ;;  %v7417_v61 = vpop.f32.mrf.mxu2  ;;  %v23384_v28 = vld [vmem:[%s23913_s20 + $0x2f0] sm:$0xff] }
 0x818   :  { %7908 = vmatpush.msra.mxu0 %v23332_v47  ;;  %7934 = vmatpush.msrb.mxu2 %v23384_v28  ;;  %v23413_v61 = vld [vmem:[%s23913_s20 + $0x2e0] sm:$0xff] }
 0x819   :  { %7869 = vmatmul.f32.vlgmr.msra.gmra.mxu2 %v7640_v41  ;;  %v23394_v41 = vld [vmem:[%s23913_s20 + $0x210] sm:$0xff] }
 0x81a   :  { %7997 = vmatpush.msrb.mxu0 %v22874_v31  ;;  %v23365_v31 = vld [vmem:[%s23913_s20 + $0x220] sm:$0xff]  ;;  %24110 = vst [vmem:[#allocation35_spill] sm:$0xff] %v23394_v41 }
 0x81b   :  { %7924 = vmatpush.msrb.mxu1 %v23365_v31 }
 0x81c   :  { %7998 = vmatpush.msrb.mxu0 %v22894_v12  ;;  %v7389_v12 = vpop.f32.mrf.mxu3 }
 0x81d   :  { %v7390_v51 = vadd.f32 %v7389_v12, %v7377_v25 }
 0x81e   :  { %7999 = vmatpush.msrb.mxu0 %v22912_v48  ;;  %v23379_v48 = vld [vmem:[%s23913_s20 + $0x218] sm:$0xff]  ;;  %v7469_v12 = vpop.f32.mrf.mxu1 }
 0x81f   :  { %24109 = vst [vmem:[#allocation12_spill] sm:$0xff] %v23379_v48  ;;  %7925 = vmatpush.msrb.mxu1 %v23379_v48  ;;  %v7403_v25 = vadd.f32 %v23215_v18, %v7390_v51  ;;  %v23423_v18 = vld [vmem:[%s23913_s20 + $0x200] sm:$0xff]  ;;  %v7441_v12 = vpop.f32.mrf.mxu2 }
 0x820   :  { %8000 = vmatpush.msrb.mxu0 %v22930_v46  ;;  %v23399_v46 = vld [vmem:[%s23913_s20 + $0x2e8] sm:$0xff] }
 0x821   :  { %7926 = vmatpush.msrb.mxu1 %v23394_v41  ;;  %7935 = vmatpush.msrb.mxu2 %v23399_v46  ;;  %v23415_v48 = vadd.f32 %v7415_v15, %v7403_v25  ;;  %v7430_v41 = vpop.f32.mrf.mxu0 }
 0x822   :  { %8001 = vmatpush.msrb.mxu0 %v22950_v7  ;;  %v23408_v7 = vld [vmem:[%s23913_s20 + $0x208] sm:$0xff]  ;;  %v23465_v41 = vld [vmem:[%s23913_s20 + $0x2b8] sm:$0xff] }
 0x823   :  { %24111 = vst [vmem:[#allocation5_spill] sm:$0xff] %v23408_v7  ;;  %7927 = vmatpush.msrb.mxu1 %v23408_v7  ;;  %7936 = vmatpush.msrb.mxu2 %v23413_v61  ;;  %v7641_v15 = vsel %vm2941_vm1, %v23415_v48, 0.0 }
 0x824   :  { %8002 = vmatpush.msrb.mxu0 %v22968_v21  ;;  %v23428_v21 = vld [vmem:[%s23913_s20 + $0x2d8] sm:$0xff]  ;;  %v7642_v51 = vrot.slane %v7641_v15, 4  ;;  %v7391_v25 = vpop.f32.mrf.mxu3 }
 0x825   :  { %7928 = vmatpush.msrb.mxu1 %v23423_v18  ;;  %7937 = vmatpush.msrb.mxu2 %v23428_v21 }
 0x826   :  { %8003 = vmatpush.msrb.mxu0 %v22986_v38  ;;  %v23439_v38 = vld [vmem:[%s23913_s20 + $0x2d0] sm:$0xff]  ;;  %v7643_v7 = vadd.f32 %v7642_v51, %v7641_v15 }
 0x827   :  { %8017 = vmatpush.msra.mxu1 %v23042_v57  ;;  %7938 = vmatpush.msrb.mxu2 %v23439_v38  ;;  %v23449_v57 = vpop.f32.mrf.mxu1 }
 0x828   :  { %8004 = vmatpush.msrb.mxu0 %v23004_v59  ;;  %v23447_v59 = vld [vmem:[%s23913_s20 + $0x2c8] sm:$0xff]  ;;  %v7644_v25 = vrot.slane %v7643_v7, 2 }
 0x829   :  { %8018 = vmatpush.msra.mxu1 %v23056_v24  ;;  %7939 = vmatpush.msrb.mxu2 %v23447_v59 }
 0x82a   :  { %8005 = vmatpush.msrb.mxu0 %v23016_v27  ;;  %v23457_v27 = vld [vmem:[%s23913_s20 + $0x2c0] sm:$0xff]  ;;  %v7645_v24 = vadd.f32 %v7644_v25, %v7643_v7  ;;  %v23481_v7 = vld [vmem:[%s23913_s20 + $0x2a8] sm:$0xff] }
 0x82b   :  { %8019 = vmatpush.msra.mxu1 %v23076_v42  ;;  %7940 = vmatpush.msrb.mxu2 %v23457_v27  ;;  %v23473_v42 = vld [vmem:[%s23913_s20 + $0x2b0] sm:$0xff] }
 0x82c   :  { %8006 = vmatpush.msrb.mxu0 %v23036_v14  ;;  %v7646_v14 = vrot.slane %v7645_v24, 1 }
 0x82d   :  { %8020 = vmatpush.msra.mxu1 %v23095_v2  ;;  %7941 = vmatpush.msrb.mxu2 %v23465_v41 }
 0x82e   :  { %8007 = vmatpush.msrb.mxu0 %v23048_v56  ;;  %v7443_v56 = vpop.f32.mrf.mxu2  ;;  %v7647_v2 = vadd.f32 %v7646_v14, %v7645_v24 }
 0x82f   :  { %8021 = vmatpush.msra.mxu1 %v23118_v19  ;;  %7942 = vmatpush.msrb.mxu2 %v23473_v42  ;;  %v23488_v19 = vld [vmem:[%s23913_s20 + $0x2a0] sm:$0xff] }
 0x830   :  { %8008 = vmatpush.msrb.mxu0 %v23068_v32  ;;  %v7495_v32 = vpop.f32.mrf.mxu1  ;;  %7889 = vmatmul.f32.vlgmr.msrb.gmra.mxu3 %v7647_v2 }
 0x831   :  { %8022 = vmatpush.msra.mxu1 %v23136_v1  ;;  %7943 = vmatpush.msrb.mxu2 %v23481_v7  ;;  %v6346_v1 = vperm.slane %v23030_v0, 3 }
 0x832   :  { %8009 = vmatpush.msrb.mxu0 %v23087_v17  ;;  %v23496_v17 = vld [vmem:[%s23913_s20 + $0x298] sm:$0xff]  ;;  %v7454_v15 = vpop.f32.mrf.mxu3 }
 0x833   :  { %8023 = vmatpush.msra.mxu1 %v23152_v36  ;;  %7944 = vmatpush.msrb.mxu2 %v23488_v19  ;;  %v7677_v36 = vmul.f32 %v23277_v45, %v23277_v45 }
 0x834   :  { %8010 = vmatpush.msrb.mxu0 %v23106_v11  ;;  %v23505_v11 = vld [vmem:[%s23913_s20 + $0x290] sm:$0xff] }
 0x835   :  { %8024 = vmatpush.msra.mxu1 %v23169_v16  ;;  %7945 = vmatpush.msrb.mxu2 %v23496_v17  ;;  %v7429_v16 = vadd.f32 %v23388_v8, %v6346_v1  ;;  %v7690_v8 = vsel %vm2941_vm1, %v7677_v36, 0.0 }
 0x836   :  { %8011 = vmatpush.msrb.mxu0 %v23129_v40  ;;  %v23512_v40 = vld [vmem:[%s23913_s20 + $0x288] sm:$0xff]  ;;  %v7480_v51 = vpop.f32.mrf.mxu0 }
 0x837   :  { %8025 = vmatpush.msra.mxu1 %v23182_v54  ;;  %7946 = vmatpush.msrb.mxu2 %v23505_v11  ;;  %v7442_v54 = vadd.f32 %v7441_v12, %v7429_v16  ;;  %v7691_v12 = vrot.slane %v7690_v8, 4 }
 0x838   :  { %8012 = vmatpush.msrb.mxu0 %v23142_v29  ;;  %v23522_v29 = vld [vmem:[%s23913_s20 + $0x280] sm:$0xff] }
 0x839   :  { %8026 = vmatpush.msra.mxu1 %v23200_v62  ;;  %7947 = vmatpush.msrb.mxu2 %v23512_v40  ;;  %v7455_v25 = vadd.f32 %v7454_v15, %v7442_v54 }
 0x83b   :  { %8027 = vmatpush.msra.mxu1 %v23221_v30  ;;  %7948 = vmatpush.msrb.mxu2 %v23522_v29  ;;  %v23531_v62 = vadd.f32 %v23356_v33, %v7455_v25  ;;  %v7456_v33 = vpop.f32.mrf.mxu3 }
 0x83c   :  { %v24115_v33 = vld [vmem:[#allocation36_spill] sm:$0xff] }
 0x83d   :  { %8037 = vmatpush.msra.mxu2 %v23061_v34  ;;  %8028 = vmatpush.msra.mxu1 %v23240_v44  ;;  %v7648_v30 = vsel %vm2941_vm1, %v23531_v62, 0.0  ;;  %v6347_v34 = vperm.slane %v23030_v0, 4  ;;  %v7506_v14 = vpop.f32.mrf.mxu2 }
 0x83e   :  { %v7649_v24 = vrot.slane %v7648_v30, 4 }
 0x83f   :  { %8038 = vmatpush.msra.mxu2 %v23081_v5  ;;  %8029 = vmatpush.msra.mxu1 %v23263_v35  ;;  %v7692_v5 = vadd.f32 %v7691_v12, %v7690_v8  ;;  %v7481_v35 = vadd.f32 %v7480_v51, %v6347_v34 }
 0x840   :  { %v7650_v44 = vadd.f32 %v7649_v24, %v7648_v30  ;;  %v23546_v2 = vpop.f32.mrf.mxu1 }
 0x841   :  { %8039 = vmatpush.msra.mxu2 %v23100_v4  ;;  %8030 = vmatpush.msra.mxu1 %v23283_v13  ;;  %v7482_v4 = vpop.f32.mrf.mxu0  ;;  %v7678_v13 = vmul.f32 %v23415_v48, %v23415_v48  ;;  %v7494_v32 = vadd.f32 %v23449_v57, %v7481_v35  ;;  %v7679_v35 = vmul.f32 %v23531_v62, %v23531_v62 }
 0x842   :  { %v7651_v56 = vrot.slane %v7650_v44, 2 }
 0x843   :  { %8040 = vmatpush.msra.mxu2 %v23112_v55  ;;  %8031 = vmatpush.msra.mxu1 %v23303_v9  ;;  %v7693_v55 = vrot.slane %v7692_v5, 2  ;;  %v7519_v54 = vpop.f32.mrf.mxu3 }
 0x844   :  { %v7652_v9 = vadd.f32 %v7651_v56, %v7650_v44  ;;  %v24117_v56 = vld [vmem:[#allocation20_spill] sm:$0xff] }
 0x845   :  { %8041 = vmatpush.msra.mxu2 %v23123_v58  ;;  %8032 = vmatpush.msra.mxu1 %v23326_v43  ;;  %v7829_v43 = vld [vmem:[%s23913_s20 + $0x308] sm:$0xff]  ;;  %v7697_v58 = vsel %vm2941_vm1, %v7678_v13, 0.0  ;;  %v7694_v36 = vadd.f32 %v7693_v55, %v7692_v5  ;;  %v7508_v16 = vpop.f32.mrf.mxu2 }
 0x846   :  { %v7653_v1 = vrot.slane %v7652_v9, 1  ;;  %7967 = vmatpush.msra.mxu3 %v7829_v43  ;;  %v7698_v57 = vrot.slane %v7697_v58, 4 }
 0x847   :  { %8042 = vmatpush.msra.mxu2 %v23157_v63  ;;  %v7507_v63 = vadd.f32 %v7506_v14, %v7494_v32  ;;  %v7695_v25 = vrot.slane %v7694_v36, 1  ;;  %v24116_v14 = vld [vmem:[#allocation18_spill] sm:$0xff] }
 0x848   :  { %v7654_v15 = vadd.f32 %v7653_v1, %v7652_v9  ;;  %v7560_v8 = vpop.f32.mrf.mxu1 }
 0x849   :  { %8043 = vmatpush.msra.mxu2 %v23174_v23  ;;  %v23556_v23 = vadd.f32 %v7519_v54, %v7507_v63  ;;  %v24121_v54 = vld [vmem:[#allocation29_spill] sm:$0xff] }
 0x84a   :  { %7909 = vmatmul.f32.vlgmr.msra.gmra.mxu0 %v7654_v15 }
 0x84b   :  { %8044 = vmatpush.msra.mxu2 %v23187_v49  ;;  %v7828_v49 = vld [vmem:[%s23913_s20 + $0x300] sm:$0xff]  ;;  %v7655_v51 = vsel %vm2941_vm1, %v23556_v23, 0.0  ;;  %8077 = vmatpush.msra.mxu0 %v23370_v60  ;;  %v7521_v60 = vpop.f32.mrf.mxu3 }
 0x84c   :  { %7968 = vmatpush.msra.mxu3 %v7828_v49  ;;  %v7656_v12 = vrot.slane %v7655_v51, 4 }
 0x84d   :  { %8045 = vmatpush.msra.mxu2 %v23205_v3  ;;  %8078 = vmatpush.msra.mxu0 %v23384_v28  ;;  %v7699_v3 = vadd.f32 %v7698_v57, %v7697_v58  ;;  %v7571_v24 = vpop.f32.mrf.mxu2 }
 0x84e   :  { %7977 = vmatpush.msrb.mxu3 %v22778_v50  ;;  %v7657_v30 = vadd.f32 %v7656_v12, %v7655_v51  ;;  %v24122_v51 = vld [vmem:[#allocation32_spill] sm:$0xff]  ;;  %v24123_v12 = vld [vmem:[#allocation34_spill] sm:$0xff] }
 0x84f   :  { %8046 = vmatpush.msra.mxu2 %v23226_v37  ;;  %8079 = vmatpush.msra.mxu0 %v23399_v46  ;;  %v7696_v37 = vadd.f32 %v7695_v25, %v7694_v36  ;;  %v7700_v50 = vrot.slane %v7699_v3, 2  ;;  %v24113_v46 = vld [vmem:[#allocation16_spill] sm:$0xff] }
 0x850   :  { %7978 = vmatpush.msrb.mxu3 %v22783_v10  ;;  %v7658_v34 = vrot.slane %v7657_v30, 2  ;;  %v23575_v10 = vpop.f32.mrf.mxu1 }
 0x851   :  { %8047 = vmatpush.msra.mxu2 %v23245_v39  ;;  %8080 = vmatpush.msra.mxu0 %v23413_v61  ;;  %v7701_v44 = vadd.f32 %v7700_v50, %v7699_v3 }
 0x852   :  { %7979 = vmatpush.msrb.mxu3 %v22799_v26  ;;  %v7659_v39 = vadd.f32 %v7658_v34, %v7657_v30  ;;  %8013 = vmatmul.f32.vlgmr.msrb.gmra.mxu0 %v7696_v37  ;;  %v6348_v26 = vperm.slane %v23030_v0, 5  ;;  %v24124_v34 = vld [vmem:[#allocation37_spill] sm:$0xff]  ;;  %v24125_v37 = vld [vmem:[#allocation8_spill] sm:$0xff] }
 0x853   :  { %8048 = vmatpush.msra.mxu2 %v23257_v52  ;;  %8081 = vmatpush.msra.mxu0 %v23428_v21  ;;  %v24112_v52 = vld [vmem:[#allocation23_spill] sm:$0xff] }
 0x854   :  { %7980 = vmatpush.msrb.mxu3 %v22824_v22  ;;  %v7660_v28 = vrot.slane %v7659_v39, 1 }
 0x855   :  { %8049 = vmatpush.msra.mxu2 %v23275_v20  ;;  %8082 = vmatpush.msra.mxu0 %v23439_v38  ;;  %v24114_v20 = vld [vmem:[#allocation27_spill] sm:$0xff]  ;;  %v7573_v21 = vpop.f32.mrf.mxu2  ;;  %v7702_v38 = vrot.slane %v7701_v44, 1 }
 0x856   :  { %7981 = vmatpush.msrb.mxu3 %v24113_v46  ;;  %v7545_v5 = vpop.f32.mrf.mxu0  ;;  %v7661_v61 = vadd.f32 %v7660_v28, %v7659_v39  ;;  %v7532_v22 = vpop.f32.mrf.mxu3  ;;  %v6349_v28 = vperm.slane %v23030_v0, 6 }
 0x857   :  { %8050 = vmatpush.msra.mxu2 %v24112_v52  ;;  %8083 = vmatpush.msra.mxu0 %v23447_v59  ;;  %v7533_v4 = vadd.f32 %v7532_v22, %v6348_v26  ;;  %v7704_v59 = vsel %vm2941_vm1, %v7679_v35, 0.0  ;;  %v7703_v1 = vadd.f32 %v7702_v38, %v7701_v44 }
 0x858   :  { %7982 = vmatpush.msrb.mxu3 %v24115_v33  ;;  %7929 = vmatmul.f32.vlgmr.msrb.gmra.mxu1 %v7661_v61  ;;  %v7625_v55 = vpop.f32.mrf.mxu1  ;;  %v7705_v58 = vrot.slane %v7704_v59, 4 }
 0x859   :  { %8051 = vmatpush.msra.mxu2 %v24114_v20  ;;  %8084 = vmatpush.msra.mxu0 %v23457_v27  ;;  %v7546_v13 = vadd.f32 %v7545_v5, %v7533_v4  ;;  %v24119_v27 = vld [vmem:[#allocation24_spill] sm:$0xff]  ;;  %v24126_v5 = vld [vmem:[#allocation9_spill] sm:$0xff] }
 0x85a   :  { %7983 = vmatpush.msrb.mxu3 %v24116_v14  ;;  %8111 = vmatpush.msrb.mxu1 %v7829_v43  ;;  %v7676_v26 = vmul.f32 %v24126_v5, %v24126_v5 }
 0x85b   :  { %8052 = vmatpush.msra.mxu2 %v23332_v47  ;;  %8085 = vmatpush.msra.mxu0 %v23465_v41  ;;  %v24118_v47 = vld [vmem:[#allocation22_spill] sm:$0xff]  ;;  %v7559_v9 = vadd.f32 %v23546_v2, %v7546_v13 }
 0x85c   :  { %7984 = vmatpush.msrb.mxu3 %v24117_v56  ;;  %8112 = vmatpush.msrb.mxu1 %v7828_v49  ;;  %v24120_v41 = vld [vmem:[#allocation26_spill] sm:$0xff]  ;;  %v7683_v33 = vsel %vm2941_vm1, %v7676_v26, 0.0 }
 0x85d   :  { %8086 = vmatpush.msra.mxu0 %v23473_v42  ;;  %v23597_v43 = vadd.f32 %v7571_v24, %v7559_v9  ;;  %v7684_v35 = vrot.slane %v7683_v33, 4 }
 0x85e   :  { %7985 = vmatpush.msrb.mxu3 %v24118_v47  ;;  %v7547_v32 = vpop.f32.mrf.mxu0  ;;  %v7534_v63 = vpop.f32.mrf.mxu3 }
 0x85f   :  { %8087 = vmatpush.msra.mxu0 %v23481_v7  ;;  %v7662_v36 = vsel %vm2941_vm1, %v23597_v43, 0.0  ;;  %v7681_v2 = vmul.f32 %v23597_v43, %v23597_v43  ;;  %v7584_v16 = vpop.f32.mrf.mxu2  ;;  %v7706_v7 = vadd.f32 %v7705_v58, %v7704_v59  ;;  %v7685_v55 = vadd.f32 %v7684_v35, %v7683_v33 }
 0x860   :  { %7986 = vmatpush.msrb.mxu3 %v24119_v27  ;;  %8033 = vmatmul.f32.vlgmr.msra.gmra.mxu1 %v7703_v1  ;;  %v7663_v42 = vrot.slane %v7662_v36, 4  ;;  %v7585_v20 = vadd.f32 %v7584_v16, %v6349_v28 }
 0x861   :  { %8088 = vmatpush.msra.mxu0 %v23488_v19  ;;  %v7718_v15 = vsel %vm2941_vm1, %v7681_v2, 0.0  ;;  %v7707_v19 = vrot.slane %v7706_v7, 2  ;;  %v7686_v1 = vrot.slane %v7685_v55, 2 }
 0x862   :  { %7987 = vmatpush.msrb.mxu3 %v24120_v41  ;;  %v7664_v49 = vadd.f32 %v7663_v42, %v7662_v36  ;;  %v7719_v57 = vrot.slane %v7718_v15, 4  ;;  %v24127_v42 = vld [vmem:[#allocation11_spill] sm:$0xff] }
 0x863   :  { %8089 = vmatpush.msra.mxu0 %v23496_v17  ;;  %v7708_v50 = vadd.f32 %v7707_v19, %v7706_v7  ;;  %v7687_v41 = vadd.f32 %v7686_v1, %v7685_v55  ;;  %v24128_v7 = vld [vmem:[#allocation13_spill] sm:$0xff]  ;;  %v8155_v1 = vld.sshfl [vmem:[#allocation1 + $0x18] sm:$0xff pattern:$0x75316420] }
 0x864   :  { %7988 = vmatpush.msrb.mxu3 %v24121_v54  ;;  %v7665_v8 = vrot.slane %v7664_v49, 2  ;;  %v7720_v25 = vadd.f32 %v7719_v57, %v7718_v15  ;;  %v7680_v15 = vmul.f32 %v23556_v23, %v23556_v23  ;;  %v24132_v19 = vld [vmem:[#allocation21_spill] sm:$0xff] }
 0x865   :  { %8090 = vmatpush.msra.mxu0 %v23505_v11  ;;  %v7688_v54 = vrot.slane %v7687_v41, 1 }
 0x866   :  { %7989 = vmatpush.msrb.mxu3 %v24122_v51  ;;  %v7666_v3 = vadd.f32 %v7665_v8, %v7664_v49  ;;  %v7721_v30 = vrot.slane %v7720_v25, 2  ;;  %v24129_v49 = vld [vmem:[#allocation15_spill] sm:$0xff]  ;;  %v7711_v51 = vsel %vm2941_vm1, %v7680_v15, 0.0  ;;  %v24130_v8 = vld [vmem:[#allocation17_spill] sm:$0xff] }
 0x867   :  { %8091 = vmatpush.msra.mxu0 %v23512_v40  ;;  %v7586_v60 = vpop.f32.mrf.mxu2  ;;  %v7709_v40 = vrot.slane %v7708_v50, 1  ;;  %v7689_v57 = vadd.f32 %v7688_v54, %v7687_v41  ;;  %v8154_v41 = vld.sshfl [vmem:[#allocation1 + $0x10] sm:$0xff pattern:$0x75316420] }
 0x868   :  { %7990 = vmatpush.msrb.mxu3 %v24123_v12  ;;  %v7667_v17 = vrot.slane %v7666_v3, 1  ;;  %v7722_v24 = vadd.f32 %v7721_v30, %v7720_v25  ;;  %v24131_v25 = vld [vmem:[#allocation19_spill] sm:$0xff]  ;;  %v7712_v12 = vrot.slane %v7711_v51, 4  ;;  %v24135_v60 = vld [vmem:[#allocation33_spill] sm:$0xff] }
 0x869   :  { %8092 = vmatpush.msra.mxu0 %v23522_v29  ;;  %v7710_v61 = vadd.f32 %v7709_v40, %v7708_v50 }
 0x86a   :  { %7991 = vmatpush.msrb.mxu3 %v24124_v34  ;;  %v7668_v11 = vadd.f32 %v7667_v17, %v7666_v3  ;;  %v7723_v39 = vrot.slane %v7722_v24, 1  ;;  %v24133_v3 = vld [vmem:[#allocation25_spill] sm:$0xff]  ;;  %v7713_v30 = vadd.f32 %v7712_v12, %v7711_v51  ;;  %v24134_v34 = vld [vmem:[#allocation30_spill] sm:$0xff] }
 0x86b   :  { %v24142_v12 = vld [vmem:[#allocation10_spill] sm:$0xff] }
 0x86c   :  { %7992 = vmatpush.msrb.mxu3 %v24125_v37  ;;  %7949 = vmatmul.f32.vlgmr.msrb.gmra.mxu2 %v7668_v11  ;;  %v7724_v52 = vadd.f32 %v7723_v39, %v7722_v24  ;;  %v7714_v17 = vrot.slane %v7713_v30, 2  ;;  %v24136_v37 = vld [vmem:[#allocation12_spill] sm:$0xff]  ;;  %v24137_v11 = vld [vmem:[#allocation35_spill] sm:$0xff]  ;;  %v24138_v39 = vld [vmem:[#allocation5_spill] sm:$0xff] }
 0x86e   :  { %8093 = vmatmul.f32.vlgmr.msra.gmra.mxu0 %v7724_v52  ;;  %v7715_v24 = vadd.f32 %v7714_v17, %v7713_v30  ;;  %v8121_v17 = vld [vmem:[%s23915_s22] sm:$0x1] }
 0x870   :  { %v7716_v50 = vrot.slane %v7715_v24, 1 }
 0x872   :  { %v7717_v52 = vadd.f32 %v7716_v50, %v7715_v24 }
 0x874   :  { %8053 = vmatmul.f32.vlgmr.msra.gmra.mxu2 %v7710_v61 }
 0x876   :  { %v7610_v46 = vpop.f32.mrf.mxu0  ;;  %v7597_v29 = vpop.f32.mrf.mxu3 }
 0x877   :  { %v7598_v44 = vadd.f32 %v7597_v29, %v7585_v20 }
 0x879   :  { %v7611_v22 = vadd.f32 %v7610_v46, %v7598_v44 }
 0x87b   :  { %v23621_v21 = vadd.f32 %v23575_v10, %v7611_v22 }
 0x87d   :  { %v7669_v0 = vsel %vm2984_vm2, %v23621_v21, 0.0  ;;  %v7682_v4 = vmul.f32 %v23621_v21, %v23621_v21 }
 0x87e   :  { %v7612_v14 = vpop.f32.mrf.mxu0  ;;  %v7670_v38 = vrot.slane %v7669_v0, 4  ;;  %v7599_v56 = vpop.f32.mrf.mxu3 }
 0x87f   :  { %v7725_v13 = vsel %vm2984_vm2, %v7682_v4, 0.0 }
 0x880   :  { %v7671_v47 = vadd.f32 %v7670_v38, %v7669_v0  ;;  %v7726_v59 = vrot.slane %v7725_v13, 4 }
 0x882   :  { %v7672_v9 = vrot.slane %v7671_v47, 2  ;;  %v7727_v32 = vadd.f32 %v7726_v59, %v7725_v13  ;;  %v8153_v59 = vld.sshfl [vmem:[#allocation1 + $0x8] sm:$0xff pattern:$0x75316420] }
 0x883   :  { %14401 = vmatpush.msk.msra.mxu1 %vm3479_vm3, %v8153_v59  ;;  %v16558_v59 = vld [vmem:[#allocation2 + $0x168] sm:$0xf0] }
 0x884   :  { %v7673_v10 = vadd.f32 %v7672_v9, %v7671_v47  ;;  %v7728_v27 = vrot.slane %v7727_v32, 2  ;;  %v8152_v47 = vld.sshfl [vmem:[#allocation1] sm:$0xff pattern:$0x75316420] }
 0x885   :  { %14399 = vmatpush.msk.msrb.mxu2 %vm3479_vm3, %v8152_v47 }
 0x886   :  { %v7674_v58 = vrot.slane %v7673_v10, 1  ;;  %v7729_v63 = vadd.f32 %v7728_v27, %v7727_v32  ;;  %v24139_v32 = vld [vmem:[#allocation28_spill] sm:$0xff] }
 0x887   :  { %8330 = vst [vmem:[#allocation1] ss:$2 sm:$0xff] %v24139_v32  ;;  %14403 = vmatpush.msk.msra.mxu2 %vm3479_vm3, %v8154_v41  ;;  %v16726_v32 = vld [vmem:[#allocation2 + $0x6a8] sm:$0xf0] }
 0x888   :  { %v7675_v36 = vadd.f32 %v7674_v58, %v7673_v10  ;;  %v7730_v2 = vrot.slane %v7729_v63, 1  ;;  %v8156_v58 = vld.sshfl [vmem:[#allocation1 + $0x20] sm:$0xff pattern:$0x75316420] }
 0x889   :  { %14407 = vmatpush.msk.msrb.mxu0 %vm3479_vm3, %v8156_v58  ;;  %v15045_v58 = vld [vmem:[#allocation2 + $0x4d0] sm:$0xf] }
 0x88a   :  { %v7731_v16 = vadd.f32 %v7730_v2, %v7729_v63  ;;  %14397 = vmatmul.msk.f32.vlgmr.msra.gmra.mxu3 %vm2300_vm0, %v7675_v36  ;;  %v8157_v36 = vld.sshfl [vmem:[#allocation1 + $0x28] sm:$0xff pattern:$0x75316420] }
 0x88b   :  { %8057 = vmatpush.msra.mxu3 %v24127_v42  ;;  %v7850_v40 = vpop.f32.mrf.mxu1  ;;  %v24141_v42 = vld [vmem:[#allocation14_spill] sm:$0xff] }
 0x88c   :  { %14398 = vmatmul.msk.f32.vlgmr.msrb.gmra.mxu1 %vm2300_vm0, %v7731_v16  ;;  %v24140_v16 = vld [vmem:[#allocation31_spill] sm:$0xff]  ;;  %8334 = vst [vmem:[#allocation1 + $0x20] ss:$2 sm:$0xff] %v24141_v42  ;;  %v16551_v42 = vld [vmem:[#allocation2 + $0x130] sm:$0xf0] }
 0x88d   :  { %8058 = vmatpush.msra.mxu3 %v24128_v7  ;;  %8332 = vst [vmem:[#allocation1 + $0x10] ss:$2 sm:$0xff] %v24140_v16  ;;  %14409 = vmatpush.msk.msrb.mxu1 %vm3479_vm3, %v8157_v36  ;;  %v14569_v36 = vld [vmem:[#allocation2 + $0x118] sm:$0xf] }
 0x88f   :  { %8059 = vmatpush.msra.mxu3 %v24129_v49  ;;  %v8337_v49 = vld.sshfl [vmem:[#allocation1] sm:$0xff pattern:$0x75316420] }
 0x891   :  { %8060 = vmatpush.msra.mxu3 %v24130_v8  ;;  %v8158_v8 = vld.sshfl [vmem:[#allocation1 + $0x30] sm:$0xff pattern:$0x75316420] }
 0x892   :  { %7993 = vmatmul.f32.vlgmr.msrb.gmra.mxu3 %v7689_v57  ;;  %v8338_v57 = vld.sshfl [vmem:[#allocation1 + $0x8] sm:$0xff pattern:$0x75316420]  ;;  %8336 = vst [vmem:[#allocation1 + $0x30] ss:$2 sm:$0xff] %v24142_v12 }
 0x893   :  { %8061 = vmatpush.msra.mxu3 %v24131_v25  ;;  %14415 = vmatpush.msk.msra.mxu0 %vm3479_vm3, %v8338_v57  ;;  %v16593_v57 = vld [vmem:[#allocation2 + $0x280] sm:$0xf0] }
 0x895   :  { %8062 = vmatpush.msra.mxu3 %v24132_v19 }
 0x897   :  { %8063 = vmatpush.msra.mxu3 %v24133_v3 }
 0x899   :  { %8064 = vmatpush.msra.mxu3 %v24134_v34 }
 0x89b   :  { %8065 = vmatpush.msra.mxu3 %v24135_v60 }
 0x89d   :  { %8066 = vmatpush.msra.mxu3 %v23345_v53  ;;  %v7870_v53 = vpop.f32.mrf.mxu2 }
 0x89f   :  { %8067 = vmatpush.msra.mxu3 %v23353_v6 }
 0x8a1   :  { %8068 = vmatpush.msra.mxu3 %v23365_v31  ;;  %v7871_v31 = vadd.f32 %v7870_v53, %v7850_v40  ;;  %v8134_v40 = vld [vmem:[%s23916_s23] sm:$0x1]  ;;  %v16621_v53 = vld [vmem:[#allocation2 + $0x360] sm:$0xf0] }
 0x8a3   :  { %8069 = vmatpush.msra.mxu3 %v24136_v37 }
 0x8a5   :  { %8070 = vmatpush.msra.mxu3 %v24137_v11  ;;  %v8339_v11 = vld.sshfl [vmem:[#allocation1 + $0x10] sm:$0xff pattern:$0x75316420] }
 0x8a7   :  { %8071 = vmatpush.msra.mxu3 %v24138_v39  ;;  %v8341_v39 = vld.sshfl [vmem:[#allocation1 + $0x20] sm:$0xff pattern:$0x75316420] }
 0x8a9   :  { %8072 = vmatpush.msra.mxu3 %v23423_v18 }
 0x8aa   :  { %8073 = vmatmul.f32.vlgmr.msra.gmra.mxu3 %v7717_v52  ;;  %v8342_v52 = vld.sshfl [vmem:[#allocation1 + $0x28] sm:$0xff pattern:$0x75316420] }
 0x8ab   :  { %14405 = vmatpush.msk.msrb.mxu3 %vm3479_vm3, %v8155_v1 }
 0x8ad   :  { %14413 = vmatpush.msk.msra.mxu3 %vm3479_vm3, %v8337_v49  ;;  %v14737_v49 = vld [vmem:[#allocation2 + $0x268] sm:$0xf] }
 0x8ae   :  { %v14738_v12 = vor.u32 %v16593_v57, %v14737_v49  ;;  %v16698_v49 = vld [vmem:[#allocation2 + $0x5c8] sm:$0xf0]  ;;  %v15465_v57 = vld [vmem:[#allocation2 + $0x818] sm:$0xf] }
 0x8b3   :  { %v7890_v28 = vpop.f32.mrf.mxu3 }
 0x8b4   :  { %v7891_v44 = vadd.f32 %v7890_v28, %v7871_v31  ;;  %v14821_v31 = vld [vmem:[#allocation2 + $0x310] sm:$0xf] }
 0x8c7   :  { %v7910_v26 = vpop.f32.mrf.mxu0 }
 0x8c8   :  { %v7911_v22 = vadd.f32 %v7910_v26, %v7891_v44  ;;  %v14625_v44 = vld [vmem:[#allocation2 + $0x188] sm:$0xf] }
 0x8cf   :  { %v8014_v29 = vpop.f32.mrf.mxu0 }
 0x8d5   :  { %v7930_v6 = vpop.f32.mrf.mxu1 }
 0x8d6   :  { %v7931_v35 = vadd.f32 %v7930_v6, %v7911_v22  ;;  %v8340_v6 = vld.sshfl [vmem:[#allocation1 + $0x18] sm:$0xff pattern:$0x75316420]  ;;  %v16565_v22 = vld [vmem:[#allocation2 + $0x1a0] sm:$0xf0] }
 0x8dd   :  { %v8034_v14 = vpop.f32.mrf.mxu1 }
 0x8eb   :  { %v8094_v9 = vpop.f32.mrf.mxu0 }
 0x8ef   :  { %v7950_v20 = vpop.f32.mrf.mxu2 }
 0x8f0   :  { %v7951_v4 = vadd.f32 %v7950_v20, %v7931_v35  ;;  %v8343_v20 = vld.sshfl [vmem:[#allocation1 + $0x30] sm:$0xff pattern:$0x75316420]  ;;  %v16733_v35 = vld [vmem:[#allocation2 + $0x6e0] sm:$0xf0] }
 0x8f7   :  { %v8054_v38 = vpop.f32.mrf.mxu2 }
 0x909   :  { %v8114_v63 = vpop.f32.mrf.mxu1 }
 0x90d   :  { %v7970_v46 = vpop.f32.mrf.mxu3 }
 0x90e   :  { %v7971_v18 = vadd.f32 %v7970_v46, %v7951_v4  ;;  %v14849_v46 = vld [vmem:[#allocation2 + $0x348] sm:$0xf]  ;;  %v16607_v4 = vld [vmem:[#allocation2 + $0x2f0] sm:$0xf0] }
 0x910   :  { %v7973_v10 = vmul.f32 0.0025510204, %v7971_v18  ;;  %v14597_v18 = vld [vmem:[#allocation2 + $0x150] sm:$0xf] }
 0x911   :  { %v14598_v41 = vor.u32 %v16558_v59, %v14597_v18  ;;  %v16789_v59 = vld [vmem:[#allocation2 + $0x8a0] sm:$0xf0] }
 0x912   :  { %v8118_v54 = vmul.f32 %v7973_v10, %v7973_v10 }
 0x915   :  { %v7994_v61 = vpop.f32.mrf.mxu3 }
 0x916   :  { %v8015_v33 = vadd.f32 %v8014_v29, %v7994_v61  ;;  %v14850_v61 = vor.u32 %v16621_v53, %v14849_v46  ;;  %v16614_v29 = vld [vmem:[#allocation2 + $0x328] sm:$0xf0] }
 0x918   :  { %v8035_v0 = vadd.f32 %v8034_v14, %v8015_v33  ;;  %v14822_v33 = vor.u32 %v16614_v29, %v14821_v31  ;;  %v15297_v14 = vld [vmem:[#allocation2 + $0x6c8] sm:$0xf]  ;;  %v16572_v31 = vld [vmem:[#allocation2 + $0x1d8] sm:$0xf0] }
 0x919   :  { %v15745_v29 = vld [vmem:[#allocation2 + $0xa48] sm:$0xf] }
 0x91a   :  { %v8055_v56 = vadd.f32 %v8054_v38, %v8035_v0  ;;  %v14793_v0 = vld [vmem:[#allocation2 + $0x2d8] sm:$0xf]  ;;  %v14626_v38 = vor.u32 %v16565_v22, %v14625_v44  ;;  %v16845_v44 = vld [vmem:[#allocation2 + $0xa60] sm:$0xf0] }
 0x91b   :  { %v14794_v47 = vor.u32 %v16607_v4, %v14793_v0  ;;  %v15746_v0 = vor.u32 %v16845_v44, %v15745_v29  ;;  %v15717_v4 = vld [vmem:[#allocation2 + $0xa10] sm:$0xf] }
 0x92d   :  { %v8074_v13 = vpop.f32.mrf.mxu3 }
 0x92e   :  { %v8075_v55 = vadd.f32 %v8074_v13, %v8055_v56  ;;  %v15298_v56 = vor.u32 %v16733_v35, %v15297_v14  ;;  %v15073_v13 = vld [vmem:[#allocation2 + $0x508] sm:$0xf]  ;;  %v14457_v14 = vld [vmem:[#allocation2 + $0x38] sm:$0xf]  ;;  %v16523_v35 = vld [vmem:[#allocation2 + $0x50] sm:$0xf0] }
 0x92f   :  { %v14458_v18 = vor.u32 %v16523_v35, %v14457_v14  ;;  %v15577_v35 = vld [vmem:[#allocation2 + $0x8f8] sm:$0xf] }
 0x930   :  { %v8095_v27 = vadd.f32 %v8094_v9, %v8075_v55  ;;  %v16677_v55 = vld [vmem:[#allocation2 + $0x520] sm:$0xf0]  ;;  %v15269_v9 = vld [vmem:[#allocation2 + $0x690] sm:$0xf] }
 0x931   :  { %v15074_v1 = vor.u32 %v16677_v55, %v15073_v13  ;;  %v16516_v13 = vld [vmem:[#allocation2 + $0x18] sm:$0xf0] }
 0x932   :  { %v8115_v2 = vadd.f32 %v8114_v63, %v8095_v27  ;;  %v16600_v27 = vld [vmem:[#allocation2 + $0x2b8] sm:$0xf0]  ;;  %v16670_v63 = vld [vmem:[#allocation2 + $0x4e8] sm:$0xf0] }
 0x934   :  { %v8117_v15 = vmul.f32 0.0025510204, %v8115_v2  ;;  %v15270_v2 = vor.u32 %v16726_v32, %v15269_v9  ;;  %v15689_v9 = vld [vmem:[#allocation2 + $0x9d8] sm:$0xf]  ;;  %v16831_v32 = vld [vmem:[#allocation2 + $0x9f0] sm:$0xf0] }
 0x936   :  { %v8119_v7 = vsub.f32 %v8117_v15, %v8118_v54  ;;  %v15241_v54 = vld [vmem:[#allocation2 + $0x658] sm:$0xf]  ;;  %v16719_v15 = vld [vmem:[#allocation2 + $0x670] sm:$0xf0] }
 0x938   :  { %v8120_v51 = vmax.f32 %v8119_v7, 0.0  ;;  %v15046_v7 = vor.u32 %v16670_v63, %v15045_v58  ;;  %v15493_v58 = vld [vmem:[#allocation2 + $0x850] sm:$0xf]  ;;  %v16782_v63 = vld [vmem:[#allocation2 + $0x868] sm:$0xf0] }
 0x93a   :  { %v8122_v25 = vadd.f32 1e-05, %v8120_v51  ;;  %v14570_v51 = vor.u32 %v16551_v42, %v14569_v36  ;;  %v15661_v36 = vld [vmem:[#allocation2 + $0x9a0] sm:$0xf]  ;;  %v15017_v42 = vld [vmem:[#allocation2 + $0x498] sm:$0xf] }
 0x93c   :  { %16867 = vrsqrt.f32 %v8122_v25  ;;  %vm8129_vm14 = vweird.f32 %v8122_v25 }
 0x942   :  { %v16868_v19 = vpop.eup %16867 }
 0x943   :  { %v8124_v3 = vmul.f32 %v16868_v19, %v8122_v25  ;;  %vm8130_vm13 = vweird.f32 %v16868_v19  ;;  %v15242_v25 = vor.u32 %v16719_v15, %v15241_v54  ;;  %v16663_v54 = vld [vmem:[#allocation2 + $0x4b0] sm:$0xf0]  ;;  %v15157_v15 = vld [vmem:[#allocation2 + $0x5b0] sm:$0xf] }
 0x944   :  { %vm8131_vm15 = vmor %vm8129_vm14, %vm8130_vm13 }
 0x945   :  { %v8125_v30 = vmul.f32 %v16868_v19, %v8124_v3  ;;  %v15213_v3 = vld [vmem:[#allocation2 + $0x620] sm:$0xf] }
 0x947   :  { %v8126_v34 = vmul.f32 0.5, %v8125_v30  ;;  %v16712_v30 = vld [vmem:[#allocation2 + $0x638] sm:$0xf0] }
 0x949   :  { %v8127_v60 = vsub.f32 1.5, %v8126_v34  ;;  %v14709_v34 = vld [vmem:[#allocation2 + $0x230] sm:$0xf] }
 0x94b   :  { %v8128_v24 = vmul.f32 %v16868_v19, %v8127_v60  ;;  %v16586_v60 = vld [vmem:[#allocation2 + $0x248] sm:$0xf0] }
 0x94d   :  { %v8132_v37 = vsel %vm8131_vm15, %v16868_v19, %v8128_v24  ;;  %v16544_v19 = vld [vmem:[#allocation2 + $0xf8] sm:$0xf0]  ;;  %v14513_v24 = vld [vmem:[#allocation2 + $0xa8] sm:$0xf] }
 0x94e   :  { %v8133_v50 = vmul.f32 %v8132_v37, %v8121_v17  ;;  %v15214_v37 = vor.u32 %v16712_v30, %v15213_v3  ;;  %v14989_v30 = vld [vmem:[#allocation2 + $0x460] sm:$0xf] }
 0x950   :  { %14400 = vmatmul.msk.f32.vlgmr.msrb.gmra.mxu2 %vm3475_vm7, %v8133_v50  ;;  %14402 = vmatmul.msk.f32.vlgmr.msra.gmra.mxu1 %vm3475_vm7, %v8133_v50  ;;  %v8135_v28 = vmul.f32 %v8133_v50, %v7973_v10  ;;  %v14765_v10 = vld [vmem:[#allocation2 + $0x2a0] sm:$0xf] }
 0x951   :  { %14406 = vmatmul.msk.f32.vlgmr.msrb.gmra.mxu3 %vm3475_vm7, %v8133_v50  ;;  %14408 = vmatmul.msk.f32.vlgmr.msrb.gmra.mxu0 %vm3475_vm7, %v8133_v50  ;;  %v14766_v16 = vor.u32 %v16600_v27, %v14765_v10  ;;  %v15690_v27 = vor.u32 %v16831_v32, %v15689_v9  ;;  %v14599_v9 = vld [vmem:[#allocation2 + $0x16c] sm:$0xf0] }
 0x952   :  { %14411 = vmatpush.msk.msrb.mxu2 %vm3479_vm3, %v8158_v8  ;;  %14417 = vmatpush.msk.msra.mxu1 %vm3479_vm3, %v8339_v11  ;;  %v23675_v26 = vsub.f32 %v8134_v40, %v8135_v28  ;;  %v14541_v8 = vld [vmem:[#allocation2 + $0xe0] sm:$0xf]  ;;  %v16537_v11 = vld [vmem:[#allocation2 + $0xc0] sm:$0xf0]  ;;  %v14681_v28 = vld [vmem:[#allocation2 + $0x1f8] sm:$0xf] }
 0x953   :  { %14421 = vmatpush.msk.msrb.mxu3 %vm3479_vm3, %v8341_v39  ;;  %14423 = vmatpush.msk.msrb.mxu0 %vm3479_vm3, %v8342_v52  ;;  %v14542_v17 = vor.u32 %v16544_v19, %v14541_v8  ;;  %v15185_v39 = vld [vmem:[#allocation2 + $0x5e8] sm:$0xf]  ;;  %v16705_v52 = vld [vmem:[#allocation2 + $0x600] sm:$0xf0]  ;;  %v16579_v40 = vld [vmem:[#allocation2 + $0x210] sm:$0xf0]  ;;  %v14514_v46 = vor.u32 %v16537_v11, %v14513_v24  ;;  %v15158_v8 = vor.u32 %v16698_v49, %v15157_v15 }
 0x954   :  { %v15186_v53 = vor.u32 %v16705_v52, %v15185_v39  ;;  %v16817_v19 = vld [vmem:[#allocation2 + $0x980] sm:$0xf0]  ;;  %v16691_v24 = vld [vmem:[#allocation2 + $0x590] sm:$0xf0]  ;;  %v15605_v52 = vld [vmem:[#allocation2 + $0x930] sm:$0xf] }
 0x955   :  { %v16628_v49 = vld [vmem:[#allocation2 + $0x398] sm:$0xf0] }
 0x958   :  { %14404 = vmatmul.msk.f32.vlgmr.msra.gmra.mxu2 %vm3475_vm7, %v8133_v50  ;;  %14410 = vmatmul.msk.f32.vlgmr.msrb.gmra.mxu1 %vm3475_vm7, %v8133_v50 }
 0x959   :  { %14414 = vmatmul.msk.f32.vlgmr.msra.gmra.mxu3 %vm3475_vm7, %v23675_v26  ;;  %14416 = vmatmul.msk.f32.vlgmr.msra.gmra.mxu0 %vm3475_vm7, %v23675_v26 }
 0x95a   :  { %14419 = vmatpush.msk.msra.mxu2 %vm3479_vm3, %v8340_v6  ;;  %14425 = vmatpush.msk.msrb.mxu1 %vm3479_vm3, %v8343_v20  ;;  %v14485_v6 = vld [vmem:[#allocation2 + $0x70] sm:$0xf]  ;;  %v16530_v20 = vld [vmem:[#allocation2 + $0x88] sm:$0xf0] }
 0x95b   :  { %10717 = vmatpush.bf16.msra.mxu3 %v14850_v61  ;;  %10730 = vmatpush.bf16.msra.mxu0 %v15074_v1  ;;  %v14653_v61 = vld [vmem:[#allocation2 + $0x1c0] sm:$0xf] }
 0x95c   :  { %v14654_v22 = vor.u32 %v16572_v31, %v14653_v61  ;;  %v15409_v61 = vld [vmem:[#allocation2 + $0x7a8] sm:$0xf]  ;;  %v16761_v31 = vld [vmem:[#allocation2 + $0x7c0] sm:$0xf0] }
 0x95d   :  { %v15410_v44 = vor.u32 %v16761_v31, %v15409_v61 }
 0x95f   :  { %10718 = vmatpush.bf16.msra.mxu3 %v14822_v33  ;;  %10731 = vmatpush.bf16.msra.mxu0 %v15046_v7  ;;  %v14486_v33 = vor.u32 %v16530_v20, %v14485_v6  ;;  %v15018_v7 = vor.u32 %v16663_v54, %v15017_v42  ;;  %v16684_v20 = vld [vmem:[#allocation2 + $0x558] sm:$0xf0]  ;;  %v14571_v54 = vld [vmem:[#allocation2 + $0x134] sm:$0xf0] }
 0x960   :  { %14412 = vmatmul.msk.f32.vlgmr.msrb.gmra.mxu2 %vm3475_vm7, %v8133_v50  ;;  %14418 = vmatmul.msk.f32.vlgmr.msra.gmra.mxu1 %vm3475_vm7, %v23675_v26  ;;  %v14710_v50 = vor.u32 %v16586_v60, %v14709_v34  ;;  %v16656_v34 = vld [vmem:[#allocation2 + $0x478] sm:$0xf0]  ;;  %v15129_v60 = vld [vmem:[#allocation2 + $0x578] sm:$0xf] }
 0x961   :  { %14422 = vmatmul.msk.f32.vlgmr.msrb.gmra.mxu3 %vm3475_vm7, %v23675_v26  ;;  %14424 = vmatmul.msk.f32.vlgmr.msrb.gmra.mxu0 %vm3475_vm7, %v23675_v26  ;;  %v15130_v11 = vor.u32 %v16691_v24, %v15129_v60  ;;  %v14515_v24 = vld [vmem:[#allocation2 + $0xc4] sm:$0xf0] }
 0x962   :  { %10704 = vmatpush.bf16.msrb.mxu2 %v14626_v38  ;;  %10743 = vmatpush.bf16.msra.mxu1 %v15298_v56  ;;  %v16838_v38 = vld [vmem:[#allocation2 + $0xa28] sm:$0xf0]  ;;  %v14429_v56 = vld [vmem:[#allocation2] sm:$0xf] }
 0x963   :  { %10719 = vmatpush.bf16.msra.mxu3 %v14794_v47  ;;  %v15718_v55 = vor.u32 %v16838_v38, %v15717_v4  ;;  %v15521_v47 = vld [vmem:[#allocation2 + $0x888] sm:$0xf]  ;;  %v14430_v1 = vor.u32 %v16516_v13, %v14429_v56  ;;  %10732 = vmatpush.bf16.msra.mxu0 %v15018_v7  ;;  %v14933_v38 = vld [vmem:[#allocation2 + $0x3f0] sm:$0xf]  ;;  %v14877_v7 = vld [vmem:[#allocation2 + $0x380] sm:$0xf] }
 0x964   :  { %v15522_v10 = vor.u32 %v16789_v59, %v15521_v47  ;;  %v15381_v13 = vld [vmem:[#allocation2 + $0x770] sm:$0xf]  ;;  %v16555_v47 = vld [vmem:[#allocation2 + $0x154] sm:$0xf] }
 0x965   :  { %v14602_v32 = vor.u32 %v16555_v47, %v14599_v9 }
 0x966   :  { %10705 = vmatpush.bf16.msrb.mxu2 %v14598_v41  ;;  %10744 = vmatpush.bf16.msra.mxu1 %v15270_v2  ;;  %v15494_v41 = vor.u32 %v16782_v63, %v15493_v58  ;;  %v16824_v2 = vld [vmem:[#allocation2 + $0x9b8] sm:$0xf0]  ;;  %v14905_v58 = vld [vmem:[#allocation2 + $0x3b8] sm:$0xf]  ;;  %v16635_v63 = vld [vmem:[#allocation2 + $0x3d0] sm:$0xf0] }
 0x967   :  { %10720 = vmatpush.bf16.msra.mxu3 %v14766_v16  ;;  %v15662_v16 = vor.u32 %v16824_v2, %v15661_v36  ;;  %v15353_v36 = vld [vmem:[#allocation2 + $0x738] sm:$0xf]  ;;  %v16747_v2 = vld [vmem:[#allocation2 + $0x750] sm:$0xf0] }
 0x968   :  { %14420 = vmatmul.msk.f32.vlgmr.msra.gmra.mxu2 %vm3475_vm7, %v23675_v26  ;;  %14426 = vmatmul.msk.f32.vlgmr.msrb.gmra.mxu1 %vm3475_vm7, %v23675_v26  ;;  %v14682_v26 = vor.u32 %v16579_v40, %v14681_v28  ;;  %v16810_v28 = vld [vmem:[#allocation2 + $0x948] sm:$0xf0]  ;;  %v15354_v42 = vor.u32 %v16747_v2, %v15353_v36 }
 0x969   :  { %v15606_v40 = vor.u32 %v16810_v28, %v15605_v52  ;;  %v16674_v2 = vld [vmem:[#allocation2 + $0x50c] sm:$0xf] }
 0x96a   :  { %10706 = vmatpush.bf16.msrb.mxu2 %v14570_v51  ;;  %10745 = vmatpush.bf16.msra.mxu1 %v15242_v25  ;;  %v16775_v51 = vld [vmem:[#allocation2 + $0x830] sm:$0xf0] }
 0x96b   :  { %10721 = vmatpush.bf16.msra.mxu3 %v14738_v12  ;;  %v15466_v25 = vor.u32 %v16775_v51, %v15465_v57  ;;  %v15633_v12 = vld [vmem:[#allocation2 + $0x968] sm:$0xf]  ;;  %v14878_v57 = vor.u32 %v16628_v49, %v14877_v7  ;;  %v15325_v51 = vld [vmem:[#allocation2 + $0x700] sm:$0xf] }
 0x96c   :  { %v15634_v3 = vor.u32 %v16817_v19, %v15633_v12  ;;  %v16541_v12 = vld [vmem:[#allocation2 + $0xe4] sm:$0xf]  ;;  %v14543_v19 = vld [vmem:[#allocation2 + $0xfc] sm:$0xf0] }
 0x96e   :  { %10707 = vmatpush.bf16.msrb.mxu2 %v14542_v17  ;;  %10746 = vmatpush.bf16.msra.mxu1 %v15214_v37  ;;  %v14990_v17 = vor.u32 %v16656_v34, %v14989_v30  ;;  %v15437_v37 = vld [vmem:[#allocation2 + $0x7e0] sm:$0xf]  ;;  %v16852_v34 = vld [vmem:[#allocation2 + $0xa98] sm:$0xf0] }
 0x96f   :  { %10722 = vmatpush.bf16.msra.mxu3 %v14710_v50  ;;  %v16768_v50 = vld [vmem:[#allocation2 + $0x7f8] sm:$0xf0]  ;;  %v15773_v30 = vld [vmem:[#allocation2 + $0xa80] sm:$0xf] }
 0x970   :  { %v15438_v39 = vor.u32 %v16768_v50, %v15437_v37  ;;  %10733 = vmatpush.bf16.msra.mxu0 %v14990_v17  ;;  %v15774_v60 = vor.u32 %v16852_v34, %v15773_v30  ;;  %v16534_v17 = vld [vmem:[#allocation2 + $0xac] sm:$0xf]  ;;  %v16527_v50 = vld [vmem:[#allocation2 + $0x74] sm:$0xf]  ;;  %v15047_v34 = vld [vmem:[#allocation2 + $0x4ec] sm:$0xf0] }
 0x971   :  { %v14518_v37 = vor.u32 %v16534_v17, %v14515_v24  ;;  %v16667_v30 = vld [vmem:[#allocation2 + $0x4d4] sm:$0xf] }
 0x972   :  { %10708 = vmatpush.bf16.msrb.mxu2 %v14514_v46  ;;  %10747 = vmatpush.bf16.msra.mxu1 %v15186_v53  ;;  %v14961_v46 = vld [vmem:[#allocation2 + $0x428] sm:$0xf]  ;;  %v16649_v53 = vld [vmem:[#allocation2 + $0x440] sm:$0xf0] }
 0x973   :  { %10723 = vmatpush.bf16.msra.mxu3 %v14682_v26  ;;  %v15101_v26 = vld [vmem:[#allocation2 + $0x540] sm:$0xf]  ;;  %v14962_v6 = vor.u32 %v16649_v53, %v14961_v46  ;;  %v14459_v46 = vld [vmem:[#allocation2 + $0x54] sm:$0xf0] }
 0x974   :  { %v15102_v29 = vor.u32 %v16684_v20, %v15101_v26  ;;  %v16513_v26 = vld [vmem:[#allocation2 + $0x4] sm:$0xf] }
 0x975   :  { %10734 = vmatpush.bf16.msra.mxu0 %v14962_v6  ;;  %v14431_v6 = vld [vmem:[#allocation2 + $0x1c] sm:$0xf0] }
 0x976   :  { %10709 = vmatpush.bf16.msrb.mxu2 %v14486_v33  ;;  %10748 = vmatpush.bf16.msra.mxu1 %v15158_v8  ;;  %v16562_v33 = vld [vmem:[#allocation2 + $0x18c] sm:$0xf]  ;;  %v16740_v8 = vld [vmem:[#allocation2 + $0x718] sm:$0xf0]  ;;  %v14434_v31 = vor.u32 %v16513_v26, %v14431_v6 }
 0x977   :  { %10724 = vmatpush.bf16.msra.mxu3 %v14654_v22  ;;  %v14627_v22 = vld [vmem:[#allocation2 + $0x1a4] sm:$0xf0] }
 0x978   :  { %v14630_v14 = vor.u32 %v16562_v33, %v14627_v22 }
 0x97a   :  { %10710 = vmatpush.bf16.msrb.mxu2 %v14458_v18  ;;  %10749 = vmatpush.bf16.msra.mxu1 %v15130_v11  ;;  %v16642_v18 = vld [vmem:[#allocation2 + $0x408] sm:$0xf0]  ;;  %v14487_v11 = vld [vmem:[#allocation2 + $0x8c] sm:$0xf0] }
 0x97b   :  { %10769 = vmatpush.bf16.msrb.mxu3 %v15746_v0  ;;  %v16803_v0 = vld [vmem:[#allocation2 + $0x910] sm:$0xf0]  ;;  %v14934_v56 = vor.u32 %v16642_v18, %v14933_v38  ;;  %v15299_v38 = vld [vmem:[#allocation2 + $0x6e4] sm:$0xf0] }
 0x97c   :  { %v15578_v4 = vor.u32 %v16803_v0, %v15577_v35 }
 0x97d   :  { %10735 = vmatpush.bf16.msra.mxu0 %v14934_v56 }
 0x97e   :  { %10711 = vmatpush.bf16.msrb.mxu2 %v14430_v1  ;;  %10750 = vmatpush.bf16.msra.mxu1 %v15102_v29  ;;  %v15549_v1 = vld [vmem:[#allocation2 + $0x8c0] sm:$0xf] }
 0x97f   :  { %10770 = vmatpush.bf16.msrb.mxu3 %v15718_v55  ;;  %v16754_v55 = vld [vmem:[#allocation2 + $0x788] sm:$0xf0] }
 0x980   :  { %v15382_v59 = vor.u32 %v16754_v55, %v15381_v13 }
 0x982   :  { %10756 = vmatpush.bf16.msra.mxu2 %v15522_v10  ;;  %10795 = vmatpush.bf16.msrb.mxu1 %v14630_v14  ;;  %v16796_v10 = vld [vmem:[#allocation2 + $0x8d8] sm:$0xf0] }
 0x983   :  { %10771 = vmatpush.bf16.msrb.mxu3 %v15690_v27  ;;  %v15550_v27 = vor.u32 %v16796_v10, %v15549_v1  ;;  %v16723_v10 = vld [vmem:[#allocation2 + $0x694] sm:$0xf] }
 0x986   :  { %10757 = vmatpush.bf16.msra.mxu2 %v15494_v41  ;;  %10796 = vmatpush.bf16.msrb.mxu1 %v14602_v32  ;;  %v14906_v41 = vor.u32 %v16635_v63, %v14905_v58 }
 0x987   :  { %10772 = vmatpush.bf16.msrb.mxu3 %v15662_v16  ;;  %v16548_v16 = vld [vmem:[#allocation2 + $0x11c] sm:$0xf] }
 0x988   :  { %10736 = vmatpush.bf16.msra.mxu0 %v14906_v41  ;;  %v14574_v15 = vor.u32 %v16548_v16, %v14571_v54  ;;  %v15075_v16 = vld [vmem:[#allocation2 + $0x524] sm:$0xf0] }
 0x98a   :  { %10758 = vmatpush.bf16.msra.mxu2 %v15466_v25  ;;  %10797 = vmatpush.bf16.msrb.mxu1 %v14574_v15  ;;  %v15326_v25 = vor.u32 %v16740_v8, %v15325_v51  ;;  %v14851_v15 = vld [vmem:[#allocation2 + $0x364] sm:$0xf0]  ;;  %v15243_v51 = vld [vmem:[#allocation2 + $0x674] sm:$0xf0] }
 0x98b   :  { %10773 = vmatpush.bf16.msrb.mxu3 %v15634_v3  ;;  %v14546_v3 = vor.u32 %v16541_v12, %v14543_v19 }
 0x98c   :  { %10737 = vmatpush.bf16.msra.mxu0 %v14878_v57  ;;  %v16716_v57 = vld [vmem:[#allocation2 + $0x65c] sm:$0xf] }
 0x98e   :  { %10759 = vmatpush.bf16.msra.mxu2 %v15438_v39  ;;  %10798 = vmatpush.bf16.msrb.mxu1 %v14546_v3  ;;  %v14490_v39 = vor.u32 %v16527_v50, %v14487_v11  ;;  %v16611_v50 = vld [vmem:[#allocation2 + $0x314] sm:$0xf]  ;;  %v14823_v11 = vld [vmem:[#allocation2 + $0x32c] sm:$0xf0] }
 0x98f   :  { %10774 = vmatpush.bf16.msrb.mxu3 %v15606_v40  ;;  %v16520_v40 = vld [vmem:[#allocation2 + $0x3c] sm:$0xf]  ;;  %v14826_v6 = vor.u32 %v16611_v50, %v14823_v11 }
 0x990   :  { %10789 = vmatpush.bf16.msrb.mxu0 %v15774_v60  ;;  %v14462_v53 = vor.u32 %v16520_v40, %v14459_v46  ;;  %v16709_v40 = vld [vmem:[#allocation2 + $0x624] sm:$0xf]  ;;  %v15215_v46 = vld [vmem:[#allocation2 + $0x63c] sm:$0xf0] }
 0x992   :  { %10760 = vmatpush.bf16.msra.mxu2 %v15410_v44  ;;  %10799 = vmatpush.bf16.msrb.mxu1 %v14518_v37  ;;  %v15246_v37 = vor.u32 %v16716_v57, %v15243_v51  ;;  %v14739_v57 = vld [vmem:[#allocation2 + $0x284] sm:$0xf0] }
 0x993   :  { %10775 = vmatpush.bf16.msrb.mxu3 %v15578_v4  ;;  %v16730_v4 = vld [vmem:[#allocation2 + $0x6cc] sm:$0xf] }
 0x994   :  { %v15302_v47 = vor.u32 %v16730_v4, %v15299_v38  ;;  %v16702_v4 = vld [vmem:[#allocation2 + $0x5ec] sm:$0xf]  ;;  %v15187_v38 = vld [vmem:[#allocation2 + $0x604] sm:$0xf0] }
 0x996   :  { %10761 = vmatpush.bf16.msra.mxu2 %v15382_v59  ;;  %10800 = vmatpush.bf16.msrb.mxu1 %v14490_v39 }
 0x997   :  { %10776 = vmatpush.bf16.msrb.mxu3 %v15550_v27  ;;  %v15271_v27 = vld [vmem:[#allocation2 + $0x6ac] sm:$0xf0] }
 0x998   :  { %v15274_v54 = vor.u32 %v16723_v10, %v15271_v27  ;;  %v16597_v10 = vld [vmem:[#allocation2 + $0x2a4] sm:$0xf]  ;;  %v14767_v27 = vld [vmem:[#allocation2 + $0x2bc] sm:$0xf0] }
 0x99a   :  { %10762 = vmatpush.bf16.msra.mxu2 %v15354_v42  ;;  %10801 = vmatpush.bf16.msrb.mxu1 %v14462_v53  ;;  %v15050_v53 = vor.u32 %v16667_v30, %v15047_v34  ;;  %v15495_v30 = vld [vmem:[#allocation2 + $0x86c] sm:$0xf0] }
 0x99e   :  { %10763 = vmatpush.bf16.msra.mxu2 %v15326_v25  ;;  %10802 = vmatpush.bf16.msrb.mxu1 %v14434_v31  ;;  %v15078_v25 = vor.u32 %v16674_v2, %v15075_v16  ;;  %v15523_v2 = vld [vmem:[#allocation2 + $0x8a4] sm:$0xf0] }
 0x9cd   :  { %v8213_v52 = vpop.f32.mrf.mxu1 }
 0x9ce   :  { %v23696_v28 = vpop.f32.mrf.mxu0  ;;  %v8317_v20 = vperm.slane %v8213_v52, 0 }
 0x9cf   :  { %v8320_v39 = vperm.slane %v23696_v28, 0 }
 0x9d0   :  { %v8324_v22 = vmul.f32 %v8317_v20, %v23277_v45  ;;  %v16660_v20 = vld [vmem:[#allocation2 + $0x49c] sm:$0xf] }
 0x9d3   :  { %v8193_v61 = vpop.f32.mrf.mxu2 }
 0x9d4   :  { %v23698_v29 = vpop.f32.mrf.mxu3  ;;  %v8316_v35 = vperm.slane %v8193_v61, 0  ;;  %v15019_v61 = vld [vmem:[#allocation2 + $0x4b4] sm:$0xf0] }
 0x9d5   :  { %v8293_v44 = vpop.f32.mrf.mxu1  ;;  %v8319_v31 = vperm.slane %v23698_v29, 0  ;;  %v14991_v29 = vld [vmem:[#allocation2 + $0x47c] sm:$0xf0] }
 0x9d6   :  { %v8398_v33 = vpop.f32.mrf.mxu0  ;;  %v8323_v59 = vmul.f32 %v8316_v35, %v24126_v5  ;;  %v8321_v41 = vperm.slane %v8293_v44, 0  ;;  %v16618_v5 = vld [vmem:[#allocation2 + $0x34c] sm:$0xf]  ;;  %v8327_v35 = vmul.f32 %v8320_v39, %v23556_v23  ;;  %v16583_v39 = vld [vmem:[#allocation2 + $0x234] sm:$0xf] }
 0x9d7   :  { %v8502_v14 = vperm.slane %v8398_v33, 0  ;;  %v14854_v3 = vor.u32 %v16618_v5, %v14851_v15  ;;  %v15218_v33 = vor.u32 %v16709_v40, %v15215_v46  ;;  %v16681_v40 = vld [vmem:[#allocation2 + $0x544] sm:$0xf]  ;;  %v15103_v46 = vld [vmem:[#allocation2 + $0x55c] sm:$0xf0] }
 0x9d9   :  { %v8509_v0 = vadd.f32 %v8502_v14, %v8324_v22  ;;  %v16604_v22 = vld [vmem:[#allocation2 + $0x2dc] sm:$0xf]  ;;  %v14795_v14 = vld [vmem:[#allocation2 + $0x2f4] sm:$0xf0] }
 0x9db   :  { %v8516_v18 = vmax.f32 %v8509_v0, 0.0  ;;  %v8233_v56 = vpop.f32.mrf.mxu2 }
 0x9dc   :  { %v8318_v13 = vperm.slane %v8233_v56, 0  ;;  %v8378_v55 = vpop.f32.mrf.mxu3 }
 0x9dd   :  { %v23702_v9 = vpack.c.bf16 %v8516_v18, %v8516_v18  ;;  %v8501_v32 = vperm.slane %v8378_v55, 0  ;;  %v8418_v1 = vpop.f32.mrf.mxu1  ;;  %v15022_v18 = vor.u32 %v16660_v20, %v15019_v61  ;;  %v14798_v55 = vor.u32 %v16604_v22, %v14795_v14  ;;  %v16772_v20 = vld [vmem:[#allocation2 + $0x81c] sm:$0xf]  ;;  %v15467_v61 = vld [vmem:[#allocation2 + $0x834] sm:$0xf0] }
 0x9de   :  { %v8325_v45 = vmul.f32 %v8318_v13, %v23415_v48  ;;  %v8503_v58 = vperm.slane %v8418_v1, 0  ;;  %v8478_v63 = vpop.f32.mrf.mxu0  ;;  %v8328_v48 = vmul.f32 %v8321_v41, %v23597_v43  ;;  %v15190_v1 = vor.u32 %v16702_v4, %v15187_v38  ;;  %v16576_v22 = vld [vmem:[#allocation2 + $0x1fc] sm:$0xf]  ;;  %v14683_v14 = vld [vmem:[#allocation2 + $0x214] sm:$0xf0] }
 0x9df   :  { %v8508_v36 = vadd.f32 %v8501_v32, %v8323_v59  ;;  %10725 = vmatmul.bf16.vlgmr.msra.gmra.mxu3 %v23702_v9  ;;  %v8506_v49 = vperm.slane %v8478_v63, 0  ;;  %v14605_v4 = vld [vmem:[#allocation2 + $0x158] sm:$0xf] }
 0x9e0   :  { %v8510_v42 = vadd.f32 %v8503_v58, %v8325_v45  ;;  %10834 = vmatpush.bf16.msra.mxu3 %v15302_v47  ;;  %v16653_v47 = vld [vmem:[#allocation2 + $0x464] sm:$0xf]  ;;  %v16695_v45 = vld [vmem:[#allocation2 + $0x5b4] sm:$0xf]  ;;  %v15159_v58 = vld [vmem:[#allocation2 + $0x5cc] sm:$0xf0] }
 0x9e1   :  { %v8515_v7 = vmax.f32 %v8508_v36, 0.0  ;;  %v8513_v52 = vadd.f32 %v8506_v49, %v8328_v48  ;;  %v14994_v41 = vor.u32 %v16653_v47, %v14991_v29  ;;  %v16786_v36 = vld [vmem:[#allocation2 + $0x88c] sm:$0xf]  ;;  %v16625_v47 = vld [vmem:[#allocation2 + $0x384] sm:$0xf] }
 0x9e2   :  { %v8517_v8 = vmax.f32 %v8510_v42, 0.0  ;;  %v16646_v42 = vld [vmem:[#allocation2 + $0x42c] sm:$0xf]  ;;  %v15526_v51 = vor.u32 %v16786_v36, %v15523_v2  ;;  %v14879_v29 = vld [vmem:[#allocation2 + $0x39c] sm:$0xf0] }
 0x9e3   :  { %v23707_v12 = vpack.c.bf16 %v8515_v7, %v8515_v7  ;;  %v8313_v19 = vpop.f32.mrf.mxu2  ;;  %v8520_v0 = vmax.f32 %v8513_v52, 0.0  ;;  %v15162_v7 = vor.u32 %v16695_v45, %v15159_v58  ;;  %v16590_v49 = vld [vmem:[#allocation2 + $0x26c] sm:$0xf]  ;;  %v14711_v52 = vld [vmem:[#allocation2 + $0x24c] sm:$0xf0] }
 0x9e4   :  { %v23709_v60 = vpack.c.bf16 %v8517_v8, %v8517_v8  ;;  %10835 = vmatpush.bf16.msra.mxu3 %v15274_v54  ;;  %v8322_v17 = vperm.slane %v8313_v19, 0  ;;  %v8458_v24 = vpop.f32.mrf.mxu3  ;;  %v14963_v54 = vld [vmem:[#allocation2 + $0x444] sm:$0xf0]  ;;  %v16688_v8 = vld [vmem:[#allocation2 + $0x57c] sm:$0xf] }
 0x9e5   :  { %10712 = vmatmul.bf16.vlgmr.msrb.gmra.mxu2 %v23707_v12  ;;  %v8498_v43 = vpop.f32.mrf.mxu1  ;;  %v8505_v26 = vperm.slane %v8458_v24, 0  ;;  %v23718_v23 = vpack.c.bf16 %v8520_v0, %v8520_v0  ;;  %v14966_v19 = vor.u32 %v16646_v42, %v14963_v54  ;;  %v16639_v24 = vld [vmem:[#allocation2 + $0x3f4] sm:$0xf]  ;;  %v15470_v0 = vor.u32 %v16772_v20, %v15467_v61  ;;  %v16842_v45 = vld [vmem:[#allocation2 + $0xa4c] sm:$0xf] }
 0x9e6   :  { %10821 = vmatpush.bf16.msrb.mxu2 %v15078_v25  ;;  %10738 = vmatmul.bf16.vlgmr.msra.gmra.mxu0 %v23709_v60  ;;  %v8329_v44 = vmul.f32 %v8322_v17, %v23621_v21  ;;  %v8507_v28 = vperm.slane %v8498_v43, 0  ;;  %v8326_v21 = vmul.f32 %v8319_v31, %v23531_v62  ;;  %v14770_v62 = vor.u32 %v16597_v10, %v14767_v27  ;;  %v15131_v25 = vld [vmem:[#allocation2 + $0x594] sm:$0xf0]  ;;  %v15747_v58 = vld [vmem:[#allocation2 + $0xa64] sm:$0xf0] }
 0x9e7   :  { %10808 = vmatpush.bf16.msra.mxu0 %v14854_v3  ;;  %v8512_v56 = vadd.f32 %v8505_v26, %v8327_v35  ;;  %v16779_v3 = vld [vmem:[#allocation2 + $0x854] sm:$0xf]  ;;  %v14742_v17 = vor.u32 %v16590_v49, %v14739_v57  ;;  %v15134_v11 = vor.u32 %v16688_v8, %v15131_v25  ;;  %v14714_v31 = vor.u32 %v16583_v39, %v14711_v52  ;;  %v16552_v36 = vld [vmem:[#allocation2 + $0x138] sm:$0xf0]  ;;  %v16758_v2 = vld [vmem:[#allocation2 + $0x7ac] sm:$0xf] }
 0x9e8   :  { %10836 = vmatpush.bf16.msra.mxu3 %v15246_v37  ;;  %v8514_v59 = vadd.f32 %v8507_v28, %v8329_v44  ;;  %v14935_v37 = vld [vmem:[#allocation2 + $0x40c] sm:$0xf0]  ;;  %v15498_v43 = vor.u32 %v16779_v3, %v15495_v30  ;;  %v16632_v44 = vld [vmem:[#allocation2 + $0x3bc] sm:$0xf]  ;;  %v14907_v28 = vld [vmem:[#allocation2 + $0x3d4] sm:$0xf0] }
 0x9e9   :  { %v8519_v16 = vmax.f32 %v8512_v56, 0.0  ;;  %v14938_v26 = vor.u32 %v16639_v24, %v14935_v37  ;;  %v14910_v38 = vor.u32 %v16632_v44, %v14907_v28  ;;  %v16765_v56 = vld [vmem:[#allocation2 + $0x7e4] sm:$0xf]  ;;  %v15411_v42 = vld [vmem:[#allocation2 + $0x7c4] sm:$0xf0] }
 0x9ea   :  { %10822 = vmatpush.bf16.msrb.mxu2 %v15050_v53  ;;  %v8521_v5 = vmax.f32 %v8514_v59, 0.0  ;;  %v14633_v53 = vld [vmem:[#allocation2 + $0x190] sm:$0xf]  ;;  %v14655_v59 = vld [vmem:[#allocation2 + $0x1dc] sm:$0xf0] }
 0x9eb   :  { %10809 = vmatpush.bf16.msra.mxu0 %v14826_v6  ;;  %v8438_v13 = vpop.f32.mrf.mxu2  ;;  %v23723_v34 = vpack.c.bf16 %v8519_v16, %v8519_v16  ;;  %v16566_v6 = vld [vmem:[#allocation2 + $0x1a8] sm:$0xf0]  ;;  %v15081_v54 = vld [vmem:[#allocation2 + $0x510] sm:$0xf]  ;;  %v16835_v49 = vld [vmem:[#allocation2 + $0xa14] sm:$0xf] }
 0x9ec   :  { %10837 = vmatpush.bf16.msra.mxu3 %v15218_v33  ;;  %v8504_v32 = vperm.slane %v8438_v13, 0  ;;  %v23725_v50 = vpack.c.bf16 %v8521_v5, %v8521_v5  ;;  %v15106_v33 = vor.u32 %v16681_v40, %v15103_v46  ;;  %v14634_v35 = vor.u32 %v16566_v6, %v14633_v53  ;;  %v15439_v13 = vld [vmem:[#allocation2 + $0x7fc] sm:$0xf0]  ;;  %v16678_v5 = vld [vmem:[#allocation2 + $0x528] sm:$0xf0] }
 0x9ed   :  { %v15442_v27 = vor.u32 %v16765_v56, %v15439_v13  ;;  %v15719_v57 = vld [vmem:[#allocation2 + $0xa2c] sm:$0xf0]  ;;  %v15082_v8 = vor.u32 %v16678_v5, %v15081_v54  ;;  %v14549_v25 = vld [vmem:[#allocation2 + $0xe8] sm:$0xf]  ;;  %v16751_v3 = vld [vmem:[#allocation2 + $0x774] sm:$0xf] }
 0x9ee   :  { %v8511_v63 = vadd.f32 %v8504_v32, %v8326_v21  ;;  %10823 = vmatpush.bf16.msrb.mxu2 %v15022_v18  ;;  %v16559_v18 = vld [vmem:[#allocation2 + $0x170] sm:$0xf0]  ;;  %v16569_v21 = vld [vmem:[#allocation2 + $0x1c4] sm:$0xf]  ;;  %v15383_v30 = vld [vmem:[#allocation2 + $0x78c] sm:$0xf0]  ;;  %v15722_v37 = vor.u32 %v16835_v49, %v15719_v57 }
 0x9ef   :  { %10777 = vmatmul.bf16.vlgmr.msrb.gmra.mxu3 %v23718_v23  ;;  %10810 = vmatpush.bf16.msra.mxu0 %v14798_v55  ;;  %v14686_v55 = vor.u32 %v16576_v22, %v14683_v14  ;;  %v16849_v32 = vld [vmem:[#allocation2 + $0xa84] sm:$0xf]  ;;  %v14606_v10 = vor.u32 %v16559_v18, %v14605_v4  ;;  %v14658_v16 = vor.u32 %v16569_v21, %v14655_v59  ;;  %v16671_v24 = vld [vmem:[#allocation2 + $0x4f0] sm:$0xf0]  ;;  %v16828_v39 = vld [vmem:[#allocation2 + $0x9dc] sm:$0xf] }
 0x9f0   :  { %v8518_v15 = vmax.f32 %v8511_v63, 0.0  ;;  %10838 = vmatpush.bf16.msra.mxu3 %v15190_v1  ;;  %v15775_v1 = vld [vmem:[#allocation2 + $0xa9c] sm:$0xf0]  ;;  %v14882_v63 = vor.u32 %v16625_v47, %v14879_v29  ;;  %v15691_v52 = vld [vmem:[#allocation2 + $0x9f4] sm:$0xf0] }
 0x9f1   :  { %v14521_v46 = vld [vmem:[#allocation2 + $0xb0] sm:$0xf]  ;;  %v16538_v53 = vld [vmem:[#allocation2 + $0xc8] sm:$0xf0]  ;;  %v15355_v6 = vld [vmem:[#allocation2 + $0x754] sm:$0xf0] }
 0x9f2   :  { %v23721_v48 = vpack.c.bf16 %v8518_v15, %v8518_v15  ;;  %10824 = vmatpush.bf16.msrb.mxu2 %v14994_v41  ;;  %v14577_v41 = vld [vmem:[#allocation2 + $0x120] sm:$0xf]  ;;  %v15750_v15 = vor.u32 %v16842_v45, %v15747_v58  ;;  %v16664_v61 = vld [vmem:[#allocation2 + $0x4b8] sm:$0xf0]  ;;  %v14522_v44 = vor.u32 %v16538_v53, %v14521_v46  ;;  %v16821_v28 = vld [vmem:[#allocation2 + $0x9a4] sm:$0xf] }
 0x9f3   :  { %10811 = vmatpush.bf16.msra.mxu0 %v14770_v62  ;;  %v15778_v62 = vor.u32 %v16849_v32, %v15775_v1  ;;  %v15025_v20 = vld [vmem:[#allocation2 + $0x4a0] sm:$0xf]  ;;  %v16737_v4 = vld [vmem:[#allocation2 + $0x704] sm:$0xf]  ;;  %v14997_v18 = vld [vmem:[#allocation2 + $0x468] sm:$0xf] }
 0x9f4   :  { %10839 = vmatpush.bf16.msra.mxu3 %v15162_v7  ;;  %10751 = vmatmul.bf16.vlgmr.msra.gmra.mxu1 %v23721_v48  ;;  %v14578_v7 = vor.u32 %v16552_v36, %v14577_v41  ;;  %v15026_v14 = vor.u32 %v16664_v61, %v15025_v20  ;;  %v16657_v56 = vld [vmem:[#allocation2 + $0x480] sm:$0xf0]  ;;  %v16622_v47 = vld [vmem:[#allocation2 + $0x368] sm:$0xf0]  ;;  %v15635_v59 = vld [vmem:[#allocation2 + $0x984] sm:$0xf0] }
 0x9f5   :  { %10764 = vmatmul.bf16.vlgmr.msra.gmra.mxu2 %v23723_v34  ;;  %10847 = vmatpush.bf16.msra.mxu1 %v15526_v51  ;;  %v15414_v51 = vor.u32 %v16758_v2, %v15411_v42  ;;  %v16814_v21 = vld [vmem:[#allocation2 + $0x96c] sm:$0xf]  ;;  %v14998_v1 = vor.u32 %v16657_v56, %v14997_v18  ;;  %v14969_v58 = vld [vmem:[#allocation2 + $0x430] sm:$0xf]  ;;  %v14829_v36 = vld [vmem:[#allocation2 + $0x318] sm:$0xf] }
 0x9f6   :  { %10825 = vmatpush.bf16.msrb.mxu2 %v14966_v19  ;;  %15799 = vmatmul.msk.bf16.vlgmr.msrb.gmra.mxu0 %vm2300_vm0, %v23725_v50  ;;  %v16545_v19 = vld [vmem:[#allocation2 + $0x100] sm:$0xf0]  ;;  %v16650_v41 = vld [vmem:[#allocation2 + $0x448] sm:$0xf0]  ;;  %v16615_v2 = vld [vmem:[#allocation2 + $0x330] sm:$0xf0] }
 0x9f7   :  { %10812 = vmatpush.bf16.msra.mxu0 %v14742_v17  ;;  %v15053_v17 = vld [vmem:[#allocation2 + $0x4d8] sm:$0xf]  ;;  %v15607_v42 = vld [vmem:[#allocation2 + $0x94c] sm:$0xf0]  ;;  %v14437_v54 = vld [vmem:[#allocation2 + $0x8] sm:$0xf] }
 0x9f8   :  { %10840 = vmatpush.bf16.msra.mxu3 %v15134_v11  ;;  %v14550_v11 = vor.u32 %v16545_v19, %v14549_v25  ;;  %v15054_v40 = vor.u32 %v16671_v24, %v15053_v17  ;;  %v16517_v5 = vld [vmem:[#allocation2 + $0x20] sm:$0xf0]  ;;  %v14941_v49 = vld [vmem:[#allocation2 + $0x3f8] sm:$0xf]  ;;  %v15529_v57 = vld [vmem:[#allocation2 + $0x890] sm:$0xf] }
 0x9f9   :  { %10848 = vmatpush.bf16.msra.mxu1 %v15498_v43  ;;  %v15386_v43 = vor.u32 %v16751_v3, %v15383_v30  ;;  %v16643_v25 = vld [vmem:[#allocation2 + $0x410] sm:$0xf0]  ;;  %v14801_v19 = vld [vmem:[#allocation2 + $0x2e0] sm:$0xf]  ;;  %v16608_v3 = vld [vmem:[#allocation2 + $0x2f8] sm:$0xf0]  ;;  %v14438_v30 = vor.u32 %v16517_v5, %v14437_v54 }
 0x9fa   :  { %10826 = vmatpush.bf16.msrb.mxu2 %v14938_v26  ;;  %v16744_v26 = vld [vmem:[#allocation2 + $0x73c] sm:$0xf]  ;;  %v15579_v24 = vld [vmem:[#allocation2 + $0x914] sm:$0xf0]  ;;  %v16793_v20 = vld [vmem:[#allocation2 + $0x8c4] sm:$0xf] }
 0x9fb   :  { %10813 = vmatpush.bf16.msra.mxu0 %v14714_v31  ;;  %v15694_v31 = vor.u32 %v16828_v39, %v15691_v52  ;;  %v15358_v22 = vor.u32 %v16744_v26, %v15355_v6  ;;  %v16800_v17 = vld [vmem:[#allocation2 + $0x8fc] sm:$0xf]  ;;  %v14802_v39 = vor.u32 %v16608_v3, %v14801_v19  ;;  %v14913_v52 = vld [vmem:[#allocation2 + $0x3c0] sm:$0xf]  ;;  %v14773_v26 = vld [vmem:[#allocation2 + $0x2a8] sm:$0xf] }
 0x9fc   :  { %10841 = vmatpush.bf16.msra.mxu3 %v15106_v33  ;;  %v15663_v33 = vld [vmem:[#allocation2 + $0x9bc] sm:$0xf0]  ;;  %v15582_v46 = vor.u32 %v16800_v17, %v15579_v24  ;;  %v16636_v53 = vld [vmem:[#allocation2 + $0x3d8] sm:$0xf0]  ;;  %v16601_v6 = vld [vmem:[#allocation2 + $0x2c0] sm:$0xf0] }
 0x9fd   :  { %10849 = vmatpush.bf16.msra.mxu1 %v15470_v0  ;;  %v16531_v0 = vld [vmem:[#allocation2 + $0x90] sm:$0xf0]  ;;  %v15666_v13 = vor.u32 %v16821_v28, %v15663_v33  ;;  %v15551_v61 = vld [vmem:[#allocation2 + $0x8dc] sm:$0xf0]  ;;  %v16734_v28 = vld [vmem:[#allocation2 + $0x6e8] sm:$0xf0]  ;;  %v14914_v33 = vor.u32 %v16636_v53, %v14913_v52 }
 0x9fe   :  { %10827 = vmatpush.bf16.msrb.mxu2 %v14910_v38  ;;  %v15327_v38 = vld [vmem:[#allocation2 + $0x71c] sm:$0xf0]  ;;  %v14745_v18 = vld [vmem:[#allocation2 + $0x270] sm:$0xf]  ;;  %v16594_v56 = vld [vmem:[#allocation2 + $0x288] sm:$0xf0] }
 0x9ff   :  { %10814 = vmatpush.bf16.msra.mxu0 %v14686_v55  ;;  %10842 = vmatmul.bf16.vlgmr.msra.gmra.mxu3 %v23721_v48  ;;  %v14857_v55 = vld [vmem:[#allocation2 + $0x350] sm:$0xf]  ;;  %v15330_v32 = vor.u32 %v16737_v4, %v15327_v38  ;;  %v15554_v4 = vor.u32 %v16793_v20, %v15551_v61  ;;  %v16629_v38 = vld [vmem:[#allocation2 + $0x3a0] sm:$0xf0]  ;;  %v15221_v3 = vld [vmem:[#allocation2 + $0x628] sm:$0xf] }
 0xa00   :  { %10886 = vmatpush.bf16.msrb.mxu3 %v14634_v35  ;;  %v14493_v35 = vld [vmem:[#allocation2 + $0x78] sm:$0xf]  ;;  %v14858_v45 = vor.u32 %v16622_v47, %v14857_v55  ;;  %v15781_v55 = vld [vmem:[#allocation2 + $0xa88] sm:$0xf]  ;;  %v16853_v47 = vld [vmem:[#allocation2 + $0xaa0] sm:$0xf0] }
 0xa01   :  { %10850 = vmatpush.bf16.msra.mxu1 %v15442_v27  ;;  %v14494_v29 = vor.u32 %v16531_v0, %v14493_v35  ;;  %v16524_v27 = vld [vmem:[#allocation2 + $0x58] sm:$0xf0]  ;;  %v15473_v35 = vld [vmem:[#allocation2 + $0x820] sm:$0xf]  ;;  %v15753_v53 = vld [vmem:[#allocation2 + $0xa50] sm:$0xf] }
 0xa02   :  { %10828 = vmatpush.bf16.msrb.mxu2 %v14882_v63  ;;  %v15638_v63 = vor.u32 %v16814_v21, %v15635_v59  ;;  %v16776_v0 = vld [vmem:[#allocation2 + $0x838] sm:$0xf0]  ;;  %v15277_v21 = vld [vmem:[#allocation2 + $0x698] sm:$0xf]  ;;  %v16727_v59 = vld [vmem:[#allocation2 + $0x6b0] sm:$0xf0] }
 0xa03   :  { %10815 = vmatpush.bf16.msra.mxu0 %v14658_v16  ;;  %v14803_v52 = vld [vmem:[#allocation2 + $0x2fc] sm:$0xf0]  ;;  %v15193_v20 = vld [vmem:[#allocation2 + $0x5f0] sm:$0xf]  ;;  %v16706_v61 = vld [vmem:[#allocation2 + $0x608] sm:$0xf0] }
 0xa04   :  { %10887 = vmatpush.bf16.msrb.mxu3 %v14606_v10  ;;  %10803 = vmatmul.bf16.vlgmr.msrb.gmra.mxu1 %v23707_v12  ;;  %v14465_v10 = vld [vmem:[#allocation2 + $0x40] sm:$0xf] }
 0xa05   :  { %10829 = vmatmul.bf16.vlgmr.msrb.gmra.mxu2 %v23709_v60  ;;  %10851 = vmatpush.bf16.msra.mxu1 %v15414_v51  ;;  %v14466_v16 = vor.u32 %v16524_v27, %v14465_v10  ;;  %v16790_v51 = vld [vmem:[#allocation2 + $0x8a8] sm:$0xf0]  ;;  %v15445_v10 = vld [vmem:[#allocation2 + $0x7e8] sm:$0xf]  ;;  %v16769_v27 = vld [vmem:[#allocation2 + $0x800] sm:$0xf0] }
 0xa06   :  { %10880 = vmatpush.bf16.msra.mxu2 %v15778_v62  ;;  %10816 = vmatmul.bf16.vlgmr.msra.gmra.mxu0 %v23702_v9  ;;  %v16807_v62 = vld [vmem:[#allocation2 + $0x934] sm:$0xf] }
 0xa07   :  { %10860 = vmatpush.bf16.msrb.mxu0 %v15750_v15  ;;  %v14970_v15 = vor.u32 %v16650_v41, %v14969_v58  ;;  %v15782_v58 = vor.u32 %v16853_v47, %v15781_v55  ;;  %v14717_v41 = vld [vmem:[#allocation2 + $0x238] sm:$0xf]  ;;  %v15333_v47 = vld [vmem:[#allocation2 + $0x708] sm:$0xf] }
 0xa08   :  { %10888 = vmatpush.bf16.msrb.mxu3 %v14578_v7  ;;  %v14830_v7 = vor.u32 %v16615_v2, %v14829_v36  ;;  %v16587_v36 = vld [vmem:[#allocation2 + $0x250] sm:$0xf0]  ;;  %v15278_v2 = vor.u32 %v16727_v59, %v15277_v21 }
 0xa09   :  { %10852 = vmatpush.bf16.msra.mxu1 %v15386_v43  ;;  %v15501_v43 = vld [vmem:[#allocation2 + $0x858] sm:$0xf]  ;;  %v14718_v5 = vor.u32 %v16587_v36, %v14717_v41  ;;  %v16591_v21 = vld [vmem:[#allocation2 + $0x274] sm:$0xf]  ;;  %v15137_v41 = vld [vmem:[#allocation2 + $0x580] sm:$0xf] }
 0xa0a   :  { %10912 = vmatpush.bf16.msrb.mxu2 %v15082_v8  ;;  %v15610_v8 = vor.u32 %v16807_v62, %v15607_v42  ;;  %v15249_v62 = vld [vmem:[#allocation2 + $0x660] sm:$0xf]  ;;  %v16720_v42 = vld [vmem:[#allocation2 + $0x678] sm:$0xf0] }
 0xa0b   :  { %10861 = vmatpush.bf16.msrb.mxu0 %v15722_v37  ;;  %v15530_v37 = vor.u32 %v16790_v51, %v15529_v57  ;;  %v14831_v57 = vld [vmem:[#allocation2 + $0x334] sm:$0xf0]  ;;  %v14689_v51 = vld [vmem:[#allocation2 + $0x200] sm:$0xf]  ;;  %v16692_v36 = vld [vmem:[#allocation2 + $0x598] sm:$0xf0] }
 0xa0c   :  { %10889 = vmatpush.bf16.msrb.mxu3 %v14550_v11  ;;  %v14942_v11 = vor.u32 %v16643_v25, %v14941_v49  ;;  %v16612_v49 = vld [vmem:[#allocation2 + $0x31c] sm:$0xf]  ;;  %v15250_v25 = vor.u32 %v16720_v42, %v15249_v62 }
 0xa0d   :  { %10853 = vmatpush.bf16.msra.mxu1 %v15358_v22  ;;  %v14774_v22 = vor.u32 %v16601_v6, %v14773_v26  ;;  %v14834_v17 = vor.u32 %v16612_v49, %v14831_v57  ;;  %v16846_v26 = vld [vmem:[#allocation2 + $0xa68] sm:$0xf0]  ;;  %v16584_v62 = vld [vmem:[#allocation2 + $0x23c] sm:$0xf]  ;;  %v15669_v49 = vld [vmem:[#allocation2 + $0x9a8] sm:$0xf] }
 0xa0e   :  { %10913 = vmatpush.bf16.msrb.mxu2 %v15054_v40  ;;  %v16783_v40 = vld [vmem:[#allocation2 + $0x870] sm:$0xf0]  ;;  %v16825_v57 = vld [vmem:[#allocation2 + $0x9c0] sm:$0xf0] }
 0xa0f   :  { %10862 = vmatpush.bf16.msrb.mxu0 %v15694_v31  ;;  %v15502_v31 = vor.u32 %v16783_v40, %v15501_v43  ;;  %v14661_v43 = vld [vmem:[#allocation2 + $0x1c8] sm:$0xf]  ;;  %v16573_v40 = vld [vmem:[#allocation2 + $0x1e0] sm:$0xf0] }
 0xa10   :  { %10890 = vmatpush.bf16.msrb.mxu3 %v14522_v44  ;;  %v15305_v44 = vld [vmem:[#allocation2 + $0x6d0] sm:$0xf] }
 0xa11   :  { %10854 = vmatpush.bf16.msra.mxu1 %v15330_v32 }
 0xa12   :  { %10914 = vmatpush.bf16.msrb.mxu2 %v15026_v14  ;;  %v14885_v14 = vld [vmem:[#allocation2 + $0x388] sm:$0xf] }
 0xa13   :  { %10863 = vmatpush.bf16.msrb.mxu0 %v15666_v13  ;;  %v15306_v13 = vor.u32 %v16734_v28, %v15305_v44  ;;  %v14886_v32 = vor.u32 %v16629_v38, %v14885_v14  ;;  %v14662_v44 = vor.u32 %v16573_v40, %v14661_v43  ;;  %v15361_v28 = vld [vmem:[#allocation2 + $0x740] sm:$0xf]  ;;  %v16598_v14 = vld [vmem:[#allocation2 + $0x2ac] sm:$0xf]  ;;  %v16839_v38 = vld [vmem:[#allocation2 + $0xa30] sm:$0xf0] }
 0xa14   :  { %10891 = vmatpush.bf16.msrb.mxu3 %v14494_v29  ;;  %10855 = vmatmul.bf16.vlgmr.msra.gmra.mxu1 %v23723_v34  ;;  %v15474_v29 = vor.u32 %v16776_v0, %v15473_v35  ;;  %v14775_v35 = vld [vmem:[#allocation2 + $0x2c4] sm:$0xf0]  ;;  %v15194_v0 = vor.u32 %v16706_v61, %v15193_v20  ;;  %v15641_v43 = vld [vmem:[#allocation2 + $0x970] sm:$0xf]  ;;  %v16818_v40 = vld [vmem:[#allocation2 + $0x988] sm:$0xf0] }
 0xa15   :  { %10899 = vmatpush.bf16.msrb.mxu1 %v14858_v45  ;;  %15800 = vmatmul.msk.bf16.vlgmr.msra.gmra.mxu2 %vm2300_vm0, %v23725_v50  ;;  %v16619_v45 = vld [vmem:[#allocation2 + $0x354] sm:$0xf]  ;;  %v14778_v55 = vor.u32 %v16598_v14, %v14775_v35  ;;  %v14663_v20 = vld [vmem:[#allocation2 + $0x1e4] sm:$0xf0]  ;;  %v16556_v61 = vld [vmem:[#allocation2 + $0x15c] sm:$0xf] }
 0xa16   :  { %10915 = vmatpush.bf16.msrb.mxu2 %v14998_v1  ;;  %v14746_v1 = vor.u32 %v16594_v56, %v14745_v18  ;;  %v15165_v56 = vld [vmem:[#allocation2 + $0x5b8] sm:$0xf]  ;;  %v15755_v14 = vld [vmem:[#allocation2 + $0xa6c] sm:$0xf0] }
 0xa17   :  { %10864 = vmatpush.bf16.msrb.mxu0 %v15638_v63  ;;  %v14859_v63 = vld [vmem:[#allocation2 + $0x36c] sm:$0xf0]  ;;  %v15613_v35 = vld [vmem:[#allocation2 + $0x938] sm:$0xf] }
 0xa18   :  { %10892 = vmatpush.bf16.msrb.mxu3 %v14466_v16  ;;  %v15446_v16 = vor.u32 %v16769_v27, %v15445_v10  ;;  %v14862_v54 = vor.u32 %v16619_v45, %v14859_v63  ;;  %v15083_v10 = vld [vmem:[#allocation2 + $0x52c] sm:$0xf0]  ;;  %v15697_v45 = vld [vmem:[#allocation2 + $0x9e0] sm:$0xf] }
 0xa19   :  { %10900 = vmatpush.bf16.msrb.mxu1 %v14830_v7  ;;  %v16762_v7 = vld [vmem:[#allocation2 + $0x7c8] sm:$0xf0] }
 0xa1a   :  { %10916 = vmatpush.bf16.msrb.mxu2 %v14970_v15  ;;  %v15417_v15 = vld [vmem:[#allocation2 + $0x7b0] sm:$0xf] }
 0xa1b   :  { %10865 = vmatpush.bf16.msrb.mxu0 %v15610_v8  ;;  %v16580_v8 = vld [vmem:[#allocation2 + $0x218] sm:$0xf0]  ;;  %v15418_v19 = vor.u32 %v16762_v7, %v15417_v15  ;;  %v15055_v15 = vld [vmem:[#allocation2 + $0x4f4] sm:$0xf0]  ;;  %v15138_v7 = vor.u32 %v16692_v36, %v15137_v41 }
 0xa1c   :  { %10893 = vmatpush.bf16.msrb.mxu3 %v14438_v30  ;;  %v16713_v30 = vld [vmem:[#allocation2 + $0x640] sm:$0xf0]  ;;  %v14690_v24 = vor.u32 %v16580_v8, %v14689_v51  ;;  %v15109_v51 = vld [vmem:[#allocation2 + $0x548] sm:$0xf] }
 0xa1d   :  { %10901 = vmatpush.bf16.msrb.mxu1 %v14802_v39  ;;  %v16605_v39 = vld [vmem:[#allocation2 + $0x2e4] sm:$0xf] }
 0xa1e   :  { %10917 = vmatpush.bf16.msrb.mxu2 %v14942_v11  ;;  %v16755_v11 = vld [vmem:[#allocation2 + $0x790] sm:$0xf0]  ;;  %v16685_v8 = vld [vmem:[#allocation2 + $0x560] sm:$0xf0] }
 0xa1f   :  { %10894 = vmatmul.bf16.vlgmr.msrb.gmra.mxu3 %v23707_v12  ;;  %10866 = vmatpush.bf16.msrb.mxu0 %v15582_v46  ;;  %v15222_v46 = vor.u32 %v16713_v30, %v15221_v3  ;;  %v16577_v3 = vld [vmem:[#allocation2 + $0x204] sm:$0xf]  ;;  %v16563_v30 = vld [vmem:[#allocation2 + $0x194] sm:$0xf] }
 0xa20   :  { %10938 = vmatpush.bf16.msra.mxu3 %v15530_v37  ;;  %v15389_v37 = vld [vmem:[#allocation2 + $0x778] sm:$0xf] }
 0xa21   :  { %10902 = vmatpush.bf16.msrb.mxu1 %v14774_v22  ;;  %v15390_v6 = vor.u32 %v16755_v11, %v15389_v37  ;;  %v15754_v22 = vor.u32 %v16846_v26, %v15753_v53  ;;  %v14691_v37 = vld [vmem:[#allocation2 + $0x21c] sm:$0xf0]  ;;  %v16661_v11 = vld [vmem:[#allocation2 + $0x4a4] sm:$0xf]  ;;  %v16570_v53 = vld [vmem:[#allocation2 + $0x1cc] sm:$0xf] }
 0xa22   :  { %10918 = vmatpush.bf16.msrb.mxu2 %v14914_v33  ;;  %v16748_v33 = vld [vmem:[#allocation2 + $0x758] sm:$0xf0]  ;;  %v14694_v26 = vor.u32 %v16577_v3, %v14691_v37  ;;  %v16633_v3 = vld [vmem:[#allocation2 + $0x3c4] sm:$0xf]  ;;  %v15671_v37 = vld [vmem:[#allocation2 + $0x9c4] sm:$0xf0] }
 0xa23   :  { %10867 = vmatpush.bf16.msrb.mxu0 %v15554_v4  ;;  %v15725_v4 = vld [vmem:[#allocation2 + $0xa18] sm:$0xf]  ;;  %v15362_v18 = vor.u32 %v16748_v33, %v15361_v28  ;;  %v16654_v28 = vld [vmem:[#allocation2 + $0x46c] sm:$0xf]  ;;  %v14999_v33 = vld [vmem:[#allocation2 + $0x484] sm:$0xf0] }
 0xa24   :  { %10939 = vmatpush.bf16.msra.mxu3 %v15502_v31  ;;  %v14806_v31 = vor.u32 %v16605_v39, %v14803_v52  ;;  %v15726_v59 = vor.u32 %v16839_v38, %v15725_v4  ;;  %v15027_v39 = vld [vmem:[#allocation2 + $0x4bc] sm:$0xf0]  ;;  %v15110_v52 = vor.u32 %v16685_v8, %v15109_v51  ;;  %v14666_v38 = vor.u32 %v16570_v53, %v14663_v20  ;;  %v16535_v51 = vld [vmem:[#allocation2 + $0xb4] sm:$0xf]  ;;  %v14523_v8 = vld [vmem:[#allocation2 + $0xcc] sm:$0xf0] }
 0xa25   :  { %10903 = vmatpush.bf16.msrb.mxu1 %v14746_v1  ;;  %v16675_v1 = vld [vmem:[#allocation2 + $0x514] sm:$0xf] }
 0xa26   :  { %10919 = vmatpush.bf16.msrb.mxu2 %v14886_v32  ;;  %10868 = vmatmul.bf16.vlgmr.msrb.gmra.mxu0 %v23718_v23  ;;  %v14747_v32 = vld [vmem:[#allocation2 + $0x28c] sm:$0xf0]  ;;  %v16815_v20 = vld [vmem:[#allocation2 + $0x974] sm:$0xf] }
 0xa27   :  { %10925 = vmatpush.bf16.msra.mxu0 %v15306_v13  ;;  %v16699_v13 = vld [vmem:[#allocation2 + $0x5d0] sm:$0xf0] }
 0xa28   :  { %10940 = vmatpush.bf16.msra.mxu3 %v15474_v29  ;;  %v16741_v29 = vld [vmem:[#allocation2 + $0x720] sm:$0xf0]  ;;  %v15166_v27 = vor.u32 %v16699_v13, %v15165_v56  ;;  %v14579_v13 = vld [vmem:[#allocation2 + $0x13c] sm:$0xf0] }
 0xa29   :  { %10920 = vmatmul.bf16.vlgmr.msrb.gmra.mxu2 %v23709_v60  ;;  %10904 = vmatpush.bf16.msrb.mxu1 %v14718_v5  ;;  %v15334_v63 = vor.u32 %v16741_v29, %v15333_v47  ;;  %v16668_v5 = vld [vmem:[#allocation2 + $0x4dc] sm:$0xf]  ;;  %v16549_v56 = vld [vmem:[#allocation2 + $0x124] sm:$0xf]  ;;  %v16647_v29 = vld [vmem:[#allocation2 + $0x434] sm:$0xf] }
 0xa2a   :  { %10971 = vmatpush.bf16.msra.mxu2 %v15782_v58  ;;  %v16832_v58 = vld [vmem:[#allocation2 + $0x9f8] sm:$0xf0] }
 0xa2b   :  { %10926 = vmatpush.bf16.msra.mxu0 %v15278_v2  ;;  %v14750_v2 = vor.u32 %v16591_v21, %v14747_v32  ;;  %v15698_v42 = vor.u32 %v16832_v58, %v15697_v45  ;;  %v14971_v21 = vld [vmem:[#allocation2 + $0x44c] sm:$0xf0]  ;;  %v15727_v32 = vld [vmem:[#allocation2 + $0xa34] sm:$0xf0]  ;;  %v16542_v58 = vld [vmem:[#allocation2 + $0xec] sm:$0xf] }
 0xa2c   :  { %10941 = vmatpush.bf16.msra.mxu3 %v15446_v16  ;;  %v15086_v16 = vor.u32 %v16675_v1, %v15083_v10  ;;  %v15585_v1 = vld [vmem:[#allocation2 + $0x900] sm:$0xf]  ;;  %v16804_v10 = vld [vmem:[#allocation2 + $0x918] sm:$0xf0]  ;;  %v14974_v45 = vor.u32 %v16647_v29, %v14971_v21  ;;  %v15615_v29 = vld [vmem:[#allocation2 + $0x954] sm:$0xf0] }
 0xa2d   :  { %10905 = vmatpush.bf16.msrb.mxu1 %v14690_v24  ;;  %v15670_v24 = vor.u32 %v16825_v57, %v15669_v49  ;;  %v15586_v36 = vor.u32 %v16804_v10, %v15585_v1  ;;  %v15307_v49 = vld [vmem:[#allocation2 + $0x6ec] sm:$0xf0]  ;;  %v16514_v10 = vld [vmem:[#allocation2 + $0xc] sm:$0xf] }
 0xa2e   :  { %10990 = vmatpush.bf16.msrb.mxu2 %v14862_v54  ;;  %v14719_v54 = vld [vmem:[#allocation2 + $0x254] sm:$0xf0] }
 0xa2f   :  { %10927 = vmatpush.bf16.msra.mxu0 %v15250_v25  ;;  %v14722_v25 = vor.u32 %v16584_v62, %v14719_v54  ;;  %v16829_v62 = vld [vmem:[#allocation2 + $0x9e4] sm:$0xf]  ;;  %v15557_v54 = vld [vmem:[#allocation2 + $0x8c8] sm:$0xf] }
 0xa30   :  { %10942 = vmatpush.bf16.msra.mxu3 %v15418_v19  ;;  %v15058_v19 = vor.u32 %v16668_v5, %v15055_v15  ;;  %v16797_v5 = vld [vmem:[#allocation2 + $0x8e0] sm:$0xf0] }
 0xa31   :  { %10906 = vmatpush.bf16.msrb.mxu1 %v14662_v44  ;;  %v15642_v44 = vor.u32 %v16818_v40, %v15641_v43  ;;  %v16528_v40 = vld [vmem:[#allocation2 + $0x7c] sm:$0xf] }
 0xa32   :  { %10991 = vmatpush.bf16.msrb.mxu2 %v14834_v17  ;;  %v14635_v17 = vld [vmem:[#allocation2 + $0x1ac] sm:$0xf0] }
 0xa33   :  { %10928 = vmatpush.bf16.msra.mxu0 %v15222_v46  ;;  %v14638_v46 = vor.u32 %v16563_v30, %v14635_v17  ;;  %v14915_v30 = vld [vmem:[#allocation2 + $0x3dc] sm:$0xf0] }
 0xa34   :  { %10943 = vmatpush.bf16.msra.mxu3 %v15390_v6  ;;  %10907 = vmatmul.bf16.vlgmr.msrb.gmra.mxu1 %v23702_v9  ;;  %v15030_v6 = vor.u32 %v16661_v11, %v15027_v39  ;;  %v14526_v11 = vor.u32 %v16535_v51, %v14523_v8  ;;  %v16724_v39 = vld [vmem:[#allocation2 + $0x69c] sm:$0xf]  ;;  %v14918_v43 = vor.u32 %v16633_v3, %v14915_v30  ;;  %v16609_v51 = vld [vmem:[#allocation2 + $0x300] sm:$0xf0]  ;;  %v16794_v3 = vld [vmem:[#allocation2 + $0x8cc] sm:$0xf] }
 0xa35   :  { %10951 = vmatpush.bf16.msra.mxu1 %v15754_v22  ;;  %v16843_v22 = vld [vmem:[#allocation2 + $0xa54] sm:$0xf]  ;;  %v16780_v8 = vld [vmem:[#allocation2 + $0x85c] sm:$0xf]  ;;  %v15559_v30 = vld [vmem:[#allocation2 + $0x8e4] sm:$0xf0] }
 0xa36   :  { %10992 = vmatpush.bf16.msrb.mxu2 %v14806_v31  ;;  %v14607_v31 = vld [vmem:[#allocation2 + $0x174] sm:$0xf0] }
 0xa37   :  { %10929 = vmatpush.bf16.msra.mxu0 %v15194_v0  ;;  %v16811_v0 = vld [vmem:[#allocation2 + $0x950] sm:$0xf0]  ;;  %v14610_v4 = vor.u32 %v16556_v61, %v14607_v31  ;;  %v15643_v31 = vld [vmem:[#allocation2 + $0x98c] sm:$0xf0] }
 0xa38   :  { %10944 = vmatpush.bf16.msra.mxu3 %v15362_v18  ;;  %v15002_v18 = vor.u32 %v16654_v28, %v14999_v33  ;;  %v15614_v47 = vor.u32 %v16811_v0, %v15613_v35  ;;  %v15783_v28 = vld [vmem:[#allocation2 + $0xaa4] sm:$0xf0]  ;;  %v16521_v0 = vld [vmem:[#allocation2 + $0x44] sm:$0xf] }
 0xa39   :  { %10952 = vmatpush.bf16.msra.mxu1 %v15726_v59  ;;  %15801 = vmatmul.msk.bf16.vlgmr.msra.gmra.mxu2 %vm2300_vm0, %v23725_v50  ;;  %v16836_v59 = vld [vmem:[#allocation2 + $0xa1c] sm:$0xf] }
 0xa3a   :  { %10993 = vmatpush.bf16.msrb.mxu2 %v14778_v55  ;;  %v15758_v55 = vor.u32 %v16843_v22, %v15755_v14  ;;  %v15730_v41 = vor.u32 %v16836_v59, %v15727_v32  ;;  %v16717_v22 = vld [vmem:[#allocation2 + $0x664] sm:$0xf]  ;;  %v15251_v14 = vld [vmem:[#allocation2 + $0x67c] sm:$0xf0]  ;;  %v16710_v59 = vld [vmem:[#allocation2 + $0x62c] sm:$0xf] }
 0xa3b   :  { %10930 = vmatpush.bf16.msra.mxu0 %v15166_v27  ;;  %v14582_v27 = vor.u32 %v16549_v56, %v14579_v13  ;;  %v14865_v56 = vld [vmem:[#allocation2 + $0x358] sm:$0xf]  ;;  %v16623_v13 = vld [vmem:[#allocation2 + $0x370] sm:$0xf0]  ;;  %v15223_v32 = vld [vmem:[#allocation2 + $0x644] sm:$0xf0] }
 0xa3c   :  { %10945 = vmatpush.bf16.msra.mxu3 %v15334_v63  ;;  %v14551_v63 = vld [vmem:[#allocation2 + $0x104] sm:$0xf0]  ;;  %v14866_v1 = vor.u32 %v16623_v13, %v14865_v56  ;;  %v16721_v13 = vld [vmem:[#allocation2 + $0x680] sm:$0xf0] }
 0xa3d   :  { %10953 = vmatpush.bf16.msra.mxu1 %v15698_v42  ;;  %v15699_v42 = vld [vmem:[#allocation2 + $0x9fc] sm:$0xf0]  ;;  %v14554_v15 = vor.u32 %v16542_v58, %v14551_v63  ;;  %v16616_v63 = vld [vmem:[#allocation2 + $0x338] sm:$0xf0]  ;;  %v15257_v56 = vld [vmem:[#allocation2 + $0x668] sm:$0xf] }
 0xa3e   :  { %10994 = vmatpush.bf16.msrb.mxu2 %v14750_v2  ;;  %v16640_v2 = vld [vmem:[#allocation2 + $0x3fc] sm:$0xf] }
 0xa3f   :  { %10946 = vmatmul.bf16.vlgmr.msra.gmra.mxu3 %v23723_v34  ;;  %10931 = vmatpush.bf16.msra.mxu0 %v15138_v7  ;;  %v16731_v7 = vld [vmem:[#allocation2 + $0x6d4] sm:$0xf] }
 0xa40   :  { %11003 = vmatpush.bf16.msrb.mxu3 %v15086_v16  ;;  %v14943_v16 = vld [vmem:[#allocation2 + $0x414] sm:$0xf0]  ;;  %v15310_v17 = vor.u32 %v16731_v7, %v15307_v49  ;;  %v14809_v49 = vld [vmem:[#allocation2 + $0x2e8] sm:$0xf] }
 0xa41   :  { %10954 = vmatpush.bf16.msra.mxu1 %v15670_v24  ;;  %v14946_v57 = vor.u32 %v16640_v2, %v14943_v16  ;;  %v16822_v24 = vld [vmem:[#allocation2 + $0x9ac] sm:$0xf]  ;;  %v15226_v2 = vor.u32 %v16710_v59, %v15223_v32  ;;  %v16801_v16 = vld [vmem:[#allocation2 + $0x904] sm:$0xf] }
 0xa42   :  { %10995 = vmatpush.bf16.msrb.mxu2 %v14722_v25  ;;  %v15702_v25 = vor.u32 %v16829_v62, %v15699_v42  ;;  %v15674_v53 = vor.u32 %v16822_v24, %v15671_v37  ;;  %v15587_v62 = vld [vmem:[#allocation2 + $0x91c] sm:$0xf0]  ;;  %v16735_v24 = vld [vmem:[#allocation2 + $0x6f0] sm:$0xf0]  ;;  %v16696_v37 = vld [vmem:[#allocation2 + $0x5bc] sm:$0xf] }
 0xa43   :  { %10932 = vmatpush.bf16.msra.mxu0 %v15110_v52  ;;  %v15279_v52 = vld [vmem:[#allocation2 + $0x6b4] sm:$0xf0] }
 0xa44   :  { %11004 = vmatpush.bf16.msrb.mxu3 %v15058_v19  ;;  %v15558_v19 = vor.u32 %v16797_v5, %v15557_v54  ;;  %v15282_v61 = vor.u32 %v16724_v39, %v15279_v52  ;;  %v16703_v54 = vld [vmem:[#allocation2 + $0x5f4] sm:$0xf]  ;;  %v15195_v5 = vld [vmem:[#allocation2 + $0x60c] sm:$0xf0]  ;;  %v14810_v39 = vor.u32 %v16609_v51, %v14809_v49  ;;  %v14697_v51 = vld [vmem:[#allocation2 + $0x208] sm:$0xf] }
 0xa45   :  { %10955 = vmatpush.bf16.msra.mxu1 %v15642_v44  ;;  %v16850_v44 = vld [vmem:[#allocation2 + $0xa8c] sm:$0xf] }
 0xa46   :  { %10996 = vmatpush.bf16.msrb.mxu2 %v14694_v26  ;;  %10933 = vmatmul.bf16.vlgmr.msra.gmra.mxu0 %v23721_v48  ;;  %v16626_v26 = vld [vmem:[#allocation2 + $0x38c] sm:$0xf] }
 0xa47   :  { %10977 = vmatpush.bf16.msrb.mxu0 %v14638_v46  ;;  %v14495_v46 = vld [vmem:[#allocation2 + $0x94] sm:$0xf0] }
 0xa48   :  { %11005 = vmatpush.bf16.msrb.mxu3 %v15030_v6  ;;  %v14887_v6 = vld [vmem:[#allocation2 + $0x3a4] sm:$0xf0]  ;;  %v14498_v33 = vor.u32 %v16528_v40, %v14495_v46  ;;  %v14781_v40 = vld [vmem:[#allocation2 + $0x2b0] sm:$0xf]  ;;  %v16602_v46 = vld [vmem:[#allocation2 + $0x2c8] sm:$0xf0] }
 0xa49   :  { %10956 = vmatpush.bf16.msra.mxu1 %v15614_v47  ;;  %v14890_v35 = vor.u32 %v16626_v26, %v14887_v6  ;;  %v16808_v47 = vld [vmem:[#allocation2 + $0x93c] sm:$0xf]  ;;  %v16773_v6 = vld [vmem:[#allocation2 + $0x824] sm:$0xf] }
 0xa4a   :  { %10997 = vmatpush.bf16.msrb.mxu2 %v14666_v38  ;;  %v15646_v38 = vor.u32 %v16815_v20, %v15643_v31  ;;  %v15618_v58 = vor.u32 %v16808_v47, %v15615_v29  ;;  %v15475_v20 = vld [vmem:[#allocation2 + $0x83c] sm:$0xf0]  ;;  %v16728_v31 = vld [vmem:[#allocation2 + $0x6b8] sm:$0xf0]  ;;  %v16682_v29 = vld [vmem:[#allocation2 + $0x54c] sm:$0xf] }
 0xa4b   :  { %10978 = vmatpush.bf16.msrb.mxu0 %v14610_v4  ;;  %v14467_v4 = vld [vmem:[#allocation2 + $0x5c] sm:$0xf0]  ;;  %v23753_v47 = vld [vmem:[%s23918_s25] sm:$0x7f] }
 0xa4c   :  { %11006 = vmatpush.bf16.msrb.mxu3 %v15002_v18  ;;  %v15786_v18 = vor.u32 %v16850_v44, %v15783_v28  ;;  %v14470_v21 = vor.u32 %v16521_v0, %v14467_v4  ;;  %v16689_v44 = vld [vmem:[#allocation2 + $0x584] sm:$0xf]  ;;  %v15139_v28 = vld [vmem:[#allocation2 + $0x59c] sm:$0xf0]  ;;  %v16766_v0 = vld [vmem:[#allocation2 + $0x7ec] sm:$0xf] }
 0xa4d   :  { %10998 = vmatmul.bf16.vlgmr.msrb.gmra.mxu2 %v23702_v9  ;;  %10957 = vmatpush.bf16.msra.mxu1 %v15586_v36  ;;  %v15531_v36 = vld [vmem:[#allocation2 + $0x8ac] sm:$0xf0] }
 0xa4e   :  { %11042 = vmatpush.bf16.msra.mxu2 %v15758_v55  ;;  %v15254_v55 = vor.u32 %v16717_v22, %v15251_v14  ;;  %v15478_v22 = vor.u32 %v16773_v6, %v15475_v20  ;;  %v14753_v14 = vld [vmem:[#allocation2 + $0x278] sm:$0xf]  ;;  %v16574_v6 = vld [vmem:[#allocation2 + $0x1e8] sm:$0xf0]  ;;  %v16745_v20 = vld [vmem:[#allocation2 + $0x744] sm:$0xf] }
 0xa4f   :  { %10979 = vmatpush.bf16.msrb.mxu0 %v14582_v27  ;;  %v14439_v27 = vld [vmem:[#allocation2 + $0x24] sm:$0xf0] }
 0xa50   :  { %11007 = vmatpush.bf16.msrb.mxu3 %v14974_v45  ;;  %v14837_v45 = vld [vmem:[#allocation2 + $0x320] sm:$0xf]  ;;  %v14442_v42 = vor.u32 %v16514_v10, %v14439_v27  ;;  %v16567_v10 = vld [vmem:[#allocation2 + $0x1b0] sm:$0xf0] }
 0xa51   :  { %10958 = vmatpush.bf16.msra.mxu1 %v15558_v19  ;;  %v15198_v19 = vor.u32 %v16703_v54, %v15195_v5  ;;  %v16714_v54 = vld [vmem:[#allocation2 + $0x648] sm:$0xf0] }
 0xa52   :  { %11043 = vmatpush.bf16.msra.mxu2 %v15730_v41  ;;  %v16787_v41 = vld [vmem:[#allocation2 + $0x894] sm:$0xf] }
 0xa53   :  { %10980 = vmatpush.bf16.msrb.mxu0 %v14554_v15  ;;  %v14838_v15 = vor.u32 %v16616_v63, %v14837_v45  ;;  %v15534_v7 = vor.u32 %v16787_v41, %v15531_v36  ;;  %v14725_v45 = vld [vmem:[#allocation2 + $0x240] sm:$0xf]  ;;  %v15258_v63 = vor.u32 %v16721_v13, %v15257_v56  ;;  %v8923_v41 = vperm.slane %v23753_v47, 0 }
 0xa54   :  { %11008 = vmatpush.bf16.msrb.mxu3 %v14946_v57  ;;  %10959 = vmatmul.bf16.vlgmr.msra.gmra.mxu1 %v23718_v23  ;;  %v15590_v57 = vor.u32 %v16801_v16, %v15587_v62  ;;  %v15419_v16 = vld [vmem:[#allocation2 + $0x7cc] sm:$0xf0] }
 0xa55   :  { %11016 = vmatpush.bf16.msrb.mxu1 %v15310_v17  ;;  %v15313_v17 = vld [vmem:[#allocation2 + $0x6d8] sm:$0xf] }
 0xa56   :  { %11044 = vmatpush.bf16.msra.mxu2 %v15702_v25  ;;  %v15503_v25 = vld [vmem:[#allocation2 + $0x874] sm:$0xf0] }
 0xa57   :  { %10981 = vmatpush.bf16.msrb.mxu0 %v14526_v11  ;;  %v15167_v11 = vld [vmem:[#allocation2 + $0x5d4] sm:$0xf0]  ;;  %v15506_v52 = vor.u32 %v16780_v8, %v15503_v25  ;;  %v16581_v8 = vld [vmem:[#allocation2 + $0x220] sm:$0xf0] }
 0xa58   :  { %11009 = vmatpush.bf16.msrb.mxu3 %v14918_v43  ;;  %v15562_v43 = vor.u32 %v16794_v3, %v15559_v30  ;;  %v15170_v26 = vor.u32 %v16696_v37, %v15167_v11  ;;  %v16752_v3 = vld [vmem:[#allocation2 + $0x77c] sm:$0xf]  ;;  %v15391_v30 = vld [vmem:[#allocation2 + $0x794] sm:$0xf0]  ;;  %v16707_v11 = vld [vmem:[#allocation2 + $0x610] sm:$0xf0] }
 0xa59   :  { %11017 = vmatpush.bf16.msrb.mxu1 %v15282_v61  ;;  %v15285_v61 = vld [vmem:[#allocation2 + $0x6a0] sm:$0xf]  ;;  %v15201_v37 = vld [vmem:[#allocation2 + $0x5f8] sm:$0xf] }
 0xa5a   :  { %11045 = vmatpush.bf16.msra.mxu2 %v15674_v53  ;;  %v15314_v53 = vor.u32 %v16735_v24, %v15313_v17  ;;  %v15286_v4 = vor.u32 %v16728_v31, %v15285_v61  ;;  %v15202_v61 = vor.u32 %v16707_v11, %v15201_v37 }
 0xa5b   :  { %10982 = vmatpush.bf16.msrb.mxu0 %v14498_v33  ;;  %v14782_v33 = vor.u32 %v16602_v46, %v14781_v40  ;;  %v14585_v40 = vld [vmem:[#allocation2 + $0x128] sm:$0xf]  ;;  %v16553_v46 = vld [vmem:[#allocation2 + $0x140] sm:$0xf0] }
 0xa5c   :  { %11010 = vmatpush.bf16.msrb.mxu3 %v14890_v35  ;;  %v16595_v35 = vld [vmem:[#allocation2 + $0x290] sm:$0xf0] }
 0xa5d   :  { %11018 = vmatpush.bf16.msrb.mxu1 %v15254_v55  ;;  %v14754_v32 = vor.u32 %v16595_v35, %v14753_v14  ;;  %v15173_v14 = vld [vmem:[#allocation2 + $0x5c0] sm:$0xf]  ;;  %v16700_v35 = vld [vmem:[#allocation2 + $0x5d8] sm:$0xf0] }
 0xa5e   :  { %11046 = vmatpush.bf16.msra.mxu2 %v15646_v38  ;;  %v15142_v38 = vor.u32 %v16689_v44, %v15139_v28  ;;  %v15363_v44 = vld [vmem:[#allocation2 + $0x75c] sm:$0xf0]  ;;  %v15761_v28 = vld [vmem:[#allocation2 + $0xa58] sm:$0xf] }
 0xa5f   :  { %11011 = vmatmul.bf16.vlgmr.msrb.gmra.mxu3 %v23709_v60  ;;  %10983 = vmatpush.bf16.msrb.mxu0 %v14470_v21  ;;  %v15111_v21 = vld [vmem:[#allocation2 + $0x564] sm:$0xf0]  ;;  %v15366_v56 = vor.u32 %v16745_v20, %v15363_v44  ;;  %v16557_v44 = vld [vmem:[#allocation2 + $0x164] sm:$0xf] }
 0xa60   :  { %11062 = vmatpush.bf16.msra.mxu3 %v15786_v18  ;;  %v15447_v18 = vld [vmem:[#allocation2 + $0x804] sm:$0xf0]  ;;  %v15114_v36 = vor.u32 %v16682_v29, %v15111_v21 }
 0xa61   :  { %11019 = vmatpush.bf16.msrb.mxu1 %v15226_v2  ;;  %v15450_v27 = vor.u32 %v16766_v0, %v15447_v18  ;;  %v16759_v2 = vld [vmem:[#allocation2 + $0x7b4] sm:$0xf]  ;;  %v15335_v29 = vld [vmem:[#allocation2 + $0x724] sm:$0xf0] }
 0xa62   :  { %11047 = vmatpush.bf16.msra.mxu2 %v15618_v58  ;;  %v10726_v55 = vpop.f32.mrf.mxu3  ;;  %v16588_v58 = vld [vmem:[#allocation2 + $0x258] sm:$0xf0] }
 0xa63   :  { %10984 = vmatpush.bf16.msrb.mxu0 %v14442_v42  ;;  %v10739_v59 = vpop.f32.mrf.mxu0  ;;  %v15229_v42 = vld [vmem:[#allocation2 + $0x630] sm:$0xf]  ;;  %v14726_v5 = vor.u32 %v16588_v58, %v14725_v45 }
 0xa64   :  { %11081 = vmatpush.bf16.msrb.mxu3 %v14866_v1  ;;  %v14641_v1 = vld [vmem:[#allocation2 + $0x198] sm:$0xf] }
 0xa65   :  { %11020 = vmatpush.bf16.msrb.mxu1 %v15198_v19  ;;  %v14642_v62 = vor.u32 %v16567_v10, %v14641_v1  ;;  %v15230_v19 = vor.u32 %v16714_v54, %v15229_v42  ;;  %v15733_v1 = vld [vmem:[#allocation2 + $0xa20] sm:$0xf]  ;;  %v16840_v10 = vld [vmem:[#allocation2 + $0xa38] sm:$0xf0] }
 0xa66   :  { %11048 = vmatpush.bf16.msra.mxu2 %v15590_v57  ;;  %10985 = vmatmul.bf16.vlgmr.msrb.gmra.mxu0 %v23707_v12  ;;  %v15422_v57 = vor.u32 %v16759_v2, %v15419_v16  ;;  %v14529_v16 = vld [vmem:[#allocation2 + $0xb8] sm:$0xf]  ;;  %v15734_v54 = vor.u32 %v16840_v10, %v15733_v1  ;;  %v14587_v1 = vld [vmem:[#allocation2 + $0x144] sm:$0xf0]  ;;  %v14445_v10 = vld [vmem:[#allocation2 + $0x10] sm:$0xf] }
 0xa67   :  { %11029 = vmatpush.bf16.msra.mxu0 %v15534_v7  ;;  %v16560_v7 = vld [vmem:[#allocation2 + $0x178] sm:$0xf0] }
 0xa68   :  { %11082 = vmatpush.bf16.msrb.mxu3 %v14838_v15  ;;  %v14613_v15 = vld [vmem:[#allocation2 + $0x160] sm:$0xf]  ;;  %v10713_v49 = vpop.f32.mrf.mxu2 }
 0xa69   :  { %11021 = vmatpush.bf16.msrb.mxu1 %v15170_v26  ;;  %v10714_v25 = vadd.f32 %v10713_v49, %v8923_v41  ;;  %v14614_v24 = vor.u32 %v16560_v7, %v14613_v15  ;;  %v14669_v26 = vld [vmem:[#allocation2 + $0x1d0] sm:$0xf]  ;;  %v15089_v41 = vld [vmem:[#allocation2 + $0x518] sm:$0xf]  ;;  %v16686_v49 = vld [vmem:[#allocation2 + $0x568] sm:$0xf0] }
 0xa6a   :  { %11049 = vmatpush.bf16.msra.mxu2 %v15562_v43  ;;  %v10728_v17 = vpop.f32.mrf.mxu3  ;;  %v14698_v43 = vor.u32 %v16581_v8, %v14697_v51  ;;  %v14670_v0 = vor.u32 %v16574_v6, %v14669_v26  ;;  %v16833_v51 = vld [vmem:[#allocation2 + $0xa00] sm:$0xf0] }
 0xa6b   :  { %11030 = vmatpush.bf16.msra.mxu0 %v15506_v52  ;;  %v10741_v52 = vpop.f32.mrf.mxu0  ;;  %v14501_v17 = vld [vmem:[#allocation2 + $0x80] sm:$0xf] }
 0xa6c   :  { %11083 = vmatpush.bf16.msrb.mxu3 %v14810_v39  ;;  %v10727_v39 = vadd.f32 %v10726_v55, %v10714_v25  ;;  %v16738_v55 = vld [vmem:[#allocation2 + $0x70c] sm:$0xf]  ;;  %v15061_v25 = vld [vmem:[#allocation2 + $0x4e0] sm:$0xf] }
 0xa6d   :  { %11050 = vmatmul.bf16.vlgmr.msra.gmra.mxu2 %v23718_v23  ;;  %11022 = vmatpush.bf16.msrb.mxu1 %v15142_v38  ;;  %v16546_v38 = vld [vmem:[#allocation2 + $0x108] sm:$0xf0]  ;;  %v15338_v42 = vor.u32 %v16738_v55, %v15335_v29 }
 0xa6e   :  { %11107 = vmatpush.bf16.msrb.mxu2 %v15314_v53  ;;  %v15394_v53 = vor.u32 %v16752_v3, %v15391_v30  ;;  %v10740_v31 = vadd.f32 %v10739_v59, %v10727_v39  ;;  %v15174_v59 = vor.u32 %v16700_v35, %v15173_v14  ;;  %v16564_v3 = vld [vmem:[#allocation2 + $0x19c] sm:$0xf]  ;;  %v14643_v30 = vld [vmem:[#allocation2 + $0x1b4] sm:$0xf0]  ;;  %v14473_v14 = vld [vmem:[#allocation2 + $0x48] sm:$0xf] }
 0xa6f   :  { %11031 = vmatpush.bf16.msra.mxu0 %v15478_v22  ;;  %15802 = vmatmul.msk.bf16.vlgmr.msra.gmra.mxu3 %vm2300_vm0, %v23725_v50  ;;  %v14586_v22 = vor.u32 %v16553_v46, %v14585_v40  ;;  %v15677_v46 = vld [vmem:[#allocation2 + $0x9b0] sm:$0xf]  ;;  %v14646_v6 = vor.u32 %v16564_v3, %v14643_v30  ;;  %v16525_v35 = vld [vmem:[#allocation2 + $0x60] sm:$0xf0]  ;;  %v15509_v3 = vld [vmem:[#allocation2 + $0x860] sm:$0xf] }
 0xa70   :  { %11084 = vmatpush.bf16.msrb.mxu3 %v14782_v33  ;;  %v16847_v33 = vld [vmem:[#allocation2 + $0xa70] sm:$0xf0]  ;;  %v10715_v18 = vpop.f32.mrf.mxu2  ;;  %v14474_v29 = vor.u32 %v16525_v35, %v14473_v14  ;;  %v16784_v30 = vld [vmem:[#allocation2 + $0x878] sm:$0xf0]  ;;  %v14921_v14 = vld [vmem:[#allocation2 + $0x3c8] sm:$0xf] }
 0xa71   :  { %11023 = vmatpush.bf16.msrb.mxu1 %v15114_v36  ;;  %v15762_v13 = vor.u32 %v16847_v33, %v15761_v28  ;;  %v10752_v21 = vpop.f32.mrf.mxu1  ;;  %v16679_v36 = vld [vmem:[#allocation2 + $0x530] sm:$0xf0]  ;;  %v8924_v18 = vperm.slane %v23753_v47, 1 }
 0xa72   :  { %11108 = vmatpush.bf16.msrb.mxu2 %v15286_v4  ;;  %v14557_v4 = vld [vmem:[#allocation2 + $0xf0] sm:$0xf]  ;;  %v10778_v45 = vpop.f32.mrf.mxu3  ;;  %v15090_v7 = vor.u32 %v16679_v36, %v15089_v41  ;;  %v16791_v41 = vld [vmem:[#allocation2 + $0x8b0] sm:$0xf0] }
 0xa73   :  { %11032 = vmatpush.bf16.msra.mxu0 %v15450_v27  ;;  %v10753_v27 = vadd.f32 %v10752_v21, %v10740_v31  ;;  %v14558_v58 = vor.u32 %v16546_v38, %v14557_v4  ;;  %v10791_v2 = vpop.f32.mrf.mxu0  ;;  %v16665_v31 = vld [vmem:[#allocation2 + $0x4c0] sm:$0xf0]  ;;  %v15005_v21 = vld [vmem:[#allocation2 + $0x470] sm:$0xf] }
 0xa74   :  { %11085 = vmatpush.bf16.msrb.mxu3 %v14754_v32  ;;  %11024 = vmatmul.bf16.vlgmr.msrb.gmra.mxu1 %v23721_v48  ;;  %v15145_v32 = vld [vmem:[#allocation2 + $0x588] sm:$0xf] }
 0xa75   :  { %11068 = vmatpush.bf16.msra.mxu1 %v14642_v62  ;;  %v16539_v62 = vld [vmem:[#allocation2 + $0xd0] sm:$0xf0] }
 0xa76   :  { %11109 = vmatpush.bf16.msrb.mxu2 %v15258_v63  ;;  %v16693_v63 = vld [vmem:[#allocation2 + $0x5a0] sm:$0xf0]  ;;  %v14530_v8 = vor.u32 %v16539_v62, %v14529_v16  ;;  %v15621_v16 = vld [vmem:[#allocation2 + $0x940] sm:$0xf]  ;;  %v16812_v62 = vld [vmem:[#allocation2 + $0x958] sm:$0xf0] }
 0xa77   :  { %11033 = vmatpush.bf16.msra.mxu0 %v15422_v57  ;;  %v15146_v15 = vor.u32 %v16693_v63, %v15145_v32  ;;  %v15705_v57 = vld [vmem:[#allocation2 + $0x9e8] sm:$0xf]  ;;  %v16550_v32 = vld [vmem:[#allocation2 + $0x12c] sm:$0xf]  ;;  %v15537_v63 = vld [vmem:[#allocation2 + $0x898] sm:$0xf] }
 0xa78   :  { %11086 = vmatpush.bf16.msrb.mxu3 %v14726_v5  ;;  %v15117_v5 = vld [vmem:[#allocation2 + $0x550] sm:$0xf]  ;;  %v10765_v37 = vpop.f32.mrf.mxu2  ;;  %v15706_v11 = vor.u32 %v16833_v51, %v15705_v57  ;;  %v15538_v57 = vor.u32 %v16791_v41, %v15537_v63  ;;  %v16543_v51 = vld [vmem:[#allocation2 + $0xf4] sm:$0xf]  ;;  %v16630_v63 = vld [vmem:[#allocation2 + $0x3a8] sm:$0xf0] }
 0xa79   :  { %11069 = vmatpush.bf16.msra.mxu1 %v14614_v24  ;;  %v16532_v24 = vld [vmem:[#allocation2 + $0x98] sm:$0xf0]  ;;  %v10766_v39 = vadd.f32 %v10765_v37, %v10753_v27  ;;  %v10754_v52 = vpop.f32.mrf.mxu1  ;;  %v16518_v27 = vld [vmem:[#allocation2 + $0x28] sm:$0xf0]  ;;  %v15593_v37 = vld [vmem:[#allocation2 + $0x908] sm:$0xf] }
 0xa7a   :  { %11110 = vmatpush.bf16.msrb.mxu2 %v15230_v19  ;;  %v16672_v19 = vld [vmem:[#allocation2 + $0x4f8] sm:$0xf0]  ;;  %v10780_v26 = vpop.f32.mrf.mxu3  ;;  %v14502_v20 = vor.u32 %v16532_v24, %v14501_v17  ;;  %v14949_v52 = vld [vmem:[#allocation2 + $0x400] sm:$0xf] }
 0xa7b   :  { %11034 = vmatpush.bf16.msra.mxu0 %v15394_v53  ;;  %v15062_v40 = vor.u32 %v16672_v19, %v15061_v25  ;;  %v16826_v53 = vld [vmem:[#allocation2 + $0x9c8] sm:$0xf0]  ;;  %v10779_v28 = vadd.f32 %v10778_v45, %v10766_v39  ;;  %v10793_v33 = vpop.f32.mrf.mxu0  ;;  %v15622_v19 = vor.u32 %v16812_v62, %v15621_v16  ;;  %v15287_v16 = vld [vmem:[#allocation2 + $0x6bc] sm:$0xf0] }
 0xa7c   :  { %11087 = vmatpush.bf16.msrb.mxu3 %v14698_v43  ;;  %v15118_v43 = vor.u32 %v16686_v49, %v15117_v5  ;;  %v14590_v5 = vor.u32 %v16550_v32, %v14587_v1  ;;  %v16651_v49 = vld [vmem:[#allocation2 + $0x450] sm:$0xf0]  ;;  %v15565_v33 = vld [vmem:[#allocation2 + $0x8d0] sm:$0xf] }
 0xa7d   :  { %11070 = vmatpush.bf16.msra.mxu1 %v14586_v22  ;;  %v14615_v22 = vld [vmem:[#allocation2 + $0x17c] sm:$0xf0]  ;;  %v23762_v4 = vadd.f32 %v10791_v2, %v10779_v28  ;;  %v15453_v1 = vld [vmem:[#allocation2 + $0x7f0] sm:$0xf] }
 0xa7e   :  { %11111 = vmatpush.bf16.msrb.mxu2 %v15202_v61  ;;  %v15033_v61 = vld [vmem:[#allocation2 + $0x4a8] sm:$0xf]  ;;  %v14618_v55 = vor.u32 %v16557_v44, %v14615_v22  ;;  %v16798_v22 = vld [vmem:[#allocation2 + $0x8e8] sm:$0xf0] }
 0xa7f   :  { %11035 = vmatpush.bf16.msra.mxu0 %v15366_v56  ;;  %v15034_v38 = vor.u32 %v16665_v31, %v15033_v61  ;;  %v15649_v56 = vld [vmem:[#allocation2 + $0x978] sm:$0xf]  ;;  %v16777_v61 = vld [vmem:[#allocation2 + $0x840] sm:$0xf0]  ;;  %v15566_v32 = vor.u32 %v16798_v22, %v15565_v33 }
 0xa80   :  { %11088 = vmatpush.bf16.msrb.mxu3 %v14670_v0  ;;  %v15678_v0 = vor.u32 %v16826_v53, %v15677_v46  ;;  %v10767_v45 = vpop.f32.mrf.mxu2  ;;  %v16536_v46 = vld [vmem:[#allocation2 + $0xbc] sm:$0xf]  ;;  %v14531_v53 = vld [vmem:[#allocation2 + $0xd4] sm:$0xf0] }
 0xa81   :  { %11071 = vmatpush.bf16.msra.mxu1 %v14558_v58  ;;  %v10804_v36 = vpop.f32.mrf.mxu1 }
 0xa82   :  { %11112 = vmatpush.bf16.msrb.mxu2 %v15174_v59  ;;  %v16658_v59 = vld [vmem:[#allocation2 + $0x488] sm:$0xf0] }
 0xa83   :  { %11089 = vmatmul.bf16.vlgmr.msrb.gmra.mxu3 %v23702_v9  ;;  %11036 = vmatpush.bf16.msra.mxu0 %v15338_v42  ;;  %v15006_v2 = vor.u32 %v16658_v59, %v15005_v21  ;;  %v10805_v42 = vadd.f32 %v10804_v36, %v8924_v18  ;;  %v10817_v25 = vpop.f32.mrf.mxu0  ;;  %v16732_v18 = vld [vmem:[#allocation2 + $0x6dc] sm:$0xf]  ;;  %v16522_v36 = vld [vmem:[#allocation2 + $0x4c] sm:$0xf] }
 0xa84   :  { %11133 = vmatpush.bf16.msra.mxu3 %v15762_v13  ;;  %v16819_v13 = vld [vmem:[#allocation2 + $0x990] sm:$0xf0] }
 0xa85   :  { %11072 = vmatpush.bf16.msra.mxu1 %v14530_v8  ;;  %v15650_v58 = vor.u32 %v16819_v13, %v15649_v56  ;;  %v14559_v8 = vld [vmem:[#allocation2 + $0x10c] sm:$0xf0]  ;;  %v10818_v17 = vadd.f32 %v10817_v25, %v10805_v42  ;;  %v15315_v56 = vld [vmem:[#allocation2 + $0x6f4] sm:$0xf0]  ;;  %v14475_v42 = vld [vmem:[#allocation2 + $0x64] sm:$0xf0] }
 0xa86   :  { %11113 = vmatpush.bf16.msrb.mxu2 %v15146_v15  ;;  %11037 = vmatmul.bf16.vlgmr.msra.gmra.mxu0 %v23723_v34  ;;  %v14446_v15 = vor.u32 %v16518_v27, %v14445_v10  ;;  %v14562_v39 = vor.u32 %v16543_v51, %v14559_v8  ;;  %v16770_v10 = vld [vmem:[#allocation2 + $0x808] sm:$0xf0]  ;;  %v15318_v45 = vor.u32 %v16732_v18, %v15315_v56  ;;  %v16515_v8 = vld [vmem:[#allocation2 + $0x14] sm:$0xf]  ;;  %v16620_v25 = vld [vmem:[#allocation2 + $0x35c] sm:$0xf] }
 0xa87   :  { %11094 = vmatpush.bf16.msrb.mxu0 %v15090_v7  ;;  %v14977_v7 = vld [vmem:[#allocation2 + $0x438] sm:$0xf]  ;;  %v15454_v62 = vor.u32 %v16770_v10, %v15453_v1  ;;  %v16749_v18 = vld [vmem:[#allocation2 + $0x760] sm:$0xf0]  ;;  %v16704_v10 = vld [vmem:[#allocation2 + $0x5fc] sm:$0xf] }
 0xa88   :  { %11134 = vmatpush.bf16.msra.mxu3 %v15734_v54  ;;  %v10843_v54 = vpop.f32.mrf.mxu3  ;;  %v14978_v24 = vor.u32 %v16651_v49, %v14977_v7  ;;  %v10830_v26 = vpop.f32.mrf.mxu2  ;;  %v15425_v7 = vld [vmem:[#allocation2 + $0x7b8] sm:$0xf]  ;;  %v16763_v49 = vld [vmem:[#allocation2 + $0x7d0] sm:$0xf0] }
 0xa89   :  { %11073 = vmatpush.bf16.msra.mxu1 %v14502_v20  ;;  %v15481_v20 = vld [vmem:[#allocation2 + $0x828] sm:$0xf]  ;;  %v10831_v31 = vadd.f32 %v10830_v26, %v10818_v17  ;;  %v10806_v44 = vpop.f32.mrf.mxu1  ;;  %v14867_v17 = vld [vmem:[#allocation2 + $0x374] sm:$0xf0]  ;;  %v16756_v26 = vld [vmem:[#allocation2 + $0x798] sm:$0xf0] }
 0xa8a   :  { %11114 = vmatpush.bf16.msrb.mxu2 %v15118_v43  ;;  %v16644_v43 = vld [vmem:[#allocation2 + $0x418] sm:$0xf0]  ;;  %v15482_v13 = vor.u32 %v16777_v61, %v15481_v20  ;;  %v16711_v44 = vld [vmem:[#allocation2 + $0x634] sm:$0xf] }
 0xa8b   :  { %11095 = vmatpush.bf16.msrb.mxu0 %v15062_v40  ;;  %v15510_v40 = vor.u32 %v16784_v30, %v15509_v3  ;;  %v14950_v28 = vor.u32 %v16644_v43, %v14949_v52  ;;  %v10844_v21 = vadd.f32 %v10843_v54, %v10831_v31  ;;  %v10819_v59 = vpop.f32.mrf.mxu0  ;;  %v16854_v54 = vld [vmem:[#allocation2 + $0xaa8] sm:$0xf0]  ;;  %v14478_v3 = vor.u32 %v16522_v36, %v14475_v42  ;;  %v14447_v43 = vld [vmem:[#allocation2 + $0x2c] sm:$0xf0]  ;;  %v16613_v31 = vld [vmem:[#allocation2 + $0x324] sm:$0xf] }
 0xa8c   :  { %11135 = vmatpush.bf16.msra.mxu3 %v15706_v11  ;;  %v16805_v11 = vld [vmem:[#allocation2 + $0x920] sm:$0xf0]  ;;  %v15426_v52 = vor.u32 %v16763_v49, %v15425_v7  ;;  %v14450_v61 = vor.u32 %v16515_v8, %v14447_v43  ;;  %v14811_v59 = vld [vmem:[#allocation2 + $0x304] sm:$0xf0]  ;;  %v16599_v42 = vld [vmem:[#allocation2 + $0x2b4] sm:$0xf] }
 0xa8d   :  { %11115 = vmatmul.bf16.vlgmr.msrb.gmra.mxu2 %v23721_v48  ;;  %11074 = vmatpush.bf16.msra.mxu1 %v14474_v29  ;;  %v14503_v29 = vld [vmem:[#allocation2 + $0x9c] sm:$0xf0]  ;;  %v16697_v49 = vld [vmem:[#allocation2 + $0x5c4] sm:$0xf]  ;;  %v16767_v8 = vld [vmem:[#allocation2 + $0x7f4] sm:$0xf] }
 0xa8e   :  { %11159 = vmatpush.bf16.msra.mxu2 %v14646_v6  ;;  %v15594_v6 = vor.u32 %v16805_v11, %v15593_v37  ;;  %v15259_v37 = vld [vmem:[#allocation2 + $0x684] sm:$0xf0]  ;;  %v11341_v11 = vsub.f32 0.0, %v23762_v4  ;;  %v14839_v4 = vld [vmem:[#allocation2 + $0x33c] sm:$0xf0] }
 0xa8f   :  { %11096 = vmatpush.bf16.msrb.mxu0 %v15034_v38  ;;  %v16637_v38 = vld [vmem:[#allocation2 + $0x3e0] sm:$0xf0]  ;;  %v16592_v43 = vld [vmem:[#allocation2 + $0x27c] sm:$0xf] }
 0xa90   :  { %11136 = vmatpush.bf16.msra.mxu3 %v15678_v0  ;;  %v10845_v35 = vpop.f32.mrf.mxu3  ;;  %v14534_v0 = vor.u32 %v16536_v46, %v14531_v53  ;;  %v14922_v27 = vor.u32 %v16637_v38, %v14921_v14  ;;  %v15539_v46 = vld [vmem:[#allocation2 + $0x8b4] sm:$0xf0]  ;;  %v15397_v53 = vld [vmem:[#allocation2 + $0x780] sm:$0xf]  ;;  %v15231_v14 = vld [vmem:[#allocation2 + $0x64c] sm:$0xf0] }
 0xa91   :  { %11075 = vmatpush.bf16.msra.mxu1 %v14446_v15  ;;  %v10832_v15 = vpop.f32.mrf.mxu2  ;;  %v15398_v22 = vor.u32 %v16756_v26, %v15397_v53  ;;  %v16781_v35 = vld [vmem:[#allocation2 + $0x864] sm:$0xf]  ;;  %v15369_v38 = vld [vmem:[#allocation2 + $0x748] sm:$0xf]  ;;  %v16690_v53 = vld [vmem:[#allocation2 + $0x58c] sm:$0xf] }
 0xa92   :  { %11160 = vmatpush.bf16.msra.mxu2 %v14618_v55  ;;  %v16529_v55 = vld [vmem:[#allocation2 + $0x84] sm:$0xf]  ;;  %v15370_v1 = vor.u32 %v16749_v18, %v15369_v38  ;;  %v15147_v26 = vld [vmem:[#allocation2 + $0x5a4] sm:$0xf0] }
 0xa93   :  { %11097 = vmatpush.bf16.msrb.mxu0 %v15006_v2  ;;  %v14506_v41 = vor.u32 %v16529_v55, %v14503_v29  ;;  %v16725_v2 = vld [vmem:[#allocation2 + $0x6a4] sm:$0xf]  ;;  %v15234_v29 = vor.u32 %v16711_v44, %v15231_v14  ;;  %v15150_v14 = vor.u32 %v16690_v53, %v15147_v26  ;;  %v15343_v53 = vld [vmem:[#allocation2 + $0x72c] sm:$0xf0] }
 0xa94   :  { %11137 = vmatpush.bf16.msra.mxu3 %v15650_v58  ;;  %11076 = vmatmul.bf16.vlgmr.msra.gmra.mxu1 %v23707_v12  ;;  %v14893_v58 = vld [vmem:[#allocation2 + $0x390] sm:$0xf]  ;;  %v15290_v51 = vor.u32 %v16725_v2, %v15287_v16  ;;  %v16676_v2 = vld [vmem:[#allocation2 + $0x51c] sm:$0xf]  ;;  %v15091_v16 = vld [vmem:[#allocation2 + $0x534] sm:$0xf0] }
 0xa95   :  { %11120 = vmatpush.bf16.msrb.mxu1 %v15538_v57  ;;  %v14894_v57 = vor.u32 %v16630_v63, %v14893_v58  ;;  %v15483_v58 = vld [vmem:[#allocation2 + $0x844] sm:$0xf0]  ;;  %v15341_v63 = vld [vmem:[#allocation2 + $0x710] sm:$0xf] }
 0xa96   :  { %11161 = vmatpush.bf16.msra.mxu2 %v14590_v5  ;;  %v15789_v5 = vld [vmem:[#allocation2 + $0xa90] sm:$0xf] }
 0xa97   :  { %11098 = vmatpush.bf16.msrb.mxu0 %v14978_v24  ;;  %v15790_v30 = vor.u32 %v16854_v54, %v15789_v5  ;;  %v16718_v24 = vld [vmem:[#allocation2 + $0x66c] sm:$0xf]  ;;  %v14783_v5 = vld [vmem:[#allocation2 + $0x2cc] sm:$0xf0] }
 0xa98   :  { %11138 = vmatpush.bf16.msra.mxu3 %v15622_v19  ;;  %v10856_v19 = vpop.f32.mrf.mxu1  ;;  %v15262_v20 = vor.u32 %v16718_v24, %v15259_v37  ;;  %v16669_v24 = vld [vmem:[#allocation2 + $0x4e4] sm:$0xf]  ;;  %v15063_v37 = vld [vmem:[#allocation2 + $0x4fc] sm:$0xf0]  ;;  %v14593_v26 = vld [vmem:[#allocation2 + $0x130] sm:$0xf] }
 0xa99   :  { %11121 = vmatpush.bf16.msrb.mxu1 %v15510_v40  ;;  %v16788_v40 = vld [vmem:[#allocation2 + $0x89c] sm:$0xf]  ;;  %v10882_v56 = vpop.f32.mrf.mxu2 }
 0xa9a   :  { %11162 = vmatpush.bf16.msra.mxu2 %v14562_v39  ;;  %v23768_v39 = vadd.f32 %v10856_v19, %v10844_v21  ;;  %v15542_v33 = vor.u32 %v16788_v40, %v15539_v46  ;;  %v16606_v21 = vld [vmem:[#allocation2 + $0x2ec] sm:$0xf]  ;;  %v14755_v40 = vld [vmem:[#allocation2 + $0x294] sm:$0xf0] }
 0xa9b   :  { %11099 = vmatpush.bf16.msrb.mxu0 %v14950_v28  ;;  %v11348_v28 = vmul.f32 1.442695, %v11341_v11  ;;  %v14814_v36 = vor.u32 %v16606_v21, %v14811_v59  ;;  %v14758_v44 = vor.u32 %v16592_v43, %v14755_v40  ;;  %v14649_v59 = vld [vmem:[#allocation2 + $0x1a0] sm:$0xf] }
 0xa9c   :  { %11139 = vmatpush.bf16.msra.mxu3 %v15594_v6  ;;  %v14870_v6 = vor.u32 %v16620_v25, %v14867_v17  ;;  %v15455_v25 = vld [vmem:[#allocation2 + $0x80c] sm:$0xf0]  ;;  %v14786_v17 = vor.u32 %v16599_v42, %v14783_v5  ;;  %v16746_v42 = vld [vmem:[#allocation2 + $0x74c] sm:$0xf] }
 0xa9d   :  { %11122 = vmatpush.bf16.msrb.mxu1 %v15482_v13  ;;  %v14842_v13 = vor.u32 %v16613_v31, %v14839_v4  ;;  %16869 = vpow2.f32 %v11348_v28  ;;  %v15458_v46 = vor.u32 %v16767_v8, %v15455_v25  ;;  %v16760_v31 = vld [vmem:[#allocation2 + $0x7bc] sm:$0xf]  ;;  %v15427_v4 = vld [vmem:[#allocation2 + $0x7d4] sm:$0xf0]  ;;  %v16662_v28 = vld [vmem:[#allocation2 + $0x4ac] sm:$0xf] }
 0xa9e   :  { %11163 = vmatpush.bf16.msra.mxu2 %v14534_v0  ;;  %v15511_v0 = vld [vmem:[#allocation2 + $0x87c] sm:$0xf0]  ;;  %v15430_v18 = vor.u32 %v16760_v31, %v15427_v4  ;;  %v14979_v8 = vld [vmem:[#allocation2 + $0x454] sm:$0xf0] }
 0xa9f   :  { %11100 = vmatpush.bf16.msrb.mxu0 %v14922_v27  ;;  %v15203_v27 = vld [vmem:[#allocation2 + $0x614] sm:$0xf0] }
 0xaa0   :  { %11140 = vmatpush.bf16.msra.mxu3 %v15566_v32  ;;  %v10858_v55 = vpop.f32.mrf.mxu1  ;;  %v15514_v32 = vor.u32 %v16781_v35, %v15511_v0  ;;  %v14727_v35 = vld [vmem:[#allocation2 + $0x25c] sm:$0xf0]  ;;  %v16683_v0 = vld [vmem:[#allocation2 + $0x554] sm:$0xf] }
 0xaa1   :  { %11123 = vmatpush.bf16.msrb.mxu1 %v15454_v62  ;;  %v15206_v62 = vor.u32 %v16704_v10, %v15203_v27  ;;  %v15399_v55 = vld [vmem:[#allocation2 + $0x79c] sm:$0xf0] }
 0xaa2   :  { %11164 = vmatpush.bf16.msra.mxu2 %v14506_v41  ;;  %v16742_v41 = vld [vmem:[#allocation2 + $0x728] sm:$0xf0]  ;;  %v23773_v54 = vpop.f32.mrf.mxu3 }
 0xaa3   :  { %11141 = vmatmul.bf16.vlgmr.msra.gmra.mxu3 %v23718_v23  ;;  %11101 = vmatpush.bf16.msrb.mxu0 %v14894_v57  ;;  %v15342_v7 = vor.u32 %v16742_v41, %v15341_v63  ;;  %v15175_v57 = vld [vmem:[#allocation2 + $0x5dc] sm:$0xf0]  ;;  %v16870_v19 = vpop.eup %16869  ;;  %v8925_v63 = vperm.slane %v23753_v47, 2 }
 0xaa4   :  { %11198 = vmatpush.bf16.msrb.mxu3 %v15318_v45  ;;  %v16774_v45 = vld [vmem:[#allocation2 + $0x82c] sm:$0xf] }
 0xaa5   :  { %11124 = vmatpush.bf16.msrb.mxu1 %v15426_v52  ;;  %v15486_v15 = vor.u32 %v16774_v45, %v15483_v58  ;;  %v15178_v52 = vor.u32 %v16697_v49, %v15175_v57  ;;  %v16655_v45 = vld [vmem:[#allocation2 + $0x474] sm:$0xf]  ;;  %v15007_v58 = vld [vmem:[#allocation2 + $0x48c] sm:$0xf0]  ;;  %v16561_v49 = vld [vmem:[#allocation2 + $0x180] sm:$0xf0]  ;;  %v10896_v47 = vadd.f32 %v23773_v54, %v8925_v63 }
 0xaa6   :  { %11165 = vmatpush.bf16.msra.mxu2 %v14478_v3  ;;  %11102 = vmatmul.bf16.vlgmr.msrb.gmra.mxu0 %v23709_v60  ;;  %v10869_v3 = vpop.f32.mrf.mxu0  ;;  %v15010_v5 = vor.u32 %v16655_v45, %v15007_v58  ;;  %v16830_v63 = vld [vmem:[#allocation2 + $0x9ec] sm:$0xf] }
 0xaa7   :  { %11153 = vmatpush.bf16.msra.mxu0 %v15790_v30  ;;  %v10884_v30 = vpop.f32.mrf.mxu2  ;;  %v10870_v11 = vadd.f32 %v10869_v3, %v23768_v39  ;;  %v15035_v39 = vld [vmem:[#allocation2 + $0x4c4] sm:$0xf0]  ;;  %v14671_v3 = vld [vmem:[#allocation2 + $0x1ec] sm:$0xf0] }
 0xaa8   :  { %11199 = vmatpush.bf16.msrb.mxu3 %v15290_v51  ;;  %v15094_v51 = vor.u32 %v16676_v2, %v15091_v16  ;;  %v15038_v21 = vor.u32 %v16662_v28, %v15035_v39  ;;  %v14699_v2 = vld [vmem:[#allocation2 + $0x224] sm:$0xf0]  ;;  %v16680_v28 = vld [vmem:[#allocation2 + $0x538] sm:$0xf0] }
 0xaa9   :  { %11125 = vmatpush.bf16.msrb.mxu1 %v15398_v22 }
 0xaaa   :  { %11166 = vmatpush.bf16.msra.mxu2 %v14450_v61  ;;  %v15066_v61 = vor.u32 %v16669_v24, %v15063_v37  ;;  %v10897_v38 = vpop.f32.mrf.mxu3  ;;  %v16739_v37 = vld [vmem:[#allocation2 + $0x714] sm:$0xf] }
 0xaab   :  { %11172 = vmatpush.bf16.msrb.mxu0 %v14870_v6  ;;  %v23776_v6 = vadd.f32 1.0, %v16870_v19  ;;  %v16571_v19 = vld [vmem:[#allocation2 + $0x1d4] sm:$0xf]  ;;  %v16837_v38 = vld [vmem:[#allocation2 + $0xa24] sm:$0xf] }
 0xaac   :  { %11200 = vmatpush.bf16.msrb.mxu3 %v15262_v20  ;;  %v10883_v20 = vadd.f32 %v10882_v56, %v10870_v11  ;;  %v15119_v56 = vld [vmem:[#allocation2 + $0x56c] sm:$0xf0]  ;;  %v16844_v11 = vld [vmem:[#allocation2 + $0xa5c] sm:$0xf]  ;;  %v14674_v4 = vor.u32 %v16571_v19, %v14671_v3  ;;  %v16823_v19 = vld [vmem:[#allocation2 + $0x9b4] sm:$0xf] }
 0xaad   :  { %11167 = vmatmul.bf16.vlgmr.msra.gmra.mxu2 %v23707_v12  ;;  %11126 = vmatpush.bf16.msrb.mxu1 %v15370_v1  ;;  %16871 = vrcp.f32 %v23776_v6  ;;  %v15122_v41 = vor.u32 %v16683_v0, %v15119_v56  ;;  %v15679_v3 = vld [vmem:[#allocation2 + $0x9cc] sm:$0xf0]  ;;  %vm11374_vm5 = vweird.f32 %v23776_v6 }
 0xaae   :  { %11211 = vmatpush.bf16.msrb.mxu2 %v15542_v33  ;;  %v16585_v33 = vld [vmem:[#allocation2 + $0x244] sm:$0xf]  ;;  %v11342_v22 = vsub.f32 0.0, %v10883_v20  ;;  %v10871_v1 = vpop.f32.mrf.mxu0  ;;  %v16554_v20 = vld [vmem:[#allocation2 + $0x148] sm:$0xf0] }
 0xaaf   :  { %11173 = vmatpush.bf16.msrb.mxu0 %v14842_v13  ;;  %v16753_v13 = vld [vmem:[#allocation2 + $0x784] sm:$0xf]  ;;  %v10921_v10 = vpop.f32.mrf.mxu2  ;;  %v14730_v27 = vor.u32 %v16585_v33, %v14727_v35  ;;  %v15346_v35 = vor.u32 %v16739_v37, %v15343_v53  ;;  %v14594_v0 = vor.u32 %v16554_v20, %v14593_v26  ;;  %v11380_v37 = vand.u32 2147483648, %v23776_v6 }
 0xab0   :  { %11201 = vmatpush.bf16.msrb.mxu3 %v15234_v29  ;;  %v11350_v29 = vmul.f32 1.442695, %v11342_v22  ;;  %v15402_v16 = vor.u32 %v16753_v13, %v15399_v55  ;;  %v16641_v33 = vld [vmem:[#allocation2 + $0x404] sm:$0xf]  ;;  %v14951_v22 = vld [vmem:[#allocation2 + $0x41c] sm:$0xf0] }
 0xab1   :  { %11127 = vmatpush.bf16.msrb.mxu1 %v15342_v7  ;;  %v14621_v7 = vld [vmem:[#allocation2 + $0x168] sm:$0xf]  ;;  %v10908_v30 = vpop.f32.mrf.mxu1  ;;  %v14565_v13 = vld [vmem:[#allocation2 + $0xf8] sm:$0xf]  ;;  %v16547_v55 = vld [vmem:[#allocation2 + $0x110] sm:$0xf0] }
 0xab2   :  { %11212 = vmatpush.bf16.msrb.mxu2 %v15514_v32  ;;  %v16568_v32 = vld [vmem:[#allocation2 + $0x1b8] sm:$0xf0]  ;;  %16873 = vpow2.f32 %v11350_v29  ;;  %v14622_v24 = vor.u32 %v16561_v49, %v14621_v7  ;;  %v10909_v40 = vadd.f32 %v10908_v30, %v10896_v47  ;;  %v14566_v58 = vor.u32 %v16547_v55, %v14565_v13  ;;  %v15041_v7 = vld [vmem:[#allocation2 + $0x4b0] sm:$0xf]  ;;  %v16666_v49 = vld [vmem:[#allocation2 + $0x4c8] sm:$0xf0] }
 0xab3   :  { %11174 = vmatpush.bf16.msrb.mxu0 %v14814_v36  ;;  %v16578_v36 = vld [vmem:[#allocation2 + $0x20c] sm:$0xf]  ;;  %v23783_v25 = vpop.eup %16871  ;;  %v14895_v47 = vld [vmem:[#allocation2 + $0x3ac] sm:$0xf0]  ;;  %v11378_v13 = vand.u32 2147483647, %v23776_v6 }
 0xab4   :  { %11202 = vmatpush.bf16.msrb.mxu3 %v15206_v62  ;;  %11128 = vmatmul.bf16.vlgmr.msrb.gmra.mxu1 %v23723_v34  ;;  %v14650_v62 = vor.u32 %v16568_v32, %v14649_v59  ;;  %v14702_v57 = vor.u32 %v16578_v36, %v14699_v2  ;;  %v11370_v54 = vmul.f32 %v23783_v25, %v23776_v6  ;;  %v15069_v59 = vld [vmem:[#allocation2 + $0x4e8] sm:$0xf]  ;;  %v16673_v32 = vld [vmem:[#allocation2 + $0x500] sm:$0xf0]  ;;  %v14537_v2 = vld [vmem:[#allocation2 + $0xc0] sm:$0xf]  ;;  %vm11375_vm2 = vweird.f32 %v23783_v25 }
 0xab5   :  { %11185 = vmatpush.bf16.msra.mxu1 %v15094_v51  ;;  %v16648_v51 = vld [vmem:[#allocation2 + $0x43c] sm:$0xf]  ;;  %v15070_v36 = vor.u32 %v16673_v32, %v15069_v59  ;;  %vm23817_vm6 = vmor %vm11374_vm5, %vm11375_vm2  ;;  %v16526_v59 = vld [vmem:[#allocation2 + $0x68] sm:$0xf0]  ;;  %v11381_v32 = vor.u32 1.1754944e-38, %v11380_v37  ;;  %vm11379_vm10 = vcmp.eq.f32.partialorder %v11378_v13, 8.507059e+37 }
 0xab6   :  { %11213 = vmatpush.bf16.msrb.mxu2 %v15486_v15  ;;  %15803 = vmatmul.msk.bf16.vlgmr.msra.gmra.mxu0 %vm2300_vm0, %v23725_v50  ;;  %v15371_v15 = vld [vmem:[#allocation2 + $0x764] sm:$0xf0]  ;;  %v11371_v29 = vsub.f32 1.0, %v11370_v54  ;;  %v14985_v6 = vld [vmem:[#allocation2 + $0x440] sm:$0xf]  ;;  %vm11487_vm5 = vcmask 1045508  }
 0xab7   :  { %11175 = vmatpush.bf16.msrb.mxu0 %v14786_v17  ;;  %v15374_v17 = vor.u32 %v16746_v42, %v15371_v15  ;;  %v10923_v31 = vpop.f32.mrf.mxu2 }
 0xab8   :  { %11203 = vmatpush.bf16.msrb.mxu3 %v15178_v52  ;;  %v15763_v52 = vld [vmem:[#allocation2 + $0xa74] sm:$0xf0]  ;;  %v16874_v43 = vpop.eup %16873  ;;  %v11372_v42 = vmul.f32 %v23783_v25, %v11371_v29  ;;  %v15682_v31 = vor.u32 %v16823_v19, %v15679_v3 }
 0xab9   :  { %11186 = vmatpush.bf16.msra.mxu1 %v15066_v61  ;;  %v23788_v61 = vadd.f32 1.0, %v16874_v43  ;;  %v15766_v39 = vor.u32 %v16844_v11, %v15763_v52  ;;  %v10910_v45 = vpop.f32.mrf.mxu1  ;;  %v15042_v43 = vor.u32 %v16666_v49, %v15041_v7  ;;  %v15623_v7 = vld [vmem:[#allocation2 + $0x95c] sm:$0xf0]  ;;  %v14453_v49 = vld [vmem:[#allocation2 + $0x18] sm:$0xf] }
 0xaba   :  { %11214 = vmatpush.bf16.msrb.mxu2 %v15458_v46  ;;  %v14982_v46 = vor.u32 %v16648_v51, %v14979_v8  ;;  %v11373_v53 = vadd.f32 %v23783_v25, %v11372_v42 }
 0xabb   :  { %11176 = vmatpush.bf16.msrb.mxu0 %v14758_v44  ;;  %v15097_v44 = vld [vmem:[#allocation2 + $0x520] sm:$0xf]  ;;  %16875 = vrcp.f32 %v23788_v61  ;;  %v11395_v26 = vand.u32 2147483648, %v23788_v61  ;;  %vm11389_vm7 = vweird.f32 %v23788_v61 }
 0xabc   :  { %11204 = vmatpush.bf16.msrb.mxu3 %v15150_v14  ;;  %v23791_v14 = vadd.f32 %v10921_v10, %v10909_v40  ;;  %v15098_v56 = vor.u32 %v16680_v28, %v15097_v44  ;;  %v16634_v10 = vld [vmem:[#allocation2 + $0x3cc] sm:$0xf]  ;;  %v14509_v40 = vld [vmem:[#allocation2 + $0x88] sm:$0xf]  ;;  %v16659_v44 = vld [vmem:[#allocation2 + $0x490] sm:$0xf0] }
 0xabd   :  { %11187 = vmatpush.bf16.msra.mxu1 %v15038_v21  ;;  %v14954_v21 = vor.u32 %v16641_v33, %v14951_v22  ;;  %v14873_v22 = vld [vmem:[#allocation2 + $0x360] sm:$0xf] }
 0xabe   :  { %11215 = vmatpush.bf16.msrb.mxu2 %v15430_v18  ;;  %v15735_v18 = vld [vmem:[#allocation2 + $0xa3c] sm:$0xf0] }
 0xabf   :  { %11177 = vmatpush.bf16.msrb.mxu0 %v14730_v27  ;;  %v15738_v1 = vor.u32 %v16837_v38, %v15735_v18  ;;  %v14923_v27 = vld [vmem:[#allocation2 + $0x3e4] sm:$0xf0]  ;;  %v16816_v38 = vld [vmem:[#allocation2 + $0x97c] sm:$0xf]  ;;  %v15651_v18 = vld [vmem:[#allocation2 + $0x994] sm:$0xf0] }
 0xac0   :  { %11205 = vmatpush.bf16.msrb.mxu3 %v15122_v41  ;;  %v15707_v41 = vld [vmem:[#allocation2 + $0xa04] sm:$0xf0]  ;;  %v14926_v15 = vor.u32 %v16634_v10, %v14923_v27  ;;  %v11396_v10 = vor.u32 1.1754944e-38, %v11395_v26  ;;  %v16802_v26 = vld [vmem:[#allocation2 + $0x90c] sm:$0xf] }
 0xac1   :  { %11188 = vmatpush.bf16.msra.mxu1 %v15010_v5  ;;  %v23798_v5 = vpop.f32.mrf.mxu2  ;;  %v15710_v8 = vor.u32 %v16830_v63, %v15707_v41  ;;  %v15654_v41 = vor.u32 %v16816_v38, %v15651_v18  ;;  %v14789_v38 = vld [vmem:[#allocation2 + $0x2b8] sm:$0xf]  ;;  %v16603_v18 = vld [vmem:[#allocation2 + $0x2d0] sm:$0xf0] }
 0xac2   :  { %11216 = vmatpush.bf16.msrb.mxu2 %v15402_v16  ;;  %v16540_v16 = vld [vmem:[#allocation2 + $0xd8] sm:$0xf0]  ;;  %v23805_v52 = vpop.f32.mrf.mxu3 }
 0xac3   :  { %11206 = vmatmul.bf16.vlgmr.msrb.gmra.mxu3 %v23721_v48  ;;  %11178 = vmatpush.bf16.msrb.mxu0 %v14702_v57  ;;  %v16627_v57 = vld [vmem:[#allocation2 + $0x394] sm:$0xf]  ;;  %v14538_v30 = vor.u32 %v16540_v16, %v14537_v2  ;;  %v23809_v20 = vpop.f32.mrf.mxu0  ;;  %v16617_v2 = vld [vmem:[#allocation2 + $0x340] sm:$0xf0] }
 0xac4   :  { %11250 = vmatpush.bf16.msra.mxu3 %v14650_v62  ;;  %v23795_v62 = vpop.eup %16875  ;;  %v14898_v54 = vor.u32 %v16627_v57, %v14895_v47 }
 0xac5   :  { %11189 = vmatpush.bf16.msra.mxu1 %v14982_v46  ;;  %v11385_v51 = vmul.f32 %v23795_v62, %v23788_v61  ;;  %v16533_v46 = vld [vmem:[#allocation2 + $0xa0] sm:$0xf0]  ;;  %vm11390_vm4 = vweird.f32 %v23795_v62 }
 0xac6   :  { %11217 = vmatpush.bf16.msrb.mxu2 %v15374_v17  ;;  %v16851_v17 = vld [vmem:[#allocation2 + $0xa94] sm:$0xf]  ;;  %vm23826_vm8 = vmor %vm11389_vm7, %vm11390_vm4 }
 0xac7   :  { %11179 = vmatpush.bf16.msrb.mxu0 %v14674_v4  ;;  %v11386_v11 = vsub.f32 1.0, %v11385_v51  ;;  %v15013_v4 = vld [vmem:[#allocation2 + $0x478] sm:$0xf] }
 0xac8   :  { %11251 = vmatpush.bf16.msra.mxu3 %v14622_v24  ;;  %v15791_v24 = vld [vmem:[#allocation2 + $0xaac] sm:$0xf0]  ;;  %v15014_v29 = vor.u32 %v16659_v44, %v15013_v4 }
 0xac9   :  { %11190 = vmatpush.bf16.msra.mxu1 %v14954_v21  ;;  %v11387_v28 = vmul.f32 %v23795_v62, %v11386_v11  ;;  %v15794_v33 = vor.u32 %v16851_v17, %v15791_v24  ;;  %v14481_v21 = vld [vmem:[#allocation2 + $0x50] sm:$0xf]  ;;  %v10975_v27 = vpop.f32.mrf.mxu2  ;;  %v15545_v17 = vld [vmem:[#allocation2 + $0x8a0] sm:$0xf]  ;;  %v16792_v24 = vld [vmem:[#allocation2 + $0x8b8] sm:$0xf0] }
 0xaca   :  { %11218 = vmatpush.bf16.msrb.mxu2 %v15346_v35  ;;  %11180 = vmatmul.bf16.vlgmr.msrb.gmra.mxu0 %v23702_v9  ;;  %v16624_v35 = vld [vmem:[#allocation2 + $0x378] sm:$0xf0]  ;;  %v14482_v42 = vor.u32 %v16526_v59, %v14481_v21  ;;  %v15546_v4 = vor.u32 %v16792_v24, %v15545_v17  ;;  %v14929_v44 = vld [vmem:[#allocation2 + $0x3d0] sm:$0xf]  ;;  %v15321_v21 = vld [vmem:[#allocation2 + $0x6e0] sm:$0xf] }
 0xacb   :  { %11224 = vmatpush.bf16.msra.mxu0 %v15766_v39  ;;  %v11393_v39 = vand.u32 2147483647, %v23788_v61  ;;  %v11388_v55 = vadd.f32 %v23795_v62, %v11387_v28  ;;  %v14874_v45 = vor.u32 %v16624_v35, %v14873_v22  ;;  %v11377_v61 = vsel %vm23817_vm6, %v23783_v25, %v11373_v53  ;;  %v10949_v25 = vpop.f32.mrf.mxu3  ;;  %v10936_v19 = vpop.f32.mrf.mxu0  ;;  %v15517_v22 = vld [vmem:[#allocation2 + $0x868] sm:$0xf]  ;;  %v16785_v35 = vld [vmem:[#allocation2 + $0x880] sm:$0xf0] }
 0xacc   :  { %11252 = vmatpush.bf16.msra.mxu3 %v14594_v0  ;;  %v14510_v0 = vor.u32 %v16533_v46, %v14509_v40  ;;  %v11382_v47 = vsel %vm11379_vm10, %v11381_v32, %v11377_v61  ;;  %v16610_v40 = vld [vmem:[#allocation2 + $0x308] sm:$0xf0]  ;;  %v10935_v46 = vadd.f32 %v23809_v20, %v23791_v14  ;;  %v16795_v20 = vld [vmem:[#allocation2 + $0x8d4] sm:$0xf]  ;;  %v16736_v59 = vld [vmem:[#allocation2 + $0x6f8] sm:$0xf0] }
 0xacd   :  { %11219 = vmatmul.bf16.vlgmr.msrb.gmra.mxu2 %v23723_v34  ;;  %11191 = vmatpush.bf16.msra.mxu1 %v14926_v15  ;;  %v11392_v63 = vsel %vm23826_vm8, %v23795_v62, %v11388_v55  ;;  %vm11394_vm9 = vcmp.eq.f32.partialorder %v11393_v39, 8.507059e+37  ;;  %v16809_v15 = vld [vmem:[#allocation2 + $0x944] sm:$0xf]  ;;  %v16519_v62 = vld [vmem:[#allocation2 + $0x30] sm:$0xf0] }
 0xace   :  { %11276 = vmatpush.bf16.msra.mxu2 %v15098_v56  ;;  %v11397_v16 = vsel %vm11394_vm9, %v11396_v10, %v11392_v63  ;;  %v15626_v11 = vor.u32 %v16809_v15, %v15623_v7  ;;  %v14454_v53 = vor.u32 %v16519_v62, %v14453_v49  ;;  %v10948_v14 = vadd.f32 %v23805_v52, %v10935_v46  ;;  %v15567_v56 = vld [vmem:[#allocation2 + $0x8ec] sm:$0xf0]  ;;  %v14901_v10 = vld [vmem:[#allocation2 + $0x398] sm:$0xf]  ;;  %v16631_v27 = vld [vmem:[#allocation2 + $0x3b0] sm:$0xf0] }
 0xacf   :  { %11225 = vmatpush.bf16.msra.mxu0 %v15738_v1  ;;  %v11481_v57 = vrot.slane %v11397_v16, 6  ;;  %v14790_v1 = vor.u32 %v16603_v18, %v14789_v38  ;;  %v16778_v52 = vld [vmem:[#allocation2 + $0x848] sm:$0xf0]  ;;  %v16596_v61 = vld [vmem:[#allocation2 + $0x298] sm:$0xf0]  ;;  %v14902_v16 = vor.u32 %v16631_v27, %v14901_v10 }
 0xad0   :  { %11253 = vmatpush.bf16.msra.mxu3 %v14566_v58  ;;  %v16652_v58 = vld [vmem:[#allocation2 + $0x458] sm:$0xf0]  ;;  %v16729_v15 = vld [vmem:[#allocation2 + $0x6c0] sm:$0xf0]  ;;  %v16771_v25 = vld [vmem:[#allocation2 + $0x810] sm:$0xf0] }
 0xad1   :  { %11192 = vmatpush.bf16.msra.mxu1 %v14898_v54  ;;  %v14986_v51 = vor.u32 %v16652_v58, %v14985_v6  ;;  %v23838_v37 = vsel %vm2941_vm1, %v11382_v47, %v11481_v57  ;;  %v15595_v54 = vld [vmem:[#allocation2 + $0x924] sm:$0xf0]  ;;  %v23842_v28 = vpop.f32.mrf.mxu2  ;;  %v10960_v13 = vpop.f32.mrf.mxu1  ;;  %v15570_v6 = vor.u32 %v16795_v20, %v15567_v56  ;;  %v14761_v58 = vld [vmem:[#allocation2 + $0x280] sm:$0xf]  ;;  %v15461_v57 = vld [vmem:[#allocation2 + $0x7f8] sm:$0xf] }
 0xad2   :  { %11277 = vmatpush.bf16.msra.mxu2 %v15070_v36  ;;  %v14845_v36 = vld [vmem:[#allocation2 + $0x328] sm:$0xf]  ;;  %v10961_v32 = vadd.f32 %v10960_v13, %v10948_v14  ;;  %v16589_v62 = vld [vmem:[#allocation2 + $0x260] sm:$0xf0]  ;;  %v15265_v19 = vld [vmem:[#allocation2 + $0x670] sm:$0xf] }
 0xad3   :  { %11226 = vmatpush.bf16.msra.mxu0 %v15710_v8  ;;  %v14957_v8 = vld [vmem:[#allocation2 + $0x408] sm:$0xf]  ;;  %v14846_v3 = vor.u32 %v16617_v2, %v14845_v36  ;;  %v15797_v36 = vld [vmem:[#allocation2 + $0xa98] sm:$0xf]  ;;  %v16855_v2 = vld [vmem:[#allocation2 + $0xab0] sm:$0xf0] }
 0xad4   :  { %11254 = vmatpush.bf16.msra.mxu3 %v14538_v30  ;;  %11193 = vmatmul.bf16.vlgmr.msra.gmra.mxu1 %v23709_v60  ;;  %v16645_v30 = vld [vmem:[#allocation2 + $0x420] sm:$0xf0]  ;;  %v23847_v63 = vadd.f32 %v23798_v5, %v10961_v32  ;;  %v15433_v24 = vld [vmem:[#allocation2 + $0x7c0] sm:$0xf]  ;;  %v16708_v14 = vld [vmem:[#allocation2 + $0x618] sm:$0xf0] }
 0xad5   :  { %11244 = vmatpush.bf16.msrb.mxu1 %v15794_v33  ;;  %v16638_v33 = vld [vmem:[#allocation2 + $0x3e8] sm:$0xf0]  ;;  %v15769_v38 = vld [vmem:[#allocation2 + $0xa60] sm:$0xf]  ;;  %v16841_v32 = vld [vmem:[#allocation2 + $0xa40] sm:$0xf0] }
 0xad6   :  { %11278 = vmatpush.bf16.msra.mxu2 %v15042_v43  ;;  %v14817_v43 = vld [vmem:[#allocation2 + $0x2f0] sm:$0xf]  ;;  %v14930_v55 = vor.u32 %v16638_v33, %v14929_v44  ;;  %v15405_v44 = vld [vmem:[#allocation2 + $0x788] sm:$0xf]  ;;  %v16757_v33 = vld [vmem:[#allocation2 + $0x7a0] sm:$0xf0] }
 0xad7   :  { %11227 = vmatpush.bf16.msra.mxu0 %v15682_v31  ;;  %v14958_v31 = vor.u32 %v16645_v30, %v14957_v8  ;;  %v14818_v39 = vor.u32 %v16610_v40, %v14817_v43  ;;  %v15798_v8 = vor.u32 %v16855_v2, %v15797_v36  ;;  %v15462_v30 = vor.u32 %v16771_v25, %v15461_v57  ;;  %v14705_v43 = vld [vmem:[#allocation2 + $0x210] sm:$0xf]  ;;  %v16582_v40 = vld [vmem:[#allocation2 + $0x228] sm:$0xf0]  ;;  %v15209_v18 = vld [vmem:[#allocation2 + $0x600] sm:$0xf] }
 0xad8   :  { %11255 = vmatpush.bf16.msra.mxu3 %v14510_v0  ;;  %v15598_v0 = vor.u32 %v16802_v26, %v15595_v54  ;;  %v16715_v26 = vld [vmem:[#allocation2 + $0x650] sm:$0xf0]  ;;  %v15406_v20 = vor.u32 %v16757_v33, %v15405_v44  ;;  %v16701_v10 = vld [vmem:[#allocation2 + $0x5e0] sm:$0xf0]  ;;  %v15713_v36 = vld [vmem:[#allocation2 + $0x9f0] sm:$0xf] }
 0xad9   :  { %11263 = vmatpush.bf16.msra.mxu1 %v14874_v45  ;;  %v15489_v45 = vld [vmem:[#allocation2 + $0x830] sm:$0xf]  ;;  %v11001_v7 = vpop.f32.mrf.mxu2  ;;  %v10962_v47 = vpop.f32.mrf.mxu1  ;;  %v16834_v2 = vld [vmem:[#allocation2 + $0xa08] sm:$0xf0]  ;;  %v15685_v57 = vld [vmem:[#allocation2 + $0x9b8] sm:$0xf] }
 0xada   :  { %11279 = vmatpush.bf16.msra.mxu2 %v15014_v29  ;;  %v15518_v29 = vor.u32 %v16785_v35, %v15517_v22  ;;  %v15490_v49 = vor.u32 %v16778_v52, %v15489_v45  ;;  %v14677_v22 = vld [vmem:[#allocation2 + $0x1d8] sm:$0xf]  ;;  %v16575_v35 = vld [vmem:[#allocation2 + $0x1f0] sm:$0xf0]  ;;  %v15601_v44 = vld [vmem:[#allocation2 + $0x910] sm:$0xf] }
 0xadb   :  { %11228 = vmatpush.bf16.msra.mxu0 %v15654_v41  ;;  %v15322_v41 = vor.u32 %v16736_v59, %v15321_v21  ;;  %v14678_v56 = vor.u32 %v16575_v35, %v14677_v22  ;;  %v15210_v21 = vor.u32 %v16708_v14, %v15209_v18  ;;  %v15741_v59 = vld [vmem:[#allocation2 + $0xa28] sm:$0xf]  ;;  %v16827_v25 = vld [vmem:[#allocation2 + $0x9d0] sm:$0xf0] }
 0xadc   :  { %11256 = vmatpush.bf16.msra.mxu3 %v14482_v42  ;;  %v15293_v42 = vld [vmem:[#allocation2 + $0x6a8] sm:$0xf]  ;;  %v15742_v52 = vor.u32 %v16841_v32, %v15741_v59 }
 0xadd   :  { %11264 = vmatpush.bf16.msra.mxu1 %v14846_v3  ;;  %v15294_v5 = vor.u32 %v16729_v15, %v15293_v42  ;;  %v16722_v3 = vld [vmem:[#allocation2 + $0x688] sm:$0xf0] }
 0xade   :  { %11280 = vmatpush.bf16.msra.mxu2 %v14986_v51  ;;  %v14733_v51 = vld [vmem:[#allocation2 + $0x248] sm:$0xf]  ;;  %v15266_v46 = vor.u32 %v16722_v3, %v15265_v19  ;;  %v16694_v42 = vld [vmem:[#allocation2 + $0x5a8] sm:$0xf0] }
 0xadf   :  { %11229 = vmatpush.bf16.msra.mxu0 %v15626_v11  ;;  %v14734_v17 = vor.u32 %v16589_v62, %v14733_v51  ;;  %v16764_v11 = vld [vmem:[#allocation2 + $0x7d8] sm:$0xf0]  ;;  %v15125_v51 = vld [vmem:[#allocation2 + $0x558] sm:$0xf]  ;;  %v16687_v62 = vld [vmem:[#allocation2 + $0x570] sm:$0xf0] }
 0xae0   :  { %11257 = vmatpush.bf16.msra.mxu3 %v14454_v53  ;;  %v15237_v53 = vld [vmem:[#allocation2 + $0x638] sm:$0xf]  ;;  %v15126_v3 = vor.u32 %v16687_v62, %v15125_v51 }
 0xae1   :  { %11265 = vmatpush.bf16.msra.mxu1 %v14818_v39 }
 0xae2   :  { %11281 = vmatpush.bf16.msra.mxu2 %v14958_v31  ;;  %v23853_v54 = vpop.f32.mrf.mxu3  ;;  %v15434_v31 = vor.u32 %v16764_v11, %v15433_v24 }
 0xae3   :  { %11258 = vmatmul.bf16.vlgmr.msra.gmra.mxu3 %v23707_v12  ;;  %11230 = vmatpush.bf16.msra.mxu0 %v15598_v0  ;;  %v14762_v12 = vor.u32 %v16596_v61, %v14761_v58  ;;  %v23855_v39 = vpop.f32.mrf.mxu0  ;;  %v15238_v0 = vor.u32 %v16715_v26, %v15237_v53  ;;  %v15349_v58 = vld [vmem:[#allocation2 + $0x718] sm:$0xf]  ;;  %v16743_v61 = vld [vmem:[#allocation2 + $0x730] sm:$0xf0] }
 0xae4   :  { %11302 = vmatpush.bf16.msrb.mxu3 %v15546_v4  ;;  %15804 = vmatmul.msk.bf16.vlgmr.msrb.gmra.mxu1 %vm2300_vm0, %v23725_v50  ;;  %v14706_v4 = vor.u32 %v16582_v40, %v14705_v43  ;;  %v15350_v15 = vor.u32 %v16743_v61, %v15349_v58  ;;  %v15629_v40 = vld [vmem:[#allocation2 + $0x948] sm:$0xf] }
 0xae5   :  { %11266 = vmatpush.bf16.msra.mxu1 %v14790_v1  ;;  %v15181_v1 = vld [vmem:[#allocation2 + $0x5c8] sm:$0xf] }
 0xae6   :  { %11282 = vmatpush.bf16.msra.mxu2 %v14930_v55  ;;  %v15377_v55 = vld [vmem:[#allocation2 + $0x750] sm:$0xf] }
 0xae7   :  { %11231 = vmatpush.bf16.msra.mxu0 %v15570_v6 }
 0xae8   :  { %11303 = vmatpush.bf16.msrb.mxu3 %v15518_v29  ;;  %v16750_v29 = vld [vmem:[#allocation2 + $0x768] sm:$0xf0] }
 0xae9   :  { %11267 = vmatpush.bf16.msra.mxu1 %v14762_v12  ;;  %v15378_v45 = vor.u32 %v16750_v29, %v15377_v55 }
 0xaea   :  { %11283 = vmatpush.bf16.msra.mxu2 %v14902_v16  ;;  %11232 = vmatmul.bf16.vlgmr.msra.gmra.mxu0 %v23718_v23  ;;  %v11014_v27 = vpop.f32.mrf.mxu3  ;;  %v15153_v16 = vld [vmem:[#allocation2 + $0x590] sm:$0xf] }
 0xaeb   :  { %11289 = vmatpush.bf16.msrb.mxu0 %v15322_v41  ;;  %v10988_v6 = vpop.f32.mrf.mxu0  ;;  %v15182_v41 = vor.u32 %v16701_v10, %v15181_v1  ;;  %v15154_v12 = vor.u32 %v16694_v42, %v15153_v16 }
 0xaec   :  { %11304 = vmatpush.bf16.msrb.mxu3 %v15490_v49  ;;  %v15714_v49 = vor.u32 %v16834_v2, %v15713_v36 }
 0xaed   :  { %11284 = vmatmul.bf16.vlgmr.msra.gmra.mxu2 %v23709_v60  ;;  %11268 = vmatpush.bf16.msra.mxu1 %v14734_v17  ;;  %v16848_v60 = vld [vmem:[#allocation2 + $0xa78] sm:$0xf0] }
 0xaee   :  { %11335 = vmatpush.bf16.msrb.mxu2 %v15798_v8  ;;  %v15770_v13 = vor.u32 %v16848_v60, %v15769_v38  ;;  %v11343_v8 = vsub.f32 0.0, %v23847_v63  ;;  %v16820_v17 = vld [vmem:[#allocation2 + $0x998] sm:$0xf0]  ;;  %v16799_v38 = vld [vmem:[#allocation2 + $0x8f0] sm:$0xf0] }
 0xaef   :  { %11290 = vmatpush.bf16.msrb.mxu0 %v15294_v5 }
 0xaf0   :  { %11305 = vmatpush.bf16.msrb.mxu3 %v15462_v30  ;;  %v11051_v7 = vpop.f32.mrf.mxu2  ;;  %v15657_v30 = vld [vmem:[#allocation2 + $0x980] sm:$0xf]  ;;  %v11352_v24 = vmul.f32 1.442695, %v11343_v8 }
 0xaf1   :  { %11269 = vmatpush.bf16.msra.mxu1 %v14706_v4  ;;  %v11025_v47 = vpop.f32.mrf.mxu1  ;;  %v15658_v43 = vor.u32 %v16820_v17, %v15657_v30 }
 0xaf2   :  { %v11064_v19 = vpop.f32.mrf.mxu3  ;;  %16877 = vpow2.f32 %v11352_v24 }
 0xaf3   :  { %11291 = vmatpush.bf16.msrb.mxu0 %v15266_v46  ;;  %v16813_v46 = vld [vmem:[#allocation2 + $0x960] sm:$0xf0] }
 0xaf4   :  { %11306 = vmatpush.bf16.msrb.mxu3 %v15434_v31  ;;  %v15630_v4 = vor.u32 %v16813_v46, %v15629_v40 }
 0xaf5   :  { %11270 = vmatpush.bf16.msra.mxu1 %v14678_v56 }
 0xaf7   :  { %11292 = vmatpush.bf16.msrb.mxu0 %v15238_v0  ;;  %v15573_v0 = vld [vmem:[#allocation2 + $0x8d8] sm:$0xf] }
 0xaf8   :  { %11307 = vmatpush.bf16.msrb.mxu3 %v15406_v20  ;;  %11271 = vmatmul.bf16.vlgmr.msra.gmra.mxu1 %v23702_v9  ;;  %v23864_v9 = vld [vmem:[%s23918_s25] sm:$0x7f]  ;;  %v11053_v11 = vpop.f32.mrf.mxu2  ;;  %v16878_v22 = vpop.eup %16877  ;;  %v15574_v20 = vor.u32 %v16799_v38, %v15573_v0 }
 0xaf9   :  { %11315 = vmatpush.bf16.msrb.mxu1 %v15770_v13  ;;  %v8926_v5 = vperm.slane %v23864_v9, 3  ;;  %v11027_v26 = vpop.f32.mrf.mxu1  ;;  %v8927_v59 = vperm.slane %v23864_v9, 4 }
 0xafa   :  { %v11066_v31 = vpop.f32.mrf.mxu3 }
 0xafb   :  { %11293 = vmatpush.bf16.msrb.mxu0 %v15210_v21  ;;  %v10987_v63 = vadd.f32 %v23855_v39, %v8926_v5 }
 0xafc   :  { %11308 = vmatpush.bf16.msrb.mxu3 %v15378_v45 }
 0xafd   :  { %11316 = vmatpush.bf16.msrb.mxu1 %v15742_v52  ;;  %15805 = vmatmul.msk.bf16.vlgmr.msrb.gmra.mxu2 %vm2300_vm0, %v23725_v50  ;;  %v15686_v50 = vor.u32 %v16827_v25, %v15685_v57  ;;  %v11000_v53 = vadd.f32 %v23842_v28, %v10987_v63  ;;  %v11364_v28 = vadd.f32 1.0, %v16878_v22 }
 0xaff   :  { %11294 = vmatpush.bf16.msrb.mxu0 %v15182_v41  ;;  %v11013_v33 = vadd.f32 %v23853_v54, %v11000_v53  ;;  %16879 = vrcp.f32 %v11364_v28  ;;  %v11410_v42 = vand.u32 2147483648, %v11364_v28  ;;  %vm11404_vm11 = vweird.f32 %v11364_v28 }
 0xb00   :  { %11309 = vmatpush.bf16.msrb.mxu3 %v15350_v15  ;;  %v11408_v15 = vand.u32 2147483647, %v11364_v28 }
 0xb01   :  { %11317 = vmatpush.bf16.msrb.mxu1 %v15714_v49  ;;  %v11026_v35 = vadd.f32 %v11025_v47, %v11013_v33  ;;  %v11411_v5 = vor.u32 1.1754944e-38, %v11410_v42 }
 0xb02   :  { %vm11409_vm14 = vcmp.eq.f32.partialorder %v11408_v15, 8.507059e+37 }
 0xb03   :  { %11295 = vmatpush.bf16.msrb.mxu0 %v15154_v12  ;;  %11310 = vmatmul.bf16.vlgmr.msrb.gmra.mxu3 %v23723_v34  ;;  %v16806_v34 = vld [vmem:[#allocation2 + $0x928] sm:$0xf0]  ;;  %v11038_v60 = vpop.f32.mrf.mxu0 }
 0xb04   :  { %v15602_v39 = vor.u32 %v16806_v34, %v15601_v44  ;;  %v11039_v18 = vadd.f32 %v11038_v60, %v11026_v35  ;;  %v8928_v35 = vperm.slane %v23864_v9, 5 }
 0xb05   :  { %11318 = vmatpush.bf16.msrb.mxu1 %v15686_v50  ;;  %v16880_v32 = vpop.eup %16879 }
 0xb06   :  { %v11090_v14 = vpop.f32.mrf.mxu3  ;;  %v11052_v56 = vadd.f32 %v11051_v7, %v11039_v18  ;;  %v11400_v10 = vmul.f32 %v16880_v32, %v11364_v28  ;;  %vm11405_vm0 = vweird.f32 %v16880_v32 }
 0xb07   :  { %11296 = vmatpush.bf16.msrb.mxu0 %v15126_v3  ;;  %vm11406_vm12 = vmor %vm11404_vm11, %vm11405_vm0 }
 0xb08   :  { %v11065_v13 = vadd.f32 %v11064_v19, %v11052_v56  ;;  %v11401_v58 = vsub.f32 1.0, %v11400_v10 }
 0xb09   :  { %11319 = vmatpush.bf16.msrb.mxu1 %v15658_v43 }
 0xb0a   :  { %11297 = vmatmul.bf16.vlgmr.msrb.gmra.mxu0 %v23721_v48  ;;  %v11344_v48 = vsub.f32 0.0, %v11065_v13  ;;  %v11402_v36 = vmul.f32 %v16880_v32, %v11401_v58 }
 0xb0b   :  { %v11040_v55 = vpop.f32.mrf.mxu0 }
 0xb0c   :  { %v11354_v29 = vmul.f32 1.442695, %v11344_v48  ;;  %v11403_v16 = vadd.f32 %v16880_v32, %v11402_v36 }
 0xb0d   :  { %11320 = vmatpush.bf16.msrb.mxu1 %v15630_v4 }
 0xb0e   :  { %v11092_v54 = vpop.f32.mrf.mxu3  ;;  %16881 = vpow2.f32 %v11354_v29  ;;  %v11407_v51 = vsel %vm11406_vm12, %v16880_v32, %v11403_v16 }
 0xb0f   :  { %v11412_v50 = vsel %vm11409_vm14, %v11411_v5, %v11407_v51  ;;  %v8929_v5 = vperm.slane %v23864_v9, 6 }
 0xb10   :  { %v11116_v21 = vpop.f32.mrf.mxu2  ;;  %v11482_v24 = vrot.slane %v11412_v50, 4 }
 0xb11   :  { %11321 = vmatpush.bf16.msrb.mxu1 %v15602_v39  ;;  %v11077_v1 = vpop.f32.mrf.mxu1 }
 0xb12   :  { %v11078_v27 = vadd.f32 %v11077_v1, %v8927_v59 }
 0xb14   :  { %v16882_v45 = vpop.eup %16881  ;;  %v11091_v6 = vadd.f32 %v11090_v14, %v11078_v27 }
 0xb15   :  { %11322 = vmatpush.bf16.msrb.mxu1 %v15574_v20  ;;  %v11365_v52 = vadd.f32 1.0, %v16882_v45 }
 0xb17   :  { %16883 = vrcp.f32 %v11365_v52  ;;  %v11425_v12 = vand.u32 2147483648, %v11365_v52  ;;  %v11423_v8 = vand.u32 2147483647, %v11365_v52  ;;  %vm11419_vm15 = vweird.f32 %v11365_v52 }
 0xb18   :  { %11323 = vmatmul.bf16.vlgmr.msrb.gmra.mxu1 %v23718_v23  ;;  %v11118_v61 = vpop.f32.mrf.mxu2 }
 0xb19   :  { %v11079_v41 = vpop.f32.mrf.mxu1  ;;  %v11426_v3 = vor.u32 1.1754944e-38, %v11425_v12  ;;  %vm11424_vm4 = vcmp.eq.f32.partialorder %v11423_v8, 8.507059e+37 }
 0xb1d   :  { %v16884_v2 = vpop.eup %16883 }
 0xb1e   :  { %v11415_v23 = vmul.f32 %v16884_v2, %v11365_v52  ;;  %vm11420_vm13 = vweird.f32 %v16884_v2 }
 0xb1f   :  { %vm11421_vm2 = vmor %vm11419_vm15, %vm11420_vm13  ;;  %vm11495_vm13 = vcmask 1043458  }
 0xb20   :  { %v11416_v7 = vsub.f32 1.0, %v11415_v23 }
 0xb22   :  { %v11417_v62 = vmul.f32 %v16884_v2, %v11416_v7 }
 0xb23   :  { %v11103_v49 = vpop.f32.mrf.mxu0 }
 0xb24   :  { %v11104_v57 = vadd.f32 %v11103_v49, %v11091_v6  ;;  %v11418_v19 = vadd.f32 %v16884_v2, %v11417_v62 }
 0xb26   :  { %v11142_v25 = vpop.f32.mrf.mxu3  ;;  %v11117_v47 = vadd.f32 %v11116_v21, %v11104_v57  ;;  %v11422_v30 = vsel %vm11421_vm2, %v16884_v2, %v11418_v19  ;;  %vm11496_vm2 = vmor %vm11495_vm13, %vm2941_vm1 }
 0xb27   :  { %v11427_v17 = vsel %vm11424_vm4, %v11426_v3, %v11422_v30 }
 0xb28   :  { %v11483_v63 = vrot.slane %v11427_v17, 2 }
 0xb2a   :  { %v11488_v40 = vsel %vm11487_vm5, %v11482_v24, %v11483_v63  ;;  %vm11497_vm5 = vcmask 128004  }
 0xb2b   :  { %v11105_v11 = vpop.f32.mrf.mxu0  ;;  %v11489_v46 = vsel %vm3479_vm3, %v23838_v37, %v11488_v40 }
 0xb2c   :  { %11494 = vst [vmem:[%s23919_s26] sm:$0xff] %v11489_v46 }
 0xb2e   :  { %v11144_v43 = vpop.f32.mrf.mxu3 }
 0xb30   :  { %v11168_v53 = vpop.f32.mrf.mxu2 }
 0xb31   :  { %v11129_v26 = vpop.f32.mrf.mxu1  ;;  %v11169_v0 = vadd.f32 %v11168_v53, %v8928_v35 }
 0xb32   :  { %v11130_v31 = vadd.f32 %v11129_v26, %v11117_v47 }
 0xb33   :  { %v11155_v4 = vpop.f32.mrf.mxu0 }
 0xb34   :  { %v11143_v44 = vadd.f32 %v11142_v25, %v11130_v31 }
 0xb36   :  { %v11156_v34 = vadd.f32 %v11155_v4, %v11143_v44 }
 0xb38   :  { %v11170_v33 = vpop.f32.mrf.mxu2  ;;  %v11345_v55 = vsub.f32 0.0, %v11156_v34 }
 0xb39   :  { %v11131_v39 = vpop.f32.mrf.mxu1 }
 0xb3a   :  { %v11356_v54 = vmul.f32 1.442695, %v11345_v55 }
 0xb3b   :  { %v11157_v22 = vpop.f32.mrf.mxu0 }
 0xb3c   :  { %16885 = vpow2.f32 %v11356_v54 }
 0xb42   :  { %v16886_v10 = vpop.eup %16885 }
 0xb43   :  { %v11366_v6 = vadd.f32 1.0, %v16886_v10 }
 0xb45   :  { %16887 = vrcp.f32 %v11366_v6  ;;  %vm11434_vm8 = vweird.f32 %v11366_v6  ;;  %v11440_v63 = vand.u32 2147483648, %v11366_v6  ;;  %v11438_v40 = vand.u32 2147483647, %v11366_v6 }
 0xb46   :  { %v11207_v38 = vpop.f32.mrf.mxu3 }
 0xb47   :  { %v11181_v60 = vpop.f32.mrf.mxu0  ;;  %v11441_v44 = vor.u32 1.1754944e-38, %v11440_v63  ;;  %vm11439_vm12 = vcmp.eq.f32.partialorder %v11438_v40, 8.507059e+37 }
 0xb48   :  { %v11182_v18 = vadd.f32 %v11181_v60, %v11169_v0 }
 0xb4b   :  { %v16888_v16 = vpop.eup %16887 }
 0xb4c   :  { %v11430_v49 = vmul.f32 %v16888_v16, %v11366_v6  ;;  %vm11435_vm6 = vweird.f32 %v16888_v16 }
 0xb4d   :  { %vm23881_vm9 = vmor %vm11434_vm8, %vm11435_vm6 }
 0xb4e   :  { %v11209_v37 = vpop.f32.mrf.mxu3  ;;  %v11431_v12 = vsub.f32 1.0, %v11430_v49 }
 0xb4f   :  { %v11183_v28 = vpop.f32.mrf.mxu0 }
 0xb50   :  { %v11220_v14 = vpop.f32.mrf.mxu2  ;;  %v11432_v62 = vmul.f32 %v16888_v16, %v11431_v12 }
 0xb51   :  { %v11194_v20 = vpop.f32.mrf.mxu1 }
 0xb52   :  { %v11195_v56 = vadd.f32 %v11194_v20, %v11182_v18  ;;  %v11433_v30 = vadd.f32 %v16888_v16, %v11432_v62 }
 0xb54   :  { %v11208_v13 = vadd.f32 %v11207_v38, %v11195_v56  ;;  %v11437_v31 = vsel %vm23881_vm9, %v16888_v16, %v11433_v30 }
 0xb55   :  { %v11442_v39 = vsel %vm11439_vm12, %v11441_v44, %v11437_v31 }
 0xb56   :  { %v11221_v32 = vadd.f32 %v11220_v14, %v11208_v13 }
 0xb58   :  { %v11222_v48 = vpop.f32.mrf.mxu2 }
 0xb59   :  { %v11196_v29 = vpop.f32.mrf.mxu1 }
 0xb61   :  { %v11246_v21 = vpop.f32.mrf.mxu1 }
 0xb66   :  { %v11259_v59 = vpop.f32.mrf.mxu3 }
 0xb67   :  { %v11233_v1 = vpop.f32.mrf.mxu0  ;;  %v11260_v11 = vadd.f32 %v11259_v59, %v8929_v5 }
 0xb68   :  { %v11234_v27 = vadd.f32 %v11233_v1, %v11221_v32 }
 0xb69   :  { %v11248_v58 = vpop.f32.mrf.mxu1 }
 0xb6a   :  { %v11247_v45 = vadd.f32 %v11246_v21, %v11234_v27 }
 0xb6c   :  { %v11346_v52 = vsub.f32 0.0, %v11247_v45 }
 0xb6e   :  { %v11261_v61 = vpop.f32.mrf.mxu3  ;;  %v11358_v41 = vmul.f32 1.442695, %v11346_v52 }
 0xb6f   :  { %v11235_v2 = vpop.f32.mrf.mxu0 }
 0xb70   :  { %v11285_v36 = vpop.f32.mrf.mxu2  ;;  %16889 = vpow2.f32 %v11358_v41 }
 0xb75   :  { %v11272_v23 = vpop.f32.mrf.mxu1 }
 0xb76   :  { %v16890_v42 = vpop.eup %16889  ;;  %v11273_v26 = vadd.f32 %v11272_v23, %v11260_v11 }
 0xb77   :  { %v11367_v7 = vadd.f32 1.0, %v16890_v42 }
 0xb78   :  { %v11287_v15 = vpop.f32.mrf.mxu2  ;;  %v11286_v22 = vadd.f32 %v11285_v36, %v11273_v26 }
 0xb79   :  { %16891 = vrcp.f32 %v11367_v7  ;;  %v11455_v19 = vand.u32 2147483648, %v11367_v7  ;;  %v11453_v24 = vand.u32 2147483647, %v11367_v7  ;;  %vm11449_vm10 = vweird.f32 %v11367_v7 }
 0xb7b   :  { %v11456_v53 = vor.u32 1.1754944e-38, %v11455_v19  ;;  %vm11454_vm11 = vcmp.eq.f32.partialorder %v11453_v24, 8.507059e+37 }
 0xb7d   :  { %v11274_v57 = vpop.f32.mrf.mxu1 }
 0xb7f   :  { %v16892_v51 = vpop.eup %16891 }
 0xb80   :  { %v11337_v25 = vpop.f32.mrf.mxu2  ;;  %v11445_v8 = vmul.f32 %v16892_v51, %v11367_v7  ;;  %vm11450_vm7 = vweird.f32 %v16892_v51 }
 0xb81   :  { %vm11451_vm0 = vmor %vm11449_vm10, %vm11450_vm7 }
 0xb82   :  { %v11446_v47 = vsub.f32 1.0, %v11445_v8  ;;  %vm11498_vm7 = vmor %vm11497_vm5, %vm11496_vm2 }
 0xb84   :  { %v11447_v17 = vmul.f32 %v16892_v51, %v11446_v47 }
 0xb86   :  { %v11311_v50 = vpop.f32.mrf.mxu3  ;;  %v11448_v46 = vadd.f32 %v16892_v51, %v11447_v17 }
 0xb87   :  { %v11298_v3 = vpop.f32.mrf.mxu0 }
 0xb88   :  { %v11339_v9 = vpop.f32.mrf.mxu2  ;;  %v11452_v4 = vsel %vm11451_vm0, %v16892_v51, %v11448_v46  ;;  %v11299_v60 = vadd.f32 %v11298_v3, %v11286_v22 }
 0xb89   :  { %v11457_v34 = vsel %vm11454_vm11, %v11456_v53, %v11452_v4 }
 0xb8a   :  { %v11484_v33 = vrot.slane %v11457_v34, 6  ;;  %v11312_v18 = vadd.f32 %v11311_v50, %v11299_v60 }
 0xb8c   :  { %v11490_v38 = vsel %vm2941_vm1, %v11442_v39, %v11484_v33 }
 0xb8e   :  { %v11313_v35 = vpop.f32.mrf.mxu3 }
 0xb8f   :  { %v11300_v0 = vpop.f32.mrf.mxu0 }
 0xb95   :  { %v11324_v37 = vpop.f32.mrf.mxu1 }
 0xb96   :  { %v11325_v14 = vadd.f32 %v11324_v37, %v11312_v18 }
 0xb98   :  { %v11338_v28 = vadd.f32 %v11337_v25, %v11325_v14 }
 0xb9a   :  { %v11347_v20 = vsub.f32 0.0, %v11338_v28 }
 0xb9c   :  { %v11360_v56 = vmul.f32 1.442695, %v11347_v20 }
 0xb9d   :  { %v11326_v13 = vpop.f32.mrf.mxu1 }
 0xb9e   :  { %16893 = vpow2.f32 %v11360_v56 }
 0xba4   :  { %v16894_v48 = vpop.eup %16893 }
 0xba5   :  { %v11368_v55 = vadd.f32 1.0, %v16894_v48 }
 0xba7   :  { %16895 = vrcp.f32 %v11368_v55  ;;  %v11470_v59 = vand.u32 2147483648, %v11368_v55  ;;  %v11468_v1 = vand.u32 2147483647, %v11368_v55  ;;  %vm11464_vm15 = vweird.f32 %v11368_v55 }
 0xba9   :  { %v11471_v27 = vor.u32 1.1754944e-38, %v11470_v59  ;;  %vm11469_vm6 = vcmp.eq.f32.partialorder %v11468_v1, 8.507059e+37 }
 0xbad   :  { %v16896_v29 = vpop.eup %16895 }
 0xbae   :  { %v11460_v54 = vmul.f32 %v16896_v29, %v11368_v55  ;;  %vm11465_vm14 = vweird.f32 %v16896_v29 }
 0xbaf   :  { %vm11466_vm4 = vmor %vm11464_vm15, %vm11465_vm14 }
 0xbb0   :  { %v11461_v21 = vsub.f32 1.0, %v11460_v54 }
 0xbb2   :  { %v11462_v32 = vmul.f32 %v16896_v29, %v11461_v21 }
 0xbb4   :  { %v11463_v10 = vadd.f32 %v16896_v29, %v11462_v32 }
 0xbb6   :  { %v11467_v45 = vsel %vm11466_vm4, %v16896_v29, %v11463_v10 }
 0xbb7   :  { %v11472_v6 = vsel %vm11469_vm6, %v11471_v27, %v11467_v45 }
 0xbb8   :  { %v11485_v52 = vrot.slane %v11472_v6, 4 }
 0xbba   :  { %v11491_v58 = vsel %vm3479_vm3, %v11490_v38, %v11485_v52 }
 0xbbb   :  { %11499 = vst.msk [vmem:[%s23919_s26 + $0x8] sm:$0x3f] %vm11498_vm7, %v11491_v58 }
 0xbbc   :  { %11504 = vsyncpa [#allocation3], 1 }

</bundles_post_ra>
